<compile_context>
chip_gen: v5e
topology: v5e:2x2
jax: 0.10.0
libtpu: 0.0.40
codegen_flags: <defaults>
</compile_context>

<pallas_src>
import jax
import jax.numpy as jnp
import numpy as np
from jax.experimental import pallas as pl
from jax.experimental.pallas import tpu as pltpu

BN_EPS = 1e-5  # PyTorch nn.BatchNorm2d default


# ---------------------------------------------------------------------------
# Pallas kernels
# ---------------------------------------------------------------------------
def _conv_bn_relu_kernel(p_ref, w_ref, g_ref, bt_ref, o_ref):
    # p_ref: (M, K) bf16 im2col patches, w_ref: (K, Cout) bf16
    # g/bt: (1, Cout) f32, o_ref: (M, Cout) bf16
    y = jnp.dot(p_ref[...], w_ref[...], preferred_element_type=jnp.float32)
    # Conv bias omitted: it cancels exactly in the BN mean subtraction.
    # Training-mode BatchNorm: biased batch statistics over N*H*W (= rows).
    mean = jnp.mean(y, axis=0, keepdims=True)
    var = jnp.mean(jnp.square(y - mean), axis=0, keepdims=True)
    y = (y - mean) * jax.lax.rsqrt(var + BN_EPS)
    y = y * g_ref[...] + bt_ref[...]
    o_ref[...] = jnp.maximum(y, 0.0).astype(o_ref.dtype)


def _conv_relu_kernel(p_ref, w_ref, b_ref, o_ref):
    y = jnp.dot(p_ref[...], w_ref[...], preferred_element_type=jnp.float32)
    y = y + b_ref[...]
    o_ref[...] = jnp.maximum(y, 0.0).astype(o_ref.dtype)


def _dense_kernel(x_ref, w_ref, b_ref, o_ref):
    # Full K resident; grid is over N tiles only -> no accumulator needed.
    y = jnp.dot(x_ref[...], w_ref[...], preferred_element_type=jnp.float32)
    o_ref[...] = (y + b_ref[...]).astype(o_ref.dtype)


# ---------------------------------------------------------------------------
# Glue: im2col (pure data rearrangement, XLA-side) + layer wrappers
# ---------------------------------------------------------------------------
def _im2col(x_nhwc, k=3, s=2, p=2):
    n, h, w, c = x_nhwc.shape
    xp = jnp.pad(x_nhwc, ((0, 0), (p, p), (p, p), (0, 0)))
    ho = (h + 2 * p - k) // s + 1
    wo = (w + 2 * p - k) // s + 1
    taps = []
    for kh in range(k):
        for kw in range(k):
            taps.append(xp[:, kh:kh + s * (ho - 1) + 1:s,
                           kw:kw + s * (wo - 1) + 1:s, :])
    # (N, Ho, Wo, K*K, C) -> (M, K*K*C); column order = (kh, kw, cin)
    patches = jnp.stack(taps, axis=3).reshape(n * ho * wo, k * k * c)
    return patches, (n, ho, wo)


def _weight_to_gemm(w_oihw):
    # (Cout, Cin, KH, KW) -> (KH, KW, Cin, Cout) -> (KH*KW*Cin, Cout)
    cout = w_oihw.shape[0]
    return jnp.transpose(w_oihw, (2, 3, 1, 0)).reshape(-1, cout)


_VMEM_SPEC = pl.BlockSpec(memory_space=pltpu.MemorySpace.VMEM)


def conv_bn_relu(x_nhwc, wmat_bf16, gamma, beta):
    cout = wmat_bf16.shape[1]
    patches, (n, ho, wo) = _im2col(x_nhwc)
    m = patches.shape[0]
    out = pl.pallas_call(
        _conv_bn_relu_kernel,
        out_shape=jax.ShapeDtypeStruct((m, cout), jnp.bfloat16),
        in_specs=[_VMEM_SPEC] * 4,
        out_specs=_VMEM_SPEC,
    )(patches, wmat_bf16, gamma.reshape(1, -1), beta.reshape(1, -1))
    return out.reshape(n, ho, wo, cout)


def conv_relu(x_nhwc, wmat_bf16, b):
    cout = wmat_bf16.shape[1]
    patches, (n, ho, wo) = _im2col(x_nhwc)
    m = patches.shape[0]
    out = pl.pallas_call(
        _conv_relu_kernel,
        out_shape=jax.ShapeDtypeStruct((m, cout), jnp.bfloat16),
        in_specs=[_VMEM_SPEC] * 3,
        out_specs=_VMEM_SPEC,
    )(patches, wmat_bf16, b.reshape(1, -1))
    return out.reshape(n, ho, wo, cout)


def dense(x_bf16, w_kn_bf16, b, *, tn=1024):
    # x: (M, K) bf16, w: (K, N) bf16 (flatten-permuted at init), b: (N,) f32.
    m, kdim = x_bf16.shape
    ndim = w_kn_bf16.shape[1]
    tn = min(tn, ndim)
    while ndim % tn:
        tn //= 2
    return pl.pallas_call(
        _dense_kernel,
        out_shape=jax.ShapeDtypeStruct((m, ndim), jnp.float32),
        grid_spec=pltpu.PrefetchScalarGridSpec(
            num_scalar_prefetch=0,
            grid=(ndim // tn,),
            in_specs=[
                pl.BlockSpec((m, kdim), lambda j: (0, 0)),   # full K resident
                pl.BlockSpec((kdim, tn), lambda j: (0, j)),  # stream W in bf16
                pl.BlockSpec((1, tn), lambda j: (0, j)),
            ],
            out_specs=pl.BlockSpec((m, tn), lambda j: (0, j)),
        ),
        compiler_params=pltpu.CompilerParams(
            dimension_semantics=("parallel",),
            vmem_limit_bytes=32 * 1024 * 1024),
    )(x_bf16, w_kn_bf16, b.reshape(1, -1))


# ---------------------------------------------------------------------------
# Parameters (deterministic synthetic init; shapes follow Encoder.__init__)
# ---------------------------------------------------------------------------
_CONV_CHANNELS = [(3, 32), (32, 64), (64, 128), (128, 256)]


def _conv_out_hw(h, w):
    # k=3, s=2, p=2 -> out = floor((x + 1)/2) + 1
    for _ in range(4):
        h = (h + 1) // 2 + 1
        w = (w + 1) // 2 + 1
    return h, w


def init_params(key, in_spatial):
    keys = jax.random.split(key, 16)
    ki = 0
    params = {}
    for i, (cin, cout) in enumerate(_CONV_CHANNELS):
        fan_in = cin * 9
        w = (jax.random.normal(keys[ki], (cout, cin, 3, 3), jnp.float32)
             / np.sqrt(fan_in))
        ki += 1
        # Pre-pack to GEMM layout (KH*KW*Cin, Cout), bf16, once at init.
        params[f"conv{i}_wmat"] = _weight_to_gemm(w).astype(jnp.bfloat16)
        if i < 3:
            # Conv bias omitted for Conv+BN layers (cancels under train-mode BN).
            params[f"bn{i}_g"] = 1.0 + 0.1 * jax.random.normal(
                keys[ki], (cout,), jnp.float32)
            ki += 1
            params[f"bn{i}_b"] = 0.1 * jax.random.normal(
                keys[ki], (cout,), jnp.float32)
            ki += 1
        else:
            params[f"conv{i}_b"] = 0.1 * jax.random.normal(
                keys[ki], (cout,), jnp.float32)
            ki += 1
    ho, wo = _conv_out_hw(*in_spatial)
    linear_in = 256 * ho * wo
    # PyTorch nn.Linear weight: (out_features, in_features), in_features in
    # NCHW (c, h, w) flatten order.
    w_pt = (jax.random.normal(keys[ki], (4096, linear_in), jnp.float32)
            / np.sqrt(linear_in))
    ki += 1
    # Fold the NCHW flatten into the weight: permute columns to NHWC flatten
    # order, transpose to (K, N) GEMM layout, cast to bf16 -- all at init.
    w_kn = (w_pt.reshape(4096, 256, ho, wo)
                .transpose(0, 2, 3, 1)
                .reshape(4096, linear_in).T)
    params["dense_w_kn"] = w_kn.astype(jnp.bfloat16)
    params["dense_b"] = 0.1 * jax.random.normal(keys[ki], (4096,), jnp.float32)
    return params


# ---------------------------------------------------------------------------
# Forward pass
# ---------------------------------------------------------------------------
@jax.jit
def encoder_forward(params, x_nchw):
    # NCHW -> NHWC; bf16 GEMM operands (accumulation is f32 inside kernels).
    x = jnp.transpose(x_nchw, (0, 2, 3, 1)).astype(jnp.bfloat16)
    for i in range(3):
        x = conv_bn_relu(x, params[f"conv{i}_wmat"],
                         params[f"bn{i}_g"], params[f"bn{i}_b"])
    x = conv_relu(x, params["conv3_wmat"], params["conv3_b"])
    # NHWC flatten; the dense weight columns were permuted at init so this
    # matches PyTorch's NCHW Flatten + Linear exactly (no per-call transpose).
    n = x.shape[0]
    x_flat = x.reshape(n, -1)
    return dense(x_flat, params["dense_w_kn"], params["dense_b"])


if __name__ == "__main__":
    # Small shapes consistent with the module (conv stack + 4096-wide dense).
    batch, in_ch, height, width = 2, 3, 16, 16
    key = jax.random.PRNGKey(0)
    pkey, xkey = jax.random.split(key)
    params = init_params(pkey, (height, width))
    x = jax.random.normal(xkey, (batch, in_ch, height, width), jnp.float32)

    y = encoder_forward(params, x)
    jax.block_until_ready(y)
    assert y.shape == (batch, 4096), y.shape
    print("KERNEL_OK")
</pallas_src>

<mosaic_0001>
module attributes {stable_mosaic.version = 11 : i64} {
  func.func @_conv_bn_relu_kernel(%arg0: memref<162x27xbf16, #tpu.memory_space<vmem>>, %arg1: memref<27x32xbf16, #tpu.memory_space<vmem>>, %arg2: memref<1x32xf32, #tpu.memory_space<vmem>>, %arg3: memref<1x32xf32, #tpu.memory_space<vmem>>, %arg4: memref<162x32xbf16, #tpu.memory_space<vmem>>) attributes {dimension_semantics = [], scalar_prefetch = 0 : i64, scratch_operands = 0 : i64, tpu.core_type = #tpu.core_type<tc>} {
    %c0 = arith.constant 0 : index
    %c0_0 = arith.constant 0 : index
    %0 = vector.load %arg0[%c0, %c0_0] : memref<162x27xbf16, #tpu.memory_space<vmem>>, vector<162x27xbf16>
    %c0_1 = arith.constant 0 : index
    %c0_2 = arith.constant 0 : index
    %1 = vector.load %arg1[%c0_1, %c0_2] : memref<27x32xbf16, #tpu.memory_space<vmem>>, vector<27x32xbf16>
    %cst = arith.constant dense<0.000000e+00> : vector<162x32xf32>
    %2 = tpu.matmul %0, %1, %cst {dimension_numbers = #tpu.dot_dimension_numbers<[1], [0], [0], [1], [0, 0, 1, 1], [], []>} : vector<162x27xbf16>, vector<27x32xbf16>, vector<162x32xf32> -> vector<162x32xf32>
    %cst_3 = arith.constant dense<0.000000e+00> : vector<32xf32>
    %3 = vector.multi_reduction <add>, %2, %cst_3 [0] : vector<162x32xf32> to vector<32xf32>
    %4 = vector.shape_cast %3 : vector<32xf32> to vector<1x32xf32>
    %cst_4 = arith.constant 1.620000e+02 : f32
    %5 = vector.broadcast %cst_4 : f32 to vector<1x32xf32>
    %6 = arith.divf %4, %5 : vector<1x32xf32>
    %7 = vector.broadcast %6 : vector<1x32xf32> to vector<162x32xf32>
    %8 = arith.subf %2, %7 : vector<162x32xf32>
    %9 = arith.mulf %8, %8 : vector<162x32xf32>
    %cst_5 = arith.constant dense<0.000000e+00> : vector<32xf32>
    %10 = vector.multi_reduction <add>, %9, %cst_5 [0] : vector<162x32xf32> to vector<32xf32>
    %11 = vector.shape_cast %10 : vector<32xf32> to vector<1x32xf32>
    %cst_6 = arith.constant 1.620000e+02 : f32
    %12 = vector.broadcast %cst_6 : f32 to vector<1x32xf32>
    %13 = arith.divf %11, %12 : vector<1x32xf32>
    %14 = vector.broadcast %6 : vector<1x32xf32> to vector<162x32xf32>
    %15 = arith.subf %2, %14 : vector<162x32xf32>
    %cst_7 = arith.constant 9.99999974E-6 : f32
    %16 = vector.broadcast %cst_7 : f32 to vector<1x32xf32>
    %17 = arith.addf %13, %16 : vector<1x32xf32>
    %18 = math.rsqrt %17 : vector<1x32xf32>
    %19 = vector.broadcast %18 : vector<1x32xf32> to vector<162x32xf32>
    %20 = arith.mulf %15, %19 : vector<162x32xf32>
    %c0_8 = arith.constant 0 : index
    %c0_9 = arith.constant 0 : index
    %21 = vector.load %arg2[%c0_8, %c0_9] : memref<1x32xf32, #tpu.memory_space<vmem>>, vector<1x32xf32>
    %22 = vector.broadcast %21 : vector<1x32xf32> to vector<162x32xf32>
    %23 = arith.mulf %20, %22 : vector<162x32xf32>
    %c0_10 = arith.constant 0 : index
    %c0_11 = arith.constant 0 : index
    %24 = vector.load %arg3[%c0_10, %c0_11] : memref<1x32xf32, #tpu.memory_space<vmem>>, vector<1x32xf32>
    %25 = vector.broadcast %24 : vector<1x32xf32> to vector<162x32xf32>
    %26 = arith.addf %23, %25 : vector<162x32xf32>
    %cst_12 = arith.constant 0.000000e+00 : f32
    %27 = vector.broadcast %cst_12 : f32 to vector<162x32xf32>
    %28 = arith.maximumf %26, %27 : vector<162x32xf32>
    %29 = arith.truncf %28 : vector<162x32xf32> to vector<162x32xbf16>
    %c0_13 = arith.constant 0 : index
    %c0_14 = arith.constant 0 : index
    %30 = vector.load %arg4[%c0_13, %c0_14] : memref<162x32xbf16, #tpu.memory_space<vmem>>, vector<162x32xbf16>
    tpu.vector_store %arg4[%c0_13, %c0_14], %29 {strides = array<i32>} : memref<162x32xbf16, #tpu.memory_space<vmem>>, vector<162x32xbf16>,
    return
  }
}

module attributes {stable_mosaic.version = 11 : i64} {
  func.func @_conv_bn_relu_kernel(%arg0: memref<72x288xbf16, #tpu.memory_space<vmem>>, %arg1: memref<288x64xbf16, #tpu.memory_space<vmem>>, %arg2: memref<1x64xf32, #tpu.memory_space<vmem>>, %arg3: memref<1x64xf32, #tpu.memory_space<vmem>>, %arg4: memref<72x64xbf16, #tpu.memory_space<vmem>>) attributes {dimension_semantics = [], scalar_prefetch = 0 : i64, scratch_operands = 0 : i64, tpu.core_type = #tpu.core_type<tc>} {
    %c0 = arith.constant 0 : index
    %c0_0 = arith.constant 0 : index
    %0 = vector.load %arg0[%c0, %c0_0] : memref<72x288xbf16, #tpu.memory_space<vmem>>, vector<72x288xbf16>
    %c0_1 = arith.constant 0 : index
    %c0_2 = arith.constant 0 : index
    %1 = vector.load %arg1[%c0_1, %c0_2] : memref<288x64xbf16, #tpu.memory_space<vmem>>, vector<288x64xbf16>
    %cst = arith.constant dense<0.000000e+00> : vector<72x64xf32>
    %2 = tpu.matmul %0, %1, %cst {dimension_numbers = #tpu.dot_dimension_numbers<[1], [0], [0], [1], [0, 0, 1, 1], [], []>} : vector<72x288xbf16>, vector<288x64xbf16>, vector<72x64xf32> -> vector<72x64xf32>
    %cst_3 = arith.constant dense<0.000000e+00> : vector<64xf32>
    %3 = vector.multi_reduction <add>, %2, %cst_3 [0] : vector<72x64xf32> to vector<64xf32>
    %4 = vector.shape_cast %3 : vector<64xf32> to vector<1x64xf32>
    %cst_4 = arith.constant 7.200000e+01 : f32
    %5 = vector.broadcast %cst_4 : f32 to vector<1x64xf32>
    %6 = arith.divf %4, %5 : vector<1x64xf32>
    %7 = vector.broadcast %6 : vector<1x64xf32> to vector<72x64xf32>
    %8 = arith.subf %2, %7 : vector<72x64xf32>
    %9 = arith.mulf %8, %8 : vector<72x64xf32>
    %cst_5 = arith.constant dense<0.000000e+00> : vector<64xf32>
    %10 = vector.multi_reduction <add>, %9, %cst_5 [0] : vector<72x64xf32> to vector<64xf32>
    %11 = vector.shape_cast %10 : vector<64xf32> to vector<1x64xf32>
    %cst_6 = arith.constant 7.200000e+01 : f32
    %12 = vector.broadcast %cst_6 : f32 to vector<1x64xf32>
    %13 = arith.divf %11, %12 : vector<1x64xf32>
    %14 = vector.broadcast %6 : vector<1x64xf32> to vector<72x64xf32>
    %15 = arith.subf %2, %14 : vector<72x64xf32>
    %cst_7 = arith.constant 9.99999974E-6 : f32
    %16 = vector.broadcast %cst_7 : f32 to vector<1x64xf32>
    %17 = arith.addf %13, %16 : vector<1x64xf32>
    %18 = math.rsqrt %17 : vector<1x64xf32>
    %19 = vector.broadcast %18 : vector<1x64xf32> to vector<72x64xf32>
    %20 = arith.mulf %15, %19 : vector<72x64xf32>
    %c0_8 = arith.constant 0 : index
    %c0_9 = arith.constant 0 : index
    %21 = vector.load %arg2[%c0_8, %c0_9] : memref<1x64xf32, #tpu.memory_space<vmem>>, vector<1x64xf32>
    %22 = vector.broadcast %21 : vector<1x64xf32> to vector<72x64xf32>
    %23 = arith.mulf %20, %22 : vector<72x64xf32>
    %c0_10 = arith.constant 0 : index
    %c0_11 = arith.constant 0 : index
    %24 = vector.load %arg3[%c0_10, %c0_11] : memref<1x64xf32, #tpu.memory_space<vmem>>, vector<1x64xf32>
    %25 = vector.broadcast %24 : vector<1x64xf32> to vector<72x64xf32>
    %26 = arith.addf %23, %25 : vector<72x64xf32>
    %cst_12 = arith.constant 0.000000e+00 : f32
    %27 = vector.broadcast %cst_12 : f32 to vector<72x64xf32>
    %28 = arith.maximumf %26, %27 : vector<72x64xf32>
    %29 = arith.truncf %28 : vector<72x64xf32> to vector<72x64xbf16>
    %c0_13 = arith.constant 0 : index
    %c0_14 = arith.constant 0 : index
    %30 = vector.load %arg4[%c0_13, %c0_14] : memref<72x64xbf16, #tpu.memory_space<vmem>>, vector<72x64xbf16>
    tpu.vector_store %arg4[%c0_13, %c0_14], %29 {strides = array<i32>} : memref<72x64xbf16, #tpu.memory_space<vmem>>, vector<72x64xbf16>,
    return
  }
}

module attributes {stable_mosaic.version = 11 : i64} {
  func.func @_conv_bn_relu_kernel(%arg0: memref<32x576xbf16, #tpu.memory_space<vmem>>, %arg1: memref<576x128xbf16, #tpu.memory_space<vmem>>, %arg2: memref<1x128xf32, #tpu.memory_space<vmem>>, %arg3: memref<1x128xf32, #tpu.memory_space<vmem>>, %arg4: memref<32x128xbf16, #tpu.memory_space<vmem>>) attributes {dimension_semantics = [], scalar_prefetch = 0 : i64, scratch_operands = 0 : i64, tpu.core_type = #tpu.core_type<tc>} {
    %c0 = arith.constant 0 : index
    %c0_0 = arith.constant 0 : index
    %0 = vector.load %arg0[%c0, %c0_0] : memref<32x576xbf16, #tpu.memory_space<vmem>>, vector<32x576xbf16>
    %c0_1 = arith.constant 0 : index
    %c0_2 = arith.constant 0 : index
    %1 = vector.load %arg1[%c0_1, %c0_2] : memref<576x128xbf16, #tpu.memory_space<vmem>>, vector<576x128xbf16>
    %cst = arith.constant dense<0.000000e+00> : vector<32x128xf32>
    %2 = tpu.matmul %0, %1, %cst {dimension_numbers = #tpu.dot_dimension_numbers<[1], [0], [0], [1], [0, 0, 1, 1], [], []>} : vector<32x576xbf16>, vector<576x128xbf16>, vector<32x128xf32> -> vector<32x128xf32>
    %cst_3 = arith.constant dense<0.000000e+00> : vector<128xf32>
    %3 = vector.multi_reduction <add>, %2, %cst_3 [0] : vector<32x128xf32> to vector<128xf32>
    %4 = vector.shape_cast %3 : vector<128xf32> to vector<1x128xf32>
    %cst_4 = arith.constant 3.200000e+01 : f32
    %5 = vector.broadcast %cst_4 : f32 to vector<1x128xf32>
    %6 = arith.divf %4, %5 : vector<1x128xf32>
    %7 = vector.broadcast %6 : vector<1x128xf32> to vector<32x128xf32>
    %8 = arith.subf %2, %7 : vector<32x128xf32>
    %9 = arith.mulf %8, %8 : vector<32x128xf32>
    %cst_5 = arith.constant dense<0.000000e+00> : vector<128xf32>
    %10 = vector.multi_reduction <add>, %9, %cst_5 [0] : vector<32x128xf32> to vector<128xf32>
    %11 = vector.shape_cast %10 : vector<128xf32> to vector<1x128xf32>
    %cst_6 = arith.constant 3.200000e+01 : f32
    %12 = vector.broadcast %cst_6 : f32 to vector<1x128xf32>
    %13 = arith.divf %11, %12 : vector<1x128xf32>
    %14 = vector.broadcast %6 : vector<1x128xf32> to vector<32x128xf32>
    %15 = arith.subf %2, %14 : vector<32x128xf32>
    %cst_7 = arith.constant 9.99999974E-6 : f32
    %16 = vector.broadcast %cst_7 : f32 to vector<1x128xf32>
    %17 = arith.addf %13, %16 : vector<1x128xf32>
    %18 = math.rsqrt %17 : vector<1x128xf32>
    %19 = vector.broadcast %18 : vector<1x128xf32> to vector<32x128xf32>
    %20 = arith.mulf %15, %19 : vector<32x128xf32>
    %c0_8 = arith.constant 0 : index
    %c0_9 = arith.constant 0 : index
    %21 = vector.load %arg2[%c0_8, %c0_9] : memref<1x128xf32, #tpu.memory_space<vmem>>, vector<1x128xf32>
    %22 = vector.broadcast %21 : vector<1x128xf32> to vector<32x128xf32>
    %23 = arith.mulf %20, %22 : vector<32x128xf32>
    %c0_10 = arith.constant 0 : index
    %c0_11 = arith.constant 0 : index
    %24 = vector.load %arg3[%c0_10, %c0_11] : memref<1x128xf32, #tpu.memory_space<vmem>>, vector<1x128xf32>
    %25 = vector.broadcast %24 : vector<1x128xf32> to vector<32x128xf32>
    %26 = arith.addf %23, %25 : vector<32x128xf32>
    %cst_12 = arith.constant 0.000000e+00 : f32
    %27 = vector.broadcast %cst_12 : f32 to vector<32x128xf32>
    %28 = arith.maximumf %26, %27 : vector<32x128xf32>
    %29 = arith.truncf %28 : vector<32x128xf32> to vector<32x128xbf16>
    %c0_13 = arith.constant 0 : index
    %c0_14 = arith.constant 0 : index
    %30 = vector.load %arg4[%c0_13, %c0_14] : memref<32x128xbf16, #tpu.memory_space<vmem>>, vector<32x128xbf16>
    tpu.vector_store %arg4[%c0_13, %c0_14], %29 {strides = array<i32>} : memref<32x128xbf16, #tpu.memory_space<vmem>>, vector<32x128xbf16>,
    return
  }
}

module attributes {stable_mosaic.version = 11 : i64} {
  func.func @_dense_kernel(%arg0: i32, %arg1: memref<2x2304xbf16, #tpu.memory_space<vmem>>, %arg2: memref<2304x1024xbf16, #tpu.memory_space<vmem>>, %arg3: memref<1x1024xf32, #tpu.memory_space<vmem>>, %arg4: memref<2x1024xf32, #tpu.memory_space<vmem>>) attributes {dimension_semantics = [#tpu.dimension_semantics<parallel>], iteration_bounds = array<i64: 4>, scalar_prefetch = 0 : i64, scratch_operands = 0 : i64, tpu.core_type = #tpu.core_type<tc>, window_params = [{pipeline_mode = #tpu.pipeline_mode<synchronous>, transform_indices = @transform_0, window_bounds = array<i64: 2, 2304>}, {transform_indices = @transform_1, window_bounds = array<i64: 2304, 1024>}, {transform_indices = @transform_2, window_bounds = array<i64: 1, 1024>}, {transform_indices = @transform_3, window_bounds = array<i64: 2, 1024>}]} {
    %c0 = arith.constant 0 : index
    %c0_0 = arith.constant 0 : index
    %0 = vector.load %arg1[%c0, %c0_0] : memref<2x2304xbf16, #tpu.memory_space<vmem>>, vector<2x2304xbf16>
    %c0_1 = arith.constant 0 : index
    %c0_2 = arith.constant 0 : index
    %1 = vector.load %arg2[%c0_1, %c0_2] : memref<2304x1024xbf16, #tpu.memory_space<vmem>>, vector<2304x1024xbf16>
    %cst = arith.constant dense<0.000000e+00> : vector<2x1024xf32>
    %2 = tpu.matmul %0, %1, %cst {dimension_numbers = #tpu.dot_dimension_numbers<[1], [0], [0], [1], [0, 0, 1, 1], [], []>} : vector<2x2304xbf16>, vector<2304x1024xbf16>, vector<2x1024xf32> -> vector<2x1024xf32>
    %c0_3 = arith.constant 0 : index
    %c0_4 = arith.constant 0 : index
    %3 = vector.load %arg3[%c0_3, %c0_4] : memref<1x1024xf32, #tpu.memory_space<vmem>>, vector<1x1024xf32>
    %4 = vector.broadcast %3 : vector<1x1024xf32> to vector<2x1024xf32>
    %5 = arith.addf %2, %4 : vector<2x1024xf32>
    %c0_5 = arith.constant 0 : index
    %c0_6 = arith.constant 0 : index
    %6 = vector.load %arg4[%c0_5, %c0_6] : memref<2x1024xf32, #tpu.memory_space<vmem>>, vector<2x1024xf32>
    tpu.vector_store %arg4[%c0_5, %c0_6], %5 {strides = array<i32>} : memref<2x1024xf32, #tpu.memory_space<vmem>>, vector<2x1024xf32>,
    return
  }
  func.func @transform_0(%arg0: i32) -> (i32, i32) {
    %c0_i32 = arith.constant 0 : i32
    %c0_i32_0 = arith.constant 0 : i32
    %c0_i32_1 = arith.constant 0 : i32
    return %c0_i32, %c0_i32_0 : i32, i32
  }
  func.func @transform_1(%arg0: i32) -> (i32, i32) {
    %c0_i32 = arith.constant 0 : i32
    %c0_i32_0 = arith.constant 0 : i32
    return %c0_i32, %arg0 : i32, i32
  }
  func.func @transform_2(%arg0: i32) -> (i32, i32) {
    %c0_i32 = arith.constant 0 : i32
    %c0_i32_0 = arith.constant 0 : i32
    return %c0_i32, %arg0 : i32, i32
  }
  func.func @transform_3(%arg0: i32) -> (i32, i32) {
    %c0_i32 = arith.constant 0 : i32
    %c0_i32_0 = arith.constant 0 : i32
    return %c0_i32, %arg0 : i32, i32
  }
}

module attributes {stable_mosaic.version = 11 : i64} {
  func.func @_conv_relu_kernel(%arg0: memref<18x1152xbf16, #tpu.memory_space<vmem>>, %arg1: memref<1152x256xbf16, #tpu.memory_space<vmem>>, %arg2: memref<1x256xf32, #tpu.memory_space<vmem>>, %arg3: memref<18x256xbf16, #tpu.memory_space<vmem>>) attributes {dimension_semantics = [], scalar_prefetch = 0 : i64, scratch_operands = 0 : i64, tpu.core_type = #tpu.core_type<tc>} {
    %c0 = arith.constant 0 : index
    %c0_0 = arith.constant 0 : index
    %0 = vector.load %arg0[%c0, %c0_0] : memref<18x1152xbf16, #tpu.memory_space<vmem>>, vector<18x1152xbf16>
    %c0_1 = arith.constant 0 : index
    %c0_2 = arith.constant 0 : index
    %1 = vector.load %arg1[%c0_1, %c0_2] : memref<1152x256xbf16, #tpu.memory_space<vmem>>, vector<1152x256xbf16>
    %cst = arith.constant dense<0.000000e+00> : vector<18x256xf32>
    %2 = tpu.matmul %0, %1, %cst {dimension_numbers = #tpu.dot_dimension_numbers<[1], [0], [0], [1], [0, 0, 1, 1], [], []>} : vector<18x1152xbf16>, vector<1152x256xbf16>, vector<18x256xf32> -> vector<18x256xf32>
    %c0_3 = arith.constant 0 : index
    %c0_4 = arith.constant 0 : index
    %3 = vector.load %arg2[%c0_3, %c0_4] : memref<1x256xf32, #tpu.memory_space<vmem>>, vector<1x256xf32>
    %4 = vector.broadcast %3 : vector<1x256xf32> to vector<18x256xf32>
    %5 = arith.addf %2, %4 : vector<18x256xf32>
    %cst_5 = arith.constant 0.000000e+00 : f32
    %6 = vector.broadcast %cst_5 : f32 to vector<18x256xf32>
    %7 = arith.maximumf %5, %6 : vector<18x256xf32>
    %8 = arith.truncf %7 : vector<18x256xf32> to vector<18x256xbf16>
    %c0_6 = arith.constant 0 : index
    %c0_7 = arith.constant 0 : index
    %9 = vector.load %arg3[%c0_6, %c0_7] : memref<18x256xbf16, #tpu.memory_space<vmem>>, vector<18x256xbf16>
    tpu.vector_store %arg3[%c0_6, %c0_7], %8 {strides = array<i32>} : memref<18x256xbf16, #tpu.memory_space<vmem>>, vector<18x256xbf16>,
    return
  }
}

</mosaic_0001>

<bundles_post_ra>
// kernel: encoder_forward.5
= control target key start
LH: loop header
LB: loop body
LE: loop exit
PB: predicated region body
PF: predicated region fallthrough
CT: control target
= control target key end

     0   :  { %9 = vsyncpa [#allocation3], 0  ;;  %s1179_s0 = inlined_call_operand.vmem [shape: bf16[162,27], index: 0, kind: input, shape index: {}]   ;;  %s1180_s1 = inlined_call_operand.hbm [shape: bf16[27,32], index: 1, kind: input, shape index: {}]   ;;  %s1181_s2 = inlined_call_operand.hbm [shape: f32[1,32], index: 2, kind: input, shape index: {}]   ;;  %s1182_s3 = inlined_call_operand.hbm [shape: f32[1,32], index: 3, kind: input, shape index: {}]   ;;  %s1183_s4 = inlined_call_operand.vmem [shape: bf16[162,32], index: 4, kind: output, shape index: {}]  }
   0x1   :  { %10 = vsyncpa [#allocation5], 0  ;;  %s31_s17 = sshll.u32 %s1181_s2, 4  ;;  %s720_s18 = smov [#allocation4]   ;;  %s32_s17 = int_to_ptr.hbm [resolvable:$true] %s31_s17 }
   0x2   :  { %s33_s19 = sshll.u32 %s720_s18, 4  ;;  %s17_s22 = sshll.u32 %s1180_s1, 4  ;;  %s34_s19 = int_to_ptr.vmem [resolvable:$true] %s33_s19  ;;  %s18_s22 = int_to_ptr.hbm [resolvable:$true] %s17_s22 }
   0x3   :  { %36 = dma.hbm_to_vmem [thread:$0]  %s32_s17, 16, %s34_s19, [#allocation5]  }
   0x4   :  { %s721_s23 = smov [#allocation2]   ;;  %s722_s25 = smov 64  }
   0x5   :  { %s19_s24 = sshll.u32 %s721_s23, 4  ;;  %s723_s26 = smov 4   ;;  %s20_s24 = int_to_ptr.vmem [resolvable:$true] %s19_s24 }
   0x6   :  { %25 = dma.hbm_to_vmem [thread:$0]  %s18_s22, 256, %s20_s24, [#allocation3], %s722_s25, %s722_s25, %s723_s26  }
   0x7   :  { %s42_s2 = sshll.u32 %s1182_s3, 4  ;;  %s724_s29 = smov [#allocation6]   ;;  %s43_s2 = int_to_ptr.hbm [resolvable:$true] %s42_s2 }
   0x8   :  { %s44_s30 = sshll.u32 %s724_s29, 4  ;;  %s45_s30 = int_to_ptr.vmem [resolvable:$true] %s44_s30 }
   0x9   :  { %47 = dma.hbm_to_vmem [thread:$0]  %s43_s2, 16, %s45_s30, [#allocation5]  }
   0xa   :  { %716 = dma.done.wait [#allocation3], 256  }
   0xb   :  { %717 = vsyncadd [#allocation3], 4294967040 }
   0xc   :  { %718 = dma.done.wait [#allocation5], 32  }
   0xd   :  { %719 = vsyncadd [#allocation5], 4294967264  ;;  %vm184_vm0 = vcmask 1044480   ;;  %vm185_vm1 = vcmask 1045504   ;;  %v725_v0 = vmov 65535   ;;  %v623_v7 = vld [vmem:[#allocation2] sm:$0xff] }
   0xe   :  { %v186_v1 = vsel %vm184_vm0, 4294967295, %v725_v0  ;;  %v600_v2 = vld [vmem:[#allocation2 + $0x8] sm:$0xf]  ;;  %v624_v3 = vld [vmem:[#allocation2 + $0x8] sm:$0x30]  ;;  %v613_v8 = vld [vmem:[%s1179_s0] sm:$0xff] }
   0xf   :  { %v187_v4 = vsel %vm185_vm1, %v186_v1, 0  ;;  %v601_v5 = vor.u32 %v624_v3, %v600_v2  ;;  %v616_v9 = vld [vmem:[%s1179_s0 + $0x18] sm:$0xff]  ;;  %vm150_vm2 = vcmask 220160   ;;  %v619_v10 = vld [vmem:[%s1179_s0 + $0x30] sm:$0xff]  ;;  %v622_v11 = vld [vmem:[%s1179_s0 + $0x48] sm:$0xff]  ;;  %vm254_vm3 = vcmask 261120  }
  0x10   :  { %v81_v12 = vld [vmem:[%s1179_s0 + $0x50] sm:$0x1]  ;;  %v614_v14 = vld [vmem:[%s1179_s0 + $0x8] sm:$0xff]  ;;  %v617_v15 = vld [vmem:[%s1179_s0 + $0x20] sm:$0xff]  ;;  %vm294_vm4 = vcmask 254976   ;;  %vm525_vm9 = vcmask 257024  }
  0x11   :  { %v189_v6 = vand.u32 %v601_v5, %v187_v4  ;;  %v127_v13 = vunpack.c.l.b16 %v81_v12  ;;  %v620_v16 = vld [vmem:[%s1179_s0 + $0x38] sm:$0xff]  ;;  %v615_v18 = vld [vmem:[%s1179_s0 + $0x10] sm:$0xff]  ;;  %v618_v19 = vld [vmem:[%s1179_s0 + $0x28] sm:$0xff]  ;;  %v726_v5 = vmov 162.0   ;;  %vm546_vm10 = vcmask 253952  }
  0x12   :  { %v621_v20 = vld [vmem:[%s1179_s0 + $0x40] sm:$0xff]  ;;  %640 = vrcp.f32 %v726_v5 }
  0x13   :  { %197 = vmatpush.bf16.msra.mxu0 %v189_v6  ;;  %625 = vmatpush.bf16.msra.mxu1 %v189_v6  ;;  %v138_v17 = vpack.c.b16 %v127_v13, %v127_v13 }
  0x14   :  { %626 = vmatpush.bf16.msra.mxu2 %v189_v6  ;;  %627 = vmatpush.bf16.msra.mxu3 %v189_v6 }
  0x17   :  { %198 = vmatpush.bf16.msra.mxu0 %v623_v7  ;;  %628 = vmatpush.bf16.msra.mxu1 %v623_v7 }
  0x18   :  { %629 = vmatpush.bf16.msra.mxu2 %v623_v7  ;;  %630 = vmatpush.bf16.msra.mxu3 %v623_v7  ;;  %v641_v12 = vpop.eup %640 }
  0x19   :  { %vm308_vm5 = vweird.f32 %v641_v12 }
  0x1a   :  { %602 = vmatmul.msk.bf16.vlgmr.msra.gmra.mxu0 %vm150_vm2, %v613_v8  ;;  %605 = vmatmul.msk.bf16.vlgmr.msra.gmra.mxu1 %vm150_vm2, %v616_v9 }
  0x1b   :  { %608 = vmatmul.msk.bf16.vlgmr.msra.gmra.mxu2 %vm150_vm2, %v619_v10  ;;  %611 = vmatmul.msk.bf16.vlgmr.msra.gmra.mxu3 %vm150_vm2, %v622_v11 }
  0x2a   :  { %603 = vmatmul.msk.bf16.gmra.mxu0 %vm150_vm2, %v614_v14  ;;  %606 = vmatmul.msk.bf16.gmra.mxu1 %vm150_vm2, %v617_v15 }
  0x2b   :  { %609 = vmatmul.msk.bf16.gmra.mxu2 %vm150_vm2, %v620_v16  ;;  %612 = vmatmul.msk.bf16.gmra.mxu3 %vm150_vm2, %v138_v17  ;;  %v304_v17 = vmul.f32 162.0, %v641_v12 }
  0x3a   :  { %604 = vmatmul.msk.bf16.gmra.mxu0 %vm150_vm2, %v615_v18  ;;  %607 = vmatmul.msk.bf16.gmra.mxu1 %vm150_vm2, %v618_v19 }
  0x3b   :  { %610 = vmatmul.msk.bf16.gmra.mxu2 %vm150_vm2, %v621_v20 }
  0x97   :  { %v805_v21 = vpop.f32.mrf.mxu0  ;;  %v807_v22 = vpop.f32.mrf.mxu1 }
  0x98   :  { %v255_v37 = vsel %vm254_vm3, %v805_v21, 0.0  ;;  %v266_v51 = vsel %vm254_vm3, %v807_v22, 0.0 }
  0x9e   :  { %v813_v25 = vpop.f32.mrf.mxu2  ;;  %v815_v26 = vpop.f32.mrf.mxu3 }
  0x9f   :  { %v809_v23 = vpop.f32.mrf.mxu0  ;;  %v811_v24 = vpop.f32.mrf.mxu1  ;;  %v278_v1 = vsel %vm254_vm3, %v813_v25, 0.0  ;;  %v290_v16 = vsel %vm254_vm3, %v815_v26, 0.0 }
  0xa0   :  { %v256_v34 = vsel %vm254_vm3, %v809_v23, 0.0  ;;  %v268_v53 = vsel %vm254_vm3, %v811_v24, 0.0 }
  0xa1   :  { %v257_v39 = vadd.f32 %v256_v34, %v255_v37  ;;  %v305_v37 = vsub.f32 1.0, %v304_v17 }
  0xa6   :  { %v821_v29 = vpop.f32.mrf.mxu2  ;;  %v823_v30 = vpop.f32.mrf.mxu3 }
  0xa7   :  { %v817_v27 = vpop.f32.mrf.mxu0  ;;  %v819_v28 = vpop.f32.mrf.mxu1  ;;  %v280_v3 = vsel %vm254_vm3, %v821_v29, 0.0  ;;  %v292_v19 = vsel %vm254_vm3, %v823_v30, 0.0 }
  0xa8   :  { %v258_v38 = vsel %vm254_vm3, %v817_v27, 0.0  ;;  %v270_v55 = vsel %vm254_vm3, %v819_v28, 0.0 }
  0xa9   :  { %v259_v41 = vadd.f32 %v258_v38, %v257_v39 }
  0xae   :  { %v829_v33 = vpop.f32.mrf.mxu3  ;;  %v835_v36 = vpop.f32.mrf.mxu2 }
  0xaf   :  { %v825_v31 = vpop.f32.mrf.mxu0  ;;  %v827_v32 = vpop.f32.mrf.mxu1  ;;  %v282_v6 = vsel %vm254_vm3, %v835_v36, 0.0  ;;  %v295_v20 = vsel %vm294_vm4, %v829_v33, 0.0 }
  0xb0   :  { %v260_v40 = vsel %vm254_vm3, %v825_v31, 0.0  ;;  %v272_v57 = vsel %vm254_vm3, %v827_v32, 0.0 }
  0xb1   :  { %v261_v43 = vadd.f32 %v260_v40, %v259_v41  ;;  %v306_v40 = vmul.f32 %v641_v12, %v305_v37 }
  0xb6   :  { %v252_v44 = vpop.f32.mrf.mxu3  ;;  %v848_v50 = vpop.f32.mrf.mxu2 }
  0xb7   :  { %v833_v35 = vpop.f32.mrf.mxu0  ;;  %v845_v46 = vpop.f32.mrf.mxu1  ;;  %v284_v8 = vsel %vm254_vm3, %v848_v50, 0.0 }
  0xb8   :  { %v262_v42 = vsel %vm254_vm3, %v833_v35, 0.0  ;;  %v274_v60 = vsel %vm254_vm3, %v845_v46, 0.0 }
  0xb9   :  { %v263_v45 = vadd.f32 %v262_v42, %v261_v43  ;;  %v307_v43 = vadd.f32 %v641_v12, %v306_v40 }
  0xbe   :  { %v862_v62 = vpop.f32.mrf.mxu2 }
  0xbf   :  { %v212_v47 = vpop.f32.mrf.mxu0  ;;  %v858_v58 = vpop.f32.mrf.mxu1  ;;  %v286_v11 = vsel %vm254_vm3, %v862_v62, 0.0 }
  0xc0   :  { %v264_v48 = vsel %vm254_vm3, %v212_v47, 0.0  ;;  %v276_v63 = vsel %vm254_vm3, %v858_v58, 0.0 }
  0xc1   :  { %v265_v49 = vadd.f32 %v264_v48, %v263_v45  ;;  %v886_v48 = vsel %vm308_vm5, %v641_v12, %v307_v43 }
  0xc3   :  { %v267_v52 = vadd.f32 %v266_v51, %v265_v49 }
  0xc5   :  { %v269_v54 = vadd.f32 %v268_v53, %v267_v52 }
  0xc6   :  { %v874_v10 = vpop.f32.mrf.mxu2 }
  0xc7   :  { %v271_v56 = vadd.f32 %v270_v55, %v269_v54  ;;  %v288_v14 = vsel %vm254_vm3, %v874_v10, 0.0 }
  0xc9   :  { %v273_v59 = vadd.f32 %v272_v57, %v271_v56 }
  0xcb   :  { %v275_v61 = vadd.f32 %v274_v60, %v273_v59 }
  0xcd   :  { %v277_v0 = vadd.f32 %v276_v63, %v275_v61 }
  0xcf   :  { %v279_v2 = vadd.f32 %v278_v1, %v277_v0 }
  0xd1   :  { %v281_v4 = vadd.f32 %v280_v3, %v279_v2 }
  0xd3   :  { %v283_v7 = vadd.f32 %v282_v6, %v281_v4 }
  0xd5   :  { %v285_v9 = vadd.f32 %v284_v8, %v283_v7 }
  0xd7   :  { %v287_v13 = vadd.f32 %v286_v11, %v285_v9 }
  0xd9   :  { %v289_v15 = vadd.f32 %v288_v14, %v287_v13 }
  0xdb   :  { %v291_v18 = vadd.f32 %v290_v16, %v289_v15 }
  0xdd   :  { %v293_v34 = vadd.f32 %v292_v19, %v291_v18 }
  0xdf   :  { %v296_v38 = vadd.f32 %v295_v20, %v293_v34 }
  0xe1   :  { %v297_v39 = vrot.slane %v296_v38, 4 }
  0xe3   :  { %v298_v41 = vadd.f32 %v297_v39, %v296_v38 }
  0xe5   :  { %v299_v42 = vrot.slane %v298_v41, 2 }
  0xe7   :  { %v300_v44 = vadd.f32 %v299_v42, %v298_v41 }
  0xe9   :  { %v301_v45 = vrot.slane %v300_v44, 1 }
  0xeb   :  { %v302_v49 = vadd.f32 %v301_v45, %v300_v44 }
  0xed   :  { %v889_v51 = vmul.f32 %v886_v48, %v302_v49 }
  0xef   :  { %v893_v52 = vsub.f32 %v805_v21, %v889_v51  ;;  %v897_v53 = vsub.f32 %v809_v23, %v889_v51  ;;  %v901_v54 = vsub.f32 %v817_v27, %v889_v51  ;;  %v905_v55 = vsub.f32 %v825_v31, %v889_v51 }
  0xf0   :  { %v913_v21 = vsub.f32 %v833_v35, %v889_v51  ;;  %v918_v27 = vsub.f32 %v212_v47, %v889_v51  ;;  %v926_v63 = vsub.f32 %v807_v22, %v889_v51  ;;  %v933_v47 = vsub.f32 %v811_v24, %v889_v51 }
  0xf1   :  { %v332_v56 = vmul.f32 %v893_v52, %v893_v52  ;;  %v333_v57 = vmul.f32 %v897_v53, %v897_v53  ;;  %v334_v23 = vmul.f32 %v901_v54, %v901_v54  ;;  %v335_v31 = vmul.f32 %v905_v55, %v905_v55 }
  0xf2   :  { %v336_v35 = vmul.f32 %v913_v21, %v913_v21  ;;  %v337_v2 = vmul.f32 %v918_v27, %v918_v27  ;;  %v940_v22 = vsub.f32 %v819_v28, %v889_v51  ;;  %v338_v5 = vmul.f32 %v926_v63, %v926_v63 }
  0xf3   :  { %v353_v59 = vsel %vm254_vm3, %v332_v56, 0.0  ;;  %v354_v60 = vsel %vm254_vm3, %v333_v57, 0.0  ;;  %v356_v0 = vsel %vm254_vm3, %v334_v23, 0.0  ;;  %v358_v3 = vsel %vm254_vm3, %v335_v31, 0.0 }
  0xf4   :  { %v355_v61 = vadd.f32 %v354_v60, %v353_v59  ;;  %v360_v6 = vsel %vm254_vm3, %v336_v35, 0.0  ;;  %v947_v24 = vsub.f32 %v827_v32, %v889_v51  ;;  %v339_v8 = vmul.f32 %v933_v47, %v933_v47 }
  0xf5   :  { %v362_v9 = vsel %vm254_vm3, %v337_v2, 0.0  ;;  %v954_v28 = vsub.f32 %v845_v46, %v889_v51  ;;  %v340_v12 = vmul.f32 %v940_v22, %v940_v22  ;;  %v364_v13 = vsel %vm254_vm3, %v338_v5, 0.0 }
  0xf6   :  { %v357_v1 = vadd.f32 %v356_v0, %v355_v61  ;;  %v961_v32 = vsub.f32 %v858_v58, %v889_v51  ;;  %v341_v15 = vmul.f32 %v947_v24, %v947_v24  ;;  %v366_v16 = vsel %vm254_vm3, %v339_v8, 0.0 }
  0xf7   :  { %v968_v46 = vsub.f32 %v813_v25, %v889_v51  ;;  %v342_v18 = vmul.f32 %v954_v28, %v954_v28  ;;  %v368_v19 = vsel %vm254_vm3, %v340_v12, 0.0  ;;  %v975_v58 = vsub.f32 %v821_v29, %v889_v51 }
  0xf8   :  { %v359_v4 = vadd.f32 %v358_v3, %v357_v1  ;;  %v343_v34 = vmul.f32 %v961_v32, %v961_v32  ;;  %v370_v37 = vsel %vm254_vm3, %v341_v15, 0.0  ;;  %v982_v25 = vsub.f32 %v835_v36, %v889_v51 }
  0xf9   :  { %v344_v39 = vmul.f32 %v968_v46, %v968_v46  ;;  %v372_v40 = vsel %vm254_vm3, %v342_v18, 0.0  ;;  %v326_v29 = vsub.f32 %v848_v50, %v889_v51  ;;  %v345_v42 = vmul.f32 %v975_v58, %v975_v58 }
  0xfa   :  { %v361_v7 = vadd.f32 %v360_v6, %v359_v4  ;;  %v374_v43 = vsel %vm254_vm3, %v343_v34, 0.0  ;;  %v327_v45 = vsub.f32 %v862_v62, %v889_v51  ;;  %v346_v36 = vmul.f32 %v982_v25, %v982_v25 }
  0xfb   :  { %v376_v49 = vsel %vm254_vm3, %v344_v39, 0.0  ;;  %v999_v57 = vsub.f32 %v874_v10, %v889_v51  ;;  %v347_v50 = vmul.f32 %v326_v29, %v326_v29  ;;  %v378_v23 = vsel %vm254_vm3, %v345_v42, 0.0 }
  0xfc   :  { %v363_v11 = vadd.f32 %v362_v9, %v361_v7  ;;  %v1004_v59 = vsub.f32 %v815_v26, %v889_v51  ;;  %v348_v60 = vmul.f32 %v327_v45, %v327_v45  ;;  %v380_v62 = vsel %vm254_vm3, %v346_v36, 0.0 }
  0xfd   :  { %v1009_v35 = vsub.f32 %v823_v30, %v889_v51  ;;  %v349_v10 = vmul.f32 %v999_v57, %v999_v57  ;;  %v382_v0 = vsel %vm254_vm3, %v347_v50, 0.0  ;;  %v331_v2 = vsub.f32 %v829_v33, %v889_v51  ;;  %v1033_v50 = vld [vmem:[#allocation4] ss:$0 sm:$0xff] }
  0xfe   :  { %v365_v14 = vadd.f32 %v364_v13, %v363_v11  ;;  %v350_v26 = vmul.f32 %v1004_v59, %v1004_v59  ;;  %v384_v3 = vsel %vm254_vm3, %v348_v60, 0.0 }
  0xff   :  { %v351_v5 = vmul.f32 %v1009_v35, %v1009_v35  ;;  %v386_v30 = vsel %vm254_vm3, %v349_v10, 0.0  ;;  %v352_v7 = vmul.f32 %v331_v2, %v331_v2 }
 0x100   :  { %v367_v17 = vadd.f32 %v366_v16, %v365_v14  ;;  %v388_v8 = vsel %vm254_vm3, %v350_v26, 0.0 }
 0x101   :  { %v390_v11 = vsel %vm254_vm3, %v351_v5, 0.0  ;;  %v392_v33 = vsel %vm294_vm4, %v352_v7, 0.0 }
 0x102   :  { %v369_v20 = vadd.f32 %v368_v19, %v367_v17 }
 0x104   :  { %v371_v38 = vadd.f32 %v370_v37, %v369_v20 }
 0x106   :  { %v373_v41 = vadd.f32 %v372_v40, %v371_v38 }
 0x108   :  { %v375_v44 = vadd.f32 %v374_v43, %v373_v41 }
 0x10a   :  { %v377_v56 = vadd.f32 %v376_v49, %v375_v44 }
 0x10c   :  { %v379_v31 = vadd.f32 %v378_v23, %v377_v56 }
 0x10e   :  { %v381_v61 = vadd.f32 %v380_v62, %v379_v31  ;;  %v1042_v62 = vld [vmem:[#allocation6] ss:$0 sm:$0xff] }
 0x110   :  { %v383_v1 = vadd.f32 %v382_v0, %v381_v61 }
 0x112   :  { %v385_v4 = vadd.f32 %v384_v3, %v383_v1 }
 0x114   :  { %v387_v6 = vadd.f32 %v386_v30, %v385_v4 }
 0x116   :  { %v389_v9 = vadd.f32 %v388_v8, %v387_v6 }
 0x118   :  { %v391_v12 = vadd.f32 %v390_v11, %v389_v9 }
 0x11a   :  { %v393_v51 = vadd.f32 %v392_v33, %v391_v12 }
 0x11c   :  { %v394_v13 = vrot.slane %v393_v51, 4 }
 0x11e   :  { %v395_v14 = vadd.f32 %v394_v13, %v393_v51 }
 0x120   :  { %v396_v15 = vrot.slane %v395_v14, 2 }
 0x122   :  { %v397_v16 = vadd.f32 %v396_v15, %v395_v14 }
 0x124   :  { %v398_v17 = vrot.slane %v397_v16, 1 }
 0x126   :  { %v399_v18 = vadd.f32 %v398_v17, %v397_v16 }
 0x128   :  { %v400_v19 = vmul.f32 %v399_v18, %v886_v48 }
 0x12a   :  { %v401_v20 = vadd.f32 1e-05, %v400_v19 }
 0x12c   :  { %642 = vrsqrt.f32 %v401_v20  ;;  %vm408_vm7 = vweird.f32 %v401_v20 }
 0x132   :  { %v643_v34 = vpop.eup %642 }
 0x133   :  { %v403_v37 = vmul.f32 %v643_v34, %v401_v20  ;;  %vm409_vm6 = vweird.f32 %v643_v34 }
 0x134   :  { %vm410_vm8 = vmor %vm408_vm7, %vm409_vm6 }
 0x135   :  { %v404_v38 = vmul.f32 %v643_v34, %v403_v37 }
 0x137   :  { %v405_v39 = vmul.f32 0.5, %v404_v38 }
 0x139   :  { %v406_v40 = vsub.f32 1.5, %v405_v39 }
 0x13b   :  { %v407_v41 = vmul.f32 %v643_v34, %v406_v40 }
 0x13d   :  { %v411_v42 = vsel %vm410_vm8, %v643_v34, %v407_v41 }
 0x13e   :  { %v427_v43 = vmul.f32 %v411_v42, %v326_v29  ;;  %v1026_v44 = vmul.f32 %v411_v42, %v327_v45  ;;  %v412_v36 = vmul.f32 %v411_v42, %v893_v52  ;;  %v413_v49 = vmul.f32 %v411_v42, %v897_v53 }
 0x13f   :  { %v414_v48 = vmul.f32 %v411_v42, %v901_v54  ;;  %v1031_v56 = vmul.f32 %v411_v42, %v331_v2  ;;  %v415_v23 = vmul.f32 %v411_v42, %v905_v55  ;;  %v416_v31 = vmul.f32 %v411_v42, %v913_v21 }
 0x140   :  { %v417_v60 = vmul.f32 %v411_v42, %v918_v27  ;;  %v418_v29 = vmul.f32 %v411_v42, %v926_v63  ;;  %v437_v45 = vmul.f32 %v1033_v50, %v412_v36  ;;  %v438_v52 = vmul.f32 %v1033_v50, %v413_v49 }
 0x141   :  { %v439_v53 = vmul.f32 %v1033_v50, %v414_v48  ;;  %v419_v54 = vmul.f32 %v411_v42, %v933_v47  ;;  %v440_v61 = vmul.f32 %v1033_v50, %v415_v23  ;;  %v420_v55 = vmul.f32 %v411_v42, %v940_v22 }
 0x142   :  { %v441_v21 = vmul.f32 %v1033_v50, %v416_v31  ;;  %v421_v27 = vmul.f32 %v411_v42, %v947_v24  ;;  %v422_v63 = vmul.f32 %v411_v42, %v954_v28  ;;  %v423_v10 = vmul.f32 %v411_v42, %v961_v32 }
 0x143   :  { %v442_v0 = vmul.f32 %v1033_v50, %v417_v60  ;;  %v443_v1 = vmul.f32 %v1033_v50, %v418_v29  ;;  %v462_v2 = vadd.f32 %v1042_v62, %v437_v45  ;;  %v463_v47 = vadd.f32 %v1042_v62, %v438_v52 }
 0x144   :  { %v464_v26 = vadd.f32 %v1042_v62, %v439_v53  ;;  %v424_v22 = vmul.f32 %v411_v42, %v968_v46  ;;  %v425_v3 = vmul.f32 %v411_v42, %v975_v58  ;;  %v444_v24 = vmul.f32 %v1033_v50, %v419_v54 }
 0x145   :  { %v465_v28 = vadd.f32 %v1042_v62, %v440_v61  ;;  %v426_v32 = vmul.f32 %v411_v42, %v982_v25  ;;  %v429_v4 = vmul.f32 %v411_v42, %v999_v57  ;;  %v445_v5 = vmul.f32 %v1033_v50, %v420_v55 }
 0x146   :  { %v466_v30 = vadd.f32 %v1042_v62, %v441_v21  ;;  %v430_v6 = vmul.f32 %v411_v42, %v1004_v59  ;;  %v446_v7 = vmul.f32 %v1033_v50, %v421_v27  ;;  %v447_v46 = vmul.f32 %v1033_v50, %v422_v63 }
 0x147   :  { %v467_v58 = vadd.f32 %v1042_v62, %v442_v0  ;;  %v468_v8 = vadd.f32 %v1042_v62, %v443_v1  ;;  %v483_v9 = vmax.f32 %v462_v2, 0.0  ;;  %v484_v11 = vmax.f32 %v463_v47, 0.0 }
 0x148   :  { %v485_v12 = vmax.f32 %v464_v26, 0.0  ;;  %v431_v25 = vmul.f32 %v411_v42, %v1009_v35  ;;  %v448_v57 = vmul.f32 %v1033_v50, %v423_v10  ;;  %v469_v33 = vadd.f32 %v1042_v62, %v444_v24 }
 0x149   :  { %v486_v51 = vmax.f32 %v465_v28, 0.0  ;;  %v449_v59 = vmul.f32 %v1033_v50, %v424_v22  ;;  %v450_v13 = vmul.f32 %v1033_v50, %v425_v3  ;;  %v470_v14 = vadd.f32 %v1042_v62, %v445_v5 }
 0x14a   :  { %v487_v15 = vmax.f32 %v466_v30, 0.0  ;;  %v451_v16 = vmul.f32 %v1033_v50, %v426_v32  ;;  %v471_v17 = vadd.f32 %v1042_v62, %v446_v7  ;;  %v472_v18 = vadd.f32 %v1042_v62, %v447_v46 }
 0x14b   :  { %v488_v19 = vmax.f32 %v467_v58, 0.0  ;;  %v489_v35 = vmax.f32 %v468_v8, 0.0  ;;  %v504_v20 = vpack.c.bf16 %v483_v9, %v483_v9  ;;  %v505_v34 = vpack.c.bf16 %v484_v11, %v484_v11 }
 0x14c   :  { %v506_v37 = vpack.c.bf16 %v485_v12, %v485_v12  ;;  %v452_v38 = vmul.f32 %v1033_v50, %v427_v43  ;;  %v473_v39 = vadd.f32 %v1042_v62, %v448_v57  ;;  %v490_v40 = vmax.f32 %v469_v33, 0.0 }
 0x14d   :  { %v507_v41 = vpack.c.bf16 %v486_v51, %v486_v51  ;;  %v453_v42 = vmul.f32 %v1033_v50, %v1026_v44  ;;  %v474_v36 = vadd.f32 %v1042_v62, %v449_v59  ;;  %v491_v49 = vmax.f32 %v470_v14, 0.0  ;;  %526 = vst.msk [vmem:[%s1183_s4] sm:$0xf] %vm525_vm9, %v504_v20 }
 0x14e   :  { %v508_v48 = vpack.c.bf16 %v487_v15, %v487_v15  ;;  %v454_v23 = vmul.f32 %v1033_v50, %v429_v4  ;;  %v475_v43 = vadd.f32 %v1042_v62, %v450_v13  ;;  %v492_v31 = vmax.f32 %v471_v17, 0.0  ;;  %527 = vst.msk [vmem:[%s1183_s4 + $0x4] sm:$0xf] %vm525_vm9, %v505_v34 }
 0x14f   :  { %v509_v60 = vpack.c.bf16 %v488_v19, %v488_v19  ;;  %v455_v44 = vmul.f32 %v1033_v50, %v430_v6  ;;  %v476_v29 = vadd.f32 %v1042_v62, %v451_v16  ;;  %v493_v45 = vmax.f32 %v472_v18, 0.0  ;;  %528 = vst.msk [vmem:[%s1183_s4 + $0x8] sm:$0xf] %vm525_vm9, %v506_v37 }
 0x150   :  { %v510_v52 = vpack.c.bf16 %v489_v35, %v489_v35  ;;  %v456_v53 = vmul.f32 %v1033_v50, %v431_v25  ;;  %v477_v54 = vadd.f32 %v1042_v62, %v452_v38  ;;  %v494_v61 = vmax.f32 %v473_v39, 0.0  ;;  %529 = vst.msk [vmem:[%s1183_s4 + $0xc] sm:$0xf] %vm525_vm9, %v507_v41 }
 0x151   :  { %v511_v55 = vpack.c.bf16 %v490_v40, %v490_v40  ;;  %v457_v21 = vmul.f32 %v1033_v50, %v1031_v56  ;;  %v478_v27 = vadd.f32 %v1042_v62, %v453_v42  ;;  %v495_v63 = vmax.f32 %v474_v36, 0.0  ;;  %530 = vst.msk [vmem:[%s1183_s4 + $0x10] sm:$0xf] %vm525_vm9, %v508_v48 }
 0x152   :  { %v512_v10 = vpack.c.bf16 %v491_v49, %v491_v49  ;;  %v479_v0 = vadd.f32 %v1042_v62, %v454_v23  ;;  %v496_v1 = vmax.f32 %v475_v43, 0.0  ;;  %v513_v2 = vpack.c.bf16 %v492_v31, %v492_v31  ;;  %531 = vst.msk [vmem:[%s1183_s4 + $0x14] sm:$0xf] %vm525_vm9, %v509_v60 }
 0x153   :  { %v480_v56 = vadd.f32 %v1042_v62, %v455_v44  ;;  %v497_v50 = vmax.f32 %v476_v29, 0.0  ;;  %v514_v47 = vpack.c.bf16 %v493_v45, %v493_v45  ;;  %532 = vst.msk [vmem:[%s1183_s4 + $0x18] sm:$0xf] %vm525_vm9, %v510_v52  ;;  %v481_v26 = vadd.f32 %v1042_v62, %v456_v53 }
 0x154   :  { %v498_v22 = vmax.f32 %v477_v54, 0.0  ;;  %v515_v3 = vpack.c.bf16 %v494_v61, %v494_v61  ;;  %533 = vst.msk [vmem:[%s1183_s4 + $0x1c] sm:$0xf] %vm525_vm9, %v511_v55  ;;  %v482_v24 = vadd.f32 %v1042_v62, %v457_v21  ;;  %v499_v28 = vmax.f32 %v478_v27, 0.0 }
 0x155   :  { %v516_v32 = vpack.c.bf16 %v495_v63, %v495_v63  ;;  %534 = vst.msk [vmem:[%s1183_s4 + $0x20] sm:$0xf] %vm525_vm9, %v512_v10  ;;  %v500_v4 = vmax.f32 %v479_v0, 0.0  ;;  %v517_v5 = vpack.c.bf16 %v496_v1, %v496_v1  ;;  %v501_v30 = vmax.f32 %v480_v56, 0.0 }
 0x156   :  { %535 = vst.msk [vmem:[%s1183_s4 + $0x24] sm:$0xf] %vm525_vm9, %v513_v2  ;;  %v518_v6 = vpack.c.bf16 %v497_v50, %v497_v50  ;;  %v502_v62 = vmax.f32 %v481_v26, 0.0  ;;  %v519_v7 = vpack.c.bf16 %v498_v22, %v498_v22  ;;  %v503_v46 = vmax.f32 %v482_v24, 0.0 }
 0x157   :  { %536 = vst.msk [vmem:[%s1183_s4 + $0x28] sm:$0xf] %vm525_vm9, %v514_v47  ;;  %v520_v58 = vpack.c.bf16 %v499_v28, %v499_v28  ;;  %v521_v8 = vpack.c.bf16 %v500_v4, %v500_v4  ;;  %v522_v9 = vpack.c.bf16 %v501_v30, %v501_v30 }
 0x158   :  { %537 = vst.msk [vmem:[%s1183_s4 + $0x2c] sm:$0xf] %vm525_vm9, %v515_v3  ;;  %v523_v11 = vpack.c.bf16 %v502_v62, %v502_v62  ;;  %v524_v12 = vpack.c.bf16 %v503_v46, %v503_v46 }
 0x159   :  { %538 = vst.msk [vmem:[%s1183_s4 + $0x30] sm:$0xf] %vm525_vm9, %v516_v32 }
 0x15a   :  { %539 = vst.msk [vmem:[%s1183_s4 + $0x34] sm:$0xf] %vm525_vm9, %v517_v5 }
 0x15b   :  { %540 = vst.msk [vmem:[%s1183_s4 + $0x38] sm:$0xf] %vm525_vm9, %v518_v6 }
 0x15c   :  { %541 = vst.msk [vmem:[%s1183_s4 + $0x3c] sm:$0xf] %vm525_vm9, %v519_v7 }
 0x15d   :  { %542 = vst.msk [vmem:[%s1183_s4 + $0x40] sm:$0xf] %vm525_vm9, %v520_v58 }
 0x15e   :  { %543 = vst.msk [vmem:[%s1183_s4 + $0x44] sm:$0xf] %vm525_vm9, %v521_v8 }
 0x15f   :  { %544 = vst.msk [vmem:[%s1183_s4 + $0x48] sm:$0xf] %vm525_vm9, %v522_v9 }
 0x160   :  { %545 = vst.msk [vmem:[%s1183_s4 + $0x4c] sm:$0xf] %vm525_vm9, %v523_v11 }
 0x161   :  { %547 = vst.msk [vmem:[%s1183_s4 + $0x50] sm:$0x1] %vm546_vm10, %v524_v12 }
 0x162   :  { %552 = vsyncpa [#allocation3], 1 }
 0x163   :  { %553 = vsyncpa [#allocation5], 1 }

// kernel: encoder_forward.6
= control target key start
LH: loop header
LB: loop body
LE: loop exit
PB: predicated region body
PF: predicated region fallthrough
CT: control target
= control target key end

     0   :  { %9 = vsyncpa [#allocation3], 0  ;;  %s1004_s0 = inlined_call_operand.vmem [shape: bf16[72,288], index: 0, kind: input, shape index: {}]   ;;  %s1005_s1 = inlined_call_operand.vmem [shape: bf16[288,64], index: 1, kind: input, shape index: {}]   ;;  %s1006_s2 = inlined_call_operand.hbm [shape: f32[1,64], index: 2, kind: input, shape index: {}]   ;;  %s1007_s3 = inlined_call_operand.hbm [shape: f32[1,64], index: 3, kind: input, shape index: {}]   ;;  %s1008_s4 = inlined_call_operand.vmem [shape: bf16[72,64], index: 4, kind: output, shape index: {}]  }
   0x1   :  { %s20_s17 = sshll.u32 %s1006_s2, 4  ;;  %s21_s17 = int_to_ptr.hbm [resolvable:$true] %s20_s17 }
   0x2   :  { %10 = vsyncpa [#allocation5], 0  ;;  %s779_s18 = smov [#allocation2]   ;;  %s31_s22 = sshll.u32 %s1007_s3, 4  ;;  %s32_s22 = int_to_ptr.hbm [resolvable:$true] %s31_s22 }
   0x3   :  { %s22_s19 = sshll.u32 %s779_s18, 4  ;;  %s780_s23 = smov [#allocation4]   ;;  %s23_s19 = int_to_ptr.vmem [resolvable:$true] %s22_s19 }
   0x4   :  { %25 = dma.hbm_to_vmem [thread:$0]  %s21_s17, 16, %s23_s19, [#allocation3]  }
   0x5   :  { %s33_s24 = sshll.u32 %s780_s23, 4  ;;  %s34_s24 = int_to_ptr.vmem [resolvable:$true] %s33_s24 }
   0x6   :  { %36 = dma.hbm_to_vmem [thread:$0]  %s32_s22, 16, %s34_s24, [#allocation5]  }
   0x7   :  { %775 = dma.done.wait [#allocation3], 16  }
   0x8   :  { %776 = vsyncadd [#allocation3], 4294967280 }
   0x9   :  { %777 = dma.done.wait [#allocation5], 16  }
   0xa   :  { %778 = vsyncadd [#allocation5], 4294967280  ;;  %v691_v0 = vld [vmem:[%s1005_s1 + $0x38] sm:$0xff]  ;;  %v701_v2 = vld [vmem:[%s1005_s1 + $0x88] sm:$0xff]  ;;  %vm278_vm0 = vcmask 261120   ;;  %vm393_vm1 = vcmask 523264  }
   0xb   :  { %v699_v1 = vld [vmem:[%s1005_s1 + $0x78] sm:$0xff]  ;;  %294 = vmatpush.bf16.msra.mxu0 %v691_v0  ;;  %702 = vmatpush.bf16.msra.mxu3 %v691_v0  ;;  %v690_v3 = vld [vmem:[%s1005_s1 + $0x30] sm:$0xff]  ;;  %v700_v5 = vld [vmem:[%s1005_s1 + $0x80] sm:$0xff]  ;;  %vm531_vm6 = vcmask 519168  }
   0xc   :  { %710 = vmatpush.bf16.msra.mxu1 %v699_v1  ;;  %366 = vmatpush.bf16.msra.mxu2 %v701_v2  ;;  %v698_v4 = vld [vmem:[%s1005_s1 + $0x70] sm:$0xff]  ;;  %v557_v6 = vld [vmem:[%s1004_s0 + $0x8] sm:$0xf]  ;;  %v688_v11 = vld [vmem:[%s1005_s1 + $0x20] sm:$0xff] }
   0xd   :  { %v674_v7 = vld [vmem:[%s1004_s0 + $0x10] sm:$0xf0]  ;;  %v689_v8 = vld [vmem:[%s1005_s1 + $0x28] sm:$0xff]  ;;  %v696_v12 = vld [vmem:[%s1005_s1 + $0x60] sm:$0xff] }
   0xe   :  { %v697_v9 = vld [vmem:[%s1005_s1 + $0x68] sm:$0xff]  ;;  %v558_v10 = vor.u32 %v674_v7, %v557_v6  ;;  %v687_v13 = vld [vmem:[%s1005_s1 + $0x18] sm:$0xff]  ;;  %v686_v15 = vld [vmem:[%s1005_s1 + $0x10] sm:$0xff] }
   0xf   :  { %295 = vmatpush.bf16.msra.mxu0 %v690_v3  ;;  %703 = vmatpush.bf16.msra.mxu3 %v690_v3  ;;  %v695_v14 = vld [vmem:[%s1005_s1 + $0x58] sm:$0xff]  ;;  %v694_v16 = vld [vmem:[%s1005_s1 + $0x50] sm:$0xff]  ;;  %v569_v17 = vld [vmem:[%s1004_s0 + $0x20] sm:$0xf] }
  0x10   :  { %711 = vmatpush.bf16.msra.mxu1 %v698_v4  ;;  %367 = vmatpush.bf16.msra.mxu2 %v700_v5  ;;  %v677_v18 = vld [vmem:[%s1004_s0 + $0x28] sm:$0xf0]  ;;  %v684_v22 = vld [vmem:[%s1005_s1] sm:$0xff]  ;;  %v561_v23 = vld [vmem:[%s1004_s0 + $0x18] sm:$0xf] }
  0x11   :  { %v685_v19 = vld [vmem:[%s1005_s1 + $0x8] sm:$0xff]  ;;  %v570_v21 = vor.u32 %v677_v18, %v569_v17  ;;  %v676_v24 = vld [vmem:[%s1004_s0 + $0x20] sm:$0xf0]  ;;  %v549_v25 = vld [vmem:[%s1004_s0] sm:$0xf] }
  0x12   :  { %v693_v20 = vld [vmem:[%s1005_s1 + $0x48] sm:$0xff]  ;;  %v692_v27 = vld [vmem:[%s1005_s1 + $0x40] sm:$0xff]  ;;  %v675_v28 = vld [vmem:[%s1004_s0 + $0x1c] sm:$0xf]  ;;  %v562_v30 = vor.u32 %v676_v24, %v561_v23 }
  0x13   :  { %296 = vmatpush.bf16.msra.mxu0 %v689_v8  ;;  %704 = vmatpush.bf16.msra.mxu3 %v689_v8  ;;  %v673_v26 = vld [vmem:[%s1004_s0 + $0x8] sm:$0xf0]  ;;  %v563_v29 = vld [vmem:[%s1004_s0 + $0x24] sm:$0xf0]  ;;  %v581_v33 = vld [vmem:[%s1004_s0 + $0x38] sm:$0xf] }
  0x14   :  { %712 = vmatpush.bf16.msra.mxu1 %v697_v9  ;;  %667 = vmatmul.msk.bf16.vlgmr.msra.gmra.mxu2 %vm278_vm0, %v558_v10  ;;  %v550_v31 = vor.u32 %v673_v26, %v549_v25  ;;  %v566_v32 = vor.u32 %v675_v28, %v563_v29  ;;  %v680_v34 = vld [vmem:[%s1004_s0 + $0x40] sm:$0xf0]  ;;  %v573_v36 = vld [vmem:[%s1004_s0 + $0x30] sm:$0xf]  ;;  %v679_v37 = vld [vmem:[%s1004_s0 + $0x38] sm:$0xf0] }
  0x15   :  { %v582_v35 = vor.u32 %v680_v34, %v581_v33  ;;  %v678_v38 = vld [vmem:[%s1004_s0 + $0x34] sm:$0xf]  ;;  %v575_v39 = vld [vmem:[%s1004_s0 + $0x3c] sm:$0xf0]  ;;  %v574_v40 = vor.u32 %v679_v37, %v573_v36  ;;  %v593_v42 = vld [vmem:[%s1004_s0 + $0x50] sm:$0xf] }
  0x16   :  { %v578_v41 = vor.u32 %v678_v38, %v575_v39  ;;  %v683_v43 = vld [vmem:[%s1004_s0 + $0x58] sm:$0xf0]  ;;  %v672_v45 = vld [vmem:[%s1004_s0 + $0x4] sm:$0xf]  ;;  %v551_v46 = vld [vmem:[%s1004_s0 + $0xc] sm:$0xf0] }
  0x17   :  { %297 = vmatpush.bf16.msra.mxu0 %v688_v11  ;;  %705 = vmatpush.bf16.msra.mxu3 %v688_v11  ;;  %v594_v44 = vor.u32 %v683_v43, %v593_v42  ;;  %v554_v47 = vor.u32 %v672_v45, %v551_v46  ;;  %v585_v48 = vld [vmem:[%s1004_s0 + $0x48] sm:$0xf]  ;;  %v682_v49 = vld [vmem:[%s1004_s0 + $0x50] sm:$0xf0]  ;;  %v681_v50 = vld [vmem:[%s1004_s0 + $0x4c] sm:$0xf] }
  0x18   :  { %713 = vmatpush.bf16.msra.mxu1 %v696_v12  ;;  %v587_v51 = vld [vmem:[%s1004_s0 + $0x54] sm:$0xf0]  ;;  %v586_v52 = vor.u32 %v682_v49, %v585_v48  ;;  %v63_v54 = vld [vmem:[%s1004_s0 + $0x68] sm:$0xf]  ;;  %v62_v56 = vld [vmem:[%s1004_s0 + $0x60] sm:$0xff] }
  0x19   :  { %v590_v53 = vor.u32 %v681_v50, %v587_v51  ;;  %v144_v55 = vunpack.c.l.b16 %v63_v54  ;;  %v142_v58 = vunpack.c.l.b16 %v62_v56  ;;  %v143_v59 = vunpack.c.h.b16 %v62_v56 }
  0x1b   :  { %298 = vmatpush.bf16.msra.mxu0 %v687_v13  ;;  %706 = vmatpush.bf16.msra.mxu3 %v687_v13  ;;  %v159_v57 = vpack.c.b16 %v144_v55, %v144_v55  ;;  %v157_v60 = vpack.c.b16 %v142_v58, %v142_v58  ;;  %v158_v61 = vpack.c.b16 %v143_v59, %v143_v59 }
  0x1c   :  { %714 = vmatpush.bf16.msra.mxu1 %v695_v14 }
  0x1f   :  { %299 = vmatpush.bf16.msra.mxu0 %v686_v15  ;;  %707 = vmatpush.bf16.msra.mxu3 %v686_v15 }
  0x20   :  { %715 = vmatpush.bf16.msra.mxu1 %v694_v16 }
  0x23   :  { %300 = vmatpush.bf16.msra.mxu0 %v685_v19  ;;  %708 = vmatpush.bf16.msra.mxu3 %v685_v19 }
  0x24   :  { %716 = vmatpush.bf16.msra.mxu1 %v693_v20  ;;  %668 = vmatmul.msk.bf16.gmra.mxu2 %vm278_vm0, %v570_v21 }
  0x27   :  { %301 = vmatpush.bf16.msra.mxu0 %v684_v22  ;;  %709 = vmatpush.bf16.msra.mxu3 %v684_v22 }
  0x28   :  { %717 = vmatpush.bf16.msra.mxu1 %v692_v27 }
  0x2a   :  { %307 = vmatmul.bf16.vlgmr.msra.gmra.mxu3 %v562_v30  ;;  %302 = vmatmul.bf16.vlgmr.msra.gmra.mxu0 %v550_v31 }
  0x2b   :  { %327 = vmatpush.bf16.msrb.mxu0 %v699_v1  ;;  %340 = vmatmul.bf16.vlgmr.msra.gmra.mxu1 %v566_v32 }
  0x2f   :  { %328 = vmatpush.bf16.msrb.mxu0 %v698_v4 }
  0x33   :  { %329 = vmatpush.bf16.msrb.mxu0 %v697_v9 }
  0x34   :  { %669 = vmatmul.msk.bf16.gmra.mxu2 %vm278_vm0, %v582_v35 }
  0x37   :  { %330 = vmatpush.bf16.msrb.mxu0 %v696_v12 }
  0x3a   :  { %312 = vmatmul.bf16.gmra.mxu3 %v574_v40 }
  0x3b   :  { %331 = vmatpush.bf16.msrb.mxu0 %v695_v14  ;;  %345 = vmatmul.bf16.gmra.mxu1 %v578_v41  ;;  %v781_v41 = vmov 72.0  }
  0x3c   :  { %723 = vrcp.f32 %v781_v41 }
  0x3f   :  { %332 = vmatpush.bf16.msrb.mxu0 %v694_v16 }
  0x42   :  { %v724_v51 = vpop.eup %723 }
  0x43   :  { %333 = vmatpush.bf16.msrb.mxu0 %v693_v20  ;;  %vm422_vm2 = vweird.f32 %v724_v51 }
  0x44   :  { %670 = vmatmul.msk.bf16.gmra.mxu2 %vm278_vm0, %v594_v44 }
  0x47   :  { %334 = vmatpush.bf16.msrb.mxu0 %v692_v27 }
  0x4a   :  { %335 = vmatmul.bf16.vlgmr.msrb.gmra.mxu0 %v554_v47  ;;  %317 = vmatmul.bf16.gmra.mxu3 %v586_v52 }
  0x4b   :  { %350 = vmatmul.bf16.gmra.mxu1 %v590_v53 }
  0x54   :  { %671 = vmatmul.msk.bf16.gmra.mxu2 %vm278_vm0, %v159_v57  ;;  %v418_v57 = vmul.f32 72.0, %v724_v51 }
  0x5a   :  { %322 = vmatmul.bf16.gmra.mxu3 %v157_v60 }
  0x5b   :  { %355 = vmatmul.bf16.gmra.mxu1 %v158_v61 }
  0x97   :  { %v369_v62 = vpop.f32.mrf.mxu2 }
  0x9f   :  { %v371_v63 = vpop.f32.mrf.mxu2 }
  0xa7   :  { %v374_v0 = vpop.f32.mrf.mxu2  ;;  %v303_v5 = vpop.f32.mrf.mxu0 }
  0xa8   :  { %v341_v1 = vpop.f32.mrf.mxu1 }
  0xad   :  { %v308_v2 = vpop.f32.mrf.mxu3 }
  0xae   :  { %v342_v18 = vadd.f32 %v341_v1, %v308_v2 }
  0xaf   :  { %v376_v3 = vpop.f32.mrf.mxu2  ;;  %v305_v9 = vpop.f32.mrf.mxu0 }
  0xb0   :  { %v343_v4 = vpop.f32.mrf.mxu1  ;;  %v375_v24 = vadd.f32 %v374_v0, %v342_v18  ;;  %v419_v0 = vsub.f32 1.0, %v418_v57 }
  0xb2   :  { %v397_v34 = vsel %vm393_vm1, %v375_v24, 0.0 }
  0xb5   :  { %v310_v6 = vpop.f32.mrf.mxu3 }
  0xb6   :  { %v344_v20 = vadd.f32 %v343_v4, %v310_v6  ;;  %v420_v4 = vmul.f32 %v724_v51, %v419_v0 }
  0xb7   :  { %v379_v7 = vpop.f32.mrf.mxu2 }
  0xb8   :  { %v346_v8 = vpop.f32.mrf.mxu1  ;;  %v377_v29 = vadd.f32 %v376_v3, %v344_v20 }
  0xba   :  { %v399_v38 = vsel %vm393_vm1, %v377_v29, 0.0 }
  0xbd   :  { %v313_v10 = vpop.f32.mrf.mxu3 }
  0xbe   :  { %v347_v25 = vadd.f32 %v346_v8, %v313_v10 }
  0xbf   :  { %v381_v11 = vpop.f32.mrf.mxu2 }
  0xc0   :  { %v348_v12 = vpop.f32.mrf.mxu1  ;;  %v380_v35 = vadd.f32 %v379_v7, %v347_v25  ;;  %v421_v7 = vadd.f32 %v724_v51, %v420_v4  ;;  %v722_v4 = vld [vmem:[#allocation4] ss:$0 sm:$0xff] }
  0xc2   :  { %v401_v43 = vsel %vm393_vm1, %v380_v35, 0.0  ;;  %v423_v10 = vsel %vm422_vm2, %v724_v51, %v421_v7 }
  0xc5   :  { %v315_v14 = vpop.f32.mrf.mxu3 }
  0xc6   :  { %v349_v31 = vadd.f32 %v348_v12, %v315_v14 }
  0xc7   :  { %v336_v13 = vpop.f32.mrf.mxu0  ;;  %v384_v15 = vpop.f32.mrf.mxu2 }
  0xc8   :  { %v351_v16 = vpop.f32.mrf.mxu1  ;;  %v337_v17 = vadd.f32 %v336_v13, %v303_v5  ;;  %v382_v39 = vadd.f32 %v381_v11, %v349_v31 }
  0xca   :  { %v370_v21 = vadd.f32 %v369_v62, %v337_v17  ;;  %v403_v49 = vsel %vm393_vm1, %v382_v39, 0.0 }
  0xcc   :  { %v394_v30 = vsel %vm393_vm1, %v370_v21, 0.0 }
  0xcd   :  { %v318_v23 = vpop.f32.mrf.mxu3 }
  0xce   :  { %v352_v37 = vadd.f32 %v351_v16, %v318_v23 }
  0xcf   :  { %v338_v19 = vpop.f32.mrf.mxu0  ;;  %v386_v27 = vpop.f32.mrf.mxu2 }
  0xd0   :  { %v339_v22 = vadd.f32 %v338_v19, %v305_v9  ;;  %v353_v28 = vpop.f32.mrf.mxu1  ;;  %v385_v45 = vadd.f32 %v384_v15, %v352_v37 }
  0xd2   :  { %v372_v26 = vadd.f32 %v371_v63, %v339_v22  ;;  %v405_v52 = vsel %vm393_vm1, %v385_v45, 0.0 }
  0xd4   :  { %v395_v32 = vsel %vm393_vm1, %v372_v26, 0.0 }
  0xd5   :  { %v396_v33 = vadd.f32 %v395_v32, %v394_v30  ;;  %v320_v40 = vpop.f32.mrf.mxu3 }
  0xd6   :  { %v354_v47 = vadd.f32 %v353_v28, %v320_v40 }
  0xd7   :  { %v398_v36 = vadd.f32 %v397_v34, %v396_v33  ;;  %v389_v44 = vpop.f32.mrf.mxu2 }
  0xd8   :  { %v356_v48 = vpop.f32.mrf.mxu1  ;;  %v387_v53 = vadd.f32 %v386_v27, %v354_v47 }
  0xd9   :  { %v400_v42 = vadd.f32 %v399_v38, %v398_v36 }
  0xda   :  { %v407_v59 = vsel %vm393_vm1, %v387_v53, 0.0 }
  0xdb   :  { %v402_v46 = vadd.f32 %v401_v43, %v400_v42 }
  0xdd   :  { %v404_v50 = vadd.f32 %v403_v49, %v402_v46  ;;  %v323_v55 = vpop.f32.mrf.mxu3 }
  0xde   :  { %v357_v56 = vadd.f32 %v356_v48, %v323_v55 }
  0xdf   :  { %v406_v54 = vadd.f32 %v405_v52, %v404_v50  ;;  %v391_v58 = vpop.f32.mrf.mxu2 }
  0xe0   :  { %v390_v60 = vadd.f32 %v389_v44, %v357_v56  ;;  %v358_v61 = vpop.f32.mrf.mxu1 }
  0xe1   :  { %v408_v62 = vadd.f32 %v407_v59, %v406_v54 }
  0xe2   :  { %v409_v63 = vsel %vm393_vm1, %v390_v60, 0.0 }
  0xe3   :  { %v410_v1 = vadd.f32 %v409_v63, %v408_v62  ;;  %v721_v62 = vld [vmem:[#allocation2] ss:$0 sm:$0xff] }
  0xe5   :  { %v411_v2 = vrot.slane %v410_v1, 4  ;;  %v325_v3 = vpop.f32.mrf.mxu3 }
  0xe7   :  { %v412_v5 = vadd.f32 %v411_v2, %v410_v1 }
  0xe9   :  { %v413_v6 = vrot.slane %v412_v5, 2 }
  0xeb   :  { %v414_v8 = vadd.f32 %v413_v6, %v412_v5 }
  0xed   :  { %v415_v9 = vrot.slane %v414_v8, 1 }
  0xef   :  { %v416_v11 = vadd.f32 %v415_v9, %v414_v8 }
  0xf1   :  { %v424_v12 = vmul.f32 %v423_v10, %v416_v11 }
  0xf3   :  { %v425_v13 = vsub.f32 %v370_v21, %v424_v12  ;;  %v426_v14 = vsub.f32 %v372_v26, %v424_v12  ;;  %v427_v15 = vsub.f32 %v375_v24, %v424_v12  ;;  %v428_v16 = vsub.f32 %v377_v29, %v424_v12 }
  0xf4   :  { %v429_v17 = vsub.f32 %v380_v35, %v424_v12  ;;  %v430_v22 = vsub.f32 %v382_v39, %v424_v12  ;;  %v431_v30 = vsub.f32 %v385_v45, %v424_v12  ;;  %v432_v21 = vsub.f32 %v387_v53, %v424_v12 }
  0xf5   :  { %v434_v18 = vmul.f32 %v425_v13, %v425_v13  ;;  %v435_v19 = vmul.f32 %v426_v14, %v426_v14  ;;  %v436_v20 = vmul.f32 %v427_v15, %v427_v15  ;;  %v437_v23 = vmul.f32 %v428_v16, %v428_v16 }
  0xf6   :  { %v438_v31 = vmul.f32 %v429_v17, %v429_v17  ;;  %v439_v26 = vmul.f32 %v430_v22, %v430_v22  ;;  %v433_v34 = vsub.f32 %v390_v60, %v424_v12  ;;  %v440_v35 = vmul.f32 %v431_v30, %v431_v30 }
  0xf7   :  { %v443_v25 = vsel %vm393_vm1, %v434_v18, 0.0  ;;  %v444_v27 = vsel %vm393_vm1, %v435_v19, 0.0  ;;  %v446_v32 = vsel %vm393_vm1, %v436_v20, 0.0  ;;  %v448_v24 = vsel %vm393_vm1, %v437_v23, 0.0 }
  0xf8   :  { %v445_v28 = vadd.f32 %v444_v27, %v443_v25  ;;  %v450_v36 = vsel %vm393_vm1, %v438_v31, 0.0  ;;  %v441_v38 = vmul.f32 %v432_v21, %v432_v21  ;;  %v452_v39 = vsel %vm393_vm1, %v439_v26, 0.0 }
  0xf9   :  { %v442_v41 = vmul.f32 %v433_v34, %v433_v34  ;;  %v454_v42 = vsel %vm393_vm1, %v440_v35, 0.0 }
  0xfa   :  { %v447_v33 = vadd.f32 %v446_v32, %v445_v28  ;;  %v456_v44 = vsel %vm393_vm1, %v441_v38, 0.0 }
  0xfb   :  { %v458_v46 = vsel %vm393_vm1, %v442_v41, 0.0 }
  0xfc   :  { %v449_v29 = vadd.f32 %v448_v24, %v447_v33 }
  0xfe   :  { %v451_v37 = vadd.f32 %v450_v36, %v449_v29 }
 0x100   :  { %v453_v40 = vadd.f32 %v452_v39, %v451_v37 }
 0x102   :  { %v455_v43 = vadd.f32 %v454_v42, %v453_v40 }
 0x104   :  { %v457_v45 = vadd.f32 %v456_v44, %v455_v43 }
 0x106   :  { %v459_v47 = vadd.f32 %v458_v46, %v457_v45 }
 0x108   :  { %v460_v48 = vrot.slane %v459_v47, 4 }
 0x10a   :  { %v461_v49 = vadd.f32 %v460_v48, %v459_v47 }
 0x10c   :  { %v462_v50 = vrot.slane %v461_v49, 2 }
 0x10e   :  { %v463_v51 = vadd.f32 %v462_v50, %v461_v49 }
 0x110   :  { %v464_v52 = vrot.slane %v463_v51, 1 }
 0x112   :  { %v465_v53 = vadd.f32 %v464_v52, %v463_v51 }
 0x114   :  { %v466_v54 = vmul.f32 %v465_v53, %v423_v10 }
 0x116   :  { %v467_v55 = vadd.f32 1e-05, %v466_v54 }
 0x118   :  { %725 = vrsqrt.f32 %v467_v55  ;;  %vm474_vm4 = vweird.f32 %v467_v55 }
 0x11e   :  { %v726_v56 = vpop.eup %725 }
 0x11f   :  { %v469_v57 = vmul.f32 %v726_v56, %v467_v55  ;;  %vm475_vm3 = vweird.f32 %v726_v56 }
 0x120   :  { %vm476_vm5 = vmor %vm474_vm4, %vm475_vm3 }
 0x121   :  { %v470_v58 = vmul.f32 %v726_v56, %v469_v57 }
 0x123   :  { %v471_v59 = vmul.f32 0.5, %v470_v58 }
 0x125   :  { %v472_v60 = vsub.f32 1.5, %v471_v59 }
 0x127   :  { %v473_v61 = vmul.f32 %v726_v56, %v472_v60 }
 0x129   :  { %v477_v63 = vsel %vm476_vm5, %v726_v56, %v473_v61 }
 0x12a   :  { %v478_v0 = vmul.f32 %v477_v63, %v425_v13  ;;  %v479_v1 = vmul.f32 %v477_v63, %v426_v14  ;;  %v480_v2 = vmul.f32 %v477_v63, %v427_v15  ;;  %v481_v3 = vmul.f32 %v477_v63, %v428_v16 }
 0x12b   :  { %v482_v5 = vmul.f32 %v477_v63, %v429_v17  ;;  %v483_v6 = vmul.f32 %v477_v63, %v430_v22  ;;  %v484_v7 = vmul.f32 %v477_v63, %v431_v30  ;;  %v485_v8 = vmul.f32 %v477_v63, %v432_v21 }
 0x12c   :  { %v486_v9 = vmul.f32 %v477_v63, %v433_v34  ;;  %v491_v10 = vmul.f32 %v721_v62, %v478_v0  ;;  %v492_v11 = vmul.f32 %v721_v62, %v479_v1  ;;  %v493_v12 = vmul.f32 %v721_v62, %v480_v2 }
 0x12d   :  { %v494_v18 = vmul.f32 %v721_v62, %v481_v3  ;;  %v495_v19 = vmul.f32 %v721_v62, %v482_v5  ;;  %v496_v20 = vmul.f32 %v721_v62, %v483_v6  ;;  %v497_v23 = vmul.f32 %v721_v62, %v484_v7 }
 0x12e   :  { %v498_v25 = vmul.f32 %v721_v62, %v485_v8  ;;  %v499_v27 = vmul.f32 %v721_v62, %v486_v9  ;;  %v504_v28 = vadd.f32 %v722_v4, %v491_v10  ;;  %v505_v13 = vadd.f32 %v722_v4, %v492_v11 }
 0x12f   :  { %v506_v14 = vadd.f32 %v722_v4, %v493_v12  ;;  %v507_v15 = vadd.f32 %v722_v4, %v494_v18  ;;  %v508_v16 = vadd.f32 %v722_v4, %v495_v19  ;;  %v509_v31 = vadd.f32 %v722_v4, %v496_v20 }
 0x130   :  { %v510_v17 = vadd.f32 %v722_v4, %v497_v23  ;;  %v511_v22 = vadd.f32 %v722_v4, %v498_v25  ;;  %v512_v30 = vadd.f32 %v722_v4, %v499_v27  ;;  %v513_v32 = vmax.f32 %v504_v28, 0.0 }
 0x131   :  { %v514_v33 = vmax.f32 %v505_v13, 0.0  ;;  %v515_v21 = vmax.f32 %v506_v14, 0.0  ;;  %v516_v26 = vmax.f32 %v507_v15, 0.0  ;;  %v517_v24 = vmax.f32 %v508_v16, 0.0 }
 0x132   :  { %v518_v29 = vmax.f32 %v509_v31, 0.0  ;;  %v519_v34 = vmax.f32 %v510_v17, 0.0  ;;  %v522_v35 = vpack.c.bf16 %v513_v32, %v513_v32  ;;  %v520_v38 = vmax.f32 %v511_v22, 0.0 }
 0x133   :  { %v523_v36 = vpack.c.bf16 %v514_v33, %v514_v33  ;;  %v524_v37 = vpack.c.bf16 %v515_v21, %v515_v21  ;;  %v525_v39 = vpack.c.bf16 %v516_v26, %v516_v26  ;;  %v521_v40 = vmax.f32 %v512_v30, 0.0 }
 0x134   :  { %v526_v41 = vpack.c.bf16 %v517_v24, %v517_v24  ;;  %532 = vst.msk [vmem:[%s1008_s4] sm:$0xf] %vm531_vm6, %v522_v35  ;;  %v527_v42 = vpack.c.bf16 %v518_v29, %v518_v29  ;;  %v528_v43 = vpack.c.bf16 %v519_v34, %v519_v34  ;;  %v529_v44 = vpack.c.bf16 %v520_v38, %v520_v38 }
 0x135   :  { %533 = vst.msk [vmem:[%s1008_s4 + $0x4] sm:$0xf] %vm531_vm6, %v523_v36  ;;  %v530_v45 = vpack.c.bf16 %v521_v40, %v521_v40 }
 0x136   :  { %534 = vst.msk [vmem:[%s1008_s4 + $0x8] sm:$0xf] %vm531_vm6, %v524_v37 }
 0x137   :  { %535 = vst.msk [vmem:[%s1008_s4 + $0xc] sm:$0xf] %vm531_vm6, %v525_v39 }
 0x138   :  { %536 = vst.msk [vmem:[%s1008_s4 + $0x10] sm:$0xf] %vm531_vm6, %v526_v41 }
 0x139   :  { %537 = vst.msk [vmem:[%s1008_s4 + $0x14] sm:$0xf] %vm531_vm6, %v527_v42 }
 0x13a   :  { %538 = vst.msk [vmem:[%s1008_s4 + $0x18] sm:$0xf] %vm531_vm6, %v528_v43 }
 0x13b   :  { %539 = vst.msk [vmem:[%s1008_s4 + $0x1c] sm:$0xf] %vm531_vm6, %v529_v44 }
 0x13c   :  { %540 = vst.msk [vmem:[%s1008_s4 + $0x20] sm:$0xf] %vm531_vm6, %v530_v45 }
 0x13d   :  { %545 = vsyncpa [#allocation3], 1 }
 0x13e   :  { %546 = vsyncpa [#allocation5], 1 }

// kernel: encoder_forward.7
= control target key start
LH: loop header
LB: loop body
LE: loop exit
PB: predicated region body
PF: predicated region fallthrough
CT: control target
= control target key end

     0   :  { %9 = vsyncpa [#allocation3], 0  ;;  %s1038_s0 = inlined_call_operand.vmem [shape: bf16[32,576], index: 0, kind: input, shape index: {}]   ;;  %s1039_s1 = inlined_call_operand.hbm [shape: bf16[576,128], index: 1, kind: input, shape index: {}]   ;;  %s1040_s2 = inlined_call_operand.hbm [shape: f32[1,128], index: 2, kind: input, shape index: {}]   ;;  %s1041_s3 = inlined_call_operand.hbm [shape: f32[1,128], index: 3, kind: input, shape index: {}]   ;;  %s1042_s4 = inlined_call_operand.vmem [shape: bf16[32,128], index: 4, kind: output, shape index: {}]  }
   0x1   :  { %10 = vsyncpa [#allocation5], 0  ;;  %s31_s17 = sshll.u32 %s1040_s2, 4  ;;  %s932_s18 = smov [#allocation4]   ;;  %s32_s17 = int_to_ptr.hbm [resolvable:$true] %s31_s17 }
   0x2   :  { %s33_s19 = sshll.u32 %s932_s18, 4  ;;  %s17_s22 = sshll.u32 %s1039_s1, 4  ;;  %s34_s19 = int_to_ptr.vmem [resolvable:$true] %s33_s19  ;;  %s18_s22 = int_to_ptr.hbm [resolvable:$true] %s17_s22 }
   0x3   :  { %36 = dma.hbm_to_vmem [thread:$0]  %s32_s17, 16, %s34_s19, [#allocation5]  }
   0x4   :  { %s933_s23 = smov [#allocation2]   ;;  %s934_s25 = smov 64  }
   0x5   :  { %s19_s24 = sshll.u32 %s933_s23, 4  ;;  %s935_s26 = smov 4   ;;  %s20_s24 = int_to_ptr.vmem [resolvable:$true] %s19_s24 }
   0x6   :  { %25 = dma.hbm_to_vmem [thread:$0]  %s18_s22, 4608, %s20_s24, [#allocation3], %s934_s25, %s934_s25, %s935_s26  }
   0x7   :  { %s42_s2 = sshll.u32 %s1041_s3, 4  ;;  %s936_s29 = smov [#allocation6]   ;;  %s43_s2 = int_to_ptr.hbm [resolvable:$true] %s42_s2 }
   0x8   :  { %s44_s30 = sshll.u32 %s936_s29, 4  ;;  %s45_s30 = int_to_ptr.vmem [resolvable:$true] %s44_s30 }
   0x9   :  { %47 = dma.hbm_to_vmem [thread:$0]  %s43_s2, 16, %s45_s30, [#allocation5]  }
   0xa   :  { %928 = dma.done.wait [#allocation3], 4608  }
   0xb   :  { %929 = vsyncadd [#allocation3], 4294962688 }
   0xc   :  { %930 = dma.done.wait [#allocation5], 32  }
   0xd   :  { %931 = vsyncadd [#allocation5], 4294967264  ;;  %v800_v0 = vld [vmem:[#allocation2 + $0x38] sm:$0xff]  ;;  %v799_v4 = vld [vmem:[#allocation2 + $0x30] sm:$0xff]  ;;  %vm411_vm0 = vcmask 523264  }
   0xe   :  { %v808_v1 = vld [vmem:[#allocation2 + $0x78] sm:$0xff]  ;;  %418 = vmatpush.bf16.msra.mxu0 %v800_v0  ;;  %v807_v5 = vld [vmem:[#allocation2 + $0x70] sm:$0xff]  ;;  %v798_v8 = vld [vmem:[#allocation2 + $0x28] sm:$0xff] }
   0xf   :  { %v816_v2 = vld [vmem:[#allocation2 + $0xb8] sm:$0xff]  ;;  %437 = vmatpush.bf16.msra.mxu1 %v808_v1  ;;  %v815_v6 = vld [vmem:[#allocation2 + $0xb0] sm:$0xff]  ;;  %v806_v9 = vld [vmem:[#allocation2 + $0x68] sm:$0xff] }
  0x10   :  { %v824_v3 = vld [vmem:[#allocation2 + $0xf8] sm:$0xff]  ;;  %456 = vmatpush.bf16.msra.mxu2 %v816_v2  ;;  %v823_v7 = vld [vmem:[#allocation2 + $0xf0] sm:$0xff]  ;;  %v814_v10 = vld [vmem:[#allocation2 + $0xa8] sm:$0xff] }
  0x11   :  { %475 = vmatpush.bf16.msra.mxu3 %v824_v3  ;;  %v822_v11 = vld [vmem:[#allocation2 + $0xe8] sm:$0xff]  ;;  %v797_v12 = vld [vmem:[#allocation2 + $0x20] sm:$0xff]  ;;  %v796_v16 = vld [vmem:[#allocation2 + $0x18] sm:$0xff] }
  0x12   :  { %419 = vmatpush.bf16.msra.mxu0 %v799_v4  ;;  %v805_v13 = vld [vmem:[#allocation2 + $0x60] sm:$0xff]  ;;  %v804_v17 = vld [vmem:[#allocation2 + $0x58] sm:$0xff]  ;;  %v795_v20 = vld [vmem:[#allocation2 + $0x10] sm:$0xff] }
  0x13   :  { %438 = vmatpush.bf16.msra.mxu1 %v807_v5  ;;  %v813_v14 = vld [vmem:[#allocation2 + $0xa0] sm:$0xff]  ;;  %v812_v18 = vld [vmem:[#allocation2 + $0x98] sm:$0xff]  ;;  %v803_v21 = vld [vmem:[#allocation2 + $0x50] sm:$0xff] }
  0x14   :  { %457 = vmatpush.bf16.msra.mxu2 %v815_v6  ;;  %v821_v15 = vld [vmem:[#allocation2 + $0xe0] sm:$0xff]  ;;  %v820_v19 = vld [vmem:[#allocation2 + $0xd8] sm:$0xff]  ;;  %v811_v22 = vld [vmem:[#allocation2 + $0x90] sm:$0xff] }
  0x15   :  { %476 = vmatpush.bf16.msra.mxu3 %v823_v7  ;;  %v819_v23 = vld [vmem:[#allocation2 + $0xd0] sm:$0xff]  ;;  %v794_v24 = vld [vmem:[#allocation2 + $0x8] sm:$0xff]  ;;  %v793_v28 = vld [vmem:[#allocation2] sm:$0xff] }
  0x16   :  { %420 = vmatpush.bf16.msra.mxu0 %v798_v8  ;;  %v802_v25 = vld [vmem:[#allocation2 + $0x48] sm:$0xff]  ;;  %v801_v29 = vld [vmem:[#allocation2 + $0x40] sm:$0xff]  ;;  %v785_v33 = vld [vmem:[%s1038_s0 + $0x10] sm:$0xf0] }
  0x17   :  { %439 = vmatpush.bf16.msra.mxu1 %v806_v9  ;;  %v810_v26 = vld [vmem:[#allocation2 + $0x88] sm:$0xff]  ;;  %v809_v30 = vld [vmem:[#allocation2 + $0x80] sm:$0xff]  ;;  %v601_v35 = vld [vmem:[%s1038_s0 + $0x14] sm:$0xf0] }
  0x18   :  { %458 = vmatpush.bf16.msra.mxu2 %v814_v10  ;;  %v818_v27 = vld [vmem:[#allocation2 + $0xc8] sm:$0xff]  ;;  %v817_v31 = vld [vmem:[#allocation2 + $0xc0] sm:$0xff]  ;;  %v786_v37 = vld [vmem:[%s1038_s0 + $0x18] sm:$0xf0] }
  0x19   :  { %477 = vmatpush.bf16.msra.mxu3 %v822_v11  ;;  %v599_v32 = vld [vmem:[%s1038_s0] sm:$0xf]  ;;  %v783_v34 = vld [vmem:[%s1038_s0 + $0x4] sm:$0xf]  ;;  %v607_v36 = vld [vmem:[%s1038_s0 + $0x8] sm:$0xf] }
  0x1a   :  { %421 = vmatpush.bf16.msra.mxu0 %v797_v12  ;;  %v784_v38 = vld [vmem:[%s1038_s0 + $0xc] sm:$0xf]  ;;  %v609_v39 = vld [vmem:[%s1038_s0 + $0x1c] sm:$0xf0]  ;;  %v828_v40 = vld [vmem:[#allocation2 + $0x118] sm:$0xff]  ;;  %v600_v41 = vor.u32 %v785_v33, %v599_v32  ;;  %v604_v42 = vor.u32 %v783_v34, %v601_v35  ;;  %v608_v43 = vor.u32 %v786_v37, %v607_v36 }
  0x1b   :  { %440 = vmatpush.bf16.msra.mxu1 %v805_v13  ;;  %v612_v44 = vor.u32 %v784_v38, %v609_v39  ;;  %v827_v45 = vld [vmem:[#allocation2 + $0x110] sm:$0xff]  ;;  %v826_v46 = vld [vmem:[#allocation2 + $0x108] sm:$0xff]  ;;  %v825_v47 = vld [vmem:[#allocation2 + $0x100] sm:$0xff] }
  0x1c   :  { %459 = vmatpush.bf16.msra.mxu2 %v813_v14  ;;  %v619_v48 = vld [vmem:[%s1038_s0 + $0x28] sm:$0xf]  ;;  %v790_v49 = vld [vmem:[%s1038_s0 + $0x38] sm:$0xf0]  ;;  %v788_v50 = vld [vmem:[%s1038_s0 + $0x2c] sm:$0xf] }
  0x1d   :  { %478 = vmatpush.bf16.msra.mxu3 %v821_v15  ;;  %v621_v51 = vld [vmem:[%s1038_s0 + $0x3c] sm:$0xf0]  ;;  %v627_v52 = vld [vmem:[%s1038_s0 + $0x30] sm:$0xf]  ;;  %v791_v53 = vld [vmem:[%s1038_s0 + $0x40] sm:$0xf0]  ;;  %v620_v56 = vor.u32 %v790_v49, %v619_v48 }
  0x1e   :  { %422 = vmatpush.bf16.msra.mxu0 %v796_v16  ;;  %v789_v54 = vld [vmem:[%s1038_s0 + $0x34] sm:$0xf]  ;;  %v629_v55 = vld [vmem:[%s1038_s0 + $0x44] sm:$0xf0]  ;;  %v624_v57 = vor.u32 %v788_v50, %v621_v51  ;;  %v628_v58 = vor.u32 %v791_v53, %v627_v52  ;;  %v615_v60 = vld [vmem:[%s1038_s0 + $0x10] sm:$0xf] }
  0x1f   :  { %441 = vmatpush.bf16.msra.mxu1 %v804_v17  ;;  %v632_v59 = vor.u32 %v789_v54, %v629_v55  ;;  %v787_v61 = vld [vmem:[%s1038_s0 + $0x20] sm:$0xf0]  ;;  %v635_v62 = vld [vmem:[%s1038_s0 + $0x38] sm:$0xf]  ;;  %v792_v63 = vld [vmem:[%s1038_s0 + $0x48] sm:$0xf0] }
  0x20   :  { %460 = vmatpush.bf16.msra.mxu2 %v812_v18  ;;  %v616_v0 = vor.u32 %v787_v61, %v615_v60  ;;  %v636_v1 = vor.u32 %v792_v63, %v635_v62 }
  0x21   :  { %479 = vmatpush.bf16.msra.mxu3 %v820_v19 }
  0x22   :  { %423 = vmatpush.bf16.msra.mxu0 %v795_v20  ;;  %v937_v20 = vmov 32.0  }
  0x23   :  { %442 = vmatpush.bf16.msra.mxu1 %v803_v21  ;;  %852 = vrcp.f32 %v937_v20 }
  0x24   :  { %461 = vmatpush.bf16.msra.mxu2 %v811_v22 }
  0x25   :  { %480 = vmatpush.bf16.msra.mxu3 %v819_v23 }
  0x26   :  { %424 = vmatpush.bf16.msra.mxu0 %v794_v24 }
  0x27   :  { %443 = vmatpush.bf16.msra.mxu1 %v802_v25 }
  0x28   :  { %462 = vmatpush.bf16.msra.mxu2 %v810_v26 }
  0x29   :  { %481 = vmatpush.bf16.msra.mxu3 %v818_v27  ;;  %v853_v27 = vpop.eup %852 }
  0x2a   :  { %425 = vmatpush.bf16.msra.mxu0 %v793_v28  ;;  %v523_v37 = vmul.f32 32.0, %v853_v27  ;;  %vm527_vm1 = vweird.f32 %v853_v27 }
  0x2b   :  { %444 = vmatpush.bf16.msra.mxu1 %v801_v29 }
  0x2c   :  { %463 = vmatpush.bf16.msra.mxu2 %v809_v30 }
  0x2d   :  { %482 = vmatpush.bf16.msra.mxu3 %v817_v31  ;;  %426 = vmatmul.bf16.vlgmr.msra.gmra.mxu0 %v600_v41 }
  0x2e   :  { %498 = vmatpush.bf16.msrb.mxu0 %v828_v40  ;;  %445 = vmatmul.bf16.vlgmr.msra.gmra.mxu1 %v604_v42 }
  0x2f   :  { %840 = vmatpush.bf16.msrb.mxu1 %v828_v40  ;;  %464 = vmatmul.bf16.vlgmr.msra.gmra.mxu2 %v608_v43  ;;  %v524_v43 = vsub.f32 1.0, %v523_v37 }
  0x30   :  { %483 = vmatmul.bf16.vlgmr.msra.gmra.mxu3 %v612_v44 }
  0x32   :  { %499 = vmatpush.bf16.msrb.mxu0 %v827_v45 }
  0x33   :  { %841 = vmatpush.bf16.msrb.mxu1 %v827_v45 }
  0x36   :  { %500 = vmatpush.bf16.msrb.mxu0 %v826_v46 }
  0x37   :  { %842 = vmatpush.bf16.msrb.mxu1 %v826_v46  ;;  %v525_v46 = vmul.f32 %v853_v27, %v524_v43 }
  0x39   :  { %v526_v49 = vadd.f32 %v853_v27, %v525_v46 }
  0x3a   :  { %501 = vmatpush.bf16.msrb.mxu0 %v825_v47 }
  0x3b   :  { %843 = vmatpush.bf16.msrb.mxu1 %v825_v47  ;;  %v528_v52 = vsel %vm527_vm1, %v853_v27, %v526_v49 }
  0x3d   :  { %431 = vmatmul.bf16.gmra.mxu0 %v620_v56 }
  0x3e   :  { %450 = vmatmul.bf16.gmra.mxu1 %v624_v57 }
  0x3f   :  { %469 = vmatmul.bf16.gmra.mxu2 %v628_v58 }
  0x40   :  { %488 = vmatmul.bf16.gmra.mxu3 %v632_v59 }
  0x4d   :  { %781 = vmatmul.msk.bf16.vlgmr.msrb.gmra.mxu0 %vm411_vm0, %v616_v0 }
  0x4e   :  { %782 = vmatmul.msk.bf16.vlgmr.msrb.gmra.mxu1 %vm411_vm0, %v636_v1 }
  0xaa   :  { %v427_v2 = vpop.f32.mrf.mxu0 }
  0xab   :  { %v446_v3 = vpop.f32.mrf.mxu1 }
  0xac   :  { %v447_v18 = vadd.f32 %v446_v3, %v427_v2 }
  0xb2   :  { %v465_v4 = vpop.f32.mrf.mxu2  ;;  %v429_v5 = vpop.f32.mrf.mxu0 }
  0xb3   :  { %v448_v6 = vpop.f32.mrf.mxu1  ;;  %v484_v7 = vpop.f32.mrf.mxu3  ;;  %v466_v21 = vadd.f32 %v465_v4, %v447_v18 }
  0xb4   :  { %v449_v19 = vadd.f32 %v448_v6, %v429_v5 }
  0xb5   :  { %v485_v28 = vadd.f32 %v484_v7, %v466_v21 }
  0xba   :  { %v467_v8 = vpop.f32.mrf.mxu2  ;;  %v432_v9 = vpop.f32.mrf.mxu0 }
  0xbb   :  { %v451_v10 = vpop.f32.mrf.mxu1  ;;  %v486_v11 = vpop.f32.mrf.mxu3  ;;  %v468_v22 = vadd.f32 %v467_v8, %v449_v19 }
  0xbc   :  { %v452_v23 = vadd.f32 %v451_v10, %v432_v9 }
  0xbd   :  { %v487_v29 = vadd.f32 %v486_v11, %v468_v22  ;;  %v851_v22 = vld [vmem:[#allocation6] ss:$0 sm:$0xff] }
  0xc2   :  { %v434_v12 = vpop.f32.mrf.mxu0  ;;  %v470_v14 = vpop.f32.mrf.mxu2 }
  0xc3   :  { %v453_v13 = vpop.f32.mrf.mxu1  ;;  %v489_v15 = vpop.f32.mrf.mxu3  ;;  %v471_v25 = vadd.f32 %v470_v14, %v452_v23 }
  0xc4   :  { %v454_v26 = vadd.f32 %v453_v13, %v434_v12 }
  0xc5   :  { %v490_v33 = vadd.f32 %v489_v15, %v471_v25 }
  0xca   :  { %v503_v16 = vpop.f32.mrf.mxu0  ;;  %v472_v24 = vpop.f32.mrf.mxu2 }
  0xcb   :  { %v508_v17 = vpop.f32.mrf.mxu1  ;;  %v473_v30 = vadd.f32 %v472_v24, %v454_v26  ;;  %v491_v31 = vpop.f32.mrf.mxu3  ;;  %v504_v34 = vadd.f32 %v503_v16, %v485_v28  ;;  %v850_v16 = vld [vmem:[#allocation4] ss:$0 sm:$0xff] }
  0xcc   :  { %v509_v39 = vadd.f32 %v508_v17, %v490_v33 }
  0xcd   :  { %v492_v38 = vadd.f32 %v491_v31, %v473_v30 }
  0xd2   :  { %v505_v32 = vpop.f32.mrf.mxu0 }
  0xd3   :  { %v506_v35 = vadd.f32 %v505_v32, %v487_v29  ;;  %v510_v36 = vpop.f32.mrf.mxu1 }
  0xd4   :  { %v511_v41 = vadd.f32 %v510_v36, %v492_v38 }
  0xd5   :  { %v513_v40 = vadd.f32 %v506_v35, %v504_v34 }
  0xd7   :  { %v514_v42 = vadd.f32 %v513_v40, %v509_v39 }
  0xd9   :  { %v515_v44 = vadd.f32 %v514_v42, %v511_v41 }
  0xdb   :  { %v516_v45 = vrot.slane %v515_v44, 4 }
  0xdd   :  { %v517_v47 = vadd.f32 %v516_v45, %v515_v44 }
  0xdf   :  { %v518_v48 = vrot.slane %v517_v47, 2 }
  0xe1   :  { %v519_v50 = vadd.f32 %v518_v48, %v517_v47 }
  0xe3   :  { %v520_v51 = vrot.slane %v519_v50, 1 }
  0xe5   :  { %v521_v53 = vadd.f32 %v520_v51, %v519_v50 }
  0xe7   :  { %v529_v54 = vmul.f32 %v528_v52, %v521_v53 }
  0xe9   :  { %v530_v55 = vsub.f32 %v504_v34, %v529_v54  ;;  %v531_v56 = vsub.f32 %v506_v35, %v529_v54  ;;  %v532_v57 = vsub.f32 %v509_v39, %v529_v54  ;;  %v533_v58 = vsub.f32 %v511_v41, %v529_v54 }
  0xeb   :  { %v534_v59 = vmul.f32 %v530_v55, %v530_v55  ;;  %v535_v60 = vmul.f32 %v531_v56, %v531_v56  ;;  %v536_v61 = vmul.f32 %v532_v57, %v532_v57  ;;  %v537_v63 = vmul.f32 %v533_v58, %v533_v58 }
  0xed   :  { %v538_v62 = vadd.f32 %v535_v60, %v534_v59 }
  0xef   :  { %v539_v0 = vadd.f32 %v538_v62, %v536_v61 }
  0xf1   :  { %v540_v1 = vadd.f32 %v539_v0, %v537_v63 }
  0xf3   :  { %v541_v2 = vrot.slane %v540_v1, 4 }
  0xf5   :  { %v542_v3 = vadd.f32 %v541_v2, %v540_v1 }
  0xf7   :  { %v543_v4 = vrot.slane %v542_v3, 2 }
  0xf9   :  { %v544_v5 = vadd.f32 %v543_v4, %v542_v3 }
  0xfb   :  { %v545_v6 = vrot.slane %v544_v5, 1 }
  0xfd   :  { %v546_v7 = vadd.f32 %v545_v6, %v544_v5 }
  0xff   :  { %v547_v8 = vmul.f32 %v546_v7, %v528_v52 }
 0x101   :  { %v548_v9 = vadd.f32 1e-05, %v547_v8 }
 0x103   :  { %854 = vrsqrt.f32 %v548_v9  ;;  %vm555_vm3 = vweird.f32 %v548_v9 }
 0x109   :  { %v855_v10 = vpop.eup %854 }
 0x10a   :  { %v550_v11 = vmul.f32 %v855_v10, %v548_v9  ;;  %vm556_vm2 = vweird.f32 %v855_v10 }
 0x10b   :  { %vm557_vm4 = vmor %vm555_vm3, %vm556_vm2 }
 0x10c   :  { %v551_v12 = vmul.f32 %v855_v10, %v550_v11 }
 0x10e   :  { %v552_v13 = vmul.f32 0.5, %v551_v12 }
 0x110   :  { %v553_v14 = vsub.f32 1.5, %v552_v13 }
 0x112   :  { %v554_v15 = vmul.f32 %v855_v10, %v553_v14 }
 0x114   :  { %v558_v17 = vsel %vm557_vm4, %v855_v10, %v554_v15 }
 0x115   :  { %v559_v18 = vmul.f32 %v558_v17, %v530_v55  ;;  %v560_v19 = vmul.f32 %v558_v17, %v531_v56  ;;  %v561_v20 = vmul.f32 %v558_v17, %v532_v57  ;;  %v562_v21 = vmul.f32 %v558_v17, %v533_v58 }
 0x117   :  { %v567_v23 = vmul.f32 %v850_v16, %v559_v18  ;;  %v568_v24 = vmul.f32 %v850_v16, %v560_v19  ;;  %v569_v25 = vmul.f32 %v850_v16, %v561_v20  ;;  %v570_v26 = vmul.f32 %v850_v16, %v562_v21 }
 0x119   :  { %v575_v27 = vadd.f32 %v851_v22, %v567_v23  ;;  %v576_v28 = vadd.f32 %v851_v22, %v568_v24  ;;  %v577_v29 = vadd.f32 %v851_v22, %v569_v25  ;;  %v578_v30 = vadd.f32 %v851_v22, %v570_v26 }
 0x11b   :  { %v579_v31 = vmax.f32 %v575_v27, 0.0  ;;  %v580_v32 = vmax.f32 %v576_v28, 0.0  ;;  %v581_v33 = vmax.f32 %v577_v29, 0.0  ;;  %v582_v34 = vmax.f32 %v578_v30, 0.0 }
 0x11d   :  { %v832_v35 = vpack.c.bf16 %v580_v32, %v579_v31  ;;  %v837_v36 = vpack.c.bf16 %v582_v34, %v581_v33 }
 0x11f   :  { %833 = vst [vmem:[%s1042_s4] sm:$0xff] %v832_v35  }
 0x120   :  { %839 = vst [vmem:[%s1042_s4 + $0x8] sm:$0xff] %v837_v36  }
 0x121   :  { %595 = vsyncpa [#allocation3], 1 }
 0x122   :  { %596 = vsyncpa [#allocation5], 1 }

// kernel: encoder_forward.8
= control target key start
LH: loop header
LB: loop body
LE: loop exit
PB: predicated region body
PF: predicated region fallthrough
CT: control target
= control target key end

     0   :  { %8 = vsyncpa [#allocation3], 0  ;;  %s2376_s0 = inlined_call_operand.vmem [shape: bf16[18,1152], index: 0, kind: input, shape index: {}]   ;;  %s2377_s1 = inlined_call_operand.hbm [shape: bf16[1152,256], index: 1, kind: input, shape index: {}]   ;;  %s2378_s2 = inlined_call_operand.hbm [shape: f32[1,256], index: 2, kind: input, shape index: {}]   ;;  %s2379_s3 = inlined_call_operand.vmem [shape: bf16[18,256], index: 3, kind: output, shape index: {}]  }
   0x1   :  { %s16_s14 = sshll.u32 %s2377_s1, 4  ;;  %s17_s14 = int_to_ptr.hbm [resolvable:$true] %s16_s14 }
   0x2   :  { %9 = vsyncpa [#allocation5], 0  ;;  %s2186_s15 = smov [#allocation2]   ;;  %s30_s19 = sshll.u32 %s2378_s2, 4  ;;  %s31_s19 = int_to_ptr.hbm [resolvable:$true] %s30_s19 }
   0x3   :  { %s18_s16 = sshll.u32 %s2186_s15, 4  ;;  %s2187_s20 = smov 128   ;;  %s19_s16 = int_to_ptr.vmem [resolvable:$true] %s18_s16 }
   0x4   :  { %s2188_s21 = smov 8   ;;  %s2189_s22 = smov [#allocation4]  }
   0x5   :  { %24 = dma.hbm_to_vmem [thread:$0]  %s17_s14, 18432, %s19_s16, [#allocation3], %s2187_s20, %s2187_s20, %s2188_s21  }
   0x6   :  { %s32_s23 = sshll.u32 %s2189_s22, 4  ;;  %s33_s23 = int_to_ptr.vmem [resolvable:$true] %s32_s23 }
   0x7   :  { %35 = dma.hbm_to_vmem [thread:$0]  %s31_s19, 32, %s33_s23, [#allocation5]  }
   0x8   :  { %2182 = dma.done.wait [#allocation3], 18432  }
   0x9   :  { %2183 = vsyncadd [#allocation3], 4294948864 }
   0xa   :  { %2184 = dma.done.wait [#allocation5], 32  }
   0xb   :  { %2185 = vsyncadd [#allocation5], 4294967264  ;;  %v1443_v0 = vld [vmem:[#allocation2 + $0x70] sm:$0xf]  ;;  %v1985_v1 = vld [vmem:[#allocation2 + $0x74] sm:$0xf0] }
   0xc   :  { %v1507_v2 = vld [vmem:[#allocation2 + $0xf0] sm:$0xf]  ;;  %v1444_v3 = vor.u32 %v1985_v1, %v1443_v0  ;;  %v2001_v4 = vld [vmem:[#allocation2 + $0xf4] sm:$0xf0]  ;;  %v1435_v11 = vld [vmem:[#allocation2 + $0x60] sm:$0xf] }
   0xd   :  { %v1571_v5 = vld [vmem:[#allocation2 + $0x170] sm:$0xf]  ;;  %v2017_v6 = vld [vmem:[#allocation2 + $0x174] sm:$0xf0]  ;;  %v1508_v7 = vor.u32 %v2001_v4, %v1507_v2  ;;  %v1983_v13 = vld [vmem:[#allocation2 + $0x64] sm:$0xf0] }
   0xe   :  { %v1572_v8 = vor.u32 %v2017_v6, %v1571_v5  ;;  %v1635_v9 = vld [vmem:[#allocation2 + $0x1f0] sm:$0xf]  ;;  %v2033_v10 = vld [vmem:[#allocation2 + $0x1f4] sm:$0xf0]  ;;  %1007 = vmatpush.bf16.msra.mxu0 %v1444_v3  ;;  %v1499_v14 = vld [vmem:[#allocation2 + $0xe0] sm:$0xf]  ;;  %v1436_v16 = vor.u32 %v1983_v13, %v1435_v11 }
   0xf   :  { %v1636_v12 = vor.u32 %v2033_v10, %v1635_v9  ;;  %v1999_v15 = vld [vmem:[#allocation2 + $0xe4] sm:$0xf0]  ;;  %1025 = vmatpush.bf16.msra.mxu1 %v1508_v7  ;;  %v1563_v18 = vld [vmem:[#allocation2 + $0x160] sm:$0xf]  ;;  %v1427_v23 = vld [vmem:[#allocation2 + $0x50] sm:$0xf] }
  0x10   :  { %1043 = vmatpush.bf16.msra.mxu2 %v1572_v8  ;;  %v1500_v17 = vor.u32 %v1999_v15, %v1499_v14  ;;  %v2015_v19 = vld [vmem:[#allocation2 + $0x164] sm:$0xf0]  ;;  %v1627_v20 = vld [vmem:[#allocation2 + $0x1e0] sm:$0xf]  ;;  %v1981_v24 = vld [vmem:[#allocation2 + $0x54] sm:$0xf0] }
  0x11   :  { %1061 = vmatpush.bf16.msra.mxu3 %v1636_v12  ;;  %v1564_v21 = vor.u32 %v2015_v19, %v1563_v18  ;;  %v2031_v22 = vld [vmem:[#allocation2 + $0x1e4] sm:$0xf0]  ;;  %v1491_v26 = vld [vmem:[#allocation2 + $0xd0] sm:$0xf]  ;;  %v1997_v27 = vld [vmem:[#allocation2 + $0xd4] sm:$0xf0]  ;;  %v1428_v29 = vor.u32 %v1981_v24, %v1427_v23 }
  0x12   :  { %v1628_v25 = vor.u32 %v2031_v22, %v1627_v20  ;;  %v1555_v28 = vld [vmem:[#allocation2 + $0x150] sm:$0xf]  ;;  %1008 = vmatpush.bf16.msra.mxu0 %v1436_v16  ;;  %v2013_v30 = vld [vmem:[#allocation2 + $0x154] sm:$0xf0]  ;;  %v1492_v33 = vor.u32 %v1997_v27, %v1491_v26  ;;  %v1419_v35 = vld [vmem:[#allocation2 + $0x40] sm:$0xf] }
  0x13   :  { %v1619_v31 = vld [vmem:[#allocation2 + $0x1d0] sm:$0xf]  ;;  %v2029_v32 = vld [vmem:[#allocation2 + $0x1d4] sm:$0xf0]  ;;  %1026 = vmatpush.bf16.msra.mxu1 %v1500_v17  ;;  %v1556_v34 = vor.u32 %v2013_v30, %v1555_v28  ;;  %v1979_v36 = vld [vmem:[#allocation2 + $0x44] sm:$0xf0] }
  0x14   :  { %1044 = vmatpush.bf16.msra.mxu2 %v1564_v21  ;;  %v1483_v37 = vld [vmem:[#allocation2 + $0xc0] sm:$0xf]  ;;  %v1620_v38 = vor.u32 %v2029_v32, %v1619_v31  ;;  %v1995_v39 = vld [vmem:[#allocation2 + $0xc4] sm:$0xf0]  ;;  %v1420_v44 = vor.u32 %v1979_v36, %v1419_v35  ;;  %v1411_v47 = vld [vmem:[#allocation2 + $0x30] sm:$0xf] }
  0x15   :  { %1062 = vmatpush.bf16.msra.mxu3 %v1628_v25  ;;  %v1547_v40 = vld [vmem:[#allocation2 + $0x140] sm:$0xf]  ;;  %v2011_v41 = vld [vmem:[#allocation2 + $0x144] sm:$0xf0]  ;;  %v1484_v45 = vor.u32 %v1995_v39, %v1483_v37  ;;  %v1977_v48 = vld [vmem:[#allocation2 + $0x34] sm:$0xf0] }
  0x16   :  { %v1611_v42 = vld [vmem:[#allocation2 + $0x1c0] sm:$0xf]  ;;  %v2027_v43 = vld [vmem:[#allocation2 + $0x1c4] sm:$0xf0]  ;;  %1009 = vmatpush.bf16.msra.mxu0 %v1428_v29  ;;  %v1548_v46 = vor.u32 %v2011_v41, %v1547_v40  ;;  %v1475_v49 = vld [vmem:[#allocation2 + $0xb0] sm:$0xf]  ;;  %v1412_v56 = vor.u32 %v1977_v48, %v1411_v47 }
  0x17   :  { %1027 = vmatpush.bf16.msra.mxu1 %v1492_v33  ;;  %v1612_v50 = vor.u32 %v2027_v43, %v1611_v42  ;;  %v1993_v51 = vld [vmem:[#allocation2 + $0xb4] sm:$0xf0]  ;;  %v1539_v52 = vld [vmem:[#allocation2 + $0x130] sm:$0xf]  ;;  %v1403_v59 = vld [vmem:[#allocation2 + $0x20] sm:$0xf] }
  0x18   :  { %1045 = vmatpush.bf16.msra.mxu2 %v1556_v34  ;;  %v2009_v53 = vld [vmem:[#allocation2 + $0x134] sm:$0xf0]  ;;  %v1603_v54 = vld [vmem:[#allocation2 + $0x1b0] sm:$0xf]  ;;  %v1476_v57 = vor.u32 %v1993_v51, %v1475_v49  ;;  %v1975_v60 = vld [vmem:[#allocation2 + $0x24] sm:$0xf0] }
  0x19   :  { %1063 = vmatpush.bf16.msra.mxu3 %v1620_v38  ;;  %v2025_v55 = vld [vmem:[#allocation2 + $0x1b4] sm:$0xf0]  ;;  %v1540_v58 = vor.u32 %v2009_v53, %v1539_v52  ;;  %v1467_v61 = vld [vmem:[#allocation2 + $0xa0] sm:$0xf]  ;;  %v1991_v63 = vld [vmem:[#allocation2 + $0xa4] sm:$0xf0]  ;;  %v1404_v4 = vor.u32 %v1975_v60, %v1403_v59 }
  0x1a   :  { %1010 = vmatpush.bf16.msra.mxu0 %v1420_v44  ;;  %v1604_v62 = vor.u32 %v2025_v55, %v1603_v54  ;;  %v1531_v0 = vld [vmem:[#allocation2 + $0x120] sm:$0xf]  ;;  %v2007_v1 = vld [vmem:[#allocation2 + $0x124] sm:$0xf0]  ;;  %v1468_v5 = vor.u32 %v1991_v63, %v1467_v61  ;;  %v1395_v7 = vld [vmem:[#allocation2 + $0x10] sm:$0xf] }
  0x1b   :  { %1028 = vmatpush.bf16.msra.mxu1 %v1484_v45  ;;  %v1595_v2 = vld [vmem:[#allocation2 + $0x1a0] sm:$0xf]  ;;  %v2023_v3 = vld [vmem:[#allocation2 + $0x1a4] sm:$0xf0]  ;;  %v1532_v6 = vor.u32 %v2007_v1, %v1531_v0  ;;  %v1973_v8 = vld [vmem:[#allocation2 + $0x14] sm:$0xf0] }
  0x1c   :  { %1046 = vmatpush.bf16.msra.mxu2 %v1548_v46  ;;  %v1459_v9 = vld [vmem:[#allocation2 + $0x90] sm:$0xf]  ;;  %v1596_v10 = vor.u32 %v2023_v3, %v1595_v2  ;;  %v1989_v11 = vld [vmem:[#allocation2 + $0x94] sm:$0xf0]  ;;  %v1387_v16 = vld [vmem:[#allocation2] sm:$0xf]  ;;  %v1396_v17 = vor.u32 %v1973_v8, %v1395_v7 }
  0x1d   :  { %1064 = vmatpush.bf16.msra.mxu3 %v1612_v50  ;;  %v1523_v12 = vld [vmem:[#allocation2 + $0x110] sm:$0xf]  ;;  %v2005_v13 = vld [vmem:[#allocation2 + $0x114] sm:$0xf0]  ;;  %v1971_v18 = vld [vmem:[#allocation2 + $0x4] sm:$0xf0]  ;;  %v1460_v21 = vor.u32 %v1989_v11, %v1459_v9 }
  0x1e   :  { %1011 = vmatpush.bf16.msra.mxu0 %v1412_v56  ;;  %v1587_v14 = vld [vmem:[#allocation2 + $0x190] sm:$0xf]  ;;  %v2021_v15 = vld [vmem:[#allocation2 + $0x194] sm:$0xf0]  ;;  %v1451_v19 = vld [vmem:[#allocation2 + $0x80] sm:$0xf]  ;;  %v1524_v22 = vor.u32 %v2005_v13, %v1523_v12  ;;  %v1388_v34 = vor.u32 %v1971_v18, %v1387_v16 }
  0x1f   :  { %1029 = vmatpush.bf16.msra.mxu1 %v1476_v57  ;;  %v1987_v20 = vld [vmem:[#allocation2 + $0x84] sm:$0xf0]  ;;  %v1515_v23 = vld [vmem:[#allocation2 + $0x100] sm:$0xf]  ;;  %v1588_v26 = vor.u32 %v2021_v15, %v1587_v14  ;;  %v1965_v29 = vld [vmem:[%s2376_s0 + $0x20] sm:$0xf0] }
  0x20   :  { %1047 = vmatpush.bf16.msra.mxu2 %v1540_v58  ;;  %v2003_v24 = vld [vmem:[#allocation2 + $0x104] sm:$0xf0]  ;;  %v1579_v25 = vld [vmem:[#allocation2 + $0x180] sm:$0xf]  ;;  %v1961_v30 = vld [vmem:[%s2376_s0 + $0x4] sm:$0xf]  ;;  %v1452_v38 = vor.u32 %v1987_v20, %v1451_v19 }
  0x21   :  { %1065 = vmatpush.bf16.msra.mxu3 %v1604_v62  ;;  %v2019_v27 = vld [vmem:[#allocation2 + $0x184] sm:$0xf0]  ;;  %v1351_v28 = vld [vmem:[%s2376_s0] sm:$0xf]  ;;  %v1699_v32 = vld [vmem:[#allocation2 + $0x270] sm:$0xf]  ;;  %v1516_v39 = vor.u32 %v2003_v24, %v1515_v23 }
  0x22   :  { %1012 = vmatpush.bf16.msra.mxu0 %v1404_v4  ;;  %v1353_v31 = vld [vmem:[%s2376_s0 + $0x24] sm:$0xf0]  ;;  %v2049_v33 = vld [vmem:[#allocation2 + $0x274] sm:$0xf0]  ;;  %v1763_v36 = vld [vmem:[#allocation2 + $0x2f0] sm:$0xf]  ;;  %v1580_v43 = vor.u32 %v2019_v27, %v1579_v25  ;;  %v2240_v48 = vor.u32 %v1965_v29, %v1351_v28 }
  0x23   :  { %1030 = vmatpush.bf16.msra.mxu1 %v1468_v5  ;;  %v1359_v35 = vld [vmem:[%s2376_s0 + $0x8] sm:$0xf]  ;;  %v2065_v37 = vld [vmem:[#allocation2 + $0x2f4] sm:$0xf0]  ;;  %v1966_v40 = vld [vmem:[%s2376_s0 + $0x28] sm:$0xf0]  ;;  %v1700_v44 = vor.u32 %v2049_v33, %v1699_v32  ;;  %v2242_v53 = vor.u32 %v1961_v30, %v1353_v31 }
  0x24   :  { %1048 = vmatpush.bf16.msra.mxu2 %v1532_v6  ;;  %v1962_v41 = vld [vmem:[%s2376_s0 + $0xc] sm:$0xf]  ;;  %v1361_v42 = vld [vmem:[%s2376_s0 + $0x2c] sm:$0xf0]  ;;  %v2081_v46 = vld [vmem:[#allocation2 + $0x374] sm:$0xf0]  ;;  %v1764_v49 = vor.u32 %v2065_v37, %v1763_v36  ;;  %v2244_v54 = vor.u32 %v1966_v40, %v1359_v35 }
  0x25   :  { %1066 = vmatpush.bf16.msra.mxu3 %v1596_v10  ;;  %v1827_v45 = vld [vmem:[#allocation2 + $0x370] sm:$0xf]  ;;  %v2097_v50 = vld [vmem:[#allocation2 + $0x3f4] sm:$0xf0]  ;;  %v1691_v51 = vld [vmem:[#allocation2 + $0x260] sm:$0xf]  ;;  %v2246_v57 = vor.u32 %v1962_v41, %v1361_v42 }
  0x26   :  { %1013 = vmatpush.bf16.msra.mxu0 %v1396_v17  ;;  %v1891_v47 = vld [vmem:[#allocation2 + $0x3f0] sm:$0xf]  ;;  %v2047_v52 = vld [vmem:[#allocation2 + $0x264] sm:$0xf0]  ;;  %v1755_v55 = vld [vmem:[#allocation2 + $0x2e0] sm:$0xf]  ;;  %v1828_v58 = vor.u32 %v2081_v46, %v1827_v45 }
  0x27   :  { %1031 = vmatpush.bf16.msra.mxu1 %v1460_v21  ;;  %v2063_v56 = vld [vmem:[#allocation2 + $0x2e4] sm:$0xf0]  ;;  %v1892_v59 = vor.u32 %v2097_v50, %v1891_v47  ;;  %v1692_v60 = vor.u32 %v2047_v52, %v1691_v51  ;;  %v1819_v61 = vld [vmem:[#allocation2 + $0x360] sm:$0xf]  ;;  %v1683_v2 = vld [vmem:[#allocation2 + $0x250] sm:$0xf] }
  0x28   :  { %1049 = vmatpush.bf16.msra.mxu2 %v1524_v22  ;;  %v2079_v62 = vld [vmem:[#allocation2 + $0x364] sm:$0xf0]  ;;  %v1883_v63 = vld [vmem:[#allocation2 + $0x3e0] sm:$0xf]  ;;  %v1756_v0 = vor.u32 %v2063_v56, %v1755_v55  ;;  %v2045_v3 = vld [vmem:[#allocation2 + $0x254] sm:$0xf0] }
  0x29   :  { %1067 = vmatpush.bf16.msra.mxu3 %v1588_v26  ;;  %v2095_v1 = vld [vmem:[#allocation2 + $0x3e4] sm:$0xf0]  ;;  %v1747_v4 = vld [vmem:[#allocation2 + $0x2d0] sm:$0xf]  ;;  %v2061_v5 = vld [vmem:[#allocation2 + $0x2d4] sm:$0xf0]  ;;  %v1820_v6 = vor.u32 %v2079_v62, %v1819_v61  ;;  %v1684_v8 = vor.u32 %v2045_v3, %v1683_v2 }
  0x2a   :  { %1014 = vmatpush.bf16.msra.mxu0 %v1388_v34  ;;  %v1884_v7 = vor.u32 %v2095_v1, %v1883_v63  ;;  %v1811_v9 = vld [vmem:[#allocation2 + $0x350] sm:$0xf]  ;;  %v2077_v10 = vld [vmem:[#allocation2 + $0x354] sm:$0xf0]  ;;  %v1748_v12 = vor.u32 %v2061_v5, %v1747_v4  ;;  %v1675_v14 = vld [vmem:[#allocation2 + $0x240] sm:$0xf] }
  0x2b   :  { %1032 = vmatpush.bf16.msra.mxu1 %v1452_v38  ;;  %v1875_v11 = vld [vmem:[#allocation2 + $0x3d0] sm:$0xf]  ;;  %v2093_v13 = vld [vmem:[#allocation2 + $0x3d4] sm:$0xf0]  ;;  %v2043_v15 = vld [vmem:[#allocation2 + $0x244] sm:$0xf0]  ;;  %v1812_v19 = vor.u32 %v2077_v10, %v1811_v9 }
  0x2c   :  { %1050 = vmatpush.bf16.msra.mxu2 %v1516_v39  ;;  %v1739_v16 = vld [vmem:[#allocation2 + $0x2c0] sm:$0xf]  ;;  %v2059_v17 = vld [vmem:[#allocation2 + $0x2c4] sm:$0xf0]  ;;  %v55_v20 = vld [vmem:[%s2376_s0 + $0x50] sm:$0x11]  ;;  %v1876_v21 = vor.u32 %v2093_v13, %v1875_v11  ;;  %v1676_v22 = vor.u32 %v2043_v15, %v1675_v14 }
  0x2d   :  { %1068 = vmatpush.bf16.msra.mxu3 %v1580_v43  ;;  %1015 = vmatmul.bf16.vlgmr.msra.gmra.mxu0 %v2240_v48  ;;  %v54_v18 = vld [vmem:[%s2376_s0 + $0x48] sm:$0x11]  ;;  %v1803_v23 = vld [vmem:[#allocation2 + $0x340] sm:$0xf]  ;;  %v1740_v26 = vor.u32 %v2059_v17, %v1739_v16  ;;  %v1667_v29 = vld [vmem:[#allocation2 + $0x230] sm:$0xf]  ;;  %v244_v32 = vunpack.c.l.b16 %v55_v20  ;;  %v245_v36 = vunpack.c.h.b16 %v55_v20 }
  0x2e   :  { %1079 = vmatpush.bf16.msrb.mxu0 %v1700_v44  ;;  %1033 = vmatmul.bf16.vlgmr.msra.gmra.mxu1 %v2242_v53  ;;  %v2075_v24 = vld [vmem:[#allocation2 + $0x344] sm:$0xf0]  ;;  %v1867_v25 = vld [vmem:[#allocation2 + $0x3c0] sm:$0xf]  ;;  %v242_v28 = vunpack.c.l.b16 %v54_v18  ;;  %v2041_v30 = vld [vmem:[#allocation2 + $0x234] sm:$0xf0]  ;;  %v243_v31 = vunpack.c.h.b16 %v54_v18 }
  0x2f   :  { %1097 = vmatpush.bf16.msrb.mxu1 %v1764_v49  ;;  %1051 = vmatmul.bf16.vlgmr.msra.gmra.mxu2 %v2244_v54  ;;  %v2091_v27 = vld [vmem:[#allocation2 + $0x3c4] sm:$0xf0]  ;;  %v1731_v33 = vld [vmem:[#allocation2 + $0x2b0] sm:$0xf]  ;;  %v2057_v34 = vld [vmem:[#allocation2 + $0x2b4] sm:$0xf0]  ;;  %v1804_v35 = vor.u32 %v2075_v24, %v1803_v23  ;;  %v1668_v38 = vor.u32 %v2041_v30, %v1667_v29  ;;  %v2262_v49 = vpack.c.b16 %v244_v32, %v244_v32 }
  0x30   :  { %1069 = vmatmul.bf16.vlgmr.msra.gmra.mxu3 %v2246_v57  ;;  %1115 = vmatpush.bf16.msrb.mxu2 %v1828_v58  ;;  %v1868_v37 = vor.u32 %v2091_v27, %v1867_v25  ;;  %v1795_v39 = vld [vmem:[#allocation2 + $0x330] sm:$0xf]  ;;  %v2073_v40 = vld [vmem:[#allocation2 + $0x334] sm:$0xf0]  ;;  %v2258_v42 = vpack.c.b16 %v242_v28, %v242_v28  ;;  %v1732_v43 = vor.u32 %v2057_v34, %v1731_v33  ;;  %v1659_v45 = vld [vmem:[#allocation2 + $0x220] sm:$0xf] }
  0x31   :  { %1133 = vmatpush.bf16.msrb.mxu3 %v1892_v59  ;;  %v1859_v41 = vld [vmem:[#allocation2 + $0x3b0] sm:$0xf]  ;;  %v2089_v44 = vld [vmem:[#allocation2 + $0x3b4] sm:$0xf0]  ;;  %v2039_v46 = vld [vmem:[#allocation2 + $0x224] sm:$0xf0]  ;;  %v2260_v47 = vpack.c.b16 %v243_v31, %v243_v31  ;;  %v2264_v52 = vpack.c.b16 %v245_v36, %v245_v36  ;;  %v1796_v55 = vor.u32 %v2073_v40, %v1795_v39 }
  0x32   :  { %1080 = vmatpush.bf16.msrb.mxu0 %v1692_v60  ;;  %v1723_v50 = vld [vmem:[#allocation2 + $0x2a0] sm:$0xf]  ;;  %v2055_v51 = vld [vmem:[#allocation2 + $0x2a4] sm:$0xf0]  ;;  %v1860_v56 = vor.u32 %v2089_v44, %v1859_v41  ;;  %v1660_v58 = vor.u32 %v2039_v46, %v1659_v45  ;;  %v2037_v1 = vld [vmem:[#allocation2 + $0x214] sm:$0xf0] }
  0x33   :  { %1098 = vmatpush.bf16.msrb.mxu1 %v1756_v0  ;;  %v1787_v59 = vld [vmem:[#allocation2 + $0x320] sm:$0xf]  ;;  %v2071_v60 = vld [vmem:[#allocation2 + $0x324] sm:$0xf0]  ;;  %v1724_v62 = vor.u32 %v2055_v51, %v1723_v50  ;;  %v1651_v0 = vld [vmem:[#allocation2 + $0x210] sm:$0xf] }
  0x34   :  { %1116 = vmatpush.bf16.msrb.mxu2 %v1820_v6  ;;  %v1851_v61 = vld [vmem:[#allocation2 + $0x3a0] sm:$0xf]  ;;  %v2087_v63 = vld [vmem:[#allocation2 + $0x3a4] sm:$0xf0]  ;;  %v1715_v2 = vld [vmem:[#allocation2 + $0x290] sm:$0xf]  ;;  %v1788_v4 = vor.u32 %v2071_v60, %v1787_v59 }
  0x35   :  { %1134 = vmatpush.bf16.msrb.mxu3 %v1884_v7  ;;  %v2053_v3 = vld [vmem:[#allocation2 + $0x294] sm:$0xf0]  ;;  %v1779_v5 = vld [vmem:[#allocation2 + $0x310] sm:$0xf]  ;;  %v1852_v7 = vor.u32 %v2087_v63, %v1851_v61  ;;  %v1643_v11 = vld [vmem:[#allocation2 + $0x200] sm:$0xf] }
  0x36   :  { %1081 = vmatpush.bf16.msrb.mxu0 %v1684_v8  ;;  %v2069_v6 = vld [vmem:[#allocation2 + $0x314] sm:$0xf0]  ;;  %v1652_v8 = vor.u32 %v2037_v1, %v1651_v0  ;;  %v1843_v9 = vld [vmem:[#allocation2 + $0x390] sm:$0xf]  ;;  %v2035_v13 = vld [vmem:[#allocation2 + $0x204] sm:$0xf0] }
  0x37   :  { %1099 = vmatpush.bf16.msrb.mxu1 %v1748_v12  ;;  %v2085_v10 = vld [vmem:[#allocation2 + $0x394] sm:$0xf0]  ;;  %v1716_v12 = vor.u32 %v2053_v3, %v1715_v2  ;;  %v1707_v14 = vld [vmem:[#allocation2 + $0x280] sm:$0xf]  ;;  %v2051_v15 = vld [vmem:[#allocation2 + $0x284] sm:$0xf0]  ;;  %v1780_v20 = vor.u32 %v2069_v6, %v1779_v5  ;;  %v1644_v25 = vor.u32 %v2035_v13, %v1643_v11 }
  0x38   :  { %1117 = vmatpush.bf16.msrb.mxu2 %v1812_v19  ;;  %v1771_v16 = vld [vmem:[#allocation2 + $0x300] sm:$0xf]  ;;  %v2067_v17 = vld [vmem:[#allocation2 + $0x304] sm:$0xf0]  ;;  %v1955_v18 = vld [vmem:[#allocation2 + $0x470] sm:$0xf]  ;;  %v1844_v24 = vor.u32 %v2085_v10, %v1843_v9  ;;  %v1708_v29 = vor.u32 %v2051_v15, %v1707_v14 }
  0x39   :  { %1135 = vmatpush.bf16.msrb.mxu3 %v1876_v21  ;;  %v2113_v19 = vld [vmem:[#allocation2 + $0x474] sm:$0xf0]  ;;  %v1835_v21 = vld [vmem:[#allocation2 + $0x380] sm:$0xf]  ;;  %v1445_v23 = vld [vmem:[#allocation2 + $0x78] sm:$0xf0]  ;;  %v1772_v39 = vor.u32 %v2067_v17, %v1771_v16 }
  0x3a   :  { %1082 = vmatpush.bf16.msrb.mxu0 %v1676_v22  ;;  %v1984_v22 = vld [vmem:[#allocation2 + $0x74] sm:$0xf]  ;;  %v1367_v27 = vld [vmem:[%s2376_s0 + $0x10] sm:$0xf]  ;;  %v1369_v31 = vld [vmem:[%s2376_s0 + $0x34] sm:$0xf0]  ;;  %v1956_v32 = vor.u32 %v2113_v19, %v1955_v18 }
  0x3b   :  { %1100 = vmatpush.bf16.msrb.mxu1 %v1740_v26  ;;  %v2083_v26 = vld [vmem:[#allocation2 + $0x384] sm:$0xf0]  ;;  %v1967_v28 = vld [vmem:[%s2376_s0 + $0x30] sm:$0xf0]  ;;  %v1509_v34 = vld [vmem:[#allocation2 + $0xf8] sm:$0xf0]  ;;  %v1448_v36 = vor.u32 %v1984_v22, %v1445_v23 }
  0x3c   :  { %1118 = vmatpush.bf16.msrb.mxu2 %v1804_v35  ;;  %v1963_v30 = vld [vmem:[%s2376_s0 + $0x14] sm:$0xf]  ;;  %v1375_v35 = vld [vmem:[%s2376_s0 + $0x18] sm:$0xf]  ;;  %v1968_v40 = vld [vmem:[%s2376_s0 + $0x38] sm:$0xf0]  ;;  %v1836_v44 = vor.u32 %v2083_v26, %v1835_v21 }
  0x3d   :  { %1136 = vmatpush.bf16.msrb.mxu3 %v1868_v37  ;;  %1020 = vmatmul.bf16.gmra.mxu0 %v2258_v42  ;;  %v2000_v33 = vld [vmem:[#allocation2 + $0xf4] sm:$0xf]  ;;  %v1964_v41 = vld [vmem:[%s2376_s0 + $0x1c] sm:$0xf]  ;;  %v1947_v46 = vld [vmem:[#allocation2 + $0x460] sm:$0xf]  ;;  %v2296_v61 = vor.u32 %v1963_v30, %v1369_v31 }
  0x3e   :  { %1083 = vmatpush.bf16.msrb.mxu0 %v1668_v38  ;;  %1038 = vmatmul.bf16.gmra.mxu1 %v2260_v47  ;;  %v2016_v37 = vld [vmem:[#allocation2 + $0x174] sm:$0xf]  ;;  %v1573_v38 = vld [vmem:[#allocation2 + $0x178] sm:$0xf0]  ;;  %v1512_v45 = vor.u32 %v2000_v33, %v1509_v34  ;;  %v2111_v50 = vld [vmem:[#allocation2 + $0x464] sm:$0xf0] }
  0x3f   :  { %1101 = vmatpush.bf16.msrb.mxu1 %v1732_v43  ;;  %1056 = vmatmul.bf16.gmra.mxu2 %v2262_v49  ;;  %v1377_v43 = vld [vmem:[%s2376_s0 + $0x3c] sm:$0xf0]  ;;  %v1982_v51 = vld [vmem:[#allocation2 + $0x64] sm:$0xf]  ;;  %v1501_v60 = vld [vmem:[#allocation2 + $0xe8] sm:$0xf0]  ;;  %v1948_v2 = vor.u32 %v2111_v50, %v1947_v46 }
  0x40   :  { %1074 = vmatmul.bf16.gmra.mxu3 %v2264_v52  ;;  %1119 = vmatpush.bf16.msrb.mxu2 %v1796_v55  ;;  %v2294_v55 = vor.u32 %v1967_v28, %v1367_v27  ;;  %v1998_v59 = vld [vmem:[#allocation2 + $0xe4] sm:$0xf]  ;;  %v1565_v0 = vld [vmem:[#allocation2 + $0x168] sm:$0xf0]  ;;  %v2300_v1 = vor.u32 %v1964_v41, %v1377_v43  ;;  %v1939_v5 = vld [vmem:[#allocation2 + $0x450] sm:$0xf] }
  0x41   :  { %1137 = vmatpush.bf16.msrb.mxu3 %v1860_v56  ;;  %v1576_v56 = vor.u32 %v2016_v37, %v1573_v38  ;;  %v2014_v63 = vld [vmem:[#allocation2 + $0x164] sm:$0xf]  ;;  %v2109_v6 = vld [vmem:[#allocation2 + $0x454] sm:$0xf0]  ;;  %v1429_v9 = vld [vmem:[#allocation2 + $0x58] sm:$0xf0] }
  0x42   :  { %1084 = vmatpush.bf16.msrb.mxu0 %v1660_v58  ;;  %v1437_v58 = vld [vmem:[#allocation2 + $0x68] sm:$0xf0]  ;;  %v1996_v10 = vld [vmem:[#allocation2 + $0xd4] sm:$0xf]  ;;  %v1493_v11 = vld [vmem:[#allocation2 + $0xd8] sm:$0xf0]  ;;  %v1940_v14 = vor.u32 %v2109_v6, %v1939_v5 }
  0x43   :  { %1102 = vmatpush.bf16.msrb.mxu1 %v1724_v62  ;;  %v2298_v62 = vor.u32 %v1968_v40, %v1375_v35  ;;  %v1440_v3 = vor.u32 %v1982_v51, %v1437_v58  ;;  %v1557_v13 = vld [vmem:[#allocation2 + $0x158] sm:$0xf0]  ;;  %v1496_v16 = vor.u32 %v1996_v10, %v1493_v11  ;;  %v1931_v17 = vld [vmem:[#allocation2 + $0x440] sm:$0xf]  ;;  %v2107_v18 = vld [vmem:[#allocation2 + $0x444] sm:$0xf0] }
  0x44   :  { %1120 = vmatpush.bf16.msrb.mxu2 %v1788_v4  ;;  %v1504_v4 = vor.u32 %v1998_v59, %v1501_v60  ;;  %v1978_v19 = vld [vmem:[#allocation2 + $0x44] sm:$0xf]  ;;  %v1421_v21 = vld [vmem:[#allocation2 + $0x48] sm:$0xf0]  ;;  %v56_v26 = vld [vmem:[%s2376_s0 + $0x58] sm:$0x11]  ;;  %v1932_v27 = vor.u32 %v2107_v18, %v1931_v17 }
  0x45   :  { %1138 = vmatpush.bf16.msrb.mxu3 %v1852_v7  ;;  %v1980_v7 = vld [vmem:[#allocation2 + $0x54] sm:$0xf]  ;;  %v1994_v22 = vld [vmem:[#allocation2 + $0xc4] sm:$0xf]  ;;  %v1485_v23 = vld [vmem:[#allocation2 + $0xc8] sm:$0xf0]  ;;  %v246_v35 = vunpack.c.l.b16 %v56_v26 }
  0x46   :  { %1085 = vmatpush.bf16.msrb.mxu0 %v1652_v8  ;;  %v1568_v8 = vor.u32 %v2014_v63, %v1565_v0  ;;  %v1432_v15 = vor.u32 %v1980_v7, %v1429_v9  ;;  %v57_v28 = vld [vmem:[%s2376_s0 + $0x60] sm:$0x11]  ;;  %v1488_v30 = vor.u32 %v1994_v22, %v1485_v23  ;;  %v1923_v31 = vld [vmem:[#allocation2 + $0x430] sm:$0xf]  ;;  %v1976_v33 = vld [vmem:[#allocation2 + $0x34] sm:$0xf] }
  0x47   :  { %1103 = vmatpush.bf16.msrb.mxu1 %v1716_v12  ;;  %v2012_v12 = vld [vmem:[#allocation2 + $0x154] sm:$0xf]  ;;  %v1477_v38 = vld [vmem:[#allocation2 + $0xb8] sm:$0xf0]  ;;  %v248_v40 = vunpack.c.l.b16 %v57_v28  ;;  %v1915_v51 = vld [vmem:[#allocation2 + $0x420] sm:$0xf]  ;;  %v2312_v59 = vpack.c.b16 %v246_v35, %v246_v35 }
  0x48   :  { %1121 = vmatpush.bf16.msrb.mxu2 %v1780_v20  ;;  %v1560_v20 = vor.u32 %v2012_v12, %v1557_v13  ;;  %v1992_v37 = vld [vmem:[#allocation2 + $0xb4] sm:$0xf]  ;;  %v1541_v43 = vld [vmem:[#allocation2 + $0x138] sm:$0xf0]  ;;  %v1974_v58 = vld [vmem:[#allocation2 + $0x24] sm:$0xf] }
  0x49   :  { %1139 = vmatpush.bf16.msrb.mxu3 %v1844_v24  ;;  %v2010_v24 = vld [vmem:[#allocation2 + $0x144] sm:$0xf]  ;;  %v2008_v41 = vld [vmem:[#allocation2 + $0x134] sm:$0xf]  ;;  %v1480_v50 = vor.u32 %v1992_v37, %v1477_v38  ;;  %v1405_v63 = vld [vmem:[#allocation2 + $0x28] sm:$0xf0] }
  0x4a   :  { %1086 = vmatpush.bf16.msrb.mxu0 %v1644_v25  ;;  %v1549_v25 = vld [vmem:[#allocation2 + $0x148] sm:$0xf0]  ;;  %v1544_v60 = vor.u32 %v2008_v41, %v1541_v43  ;;  %v1990_v0 = vld [vmem:[#allocation2 + $0xa4] sm:$0xf]  ;;  %v1408_v9 = vor.u32 %v1974_v58, %v1405_v63  ;;  %v1907_v11 = vld [vmem:[#allocation2 + $0x410] sm:$0xf] }
  0x4b   :  { %1104 = vmatpush.bf16.msrb.mxu1 %v1708_v29  ;;  %v1424_v29 = vor.u32 %v1978_v19, %v1421_v21  ;;  %v1552_v34 = vor.u32 %v2010_v24, %v1549_v25  ;;  %v2006_v5 = vld [vmem:[#allocation2 + $0x124] sm:$0xf]  ;;  %v1533_v6 = vld [vmem:[#allocation2 + $0x128] sm:$0xf0]  ;;  %v2101_v12 = vld [vmem:[#allocation2 + $0x414] sm:$0xf0] }
  0x4c   :  { %1122 = vmatpush.bf16.msrb.mxu2 %v1772_v39  ;;  %v247_v39 = vunpack.c.h.b16 %v56_v26  ;;  %v1972_v13 = vld [vmem:[#allocation2 + $0x14] sm:$0xf]  ;;  %v1461_v17 = vld [vmem:[#allocation2 + $0x98] sm:$0xf0]  ;;  %v1899_v21 = vld [vmem:[#allocation2 + $0x400] sm:$0xf] }
  0x4d   :  { %1140 = vmatpush.bf16.msrb.mxu3 %v1836_v44  ;;  %1087 = vmatmul.bf16.vlgmr.msrb.gmra.mxu0 %v2294_v55  ;;  %v249_v44 = vunpack.c.h.b16 %v57_v28  ;;  %v2004_v18 = vld [vmem:[#allocation2 + $0x114] sm:$0xf]  ;;  %v1525_v19 = vld [vmem:[#allocation2 + $0x118] sm:$0xf0]  ;;  %v2099_v22 = vld [vmem:[#allocation2 + $0x404] sm:$0xf0] }
  0x4e   :  { %1151 = vmatpush.bf16.msra.mxu0 %v1956_v32  ;;  %1105 = vmatmul.bf16.vlgmr.msrb.gmra.mxu1 %v2296_v61  ;;  %v2105_v32 = vld [vmem:[#allocation2 + $0x434] sm:$0xf0]  ;;  %v1970_v25 = vld [vmem:[#allocation2 + $0x4] sm:$0xf]  ;;  %v1389_v26 = vld [vmem:[#allocation2 + $0x8] sm:$0xf0]  ;;  %v1528_v28 = vor.u32 %v2004_v18, %v1525_v19  ;;  %v1900_v35 = vor.u32 %v2099_v22, %v1899_v21 }
  0x4f   :  { %1169 = vmatpush.bf16.msra.mxu1 %v1448_v36  ;;  %1123 = vmatmul.bf16.vlgmr.msrb.gmra.mxu2 %v2298_v62  ;;  %v1413_v36 = vld [vmem:[#allocation2 + $0x38] sm:$0xf0]  ;;  %v2318_v7 = vpack.c.b16 %v249_v44, %v249_v44  ;;  %v2064_v37 = vld [vmem:[#allocation2 + $0x2f4] sm:$0xf]  ;;  %v1629_v63 = vld [vmem:[#allocation2 + $0x1e8] sm:$0xf0] }
  0x50   :  { %1187 = vmatpush.bf16.msra.mxu2 %v1512_v45  ;;  %1141 = vmatmul.bf16.vlgmr.msrb.gmra.mxu3 %v2300_v1  ;;  %v1924_v45 = vor.u32 %v2105_v32, %v1923_v31  ;;  %v1416_v46 = vor.u32 %v1976_v33, %v1413_v36  ;;  %v1517_v31 = vld [vmem:[#allocation2 + $0x108] sm:$0xf0]  ;;  %v2032_v32 = vld [vmem:[#allocation2 + $0x1f4] sm:$0xf]  ;;  %v1637_v33 = vld [vmem:[#allocation2 + $0x1f8] sm:$0xf0] }
  0x51   :  { %1205 = vmatpush.bf16.msra.mxu3 %v1576_v56  ;;  %v2103_v56 = vld [vmem:[#allocation2 + $0x424] sm:$0xf0]  ;;  %v1701_v36 = vld [vmem:[#allocation2 + $0x278] sm:$0xf0]  ;;  %v2080_v41 = vld [vmem:[#allocation2 + $0x374] sm:$0xf] }
  0x52   :  { %1152 = vmatpush.bf16.msra.mxu0 %v1948_v2  ;;  %v1469_v2 = vld [vmem:[#allocation2 + $0xa8] sm:$0xf0]  ;;  %v1765_v38 = vld [vmem:[#allocation2 + $0x2f8] sm:$0xf0]  ;;  %v2060_v19 = vld [vmem:[#allocation2 + $0x2d4] sm:$0xf] }
  0x53   :  { %1170 = vmatpush.bf16.msra.mxu1 %v1440_v3  ;;  %v2314_v3 = vpack.c.b16 %v247_v39, %v247_v39  ;;  %v1472_v10 = vor.u32 %v1990_v0, %v1469_v2  ;;  %v1392_v39 = vor.u32 %v1970_v25, %v1389_v26  ;;  %v1829_v43 = vld [vmem:[#allocation2 + $0x378] sm:$0xf0]  ;;  %v2046_v0 = vld [vmem:[#allocation2 + $0x264] sm:$0xf]  ;;  %v2076_v21 = vld [vmem:[#allocation2 + $0x354] sm:$0xf] }
  0x54   :  { %1188 = vmatpush.bf16.msra.mxu2 %v1504_v4  ;;  %v2316_v4 = vpack.c.b16 %v248_v40, %v248_v40  ;;  %v1832_v58 = vor.u32 %v2080_v41, %v1829_v43  ;;  %v1685_v18 = vld [vmem:[#allocation2 + $0x258] sm:$0xf0]  ;;  %v2026_v26 = vld [vmem:[#allocation2 + $0x1c4] sm:$0xf]  ;;  %v2056_v43 = vld [vmem:[#allocation2 + $0x2b4] sm:$0xf] }
  0x55   :  { %1206 = vmatpush.bf16.msra.mxu3 %v1568_v8  ;;  %v1916_v8 = vor.u32 %v2103_v56, %v1915_v51  ;;  %v1768_v56 = vor.u32 %v2064_v37, %v1765_v38  ;;  %v1813_v22 = vld [vmem:[#allocation2 + $0x358] sm:$0xf0]  ;;  %v2040_v38 = vld [vmem:[#allocation2 + $0x234] sm:$0xf] }
  0x56   :  { %1153 = vmatpush.bf16.msra.mxu0 %v1940_v14  ;;  %v1536_v14 = vor.u32 %v2006_v5, %v1533_v6  ;;  %v1693_v5 = vld [vmem:[#allocation2 + $0x268] sm:$0xf0]  ;;  %v2062_v6 = vld [vmem:[#allocation2 + $0x2e4] sm:$0xf]  ;;  %v1605_v37 = vld [vmem:[#allocation2 + $0x1b8] sm:$0xf0] }
  0x57   :  { %1171 = vmatpush.bf16.msra.mxu1 %v1432_v15  ;;  %v1397_v15 = vld [vmem:[#allocation2 + $0x18] sm:$0xf0] }
  0x58   :  { %1189 = vmatpush.bf16.msra.mxu2 %v1496_v16  ;;  %v1988_v16 = vld [vmem:[#allocation2 + $0x94] sm:$0xf]  ;;  %v1400_v23 = vor.u32 %v1972_v13, %v1397_v15  ;;  %v1621_v15 = vld [vmem:[#allocation2 + $0x1d8] sm:$0xf0] }
  0x59   :  { %1207 = vmatpush.bf16.msra.mxu3 %v1560_v20  ;;  %v1908_v20 = vor.u32 %v2101_v12, %v1907_v11  ;;  %v1464_v24 = vor.u32 %v1988_v16, %v1461_v17  ;;  %v1696_v12 = vor.u32 %v2046_v0, %v1693_v5  ;;  %v2044_v16 = vld [vmem:[#allocation2 + $0x254] sm:$0xf]  ;;  %v1669_v41 = vld [vmem:[#allocation2 + $0x238] sm:$0xf0] }
  0x5a   :  { %1154 = vmatpush.bf16.msra.mxu0 %v1932_v27  ;;  %v1986_v27 = vld [vmem:[#allocation2 + $0x84] sm:$0xf] }
  0x5b   :  { %1172 = vmatpush.bf16.msra.mxu1 %v1424_v29  ;;  %v1453_v29 = vld [vmem:[#allocation2 + $0x88] sm:$0xf0] }
  0x5c   :  { %1190 = vmatpush.bf16.msra.mxu2 %v1488_v30  ;;  %v2002_v30 = vld [vmem:[#allocation2 + $0x104] sm:$0xf]  ;;  %v1456_v40 = vor.u32 %v1986_v27, %v1453_v29  ;;  %v1613_v27 = vld [vmem:[#allocation2 + $0x1c8] sm:$0xf0]  ;;  %v1816_v29 = vor.u32 %v2076_v21, %v1813_v22  ;;  %v1717_v21 = vld [vmem:[#allocation2 + $0x298] sm:$0xf0] }
  0x5d   :  { %1208 = vmatpush.bf16.msra.mxu3 %v1552_v34  ;;  %1092 = vmatmul.bf16.gmra.mxu0 %v2312_v59  ;;  %v2048_v34 = vld [vmem:[#allocation2 + $0x274] sm:$0xf]  ;;  %v1520_v44 = vor.u32 %v2002_v30, %v1517_v31  ;;  %v1677_v30 = vld [vmem:[#allocation2 + $0x248] sm:$0xf0]  ;;  %v2058_v31 = vld [vmem:[#allocation2 + $0x2c4] sm:$0xf] }
  0x5e   :  { %1155 = vmatpush.bf16.msra.mxu0 %v1924_v45  ;;  %1110 = vmatmul.bf16.gmra.mxu1 %v2314_v3  ;;  %v1640_v45 = vor.u32 %v2032_v32, %v1637_v33  ;;  %v1704_v51 = vor.u32 %v2048_v34, %v1701_v36  ;;  %v2074_v32 = vld [vmem:[#allocation2 + $0x344] sm:$0xf]  ;;  %v1616_v33 = vor.u32 %v2026_v26, %v1613_v27  ;;  %v2024_v36 = vld [vmem:[#allocation2 + $0x1b4] sm:$0xf] }
  0x5f   :  { %1173 = vmatpush.bf16.msra.mxu1 %v1416_v46  ;;  %1128 = vmatmul.bf16.gmra.mxu2 %v2316_v4  ;;  %v1383_v46 = vld [vmem:[%s2376_s0 + $0x20] sm:$0xf]  ;;  %v2068_v22 = vld [vmem:[#allocation2 + $0x314] sm:$0xf] }
  0x60   :  { %1191 = vmatpush.bf16.msra.mxu2 %v1480_v50  ;;  %1146 = vmatmul.bf16.gmra.mxu3 %v2318_v7  ;;  %v1969_v50 = vld [vmem:[%s2376_s0 + $0x40] sm:$0xf0] }
  0x61   :  { %1209 = vmatpush.bf16.msra.mxu3 %v1544_v60  ;;  %v2030_v60 = vld [vmem:[#allocation2 + $0x1e4] sm:$0xf]  ;;  %v2330_v2 = vor.u32 %v1969_v50, %v1383_v46  ;;  %v1797_v46 = vld [vmem:[#allocation2 + $0x338] sm:$0xf0]  ;;  %v1608_v50 = vor.u32 %v2024_v36, %v1605_v37 }
  0x62   :  { %1156 = vmatpush.bf16.msra.mxu0 %v1916_v8  ;;  %v1757_v8 = vld [vmem:[#allocation2 + $0x2e8] sm:$0xf0]  ;;  %v1632_v11 = vor.u32 %v2030_v60, %v1629_v63  ;;  %v2038_v63 = vld [vmem:[#allocation2 + $0x224] sm:$0xf] }
  0x63   :  { %1174 = vmatpush.bf16.msra.mxu1 %v1408_v9  ;;  %v2078_v9 = vld [vmem:[#allocation2 + $0x364] sm:$0xf]  ;;  %v1760_v13 = vor.u32 %v2062_v6, %v1757_v8  ;;  %v1597_v60 = vld [vmem:[#allocation2 + $0x1a8] sm:$0xf0] }
  0x64   :  { %1192 = vmatpush.bf16.msra.mxu2 %v1472_v10  ;;  %v1821_v10 = vld [vmem:[#allocation2 + $0x368] sm:$0xf0]  ;;  %v2054_v8 = vld [vmem:[#allocation2 + $0x2a4] sm:$0xf] }
  0x65   :  { %1210 = vmatpush.bf16.msra.mxu3 %v1536_v14  ;;  %v2028_v14 = vld [vmem:[#allocation2 + $0x1d4] sm:$0xf]  ;;  %v1824_v17 = vor.u32 %v2078_v9, %v1821_v10  ;;  %v1661_v6 = vld [vmem:[#allocation2 + $0x228] sm:$0xf0]  ;;  %v2070_v10 = vld [vmem:[#allocation2 + $0x324] sm:$0xf] }
  0x66   :  { %1157 = vmatpush.bf16.msra.mxu0 %v1908_v20  ;;  %v1749_v20 = vld [vmem:[#allocation2 + $0x2d8] sm:$0xf0]  ;;  %v1725_v9 = vld [vmem:[#allocation2 + $0x2a8] sm:$0xf0] }
  0x67   :  { %1175 = vmatpush.bf16.msra.mxu1 %v1400_v23  ;;  %v1624_v23 = vor.u32 %v2028_v14, %v1621_v15  ;;  %v1752_v25 = vor.u32 %v2060_v19, %v1749_v20  ;;  %v1728_v14 = vor.u32 %v2054_v8, %v1725_v9  ;;  %v2020_v15 = vld [vmem:[#allocation2 + $0x194] sm:$0xf]  ;;  %v1653_v19 = vld [vmem:[#allocation2 + $0x218] sm:$0xf0]  ;;  %v2106_v8 = vld [vmem:[#allocation2 + $0x444] sm:$0xf] }
  0x68   :  { %1193 = vmatpush.bf16.msra.mxu2 %v1464_v24  ;;  %v1688_v24 = vor.u32 %v2044_v16, %v1685_v18  ;;  %v1589_v16 = vld [vmem:[#allocation2 + $0x198] sm:$0xf0]  ;;  %v2052_v20 = vld [vmem:[#allocation2 + $0x294] sm:$0xf]  ;;  %v1933_v9 = vld [vmem:[#allocation2 + $0x448] sm:$0xf0] }
  0x69   :  { %1211 = vmatpush.bf16.msra.mxu3 %v1528_v28  ;;  %v2042_v28 = vld [vmem:[#allocation2 + $0x244] sm:$0xf]  ;;  %v1720_v27 = vor.u32 %v2052_v20, %v1717_v21  ;;  %v2084_v20 = vld [vmem:[#allocation2 + $0x394] sm:$0xf]  ;;  %v1845_v21 = vld [vmem:[#allocation2 + $0x398] sm:$0xf0] }
  0x6a   :  { %1158 = vmatpush.bf16.msra.mxu0 %v1900_v35  ;;  %v1680_v34 = vor.u32 %v2042_v28, %v1677_v30  ;;  %v1581_v28 = vld [vmem:[#allocation2 + $0x188] sm:$0xf0] }
  0x6b   :  { %1176 = vmatpush.bf16.msra.mxu1 %v1392_v39  ;;  %v1645_v30 = vld [vmem:[#allocation2 + $0x208] sm:$0xf0] }
  0x6c   :  { %1194 = vmatpush.bf16.msra.mxu2 %v1456_v40 }
  0x6d   :  { %1212 = vmatpush.bf16.msra.mxu3 %v1520_v44  ;;  %1159 = vmatmul.bf16.vlgmr.msra.gmra.mxu0 %v2330_v2  ;;  %v1733_v44 = vld [vmem:[#allocation2 + $0x2b8] sm:$0xf0] }
  0x6e   :  { %1223 = vmatpush.bf16.msrb.mxu0 %v1640_v45  ;;  %1177 = vmatmul.bf16.vlgmr.msra.gmra.mxu1 %v2240_v48  ;;  %v1741_v48 = vld [vmem:[#allocation2 + $0x2c8] sm:$0xf0]  ;;  %v2072_v45 = vld [vmem:[#allocation2 + $0x334] sm:$0xf] }
  0x6f   :  { %1241 = vmatpush.bf16.msrb.mxu1 %v1704_v51  ;;  %1195 = vmatmul.bf16.vlgmr.msra.gmra.mxu2 %v2242_v53  ;;  %v1805_v53 = vld [vmem:[#allocation2 + $0x348] sm:$0xf0]  ;;  %v1744_v35 = vor.u32 %v2058_v31, %v1741_v48  ;;  %v1672_v51 = vor.u32 %v2040_v38, %v1669_v41  ;;  %v1800_v5 = vor.u32 %v2072_v45, %v1797_v46  ;;  %v2050_v48 = vld [vmem:[#allocation2 + $0x284] sm:$0xf] }
  0x70   :  { %1259 = vmatpush.bf16.msrb.mxu2 %v1768_v56  ;;  %1213 = vmatmul.bf16.vlgmr.msra.gmra.mxu3 %v2244_v54  ;;  %v58_v54 = vld [vmem:[%s2376_s0 + $0x68] sm:$0x1]  ;;  %v1808_v39 = vor.u32 %v2074_v32, %v1805_v53  ;;  %v1736_v56 = vor.u32 %v2056_v43, %v1733_v44  ;;  %v2066_v32 = vld [vmem:[#allocation2 + $0x304] sm:$0xf]  ;;  %v2096_v53 = vld [vmem:[#allocation2 + $0x3f4] sm:$0xf] }
  0x71   :  { %1277 = vmatpush.bf16.msrb.mxu3 %v1832_v58  ;;  %v250_v40 = vunpack.c.l.b16 %v58_v54  ;;  %v2022_v58 = vld [vmem:[#allocation2 + $0x1a4] sm:$0xf]  ;;  %v1893_v54 = vld [vmem:[#allocation2 + $0x3f8] sm:$0xf0]  ;;  %v1885_v41 = vld [vmem:[#allocation2 + $0x3e8] sm:$0xf0] }
  0x72   :  { %1224 = vmatpush.bf16.msrb.mxu0 %v1632_v11  ;;  %v1789_v11 = vld [vmem:[#allocation2 + $0x328] sm:$0xf0]  ;;  %v1896_v38 = vor.u32 %v2096_v53, %v1893_v54  ;;  %v2110_v43 = vld [vmem:[#allocation2 + $0x464] sm:$0xf] }
  0x73   :  { %1242 = vmatpush.bf16.msrb.mxu1 %v1696_v12  ;;  %v2339_v0 = vpack.c.b16 %v250_v40, %v250_v40  ;;  %v1600_v12 = vor.u32 %v2022_v58, %v1597_v60  ;;  %v1792_v18 = vor.u32 %v2070_v10, %v1789_v11  ;;  %v2094_v40 = vld [vmem:[#allocation2 + $0x3e4] sm:$0xf]  ;;  %v1949_v44 = vld [vmem:[#allocation2 + $0x468] sm:$0xf0]  ;;  %v1941_v58 = vld [vmem:[#allocation2 + $0x458] sm:$0xf0]  ;;  %v1936_v10 = vor.u32 %v2106_v8, %v1933_v9 }
  0x74   :  { %1260 = vmatpush.bf16.msrb.mxu2 %v1760_v13  ;;  %v1664_v13 = vor.u32 %v2038_v63, %v1661_v6  ;;  %v1888_v45 = vor.u32 %v2094_v40, %v1885_v41  ;;  %v1952_v46 = vor.u32 %v2110_v43, %v1949_v44  ;;  %v1869_v6 = vld [vmem:[#allocation2 + $0x3c8] sm:$0xf0]  ;;  %v1861_v11 = vld [vmem:[#allocation2 + $0x3b8] sm:$0xf0] }
  0x75   :  { %1278 = vmatpush.bf16.msrb.mxu3 %v1824_v17  ;;  %v2036_v17 = vld [vmem:[#allocation2 + $0x214] sm:$0xf] }
  0x76   :  { %1225 = vmatpush.bf16.msrb.mxu0 %v1624_v23  ;;  %v1781_v23 = vld [vmem:[#allocation2 + $0x318] sm:$0xf0]  ;;  %v1656_v26 = vor.u32 %v2036_v17, %v1653_v19  ;;  %v1917_v17 = vld [vmem:[#allocation2 + $0x428] sm:$0xf0] }
  0x77   :  { %1243 = vmatpush.bf16.msrb.mxu1 %v1688_v24  ;;  %v1592_v24 = vor.u32 %v2020_v15, %v1589_v16  ;;  %v1784_v31 = vor.u32 %v2068_v22, %v1781_v23  ;;  %v1853_v15 = vld [vmem:[#allocation2 + $0x3a8] sm:$0xf0]  ;;  %v2102_v16 = vld [vmem:[#allocation2 + $0x424] sm:$0xf]  ;;  %v2100_v22 = vld [vmem:[#allocation2 + $0x414] sm:$0xf] }
  0x78   :  { %1261 = vmatpush.bf16.msrb.mxu2 %v1752_v25  ;;  %v2018_v25 = vld [vmem:[#allocation2 + $0x184] sm:$0xf]  ;;  %v1920_v19 = vor.u32 %v2102_v16, %v1917_v17  ;;  %v1909_v23 = vld [vmem:[#allocation2 + $0x418] sm:$0xf0] }
  0x79   :  { %1279 = vmatpush.bf16.msrb.mxu3 %v1816_v29  ;;  %v2034_v29 = vld [vmem:[#allocation2 + $0x204] sm:$0xf] }
  0x7a   :  { %1226 = vmatpush.bf16.msrb.mxu0 %v1616_v33  ;;  %v2112_v33 = vld [vmem:[#allocation2 + $0x474] sm:$0xf] }
  0x7b   :  { %1244 = vmatpush.bf16.msrb.mxu1 %v1680_v34  ;;  %v1957_v34 = vld [vmem:[#allocation2 + $0x478] sm:$0xf0] }
  0x7c   :  { %1262 = vmatpush.bf16.msrb.mxu2 %v1744_v35  ;;  %v1648_v35 = vor.u32 %v2034_v29, %v1645_v30  ;;  %v1901_v29 = vld [vmem:[#allocation2 + $0x408] sm:$0xf0]  ;;  %v2353_v30 = vld [vmem:[#allocation4] sm:$0x3] }
  0x7d   :  { %1280 = vmatpush.bf16.msrb.mxu3 %v1808_v39  ;;  %1164 = vmatmul.bf16.gmra.mxu0 %v2339_v0  ;;  %v1960_v39 = vor.u32 %v2112_v33, %v1957_v34 }
  0x7e   :  { %1227 = vmatpush.bf16.msrb.mxu0 %v1608_v50  ;;  %1182 = vmatmul.bf16.gmra.mxu1 %v2258_v42  ;;  %v1709_v42 = vld [vmem:[#allocation2 + $0x288] sm:$0xf0]  ;;  %v2092_v50 = vld [vmem:[#allocation2 + $0x3d4] sm:$0xf] }
  0x7f   :  { %1245 = vmatpush.bf16.msrb.mxu1 %v1672_v51  ;;  %1200 = vmatmul.bf16.gmra.mxu2 %v2260_v47  ;;  %v1773_v47 = vld [vmem:[#allocation2 + $0x308] sm:$0xf0]  ;;  %v1712_v36 = vor.u32 %v2050_v48, %v1709_v42  ;;  %v1877_v51 = vld [vmem:[#allocation2 + $0x3d8] sm:$0xf0] }
  0x80   :  { %1263 = vmatpush.bf16.msrb.mxu2 %v1736_v56  ;;  %1218 = vmatmul.bf16.gmra.mxu3 %v2262_v49  ;;  %v1584_v49 = vor.u32 %v2018_v25, %v1581_v28  ;;  %v1776_v37 = vor.u32 %v2066_v32, %v1773_v47  ;;  %v2108_v56 = vld [vmem:[#allocation2 + $0x454] sm:$0xf]  ;;  %v1880_v60 = vor.u32 %v2092_v50, %v1877_v51  ;;  %v2098_v28 = vld [vmem:[#allocation2 + $0x404] sm:$0xf] }
  0x81   :  { %1281 = vmatpush.bf16.msrb.mxu3 %v1800_v5  ;;  %v1944_v63 = vor.u32 %v2108_v56, %v1941_v58  ;;  %v2090_v5 = vld [vmem:[#allocation2 + $0x3c4] sm:$0xf]  ;;  %v1912_v25 = vor.u32 %v2100_v22, %v1909_v23 }
  0x82   :  { %1228 = vmatpush.bf16.msrb.mxu0 %v1600_v12 }
  0x83   :  { %1246 = vmatpush.bf16.msrb.mxu1 %v1664_v13 }
  0x84   :  { %1264 = vmatpush.bf16.msrb.mxu2 %v1728_v14  ;;  %v2086_v14 = vld [vmem:[#allocation2 + $0x3a4] sm:$0xf] }
  0x85   :  { %1282 = vmatpush.bf16.msrb.mxu3 %v1792_v18  ;;  %v1856_v18 = vor.u32 %v2086_v14, %v1853_v15 }
  0x86   :  { %1229 = vmatpush.bf16.msrb.mxu0 %v1592_v24  ;;  %v1848_v24 = vor.u32 %v2084_v20, %v1845_v21 }
  0x87   :  { %1247 = vmatpush.bf16.msrb.mxu1 %v1656_v26  ;;  %v2082_v26 = vld [vmem:[#allocation2 + $0x384] sm:$0xf] }
  0x88   :  { %1265 = vmatpush.bf16.msrb.mxu2 %v1720_v27  ;;  %v1837_v27 = vld [vmem:[#allocation2 + $0x388] sm:$0xf0] }
  0x89   :  { %1283 = vmatpush.bf16.msrb.mxu3 %v1784_v31 }
  0x8a   :  { %1230 = vmatpush.bf16.msrb.mxu0 %v1584_v49 }
  0x8b   :  { %1248 = vmatpush.bf16.msrb.mxu1 %v1648_v35 }
  0x8c   :  { %1266 = vmatpush.bf16.msrb.mxu2 %v1712_v36 }
  0x8d   :  { %1284 = vmatpush.bf16.msrb.mxu3 %v1776_v37  ;;  %1231 = vmatmul.bf16.vlgmr.msrb.gmra.mxu0 %v2246_v57  ;;  %v1872_v57 = vor.u32 %v2090_v5, %v1869_v6 }
  0x8e   :  { %1295 = vmatpush.bf16.msra.mxu0 %v1896_v38  ;;  %1249 = vmatmul.bf16.vlgmr.msrb.gmra.mxu1 %v2294_v55  ;;  %v2088_v55 = vld [vmem:[#allocation2 + $0x3b4] sm:$0xf] }
  0x8f   :  { %1313 = vmatpush.bf16.msra.mxu1 %v1960_v39  ;;  %1267 = vmatmul.bf16.vlgmr.msrb.gmra.mxu2 %v2296_v61  ;;  %v2104_v61 = vld [vmem:[#allocation2 + $0x434] sm:$0xf]  ;;  %v1864_v12 = vor.u32 %v2088_v55, %v1861_v11 }
  0x90   :  { %2114 = vmatpush.bf16.msra.mxu2 %v1896_v38  ;;  %1285 = vmatmul.bf16.vlgmr.msrb.gmra.mxu3 %v2298_v62  ;;  %v1925_v62 = vld [vmem:[#allocation2 + $0x438] sm:$0xf0] }
  0x91   :  { %2122 = vmatpush.bf16.msra.mxu3 %v1960_v39  ;;  %v1928_v13 = vor.u32 %v2104_v61, %v1925_v62 }
  0x92   :  { %1296 = vmatpush.bf16.msra.mxu0 %v1888_v45 }
  0x93   :  { %1314 = vmatpush.bf16.msra.mxu1 %v1952_v46 }
  0x94   :  { %2115 = vmatpush.bf16.msra.mxu2 %v1888_v45 }
  0x95   :  { %2123 = vmatpush.bf16.msra.mxu3 %v1952_v46 }
  0x96   :  { %1297 = vmatpush.bf16.msra.mxu0 %v1880_v60 }
  0x97   :  { %1315 = vmatpush.bf16.msra.mxu1 %v1944_v63 }
  0x98   :  { %2116 = vmatpush.bf16.msra.mxu2 %v1880_v60 }
  0x99   :  { %2124 = vmatpush.bf16.msra.mxu3 %v1944_v63 }
  0x9a   :  { %1298 = vmatpush.bf16.msra.mxu0 %v1872_v57 }
  0x9b   :  { %1316 = vmatpush.bf16.msra.mxu1 %v1936_v10 }
  0x9c   :  { %2117 = vmatpush.bf16.msra.mxu2 %v1872_v57 }
  0x9d   :  { %2125 = vmatpush.bf16.msra.mxu3 %v1936_v10  ;;  %1236 = vmatmul.bf16.gmra.mxu0 %v2264_v52  ;;  %v1840_v52 = vor.u32 %v2082_v26, %v1837_v27 }
  0x9e   :  { %1299 = vmatpush.bf16.msra.mxu0 %v1864_v12  ;;  %1254 = vmatmul.bf16.gmra.mxu1 %v2312_v59  ;;  %v1904_v59 = vor.u32 %v2098_v28, %v1901_v29 }
  0x9f   :  { %1317 = vmatpush.bf16.msra.mxu1 %v1928_v13  ;;  %1272 = vmatmul.bf16.gmra.mxu2 %v2314_v3  ;;  %v205_v3 = vperm.slane %v2353_v30, 0 }
  0xa0   :  { %2118 = vmatpush.bf16.msra.mxu2 %v1864_v12  ;;  %1290 = vmatmul.bf16.gmra.mxu3 %v2316_v4 }
  0xa1   :  { %2126 = vmatpush.bf16.msra.mxu3 %v1928_v13 }
  0xa2   :  { %1300 = vmatpush.bf16.msra.mxu0 %v1856_v18 }
  0xa3   :  { %1318 = vmatpush.bf16.msra.mxu1 %v1920_v19 }
  0xa4   :  { %2119 = vmatpush.bf16.msra.mxu2 %v1856_v18 }
  0xa5   :  { %2127 = vmatpush.bf16.msra.mxu3 %v1920_v19 }
  0xa6   :  { %1301 = vmatpush.bf16.msra.mxu0 %v1848_v24 }
  0xa7   :  { %1319 = vmatpush.bf16.msra.mxu1 %v1912_v25 }
  0xa8   :  { %2120 = vmatpush.bf16.msra.mxu2 %v1848_v24 }
  0xa9   :  { %2128 = vmatpush.bf16.msra.mxu3 %v1912_v25 }
  0xaa   :  { %1302 = vmatpush.bf16.msra.mxu0 %v1840_v52  ;;  %v1016_v4 = vpop.f32.mrf.mxu0 }
  0xab   :  { %1320 = vmatpush.bf16.msra.mxu1 %v1904_v59  ;;  %v1017_v31 = vadd.f32 %v1016_v4, %v205_v3  ;;  %v1034_v48 = vpop.f32.mrf.mxu1 }
  0xac   :  { %2121 = vmatpush.bf16.msra.mxu2 %v1840_v52 }
  0xad   :  { %2129 = vmatpush.bf16.msra.mxu3 %v1904_v59  ;;  %v1035_v42 = vadd.f32 %v1034_v48, %v1017_v31  ;;  %1303 = vmatmul.bf16.vlgmr.msra.gmra.mxu0 %v2300_v1 }
  0xae   :  { %1321 = vmatmul.bf16.vlgmr.msra.gmra.mxu1 %v2330_v2 }
  0xaf   :  { %1308 = vmatmul.bf16.vlgmr.msra.gmra.mxu2 %v2318_v7 }
  0xb0   :  { %1326 = vmatmul.bf16.vlgmr.msra.gmra.mxu3 %v2339_v0 }
  0xb2   :  { %v1052_v32 = vpop.f32.mrf.mxu2  ;;  %v1018_v54 = vpop.f32.mrf.mxu0 }
  0xb3   :  { %v1053_v47 = vadd.f32 %v1052_v32, %v1035_v42  ;;  %v1070_v53 = vpop.f32.mrf.mxu3  ;;  %v1019_v49 = vadd.f32 %v1018_v54, %v205_v3  ;;  %v1036_v33 = vpop.f32.mrf.mxu1 }
  0xb5   :  { %v1071_v34 = vadd.f32 %v1070_v53, %v1053_v47  ;;  %v1037_v35 = vadd.f32 %v1036_v33, %v1019_v49 }
  0xba   :  { %v1054_v36 = vpop.f32.mrf.mxu2  ;;  %v1021_v39 = vpop.f32.mrf.mxu0 }
  0xbb   :  { %v1055_v37 = vadd.f32 %v1054_v36, %v1037_v35  ;;  %v1072_v38 = vpop.f32.mrf.mxu3  ;;  %v1022_v40 = vadd.f32 %v1021_v39, %v205_v3  ;;  %v1039_v1 = vpop.f32.mrf.mxu1 }
  0xbd   :  { %v1073_v41 = vadd.f32 %v1072_v38, %v1055_v37  ;;  %v1040_v7 = vadd.f32 %v1039_v1, %v1022_v40  ;;  %v206_v40 = vperm.slane %v2353_v30, 1 }
  0xc2   :  { %v1057_v43 = vpop.f32.mrf.mxu2  ;;  %v1023_v0 = vpop.f32.mrf.mxu0 }
  0xc3   :  { %v1058_v2 = vadd.f32 %v1057_v43, %v1040_v7  ;;  %v1075_v44 = vpop.f32.mrf.mxu3  ;;  %v1041_v45 = vpop.f32.mrf.mxu1 }
  0xc5   :  { %v1076_v46 = vadd.f32 %v1075_v44, %v1058_v2 }
  0xca   :  { %v1059_v50 = vpop.f32.mrf.mxu2  ;;  %v1088_v56 = vpop.f32.mrf.mxu0 }
  0xcb   :  { %v1077_v51 = vpop.f32.mrf.mxu3  ;;  %v1089_v58 = vadd.f32 %v1088_v56, %v1071_v34  ;;  %v1106_v60 = vpop.f32.mrf.mxu1 }
  0xcd   :  { %v1107_v63 = vadd.f32 %v1106_v60, %v1089_v58 }
  0xd2   :  { %v1124_v5 = vpop.f32.mrf.mxu2  ;;  %v1090_v9 = vpop.f32.mrf.mxu0 }
  0xd3   :  { %v1125_v6 = vadd.f32 %v1124_v5, %v1107_v63  ;;  %v1142_v8 = vpop.f32.mrf.mxu3  ;;  %v1091_v57 = vadd.f32 %v1090_v9, %v1073_v41  ;;  %v1108_v10 = vpop.f32.mrf.mxu1 }
  0xd5   :  { %v1143_v55 = vadd.f32 %v1142_v8, %v1125_v6  ;;  %v1109_v11 = vadd.f32 %v1108_v10, %v1091_v57 }
  0xda   :  { %v1126_v61 = vpop.f32.mrf.mxu2  ;;  %v1093_v13 = vpop.f32.mrf.mxu0 }
  0xdb   :  { %v1127_v62 = vadd.f32 %v1126_v61, %v1109_v11  ;;  %v1144_v12 = vpop.f32.mrf.mxu3  ;;  %v1094_v14 = vadd.f32 %v1093_v13, %v1076_v46  ;;  %v1111_v15 = vpop.f32.mrf.mxu1 }
  0xdd   :  { %v1145_v16 = vadd.f32 %v1144_v12, %v1127_v62  ;;  %v1112_v17 = vadd.f32 %v1111_v15, %v1094_v14 }
  0xe2   :  { %v1129_v18 = vpop.f32.mrf.mxu2  ;;  %v1095_v21 = vpop.f32.mrf.mxu0 }
  0xe3   :  { %v1130_v19 = vadd.f32 %v1129_v18, %v1112_v17  ;;  %v1147_v20 = vpop.f32.mrf.mxu3  ;;  %v1113_v22 = vpop.f32.mrf.mxu1 }
  0xe5   :  { %v2360_v23 = vadd.f32 %v1147_v20, %v1130_v19 }
  0xea   :  { %v1131_v24 = vpop.f32.mrf.mxu2  ;;  %v1160_v26 = vpop.f32.mrf.mxu0 }
  0xeb   :  { %v1149_v25 = vpop.f32.mrf.mxu3  ;;  %v1161_v27 = vadd.f32 %v1160_v26, %v1143_v55  ;;  %v1178_v28 = vpop.f32.mrf.mxu1 }
  0xec   :  { %v1179_v41 = vadd.f32 %v1178_v28, %v206_v40 }
  0xed   :  { %v1331_v20 = vmax.f32 %v1161_v27, 0.0 }
  0xf2   :  { %v1196_v29 = vpop.f32.mrf.mxu2  ;;  %v1162_v59 = vpop.f32.mrf.mxu0 }
  0xf3   :  { %v1214_v52 = vpop.f32.mrf.mxu3  ;;  %v2362_v3 = vadd.f32 %v1162_v59, %v1145_v16  ;;  %v1180_v4 = vpop.f32.mrf.mxu1  ;;  %v1197_v7 = vadd.f32 %v1196_v29, %v1179_v41 }
  0xf4   :  { %v1181_v50 = vadd.f32 %v1180_v4, %v206_v40 }
  0xf5   :  { %v1215_v45 = vadd.f32 %v1214_v52, %v1197_v7 }
  0xfa   :  { %v1198_v31 = vpop.f32.mrf.mxu2  ;;  %v1165_v42 = vpop.f32.mrf.mxu0 }
  0xfb   :  { %v1216_v48 = vpop.f32.mrf.mxu3  ;;  %v1183_v32 = vpop.f32.mrf.mxu1  ;;  %v1199_v58 = vadd.f32 %v1198_v31, %v1181_v50  ;;  %v1166_v28 = vadd.f32 %v1165_v42, %v2360_v23 }
  0xfc   :  { %v1184_v46 = vadd.f32 %v1183_v32, %v206_v40 }
  0xfd   :  { %v1217_v30 = vadd.f32 %v1216_v48, %v1199_v58 }
 0x102   :  { %v1201_v47 = vpop.f32.mrf.mxu2  ;;  %v1167_v54 = vpop.f32.mrf.mxu0 }
 0x103   :  { %v1219_v53 = vpop.f32.mrf.mxu3  ;;  %v1185_v49 = vpop.f32.mrf.mxu1  ;;  %v1202_v56 = vadd.f32 %v1201_v47, %v1184_v46  ;;  %v1335_v47 = vmax.f32 %v1166_v28, 0.0 }
 0x105   :  { %v1220_v9 = vadd.f32 %v1219_v53, %v1202_v56  ;;  %v1333_v53 = vmax.f32 %v2362_v3, 0.0 }
 0x10a   :  { %v1203_v33 = vpop.f32.mrf.mxu2  ;;  %v1232_v35 = vpop.f32.mrf.mxu0 }
 0x10b   :  { %v1221_v34 = vpop.f32.mrf.mxu3  ;;  %v1250_v36 = vpop.f32.mrf.mxu1  ;;  %v1233_v51 = vadd.f32 %v1232_v35, %v1215_v45 }
 0x10d   :  { %v1251_v6 = vadd.f32 %v1250_v36, %v1233_v51 }
 0x112   :  { %v1268_v37 = vpop.f32.mrf.mxu2  ;;  %v1234_v39 = vpop.f32.mrf.mxu0 }
 0x113   :  { %v1286_v38 = vpop.f32.mrf.mxu3  ;;  %v1252_v1 = vpop.f32.mrf.mxu1  ;;  %v1269_v57 = vadd.f32 %v1268_v37, %v1251_v6  ;;  %v1235_v55 = vadd.f32 %v1234_v39, %v1217_v30 }
 0x115   :  { %v1287_v11 = vadd.f32 %v1286_v38, %v1269_v57  ;;  %v1253_v14 = vadd.f32 %v1252_v1, %v1235_v55 }
 0x11a   :  { %v1270_v43 = vpop.f32.mrf.mxu2  ;;  %v1237_v44 = vpop.f32.mrf.mxu0 }
 0x11b   :  { %v1288_v2 = vpop.f32.mrf.mxu3  ;;  %v1255_v0 = vpop.f32.mrf.mxu1  ;;  %v1238_v10 = vadd.f32 %v1237_v44, %v1220_v9  ;;  %v1271_v18 = vadd.f32 %v1270_v43, %v1253_v14 }
 0x11d   :  { %v1256_v62 = vadd.f32 %v1255_v0, %v1238_v10  ;;  %v1289_v24 = vadd.f32 %v1288_v2, %v1271_v18 }
 0x122   :  { %v1273_v60 = vpop.f32.mrf.mxu2  ;;  %v1239_v5 = vpop.f32.mrf.mxu0 }
 0x123   :  { %v1291_v63 = vpop.f32.mrf.mxu3  ;;  %v1257_v8 = vpop.f32.mrf.mxu1  ;;  %v1274_v17 = vadd.f32 %v1273_v60, %v1256_v62 }
 0x125   :  { %v1292_v22 = vadd.f32 %v1291_v63, %v1274_v17 }
 0x12a   :  { %v1275_v61 = vpop.f32.mrf.mxu2  ;;  %v1304_v13 = vpop.f32.mrf.mxu0 }
 0x12b   :  { %v1293_v12 = vpop.f32.mrf.mxu3  ;;  %v1305_v15 = vadd.f32 %v1304_v13, %v1287_v11  ;;  %v1322_v16 = vpop.f32.mrf.mxu1 }
 0x12d   :  { %v1323_v19 = vadd.f32 %v1322_v16, %v1305_v15 }
 0x12f   :  { %v1332_v21 = vmax.f32 %v1323_v19, 0.0 }
 0x131   :  { %v1337_v25 = vpack.c.bf16 %v1332_v21, %v1331_v20 }
 0x132   :  { %v1309_v26 = vpop.f32.mrf.mxu2  ;;  %v1306_v59 = vpop.f32.mrf.mxu0 }
 0x133   :  { %v1310_v29 = vadd.f32 %v1309_v26, %v1292_v22  ;;  %v1327_v52 = vpop.f32.mrf.mxu3  ;;  %1340 = vst [vmem:[%s2379_s3] sm:$0xff] %v1337_v25  ;;  %v1307_v4 = vadd.f32 %v1306_v59, %v1289_v24  ;;  %v1324_v48 = vpop.f32.mrf.mxu1 }
 0x135   :  { %v1328_v31 = vadd.f32 %v1327_v52, %v1310_v29  ;;  %v1325_v32 = vadd.f32 %v1324_v48, %v1307_v4 }
 0x137   :  { %v1336_v27 = vmax.f32 %v1328_v31, 0.0  ;;  %v1334_v54 = vmax.f32 %v1325_v32, 0.0 }
 0x139   :  { %v1339_v49 = vpack.c.bf16 %v1336_v27, %v1335_v47  ;;  %v1338_v33 = vpack.c.bf16 %v1334_v54, %v1333_v53 }
 0x13a   :  { %v1311_v34 = vpop.f32.mrf.mxu2 }
 0x13b   :  { %1342 = vst [vmem:[%s2379_s3 + $0x10] sm:$0x11] %v1339_v49  ;;  %v1329_v23 = vpop.f32.mrf.mxu3 }
 0x13c   :  { %1341 = vst [vmem:[%s2379_s3 + $0x8] sm:$0xff] %v1338_v33 }
 0x13d   :  { %1347 = vsyncpa [#allocation3], 1 }
 0x13e   :  { %1348 = vsyncpa [#allocation5], 1 }

// kernel: encoder_forward.9
= control target key start
LH: loop header
LB: loop body
LE: loop exit
PB: predicated region body
PF: predicated region fallthrough
CT: control target
= control target key end

     0   :  { %s17992_s0 = inlined_call_operand.vmem [shape: bf16[2,2304], index: 0, kind: input, shape index: {}]   ;;  %s17993_s1 = inlined_call_operand.hbm [shape: bf16[2304,4096], index: 1, kind: input, shape index: {}]   ;;  %s17994_s2 = inlined_call_operand.hbm [shape: f32[1,4096], index: 2, kind: input, shape index: {}]   ;;  %s17995_s3 = inlined_call_operand.hbm [shape: f32[2,4096], index: 3, kind: output, shape index: {}]  }
   0x1   :  { %17996 = sst [smem:[#allocation11_spill]] %s17993_s1 }
   0x2   :  { %8 = vsyncpa [#allocation3], 0 }
   0x3   :  { %10 = vsyncpa [#allocation3 + $0x1], 0 }
   0x4   :  { %11 = vsyncpa [#allocation6], 0 }
   0x5   :  { %13 = vsyncpa [#allocation6 + $0x1], 0 }
   0x6   :  { %14 = vsyncpa [#allocation4], 0 }
   0x7   :  { %16 = vsyncpa [#allocation4 + $0x1], 0  ;;  %s15226_s12 = smov 0   ;;  %s15228_s13 = smov 0  }
   0x8   :  { %s15230_s14 = smov 0   ;;  %s15232_s15 = smov 0  }
   0x9 LB: > { %s15247_s16 = sadd.s32 4294967295, %s15201_s15   ;;  %s9217_s17 = sadd.s32 4294967294, %s15201_s15   ;;  %s15201_s15 = sphi %s15232_s15, %s18006_s15   ;;  %s15197_s14 = sphi %s15230_s14, %s18005_s14   ;;  %s15193_s13 = sphi %s15228_s13, %s18004_s13   ;;  %s15189_s12 = sphi %s15226_s12, %s18003_s12  }
   0xa   : > { %s15251_s18 = sadd.s32 1, %s15201_s15   ;;  %s50_s19 = sadd.s32 1, %s15197_s14 }
   0xb   : > { %s47_s20 = ssub.s32 %s15201_s15, %s15251_s18  ;;  %p57_p0 = scmp.ne.s32.totalorder %s15197_s14, %s15193_s13 }
   0xc   : > { %p48_p1 = scmp.eq.s32.totalorder %s47_s20, 0  ;;  %p58_p2 = scmp.eq.s32.totalorder %s15201_s15, 0 }
   0xd   : > { %p63_p3 = scmp.ne.s32.totalorder %s15193_s13, %s15189_s12  ;;  %p64_p4 = scmp.eq.s32.totalorder %s15247_s16, 0 }
   0xe   : > { %s15263_s21 = scalar_select %p48_p1, %s15197_s14, %s50_s19  }
   0xf   : > { %p59_p5 = por %p58_p2, %p57_p0  ;;  %p15265_p6 = por %p64_p4, %p63_p3 }
  0x10   : > { %p113_p7 = scmp.eq.s32.totalorder %s15247_s16, 3  ;;  %p119_p8 = scmp.eq.s32.totalorder %s9217_s17, 3 }
  0x11   : > { %p15013_p9 = scmp.lt.s32.totalorder %s15201_s15, 4  ;;  %s15280_s25 = sand.u32 1, %s15197_s14  }
  0x12   : > { %p15271_p10 = por %p113_p7, %p57_p0  ;;  %p15275_p11 = por %p119_p8, %p63_p3 }
  0x13   : > { %s13840_s26 = sshll.u32 %s15201_s15, 5  ;;  %s14994_s27 = smul.u32 9216, %s15280_s25 }
  0x14   : > { %s18000_s1 = sld [smem:[#allocation11_spill]]  ;;  %p15287_p12 = pnand %p15013_p9, %p59_p5 }
  0x15   : > { %s146_s6 = scalar_lea.vmem [#allocation2], %s14994_s27  ;;  %p9224_p13 = scmp.ge.s32.totalorder %s15201_s15, 1 }
  0x16   : > { %s154_s7 = sshll.u32 %s146_s6, 4  ;;  %s143_s8 = scalar_lea.sflag [#allocation3], %s15280_s25  ;;  %s155_s7 = int_to_ptr.vmem [resolvable:$true] %s154_s7 }
  0x17   : > { %p15075_p1 = pneg %p15287_p12 }
  0x1a   : > { %s151_s30 = scalar_lea.hbm %s18000_s1, %s13840_s26  ;;  %s15078_s19 = scalar_lea.hbm %s18000_s1, 36864 }
  0x1b   : > { %s152_s5 = sshll.u32 %s151_s30, 4  ;;  %s153_s5 = int_to_ptr.hbm [resolvable:$true] %s152_s5 }
  0x1c   : > { %s15071_s9 = sshra.s32 %s153_s5, 4  ;;  %s15072_s9 = int_to_ptr.hbm [resolvable:$true] %s15071_s9 }
  0x1d   : > { %s15073_s10 = scalar_lea.hbm %s15072_s9, 9216  ;;  %p15079_p4 = scmp.lt.s32.totalorder %s15072_s9, %s18000_s1 }
  0x1e   : > { %p15074_p0 = scmp.ne.s32.totalorder %s15072_s9, %s15073_s10  ;;  %p15080_p5 = scmp.lt.s32.totalorder %s15078_s19, %s15073_s10 }
  0x20   : > { %p15076_p2 = pnand %p15075_p1, %p15074_p0  ;;  %p15081_p7 = por %p15080_p5, %p15079_p4 }
  0x22   : > { %p15077_p3 = pneg %p15076_p2 }
  0x24   : > { %p15082_p8 = pnand %p15081_p7, %p15077_p3 }
  0x26   : > { %15085 = shalt.err (!%p15082_p8)
}
  0x27   : > { %s15203_s27 = smov 2048   ;;  %s15204_s28 = smov 512  }
  0x28   : > { %s15205_s29 = smov 32   ;;  %p181_p9 = scmp.lt.s32.totalorder %s15201_s15, 5 }
  0x29   : > { %15005 = dma.hbm_to_vmem [thread:$0]  (!%p15287_p12), %s153_s5, 147456, %s155_s7, %s143_s8, %s15203_s27, %s15204_s28, %s15205_s29  }
  0x2a   : > { %s9222_s30 = sshll.u32 %s15280_s25, 3  ;;  %s9223_s6 = sshll.u32 %s15201_s15, 3 }
  0x2b   : > { %p15311_p0 = pnand %p9224_p13, %p181_p9  ;;  %s172_s17 = scalar_lea.hbm %s17994_s2, %s9223_s6 }
  0x2c   : > { %s168_s19 = scalar_lea.vmem [#allocation5], %s9222_s30  ;;  %s174_s26 = sshll.u32 %s172_s17, 4  ;;  %s175_s26 = int_to_ptr.hbm [resolvable:$true] %s174_s26 }
  0x2d   : > { %s176_s20 = sshll.u32 %s168_s19, 4  ;;  %s165_s1 = scalar_lea.sflag [#allocation6], %s15280_s25  ;;  %s177_s20 = int_to_ptr.vmem [resolvable:$true] %s176_s20 }
  0x2e   : > { %s15101_s5 = sshra.s32 %s175_s26, 4  ;;  %s15108_s28 = scalar_lea.hbm %s17994_s2, 32  ;;  %s15102_s5 = int_to_ptr.hbm [resolvable:$true] %s15101_s5 }
  0x2f   : > { %s15103_s7 = scalar_lea.hbm %s15102_s5, 8  ;;  %p15109_p4 = scmp.lt.s32.totalorder %s15102_s5, %s17994_s2 }
  0x30   : > { %p15104_p2 = scmp.ne.s32.totalorder %s15102_s5, %s15103_s7  ;;  %p15110_p5 = scmp.lt.s32.totalorder %s15108_s28, %s15103_s7 }
  0x32   : > { %p15106_p13 = pnand %p15104_p2, %p15075_p1  ;;  %p15111_p7 = por %p15110_p5, %p15109_p4 }
  0x34   : > { %p15107_p3 = pneg %p15106_p13 }
  0x36   : > { %p15112_p8 = pnand %p15111_p7, %p15107_p3 }
  0x38   : > { %15115 = shalt.err (!%p15112_p8)
}
  0x39   : > { %15008 = dma.hbm_to_vmem [thread:$0]  (!%p15287_p12), %s175_s26, 128, %s177_s20, %s165_s1  }
  0x3a   : > { %185 = sbr.rel (%p15311_p0) target bundleno = 2244 (0x8c4), region = 32  ;;  %s15333_s25 = sand.u32 (!%p15311_p0), 1, %s15193_s13  }
  0x3b   : > { %s14995_s30 = smul.u32 (!%p15311_p0), 9216, %s15333_s25  ;;  %s188_s10 = scalar_lea.sflag (!%p15311_p0), [#allocation3], %s15333_s25 }
  0x3d   : > { %s15337_s11 = scalar_lea.vmem (!%p15311_p0), [#allocation2], %s14995_s30 }
  0x3f   : > { %15176 = dma.done.wait (%p15265_p6), %s188_s10, 147456  }
  0x40   : > { %15178 = vsyncadd (%p15265_p6), %s188_s10, 4294819840  ;;  %s9225_s1 = sshll.u32 %s15333_s25, 3  ;;  %s198_s4 = scalar_lea.sflag [#allocation6], %s15333_s25 }
  0x41   : > { %s15345_s9 = scalar_lea.vmem [#allocation5], %s9225_s1 }
  0x42   : > { %15180 = dma.done.wait (%p15265_p6), %s198_s4, 128  }
  0x43   : > { %15182 = vsyncadd (%p15265_p6), %s198_s4, 4294967168  ;;  %v9453_v0 = vld [vmem:[%s15337_s11 + $0x1c0] sm:$0xf]  ;;  %vm9094_vm0 = vcmask 1041408   ;;  %vm9096_vm1 = vcmask 1045508   ;;  %s9226_s7 = sshll.u32 %s15333_s25, 4 }
  0x44   : > { %v13901_v1 = vld [vmem:[%s15337_s11 + $0x1dc] sm:$0xf0]  ;;  %vm9098_vm2 = vcmask 1043456   ;;  %s17029_s8 = scalar_lea.vmem [#allocation7], %s9226_s7  ;;  %s14993_s27 = sshll.u32 %s15247_s16, 4 }
  0x45   : > { %v9709_v2 = vld [vmem:[%s15337_s11 + $0x3c0] sm:$0xf]  ;;  %v9454_v3 = vor.u32 %v13901_v1, %v9453_v0  ;;  %s9119_s6 = scalar_lea.hbm %s17995_s3, %s14993_s27  ;;  %s9121_s30 = sshll.u32 %s17029_s8, 4  ;;  %s9122_s30 = int_to_ptr.vmem [resolvable:$true] %s9121_s30 }
  0x46   : > { %v13965_v4 = vld [vmem:[%s15337_s11 + $0x3dc] sm:$0xf0]  ;;  %s9123_s10 = sshll.u32 %s9119_s6, 4  ;;  %s9108_s16 = scalar_lea.sflag [#allocation4], %s15333_s25  ;;  %s9124_s10 = int_to_ptr.hbm [resolvable:$true] %s9123_s10 }
  0x47   : > { %v9965_v5 = vld [vmem:[%s15337_s11 + $0x5c0] sm:$0xf]  ;;  %v9710_v7 = vor.u32 %v13965_v4, %v9709_v2  ;;  %7208 = vmatpush.bf16.msra.mxu0 %v9454_v3  ;;  %s15151_s22 = scalar_lea.hbm %s17995_s3, 64 }
  0x48   : > { %v14029_v6 = vld [vmem:[%s15337_s11 + $0x5dc] sm:$0xf0] }
  0x49   : > { %v9966_v8 = vor.u32 %v14029_v6, %v9965_v5  ;;  %v10221_v9 = vld [vmem:[%s15337_s11 + $0x7c0] sm:$0xf]  ;;  %7221 = vmatpush.bf16.msra.mxu1 %v9710_v7 }
  0x4a   : > { %v14093_v10 = vld [vmem:[%s15337_s11 + $0x7dc] sm:$0xf0] }
  0x4b   : > { %v9421_v11 = vld [vmem:[%s15337_s11 + $0x180] sm:$0xf]  ;;  %v10222_v12 = vor.u32 %v14093_v10, %v10221_v9  ;;  %7234 = vmatpush.bf16.msra.mxu2 %v9966_v8 }
  0x4c   : > { %v13893_v13 = vld [vmem:[%s15337_s11 + $0x19c] sm:$0xf0] }
  0x4d   : > { %v9677_v14 = vld [vmem:[%s15337_s11 + $0x380] sm:$0xf]  ;;  %v9422_v16 = vor.u32 %v13893_v13, %v9421_v11  ;;  %7247 = vmatpush.bf16.msra.mxu3 %v10222_v12 }
  0x4e   : > { %v13957_v15 = vld [vmem:[%s15337_s11 + $0x39c] sm:$0xf0] }
  0x4f   : > { %v9678_v17 = vor.u32 %v13957_v15, %v9677_v14  ;;  %v9933_v18 = vld [vmem:[%s15337_s11 + $0x580] sm:$0xf]  ;;  %7209 = vmatpush.bf16.msra.mxu0 %v9422_v16 }
  0x50   : > { %v14021_v19 = vld [vmem:[%s15337_s11 + $0x59c] sm:$0xf0] }
  0x51   : > { %v10189_v20 = vld [vmem:[%s15337_s11 + $0x780] sm:$0xf]  ;;  %v9934_v21 = vor.u32 %v14021_v19, %v9933_v18  ;;  %7222 = vmatpush.bf16.msra.mxu1 %v9678_v17 }
  0x52   : > { %v14085_v22 = vld [vmem:[%s15337_s11 + $0x79c] sm:$0xf0] }
  0x53   : > { %v9389_v23 = vld [vmem:[%s15337_s11 + $0x140] sm:$0xf]  ;;  %v10190_v25 = vor.u32 %v14085_v22, %v10189_v20  ;;  %7235 = vmatpush.bf16.msra.mxu2 %v9934_v21 }
  0x54   : > { %v13885_v24 = vld [vmem:[%s15337_s11 + $0x15c] sm:$0xf0] }
  0x55   : > { %v9645_v26 = vld [vmem:[%s15337_s11 + $0x340] sm:$0xf]  ;;  %v9390_v29 = vor.u32 %v13885_v24, %v9389_v23  ;;  %7248 = vmatpush.bf16.msra.mxu3 %v10190_v25 }
  0x56   : > { %v13949_v27 = vld [vmem:[%s15337_s11 + $0x35c] sm:$0xf0] }
  0x57   : > { %v9901_v28 = vld [vmem:[%s15337_s11 + $0x540] sm:$0xf]  ;;  %v9646_v33 = vor.u32 %v13949_v27, %v9645_v26  ;;  %7210 = vmatpush.bf16.msra.mxu0 %v9390_v29 }
  0x58   : > { %v14013_v30 = vld [vmem:[%s15337_s11 + $0x55c] sm:$0xf0] }
  0x59   : > { %v10157_v31 = vld [vmem:[%s15337_s11 + $0x740] sm:$0xf]  ;;  %v9902_v34 = vor.u32 %v14013_v30, %v9901_v28  ;;  %7223 = vmatpush.bf16.msra.mxu1 %v9646_v33 }
  0x5a   : > { %v14077_v32 = vld [vmem:[%s15337_s11 + $0x75c] sm:$0xf0] }
  0x5b   : > { %v9357_v35 = vld [vmem:[%s15337_s11 + $0x100] sm:$0xf]  ;;  %v10158_v38 = vor.u32 %v14077_v32, %v10157_v31  ;;  %7236 = vmatpush.bf16.msra.mxu2 %v9902_v34 }
  0x5c   : > { %v13877_v36 = vld [vmem:[%s15337_s11 + $0x11c] sm:$0xf0] }
  0x5d   : > { %v9613_v37 = vld [vmem:[%s15337_s11 + $0x300] sm:$0xf]  ;;  %v9358_v44 = vor.u32 %v13877_v36, %v9357_v35  ;;  %7249 = vmatpush.bf16.msra.mxu3 %v10158_v38 }
  0x5e   : > { %v13941_v39 = vld [vmem:[%s15337_s11 + $0x31c] sm:$0xf0] }
  0x5f   : > { %v9869_v40 = vld [vmem:[%s15337_s11 + $0x500] sm:$0xf]  ;;  %v9614_v45 = vor.u32 %v13941_v39, %v9613_v37  ;;  %7211 = vmatpush.bf16.msra.mxu0 %v9358_v44 }
  0x60   : > { %v14005_v41 = vld [vmem:[%s15337_s11 + $0x51c] sm:$0xf0] }
  0x61   : > { %v10125_v42 = vld [vmem:[%s15337_s11 + $0x700] sm:$0xf]  ;;  %v9870_v46 = vor.u32 %v14005_v41, %v9869_v40  ;;  %7224 = vmatpush.bf16.msra.mxu1 %v9614_v45 }
  0x62   : > { %v14069_v43 = vld [vmem:[%s15337_s11 + $0x71c] sm:$0xf0] }
  0x63   : > { %v9325_v47 = vld [vmem:[%s15337_s11 + $0xc0] sm:$0xf]  ;;  %v10126_v50 = vor.u32 %v14069_v43, %v10125_v42  ;;  %7237 = vmatpush.bf16.msra.mxu2 %v9870_v46 }
  0x64   : > { %v13869_v48 = vld [vmem:[%s15337_s11 + $0xdc] sm:$0xf0] }
  0x65   : > { %v9581_v49 = vld [vmem:[%s15337_s11 + $0x2c0] sm:$0xf]  ;;  %v9326_v56 = vor.u32 %v13869_v48, %v9325_v47  ;;  %7250 = vmatpush.bf16.msra.mxu3 %v10126_v50 }
  0x66   : > { %v13933_v51 = vld [vmem:[%s15337_s11 + $0x2dc] sm:$0xf0] }
  0x67   : > { %v9837_v52 = vld [vmem:[%s15337_s11 + $0x4c0] sm:$0xf]  ;;  %v9582_v57 = vor.u32 %v13933_v51, %v9581_v49  ;;  %7212 = vmatpush.bf16.msra.mxu0 %v9326_v56 }
  0x68   : > { %v13997_v53 = vld [vmem:[%s15337_s11 + $0x4dc] sm:$0xf0] }
  0x69   : > { %v10093_v54 = vld [vmem:[%s15337_s11 + $0x6c0] sm:$0xf]  ;;  %v9838_v58 = vor.u32 %v13997_v53, %v9837_v52  ;;  %7225 = vmatpush.bf16.msra.mxu1 %v9582_v57 }
  0x6a   : > { %v14061_v55 = vld [vmem:[%s15337_s11 + $0x6dc] sm:$0xf0] }
  0x6b   : > { %v9293_v59 = vld [vmem:[%s15337_s11 + $0x80] sm:$0xf]  ;;  %v10094_v62 = vor.u32 %v14061_v55, %v10093_v54  ;;  %7238 = vmatpush.bf16.msra.mxu2 %v9838_v58 }
  0x6c   : > { %v13861_v60 = vld [vmem:[%s15337_s11 + $0x9c] sm:$0xf0] }
  0x6d   : > { %v9549_v61 = vld [vmem:[%s15337_s11 + $0x280] sm:$0xf]  ;;  %v9294_v4 = vor.u32 %v13861_v60, %v9293_v59  ;;  %7251 = vmatpush.bf16.msra.mxu3 %v10094_v62 }
  0x6e   : > { %v13925_v63 = vld [vmem:[%s15337_s11 + $0x29c] sm:$0xf0] }
  0x6f   : > { %v9805_v0 = vld [vmem:[%s15337_s11 + $0x480] sm:$0xf]  ;;  %v9550_v5 = vor.u32 %v13925_v63, %v9549_v61  ;;  %7213 = vmatpush.bf16.msra.mxu0 %v9294_v4 }
  0x70   : > { %v13989_v1 = vld [vmem:[%s15337_s11 + $0x49c] sm:$0xf0] }
  0x71   : > { %v10061_v2 = vld [vmem:[%s15337_s11 + $0x680] sm:$0xf]  ;;  %v9806_v6 = vor.u32 %v13989_v1, %v9805_v0  ;;  %7226 = vmatpush.bf16.msra.mxu1 %v9550_v5 }
  0x72   : > { %v14053_v3 = vld [vmem:[%s15337_s11 + $0x69c] sm:$0xf0] }
  0x73   : > { %v9261_v7 = vld [vmem:[%s15337_s11 + $0x40] sm:$0xf]  ;;  %v10062_v10 = vor.u32 %v14053_v3, %v10061_v2  ;;  %7239 = vmatpush.bf16.msra.mxu2 %v9806_v6  ;;  %v233_v2 = vld [vmem:[%s17992_s0] sm:$0xff] }
  0x74   : > { %v13853_v8 = vld [vmem:[%s15337_s11 + $0x5c] sm:$0xf0]  ;;  %1407 = vst [vmem:[#allocation1] ss:$9 sm:$0xff] %v233_v2 }
  0x75   : > { %v9517_v9 = vld [vmem:[%s15337_s11 + $0x240] sm:$0xf]  ;;  %v9262_v16 = vor.u32 %v13853_v8, %v9261_v7  ;;  %7252 = vmatpush.bf16.msra.mxu3 %v10062_v10 }
  0x76   : > { %v13917_v11 = vld [vmem:[%s15337_s11 + $0x25c] sm:$0xf0] }
  0x77   : > { %v9773_v12 = vld [vmem:[%s15337_s11 + $0x440] sm:$0xf]  ;;  %v9518_v19 = vor.u32 %v13917_v11, %v9517_v9  ;;  %7214 = vmatpush.bf16.msra.mxu0 %v9262_v16 }
  0x78   : > { %v13981_v13 = vld [vmem:[%s15337_s11 + $0x45c] sm:$0xf0] }
  0x79   : > { %v10029_v14 = vld [vmem:[%s15337_s11 + $0x640] sm:$0xf]  ;;  %v9774_v20 = vor.u32 %v13981_v13, %v9773_v12  ;;  %7227 = vmatpush.bf16.msra.mxu1 %v9518_v19 }
  0x7a   : > { %v14045_v15 = vld [vmem:[%s15337_s11 + $0x65c] sm:$0xf0] }
  0x7b   : > { %v9229_v17 = vld [vmem:[%s15337_s11] sm:$0xf]  ;;  %v10030_v24 = vor.u32 %v14045_v15, %v10029_v14  ;;  %7240 = vmatpush.bf16.msra.mxu2 %v9774_v20 }
  0x7c   : > { %v13845_v18 = vld [vmem:[%s15337_s11 + $0x1c] sm:$0xf0] }
  0x7d   : > { %v9485_v21 = vld [vmem:[%s15337_s11 + $0x200] sm:$0xf]  ;;  %v9230_v31 = vor.u32 %v13845_v18, %v9229_v17  ;;  %7253 = vmatpush.bf16.msra.mxu3 %v10030_v24 }
  0x7e   : > { %v13909_v22 = vld [vmem:[%s15337_s11 + $0x21c] sm:$0xf0] }
  0x7f   : > { %v9741_v23 = vld [vmem:[%s15337_s11 + $0x400] sm:$0xf]  ;;  %v9486_v35 = vor.u32 %v13909_v22, %v9485_v21  ;;  %7215 = vmatpush.bf16.msra.mxu0 %v9230_v31 }
  0x80   : > { %v13973_v25 = vld [vmem:[%s15337_s11 + $0x41c] sm:$0xf0] }
  0x81   : > { %v9997_v26 = vld [vmem:[%s15337_s11 + $0x600] sm:$0xf]  ;;  %v9742_v36 = vor.u32 %v13973_v25, %v9741_v23  ;;  %7228 = vmatpush.bf16.msra.mxu1 %v9486_v35 }
  0x82   : > { %v14037_v27 = vld [vmem:[%s15337_s11 + $0x61c] sm:$0xf0] }
  0x83   : > { %v10477_v28 = vld [vmem:[%s15337_s11 + $0x9c0] sm:$0xf]  ;;  %v9998_v39 = vor.u32 %v14037_v27, %v9997_v26  ;;  %7241 = vmatpush.bf16.msra.mxu2 %v9742_v36  ;;  %v15459_v27 = vld [vmem:[#allocation1 + $0x12] sm:$0xff] }
  0x84   : > { %v14157_v29 = vld [vmem:[%s15337_s11 + $0x9dc] sm:$0xf0] }
  0x85   : > { %v10733_v30 = vld [vmem:[%s15337_s11 + $0xbc0] sm:$0xf]  ;;  %v10478_v40 = vor.u32 %v14157_v29, %v10477_v28  ;;  %7254 = vmatpush.bf16.msra.mxu3 %v9998_v39  ;;  %v15461_v28 = vld [vmem:[#allocation1] sm:$0xff] }
  0x86   : > { %v14221_v32 = vld [vmem:[%s15337_s11 + $0xbdc] sm:$0xf0]  ;;  %v15463_v29 = vld [vmem:[#allocation1 + $0x1b] sm:$0xff]  ;;  %7242 = vmatmul.bf16.vlgmr.msra.gmra.mxu2 %v15459_v27  ;;  %7216 = vmatmul.bf16.vlgmr.msra.gmra.mxu0 %v15461_v28 }
  0x87   : > { %v10989_v33 = vld [vmem:[%s15337_s11 + $0xdc0] sm:$0xf]  ;;  %v10734_v41 = vor.u32 %v14221_v32, %v10733_v30  ;;  %7260 = vmatpush.bf16.msrb.mxu0 %v10478_v40 }
  0x88   : > { %v14285_v34 = vld [vmem:[%s15337_s11 + $0xddc] sm:$0xf0]  ;;  %7255 = vmatmul.bf16.vlgmr.msra.gmra.mxu3 %v15463_v29 }
  0x89   : > { %v11245_v37 = vld [vmem:[%s15337_s11 + $0xfc0] sm:$0xf]  ;;  %v10990_v42 = vor.u32 %v14285_v34, %v10989_v33  ;;  %7273 = vmatpush.bf16.msrb.mxu1 %v10734_v41 }
  0x8a   : > { %v14349_v38 = vld [vmem:[%s15337_s11 + $0xfdc] sm:$0xf0] }
  0x8b   : > { %v10445_v43 = vld [vmem:[%s15337_s11 + $0x980] sm:$0xf]  ;;  %v11246_v46 = vor.u32 %v14349_v38, %v11245_v37  ;;  %7286 = vmatpush.bf16.msrb.mxu2 %v10990_v42 }
  0x8c   : > { %v14149_v44 = vld [vmem:[%s15337_s11 + $0x99c] sm:$0xf0] }
  0x8d   : > { %v10701_v45 = vld [vmem:[%s15337_s11 + $0xb80] sm:$0xf]  ;;  %v10446_v52 = vor.u32 %v14149_v44, %v10445_v43  ;;  %7299 = vmatpush.bf16.msrb.mxu3 %v11246_v46 }
  0x8e   : > { %v14213_v47 = vld [vmem:[%s15337_s11 + $0xb9c] sm:$0xf0] }
  0x8f   : > { %v10957_v48 = vld [vmem:[%s15337_s11 + $0xd80] sm:$0xf]  ;;  %v10702_v53 = vor.u32 %v14213_v47, %v10701_v45  ;;  %7261 = vmatpush.bf16.msrb.mxu0 %v10446_v52 }
  0x90   : > { %v14277_v49 = vld [vmem:[%s15337_s11 + $0xd9c] sm:$0xf0] }
  0x91   : > { %v11213_v50 = vld [vmem:[%s15337_s11 + $0xf80] sm:$0xf]  ;;  %v10958_v54 = vor.u32 %v14277_v49, %v10957_v48  ;;  %7274 = vmatpush.bf16.msrb.mxu1 %v10702_v53 }
  0x92   : > { %v14341_v51 = vld [vmem:[%s15337_s11 + $0xf9c] sm:$0xf0] }
  0x93   : > { %v10413_v55 = vld [vmem:[%s15337_s11 + $0x940] sm:$0xf]  ;;  %v11214_v58 = vor.u32 %v14341_v51, %v11213_v50  ;;  %7287 = vmatpush.bf16.msrb.mxu2 %v10958_v54 }
  0x94   : > { %v14141_v56 = vld [vmem:[%s15337_s11 + $0x95c] sm:$0xf0] }
  0x95   : > { %v10669_v57 = vld [vmem:[%s15337_s11 + $0xb40] sm:$0xf]  ;;  %v10414_v0 = vor.u32 %v14141_v56, %v10413_v55  ;;  %7300 = vmatpush.bf16.msrb.mxu3 %v11214_v58 }
  0x96   : > { %v14205_v59 = vld [vmem:[%s15337_s11 + $0xb5c] sm:$0xf0] }
  0x97   : > { %v10925_v60 = vld [vmem:[%s15337_s11 + $0xd40] sm:$0xf]  ;;  %v10670_v3 = vor.u32 %v14205_v59, %v10669_v57  ;;  %7262 = vmatpush.bf16.msrb.mxu0 %v10414_v0 }
  0x98   : > { %v14269_v61 = vld [vmem:[%s15337_s11 + $0xd5c] sm:$0xf0] }
  0x99   : > { %v11181_v62 = vld [vmem:[%s15337_s11 + $0xf40] sm:$0xf]  ;;  %v10926_v4 = vor.u32 %v14269_v61, %v10925_v60  ;;  %7275 = vmatpush.bf16.msrb.mxu1 %v10670_v3 }
  0x9a   : > { %v14333_v63 = vld [vmem:[%s15337_s11 + $0xf5c] sm:$0xf0] }
  0x9b   : > { %v10381_v1 = vld [vmem:[%s15337_s11 + $0x900] sm:$0xf]  ;;  %v11182_v7 = vor.u32 %v14333_v63, %v11181_v62  ;;  %7288 = vmatpush.bf16.msrb.mxu2 %v10926_v4 }
  0x9c   : > { %v14133_v5 = vld [vmem:[%s15337_s11 + $0x91c] sm:$0xf0] }
  0x9d   : > { %v10637_v6 = vld [vmem:[%s15337_s11 + $0xb00] sm:$0xf]  ;;  %v10382_v13 = vor.u32 %v14133_v5, %v10381_v1  ;;  %7301 = vmatpush.bf16.msrb.mxu3 %v11182_v7 }
  0x9e   : > { %v14197_v8 = vld [vmem:[%s15337_s11 + $0xb1c] sm:$0xf0] }
  0x9f   : > { %v10893_v9 = vld [vmem:[%s15337_s11 + $0xd00] sm:$0xf]  ;;  %v10638_v14 = vor.u32 %v14197_v8, %v10637_v6  ;;  %7263 = vmatpush.bf16.msrb.mxu0 %v10382_v13 }
  0xa0   : > { %v14261_v10 = vld [vmem:[%s15337_s11 + $0xd1c] sm:$0xf0] }
  0xa1   : > { %v11149_v11 = vld [vmem:[%s15337_s11 + $0xf00] sm:$0xf]  ;;  %v10894_v15 = vor.u32 %v14261_v10, %v10893_v9  ;;  %7276 = vmatpush.bf16.msrb.mxu1 %v10638_v14 }
  0xa2   : > { %v14325_v12 = vld [vmem:[%s15337_s11 + $0xf1c] sm:$0xf0] }
  0xa3   : > { %v10349_v16 = vld [vmem:[%s15337_s11 + $0x8c0] sm:$0xf]  ;;  %v11150_v19 = vor.u32 %v14325_v12, %v11149_v11  ;;  %7289 = vmatpush.bf16.msrb.mxu2 %v10894_v15 }
  0xa4   : > { %v14125_v17 = vld [vmem:[%s15337_s11 + $0x8dc] sm:$0xf0] }
  0xa5   : > { %v10605_v18 = vld [vmem:[%s15337_s11 + $0xac0] sm:$0xf]  ;;  %v10350_v26 = vor.u32 %v14125_v17, %v10349_v16  ;;  %7302 = vmatpush.bf16.msrb.mxu3 %v11150_v19 }
  0xa6   : > { %v14189_v20 = vld [vmem:[%s15337_s11 + $0xadc] sm:$0xf0] }
  0xa7   : > { %v10861_v21 = vld [vmem:[%s15337_s11 + $0xcc0] sm:$0xf]  ;;  %v10606_v30 = vor.u32 %v14189_v20, %v10605_v18  ;;  %7264 = vmatpush.bf16.msrb.mxu0 %v10350_v26 }
  0xa8   : > { %v14253_v22 = vld [vmem:[%s15337_s11 + $0xcdc] sm:$0xf0] }
  0xa9   : > { %v11117_v23 = vld [vmem:[%s15337_s11 + $0xec0] sm:$0xf]  ;;  %v10862_v31 = vor.u32 %v14253_v22, %v10861_v21  ;;  %7277 = vmatpush.bf16.msrb.mxu1 %v10606_v30 }
  0xaa   : > { %v14317_v24 = vld [vmem:[%s15337_s11 + $0xedc] sm:$0xf0] }
  0xab   : > { %v10317_v25 = vld [vmem:[%s15337_s11 + $0x880] sm:$0xf]  ;;  %v11118_v35 = vor.u32 %v14317_v24, %v11117_v23  ;;  %7290 = vmatpush.bf16.msrb.mxu2 %v10862_v31 }
  0xac   : > { %v14117_v32 = vld [vmem:[%s15337_s11 + $0x89c] sm:$0xf0] }
  0xad   : > { %v10573_v33 = vld [vmem:[%s15337_s11 + $0xa80] sm:$0xf]  ;;  %v10318_v41 = vor.u32 %v14117_v32, %v10317_v25  ;;  %7303 = vmatpush.bf16.msrb.mxu3 %v11118_v35  ;;  %v15510_v25 = vld [vmem:[#allocation1 + $0x36] sm:$0xff]  ;;  %v15515_v32 = vld [vmem:[#allocation1 + $0x3f] sm:$0xff] }
  0xae   : > { %v15467_v34 = vld [vmem:[#allocation1 + $0x9] sm:$0xff] }
  0xaf   : > { %v14181_v36 = vld [vmem:[%s15337_s11 + $0xa9c] sm:$0xf0]  ;;  %7229 = vmatmul.bf16.vlgmr.msra.gmra.mxu1 %v15467_v34  ;;  %7265 = vmatpush.bf16.msrb.mxu0 %v10318_v41 }
  0xb0   : > { %v10829_v37 = vld [vmem:[%s15337_s11 + $0xc80] sm:$0xf]  ;;  %v10574_v42 = vor.u32 %v14181_v36, %v10573_v33 }
  0xb1   : > { %v14245_v38 = vld [vmem:[%s15337_s11 + $0xc9c] sm:$0xf0] }
  0xb2   : > { %v11085_v39 = vld [vmem:[%s15337_s11 + $0xe80] sm:$0xf]  ;;  %v10830_v43 = vor.u32 %v14245_v38, %v10829_v37  ;;  %7278 = vmatpush.bf16.msrb.mxu1 %v10574_v42  ;;  %v15519_v38 = vld [vmem:[#allocation1 + $0x2d] sm:$0xff] }
  0xb3   : > { %v14309_v40 = vld [vmem:[%s15337_s11 + $0xe9c] sm:$0xf0] }
  0xb4   : > { %v10285_v44 = vld [vmem:[%s15337_s11 + $0x840] sm:$0xf]  ;;  %v11086_v47 = vor.u32 %v14309_v40, %v11085_v39  ;;  %7291 = vmatpush.bf16.msrb.mxu2 %v10830_v43 }
  0xb5   : > { %v14109_v45 = vld [vmem:[%s15337_s11 + $0x85c] sm:$0xf0] }
  0xb6   : > { %v10541_v46 = vld [vmem:[%s15337_s11 + $0xa40] sm:$0xf]  ;;  %v10286_v53 = vor.u32 %v14109_v45, %v10285_v44  ;;  %7304 = vmatpush.bf16.msrb.mxu3 %v11086_v47 }
  0xb7   : > { %v14173_v48 = vld [vmem:[%s15337_s11 + $0xa5c] sm:$0xf0] }
  0xb8   : > { %v10797_v49 = vld [vmem:[%s15337_s11 + $0xc40] sm:$0xf]  ;;  %v10542_v56 = vor.u32 %v14173_v48, %v10541_v46  ;;  %7266 = vmatpush.bf16.msrb.mxu0 %v10286_v53 }
  0xb9   : > { %v14237_v50 = vld [vmem:[%s15337_s11 + $0xc5c] sm:$0xf0] }
  0xba   : > { %v11053_v51 = vld [vmem:[%s15337_s11 + $0xe40] sm:$0xf]  ;;  %v10798_v57 = vor.u32 %v14237_v50, %v10797_v49  ;;  %7279 = vmatpush.bf16.msrb.mxu1 %v10542_v56 }
  0xbb   : > { %v14301_v52 = vld [vmem:[%s15337_s11 + $0xe5c] sm:$0xf0] }
  0xbc   : > { %v10253_v54 = vld [vmem:[%s15337_s11 + $0x800] sm:$0xf]  ;;  %v11054_v61 = vor.u32 %v14301_v52, %v11053_v51  ;;  %7292 = vmatpush.bf16.msrb.mxu2 %v10798_v57 }
  0xbd   : > { %v14101_v55 = vld [vmem:[%s15337_s11 + $0x81c] sm:$0xf0] }
  0xbe   : > { %v10509_v58 = vld [vmem:[%s15337_s11 + $0xa00] sm:$0xf]  ;;  %v10254_v4 = vor.u32 %v14101_v55, %v10253_v54  ;;  %7305 = vmatpush.bf16.msrb.mxu3 %v11054_v61 }
  0xbf   : > { %v14165_v59 = vld [vmem:[%s15337_s11 + $0xa1c] sm:$0xf0] }
  0xc0   : > { %v10765_v60 = vld [vmem:[%s15337_s11 + $0xc00] sm:$0xf]  ;;  %v10510_v8 = vor.u32 %v14165_v59, %v10509_v58  ;;  %7267 = vmatpush.bf16.msrb.mxu0 %v10254_v4 }
  0xc1   : > { %v14229_v62 = vld [vmem:[%s15337_s11 + $0xc1c] sm:$0xf0] }
  0xc2   : > { %v11021_v63 = vld [vmem:[%s15337_s11 + $0xe00] sm:$0xf]  ;;  %v10766_v9 = vor.u32 %v14229_v62, %v10765_v60  ;;  %7280 = vmatpush.bf16.msrb.mxu1 %v10510_v8 }
  0xc3   : > { %v14293_v0 = vld [vmem:[%s15337_s11 + $0xe1c] sm:$0xf0] }
  0xc4   : > { %v11501_v1 = vld [vmem:[%s15337_s11 + $0x11c0] sm:$0xf]  ;;  %v11022_v12 = vor.u32 %v14293_v0, %v11021_v63  ;;  %7293 = vmatpush.bf16.msrb.mxu2 %v10766_v9 }
  0xc5   : > { %v14413_v2 = vld [vmem:[%s15337_s11 + $0x11dc] sm:$0xf0]  ;;  %7281 = vmatmul.bf16.vlgmr.msrb.gmra.mxu1 %v15519_v38 }
  0xc6   : > { %v11757_v3 = vld [vmem:[%s15337_s11 + $0x13c0] sm:$0xf]  ;;  %v11502_v13 = vor.u32 %v14413_v2, %v11501_v1  ;;  %7306 = vmatpush.bf16.msrb.mxu3 %v11022_v12 }
  0xc7   : > { %v14477_v5 = vld [vmem:[%s15337_s11 + $0x13dc] sm:$0xf0]  ;;  %7294 = vmatmul.bf16.vlgmr.msrb.gmra.mxu2 %v15510_v25 }
  0xc8   : > { %v12013_v6 = vld [vmem:[%s15337_s11 + $0x15c0] sm:$0xf]  ;;  %v11758_v14 = vor.u32 %v14477_v5, %v11757_v3  ;;  %7312 = vmatpush.bf16.msra.mxu0 %v11502_v13 }
  0xc9   : > { %v14541_v7 = vld [vmem:[%s15337_s11 + $0x15dc] sm:$0xf0]  ;;  %7307 = vmatmul.bf16.vlgmr.msrb.gmra.mxu3 %v15515_v32 }
  0xca   : > { %v12269_v10 = vld [vmem:[%s15337_s11 + $0x17c0] sm:$0xf]  ;;  %v12014_v15 = vor.u32 %v14541_v7, %v12013_v6  ;;  %7325 = vmatpush.bf16.msra.mxu1 %v11758_v14 }
  0xcb   : > { %v14605_v11 = vld [vmem:[%s15337_s11 + $0x17dc] sm:$0xf0] }
  0xcc   : > { %v11469_v16 = vld [vmem:[%s15337_s11 + $0x1180] sm:$0xf]  ;;  %v12270_v19 = vor.u32 %v14605_v11, %v12269_v10  ;;  %7338 = vmatpush.bf16.msra.mxu2 %v12014_v15 }
  0xcd   : > { %v14405_v17 = vld [vmem:[%s15337_s11 + $0x119c] sm:$0xf0] }
  0xce   : > { %v11725_v18 = vld [vmem:[%s15337_s11 + $0x1380] sm:$0xf]  ;;  %v11470_v26 = vor.u32 %v14405_v17, %v11469_v16  ;;  %7351 = vmatpush.bf16.msra.mxu3 %v12270_v19 }
  0xcf   : > { %v14469_v20 = vld [vmem:[%s15337_s11 + $0x139c] sm:$0xf0] }
  0xd0   : > { %v11981_v21 = vld [vmem:[%s15337_s11 + $0x1580] sm:$0xf]  ;;  %v11726_v33 = vor.u32 %v14469_v20, %v11725_v18  ;;  %7313 = vmatpush.bf16.msra.mxu0 %v11470_v26 }
  0xd1   : > { %v14533_v22 = vld [vmem:[%s15337_s11 + $0x159c] sm:$0xf0] }
  0xd2   : > { %v12237_v23 = vld [vmem:[%s15337_s11 + $0x1780] sm:$0xf]  ;;  %v11982_v35 = vor.u32 %v14533_v22, %v11981_v21  ;;  %7326 = vmatpush.bf16.msra.mxu1 %v11726_v33 }
  0xd3   : > { %v14597_v24 = vld [vmem:[%s15337_s11 + $0x179c] sm:$0xf0] }
  0xd4   : > { %v11437_v30 = vld [vmem:[%s15337_s11 + $0x1140] sm:$0xf]  ;;  %v12238_v39 = vor.u32 %v14597_v24, %v12237_v23  ;;  %7339 = vmatpush.bf16.msra.mxu2 %v11982_v35 }
  0xd5   : > { %v15513_v31 = vld [vmem:[#allocation1 + $0x24] sm:$0xff] }
  0xd6   : > { %v14397_v36 = vld [vmem:[%s15337_s11 + $0x115c] sm:$0xf0]  ;;  %7268 = vmatmul.bf16.vlgmr.msrb.gmra.mxu0 %v15513_v31  ;;  %7352 = vmatpush.bf16.msra.mxu3 %v12238_v39 }
  0xd7   : > { %v11693_v37 = vld [vmem:[%s15337_s11 + $0x1340] sm:$0xf]  ;;  %v11438_v45 = vor.u32 %v14397_v36, %v11437_v30 }
  0xd8   : > { %v14461_v40 = vld [vmem:[%s15337_s11 + $0x135c] sm:$0xf0] }
  0xd9   : > { %v11949_v41 = vld [vmem:[%s15337_s11 + $0x1540] sm:$0xf]  ;;  %v11694_v46 = vor.u32 %v14461_v40, %v11693_v37  ;;  %7314 = vmatpush.bf16.msra.mxu0 %v11438_v45 }
  0xda   : > { %v14525_v42 = vld [vmem:[%s15337_s11 + $0x155c] sm:$0xf0] }
  0xdb   : > { %v12205_v43 = vld [vmem:[%s15337_s11 + $0x1740] sm:$0xf]  ;;  %v11950_v47 = vor.u32 %v14525_v42, %v11949_v41  ;;  %7327 = vmatpush.bf16.msra.mxu1 %v11694_v46 }
  0xdc   : > { %v14589_v44 = vld [vmem:[%s15337_s11 + $0x175c] sm:$0xf0] }
  0xdd   : > { %v11405_v48 = vld [vmem:[%s15337_s11 + $0x1100] sm:$0xf]  ;;  %v12206_v51 = vor.u32 %v14589_v44, %v12205_v43  ;;  %7340 = vmatpush.bf16.msra.mxu2 %v11950_v47 }
  0xde   : > { %v14389_v49 = vld [vmem:[%s15337_s11 + $0x111c] sm:$0xf0] }
  0xdf   : > { %v11661_v50 = vld [vmem:[%s15337_s11 + $0x1300] sm:$0xf]  ;;  %v11406_v58 = vor.u32 %v14389_v49, %v11405_v48  ;;  %7353 = vmatpush.bf16.msra.mxu3 %v12206_v51 }
  0xe0   : > { %v14453_v52 = vld [vmem:[%s15337_s11 + $0x131c] sm:$0xf0] }
  0xe1   : > { %v11917_v53 = vld [vmem:[%s15337_s11 + $0x1500] sm:$0xf]  ;;  %v11662_v59 = vor.u32 %v14453_v52, %v11661_v50  ;;  %7315 = vmatpush.bf16.msra.mxu0 %v11406_v58 }
  0xe2   : > { %v14517_v54 = vld [vmem:[%s15337_s11 + $0x151c] sm:$0xf0] }
  0xe3   : > { %v12173_v55 = vld [vmem:[%s15337_s11 + $0x1700] sm:$0xf]  ;;  %v11918_v60 = vor.u32 %v14517_v54, %v11917_v53  ;;  %7328 = vmatpush.bf16.msra.mxu1 %v11662_v59 }
  0xe4   : > { %v14581_v56 = vld [vmem:[%s15337_s11 + $0x171c] sm:$0xf0] }
  0xe5   : > { %v234_v57 = vld [vmem:[%s17992_s0 + $0x8] sm:$0xff]  ;;  %v12174_v0 = vor.u32 %v14581_v56, %v12173_v55  ;;  %7341 = vmatpush.bf16.msra.mxu2 %v11918_v60 }
  0xe6   : > { %1417 = vst [vmem:[#allocation1] ss:$9 sm:$0xff] %v234_v57  ;;  %v11373_v61 = vld [vmem:[%s15337_s11 + $0x10c0] sm:$0xf] }
  0xe7   : > { %v14381_v62 = vld [vmem:[%s15337_s11 + $0x10dc] sm:$0xf0]  ;;  %7354 = vmatpush.bf16.msra.mxu3 %v12174_v0 }
  0xe8   : > { %v11629_v63 = vld [vmem:[%s15337_s11 + $0x12c0] sm:$0xf]  ;;  %v11374_v6 = vor.u32 %v14381_v62, %v11373_v61 }
  0xe9   : > { %v14445_v1 = vld [vmem:[%s15337_s11 + $0x12dc] sm:$0xf0] }
  0xea   : > { %v11885_v2 = vld [vmem:[%s15337_s11 + $0x14c0] sm:$0xf]  ;;  %v11630_v7 = vor.u32 %v14445_v1, %v11629_v63  ;;  %7316 = vmatpush.bf16.msra.mxu0 %v11374_v6 }
  0xeb   : > { %v14509_v3 = vld [vmem:[%s15337_s11 + $0x14dc] sm:$0xf0] }
  0xec   : > { %v12141_v4 = vld [vmem:[%s15337_s11 + $0x16c0] sm:$0xf]  ;;  %v11886_v8 = vor.u32 %v14509_v3, %v11885_v2  ;;  %7329 = vmatpush.bf16.msra.mxu1 %v11630_v7 }
  0xed   : > { %v14573_v5 = vld [vmem:[%s15337_s11 + $0x16dc] sm:$0xf0] }
  0xee   : > { %v11341_v9 = vld [vmem:[%s15337_s11 + $0x1080] sm:$0xf]  ;;  %v12142_v12 = vor.u32 %v14573_v5, %v12141_v4  ;;  %7342 = vmatpush.bf16.msra.mxu2 %v11886_v8  ;;  %v15587_v8 = vld [vmem:[#allocation1] sm:$0xff] }
  0xef   : > { %v14373_v10 = vld [vmem:[%s15337_s11 + $0x109c] sm:$0xf0] }
  0xf0   : > { %v11597_v11 = vld [vmem:[%s15337_s11 + $0x1280] sm:$0xf]  ;;  %v11342_v18 = vor.u32 %v14373_v10, %v11341_v9  ;;  %7355 = vmatpush.bf16.msra.mxu3 %v12142_v12 }
  0xf1   : > { %v14437_v13 = vld [vmem:[%s15337_s11 + $0x129c] sm:$0xf0] }
  0xf2   : > { %v11853_v14 = vld [vmem:[%s15337_s11 + $0x1480] sm:$0xf]  ;;  %v11598_v19 = vor.u32 %v14437_v13, %v11597_v11  ;;  %7317 = vmatpush.bf16.msra.mxu0 %v11342_v18  ;;  %v15591_v11 = vld [vmem:[#allocation1 + $0x12] sm:$0xff] }
  0xf3   : > { %v14501_v15 = vld [vmem:[%s15337_s11 + $0x149c] sm:$0xf0] }
  0xf4   : > { %v12109_v16 = vld [vmem:[%s15337_s11 + $0x1680] sm:$0xf]  ;;  %v11854_v20 = vor.u32 %v14501_v15, %v11853_v14  ;;  %7330 = vmatpush.bf16.msra.mxu1 %v11598_v19  ;;  %v15596_v15 = vld [vmem:[#allocation1 + $0x1b] sm:$0xff] }
  0xf5   : > { %v14565_v17 = vld [vmem:[%s15337_s11 + $0x169c] sm:$0xf0] }
  0xf6   : > { %v11309_v21 = vld [vmem:[%s15337_s11 + $0x1040] sm:$0xf]  ;;  %v12110_v24 = vor.u32 %v14565_v17, %v12109_v16  ;;  %7343 = vmatpush.bf16.msra.mxu2 %v11854_v20 }
  0xf7   : > { %v14365_v22 = vld [vmem:[%s15337_s11 + $0x105c] sm:$0xf0] }
  0xf8   : > { %v11565_v23 = vld [vmem:[%s15337_s11 + $0x1240] sm:$0xf]  ;;  %v11310_v37 = vor.u32 %v14365_v22, %v11309_v21  ;;  %7356 = vmatpush.bf16.msra.mxu3 %v12110_v24 }
  0xf9   : > { %v14429_v26 = vld [vmem:[%s15337_s11 + $0x125c] sm:$0xf0] }
  0xfa   : > { %v11821_v30 = vld [vmem:[%s15337_s11 + $0x1440] sm:$0xf]  ;;  %v11566_v41 = vor.u32 %v14429_v26, %v11565_v23  ;;  %7318 = vmatpush.bf16.msra.mxu0 %v11310_v37 }
  0xfb   : > { %v14493_v33 = vld [vmem:[%s15337_s11 + $0x145c] sm:$0xf0] }
  0xfc   : > { %v12077_v35 = vld [vmem:[%s15337_s11 + $0x1640] sm:$0xf]  ;;  %v11822_v42 = vor.u32 %v14493_v33, %v11821_v30  ;;  %7331 = vmatpush.bf16.msra.mxu1 %v11566_v41 }
  0xfd   : > { %v14557_v36 = vld [vmem:[%s15337_s11 + $0x165c] sm:$0xf0] }
  0xfe   : > { %v11277_v39 = vld [vmem:[%s15337_s11 + $0x1000] sm:$0xf]  ;;  %v12078_v46 = vor.u32 %v14557_v36, %v12077_v35  ;;  %7344 = vmatpush.bf16.msra.mxu2 %v11822_v42 }
  0xff   : > { %v14357_v40 = vld [vmem:[%s15337_s11 + $0x101c] sm:$0xf0] }
 0x100   : > { %v11533_v43 = vld [vmem:[%s15337_s11 + $0x1200] sm:$0xf]  ;;  %v11278_v53 = vor.u32 %v14357_v40, %v11277_v39  ;;  %7357 = vmatpush.bf16.msra.mxu3 %v12078_v46 }
 0x101   : > { %v14421_v44 = vld [vmem:[%s15337_s11 + $0x121c] sm:$0xf0] }
 0x102   : > { %v11789_v45 = vld [vmem:[%s15337_s11 + $0x1400] sm:$0xf]  ;;  %v11534_v57 = vor.u32 %v14421_v44, %v11533_v43  ;;  %7319 = vmatpush.bf16.msra.mxu0 %v11278_v53 }
 0x103   : > { %v14485_v47 = vld [vmem:[%s15337_s11 + $0x141c] sm:$0xf0] }
 0x104   : > { %v12045_v48 = vld [vmem:[%s15337_s11 + $0x1600] sm:$0xf]  ;;  %v11790_v58 = vor.u32 %v14485_v47, %v11789_v45  ;;  %7332 = vmatpush.bf16.msra.mxu1 %v11534_v57 }
 0x105   : > { %v14549_v49 = vld [vmem:[%s15337_s11 + $0x161c] sm:$0xf0]  ;;  %7320 = vmatmul.bf16.vlgmr.msra.gmra.mxu0 %v15587_v8 }
 0x106   : > { %v12525_v50 = vld [vmem:[%s15337_s11 + $0x19c0] sm:$0xf]  ;;  %v12046_v61 = vor.u32 %v14549_v49, %v12045_v48  ;;  %7345 = vmatpush.bf16.msra.mxu2 %v11790_v58 }
 0x107   : > { %v14669_v51 = vld [vmem:[%s15337_s11 + $0x19dc] sm:$0xf0] }
 0x108   : > { %v12781_v52 = vld [vmem:[%s15337_s11 + $0x1bc0] sm:$0xf]  ;;  %v12526_v62 = vor.u32 %v14669_v51, %v12525_v50  ;;  %7358 = vmatpush.bf16.msra.mxu3 %v12046_v61 }
 0x109   : > { %v14733_v54 = vld [vmem:[%s15337_s11 + $0x1bdc] sm:$0xf0]  ;;  %7346 = vmatmul.bf16.vlgmr.msra.gmra.mxu2 %v15591_v11 }
 0x10a   : > { %v13037_v55 = vld [vmem:[%s15337_s11 + $0x1dc0] sm:$0xf]  ;;  %v12782_v63 = vor.u32 %v14733_v54, %v12781_v52  ;;  %7364 = vmatpush.bf16.msrb.mxu0 %v12526_v62 }
 0x10b   : > { %v14797_v56 = vld [vmem:[%s15337_s11 + $0x1ddc] sm:$0xf0]  ;;  %7359 = vmatmul.bf16.vlgmr.msra.gmra.mxu3 %v15596_v15 }
 0x10c   : > { %v13293_v59 = vld [vmem:[%s15337_s11 + $0x1fc0] sm:$0xf]  ;;  %v13038_v0 = vor.u32 %v14797_v56, %v13037_v55  ;;  %7377 = vmatpush.bf16.msrb.mxu1 %v12782_v63 }
 0x10d   : > { %v14861_v60 = vld [vmem:[%s15337_s11 + $0x1fdc] sm:$0xf0] }
 0x10e   : > { %v12493_v1 = vld [vmem:[%s15337_s11 + $0x1980] sm:$0xf]  ;;  %v13294_v4 = vor.u32 %v14861_v60, %v13293_v59  ;;  %7390 = vmatpush.bf16.msrb.mxu2 %v13038_v0 }
 0x10f   : > { %v14661_v2 = vld [vmem:[%s15337_s11 + $0x199c] sm:$0xf0] }
 0x110   : > { %v12749_v3 = vld [vmem:[%s15337_s11 + $0x1b80] sm:$0xf]  ;;  %v12494_v13 = vor.u32 %v14661_v2, %v12493_v1  ;;  %7403 = vmatpush.bf16.msrb.mxu3 %v13294_v4 }
 0x111   : > { %v14725_v5 = vld [vmem:[%s15337_s11 + $0x1b9c] sm:$0xf0] }
 0x112   : > { %v13005_v6 = vld [vmem:[%s15337_s11 + $0x1d80] sm:$0xf]  ;;  %v12750_v16 = vor.u32 %v14725_v5, %v12749_v3  ;;  %7365 = vmatpush.bf16.msrb.mxu0 %v12494_v13 }
 0x113   : > { %v14789_v7 = vld [vmem:[%s15337_s11 + $0x1d9c] sm:$0xf0] }
 0x114   : > { %v13261_v9 = vld [vmem:[%s15337_s11 + $0x1f80] sm:$0xf]  ;;  %v13006_v17 = vor.u32 %v14789_v7, %v13005_v6  ;;  %7378 = vmatpush.bf16.msrb.mxu1 %v12750_v16 }
 0x115   : > { %v14853_v10 = vld [vmem:[%s15337_s11 + $0x1f9c] sm:$0xf0] }
 0x116   : > { %v15593_v12 = vld [vmem:[#allocation1 + $0x9] sm:$0xff]  ;;  %v13262_v20 = vor.u32 %v14853_v10, %v13261_v9  ;;  %7391 = vmatpush.bf16.msrb.mxu2 %v13006_v17 }
 0x117   : > { %v12461_v14 = vld [vmem:[%s15337_s11 + $0x1940] sm:$0xf]  ;;  %7333 = vmatmul.bf16.vlgmr.msra.gmra.mxu1 %v15593_v12 }
 0x118   : > { %v14653_v18 = vld [vmem:[%s15337_s11 + $0x195c] sm:$0xf0]  ;;  %7404 = vmatpush.bf16.msrb.mxu3 %v13262_v20 }
 0x119   : > { %v12717_v19 = vld [vmem:[%s15337_s11 + $0x1b40] sm:$0xf]  ;;  %v12462_v30 = vor.u32 %v14653_v18, %v12461_v14 }
 0x11a   : > { %v14717_v21 = vld [vmem:[%s15337_s11 + $0x1b5c] sm:$0xf0] }
 0x11b   : > { %v12973_v22 = vld [vmem:[%s15337_s11 + $0x1d40] sm:$0xf]  ;;  %v12718_v33 = vor.u32 %v14717_v21, %v12717_v19  ;;  %7366 = vmatpush.bf16.msrb.mxu0 %v12462_v30 }
 0x11c   : > { %v14781_v23 = vld [vmem:[%s15337_s11 + $0x1d5c] sm:$0xf0] }
 0x11d   : > { %v13229_v24 = vld [vmem:[%s15337_s11 + $0x1f40] sm:$0xf]  ;;  %v12974_v35 = vor.u32 %v14781_v23, %v12973_v22  ;;  %7379 = vmatpush.bf16.msrb.mxu1 %v12718_v33 }
 0x11e   : > { %v14845_v26 = vld [vmem:[%s15337_s11 + $0x1f5c] sm:$0xf0] }
 0x11f   : > { %v12429_v36 = vld [vmem:[%s15337_s11 + $0x1900] sm:$0xf]  ;;  %v13230_v40 = vor.u32 %v14845_v26, %v13229_v24  ;;  %7392 = vmatpush.bf16.msrb.mxu2 %v12974_v35 }
 0x120   : > { %v14645_v37 = vld [vmem:[%s15337_s11 + $0x191c] sm:$0xf0] }
 0x121   : > { %v12685_v39 = vld [vmem:[%s15337_s11 + $0x1b00] sm:$0xf]  ;;  %v12430_v46 = vor.u32 %v14645_v37, %v12429_v36  ;;  %7405 = vmatpush.bf16.msrb.mxu3 %v13230_v40 }
 0x122   : > { %v14709_v41 = vld [vmem:[%s15337_s11 + $0x1b1c] sm:$0xf0] }
 0x123   : > { %v12941_v42 = vld [vmem:[%s15337_s11 + $0x1d00] sm:$0xf]  ;;  %v12686_v47 = vor.u32 %v14709_v41, %v12685_v39  ;;  %7367 = vmatpush.bf16.msrb.mxu0 %v12430_v46 }
 0x124   : > { %v14773_v43 = vld [vmem:[%s15337_s11 + $0x1d1c] sm:$0xf0] }
 0x125   : > { %v13197_v44 = vld [vmem:[%s15337_s11 + $0x1f00] sm:$0xf]  ;;  %v12942_v48 = vor.u32 %v14773_v43, %v12941_v42  ;;  %7380 = vmatpush.bf16.msrb.mxu1 %v12686_v47  ;;  %v15655_v47 = vld [vmem:[#allocation1 + $0x36] sm:$0xff] }
 0x126   : > { %v14837_v45 = vld [vmem:[%s15337_s11 + $0x1f1c] sm:$0xf0] }
 0x127   : > { %v12397_v49 = vld [vmem:[%s15337_s11 + $0x18c0] sm:$0xf]  ;;  %v13198_v52 = vor.u32 %v14837_v45, %v13197_v44  ;;  %7393 = vmatpush.bf16.msrb.mxu2 %v12942_v48  ;;  %v15657_v48 = vld [vmem:[#allocation1 + $0x2d] sm:$0xff] }
 0x128   : > { %v14637_v50 = vld [vmem:[%s15337_s11 + $0x18dc] sm:$0xf0] }
 0x129   : > { %v12653_v51 = vld [vmem:[%s15337_s11 + $0x1ac0] sm:$0xf]  ;;  %v12398_v58 = vor.u32 %v14637_v50, %v12397_v49  ;;  %7406 = vmatpush.bf16.msrb.mxu3 %v13198_v52  ;;  %v15659_v49 = vld [vmem:[#allocation1 + $0x3f] sm:$0xff]  ;;  %v235_v50 = vld [vmem:[%s17992_s0 + $0x10] sm:$0x3] }
 0x12a   : > { %v14701_v53 = vld [vmem:[%s15337_s11 + $0x1adc] sm:$0xf0]  ;;  %v13897_v52 = vld [vmem:[%s15337_s11 + $0x1c4] sm:$0xf] }
 0x12b   : > { %v12909_v54 = vld [vmem:[%s15337_s11 + $0x1cc0] sm:$0xf]  ;;  %v12654_v59 = vor.u32 %v14701_v53, %v12653_v51  ;;  %7368 = vmatpush.bf16.msrb.mxu0 %v12398_v58  ;;  %v9455_v53 = vld [vmem:[%s15337_s11 + $0x1e0] sm:$0xf0] }
 0x12c   : > { %v14765_v55 = vld [vmem:[%s15337_s11 + $0x1cdc] sm:$0xf0] }
 0x12d   : > { %v13165_v56 = vld [vmem:[%s15337_s11 + $0x1ec0] sm:$0xf]  ;;  %v12910_v60 = vor.u32 %v14765_v55, %v12909_v54  ;;  %7381 = vmatpush.bf16.msrb.mxu1 %v12654_v59 }
 0x12e   : > { %v14829_v57 = vld [vmem:[%s15337_s11 + $0x1edc] sm:$0xf0] }
 0x12f   : > { %v12365_v61 = vld [vmem:[%s15337_s11 + $0x1880] sm:$0xf]  ;;  %v13166_v0 = vor.u32 %v14829_v57, %v13165_v56  ;;  %7394 = vmatpush.bf16.msrb.mxu2 %v12910_v60  ;;  %v13961_v56 = vld [vmem:[%s15337_s11 + $0x3c4] sm:$0xf] }
 0x130   : > { %v14629_v62 = vld [vmem:[%s15337_s11 + $0x189c] sm:$0xf0]  ;;  %v9711_v57 = vld [vmem:[%s15337_s11 + $0x3e0] sm:$0xf0] }
 0x131   : > { %v12621_v63 = vld [vmem:[%s15337_s11 + $0x1a80] sm:$0xf]  ;;  %v12366_v6 = vor.u32 %v14629_v62, %v12365_v61  ;;  %7407 = vmatpush.bf16.msrb.mxu3 %v13166_v0  ;;  %v9458_v61 = vor.u32 %v13897_v52, %v9455_v53 }
 0x132   : > { %v14693_v1 = vld [vmem:[%s15337_s11 + $0x1a9c] sm:$0xf0] }
 0x133   : > { %v12877_v2 = vld [vmem:[%s15337_s11 + $0x1c80] sm:$0xf]  ;;  %v12622_v9 = vor.u32 %v14693_v1, %v12621_v63  ;;  %7369 = vmatpush.bf16.msrb.mxu0 %v12366_v6  ;;  %v9714_v1 = vor.u32 %v13961_v56, %v9711_v57  ;;  %v9679_v6 = vld [vmem:[%s15337_s11 + $0x3a0] sm:$0xf0] }
 0x134   : > { %v14757_v3 = vld [vmem:[%s15337_s11 + $0x1c9c] sm:$0xf0]  ;;  %v9327_v56 = vld [vmem:[%s15337_s11 + $0xe0] sm:$0xf0] }
 0x135   : > { %v13133_v4 = vld [vmem:[%s15337_s11 + $0x1e80] sm:$0xf]  ;;  %v12878_v10 = vor.u32 %v14757_v3, %v12877_v2  ;;  %7382 = vmatpush.bf16.msrb.mxu1 %v12622_v9  ;;  %v13889_v3 = vld [vmem:[%s15337_s11 + $0x184] sm:$0xf] }
 0x136   : > { %v14821_v5 = vld [vmem:[%s15337_s11 + $0x1e9c] sm:$0xf0]  ;;  %v13929_v57 = vld [vmem:[%s15337_s11 + $0x2c4] sm:$0xf] }
 0x137   : > { %v12333_v7 = vld [vmem:[%s15337_s11 + $0x1840] sm:$0xf]  ;;  %v13134_v17 = vor.u32 %v14821_v5, %v13133_v4  ;;  %7395 = vmatpush.bf16.msrb.mxu2 %v12878_v10  ;;  %v9423_v4 = vld [vmem:[%s15337_s11 + $0x1a0] sm:$0xf0] }
 0x138   : > { %v14621_v13 = vld [vmem:[%s15337_s11 + $0x185c] sm:$0xf0]  ;;  %v13953_v5 = vld [vmem:[%s15337_s11 + $0x384] sm:$0xf]  ;;  %v9426_v10 = vor.u32 %v13889_v3, %v9423_v4 }
 0x139   : > { %v12589_v14 = vld [vmem:[%s15337_s11 + $0x1a40] sm:$0xf]  ;;  %v12334_v24 = vor.u32 %v14621_v13, %v12333_v7  ;;  %7408 = vmatpush.bf16.msrb.mxu3 %v13134_v17  ;;  %v9682_v17 = vor.u32 %v13953_v5, %v9679_v6  ;;  %v13857_v3 = vld [vmem:[%s15337_s11 + $0x84] sm:$0xf] }
 0x13a   : > { %v14685_v16 = vld [vmem:[%s15337_s11 + $0x1a5c] sm:$0xf0]  ;;  %v9295_v4 = vld [vmem:[%s15337_s11 + $0xa0] sm:$0xf0] }
 0x13b   : > { %v12845_v18 = vld [vmem:[%s15337_s11 + $0x1c40] sm:$0xf]  ;;  %v12590_v36 = vor.u32 %v14685_v16, %v12589_v14  ;;  %7370 = vmatpush.bf16.msrb.mxu0 %v12334_v24  ;;  %v13921_v5 = vld [vmem:[%s15337_s11 + $0x284] sm:$0xf] }
 0x13c   : > { %v14749_v19 = vld [vmem:[%s15337_s11 + $0x1c5c] sm:$0xf0]  ;;  %v9551_v6 = vld [vmem:[%s15337_s11 + $0x2a0] sm:$0xf0] }
 0x13d   : > { %v13101_v20 = vld [vmem:[%s15337_s11 + $0x1e40] sm:$0xf]  ;;  %v12846_v37 = vor.u32 %v14749_v19, %v12845_v18  ;;  %7383 = vmatpush.bf16.msrb.mxu1 %v12590_v36  ;;  %v13881_v19 = vld [vmem:[%s15337_s11 + $0x144] sm:$0xf] }
 0x13e   : > { %v14813_v21 = vld [vmem:[%s15337_s11 + $0x1e5c] sm:$0xf0] }
 0x13f   : > { %v12301_v22 = vld [vmem:[%s15337_s11 + $0x1800] sm:$0xf]  ;;  %v13102_v43 = vor.u32 %v14813_v21, %v13101_v20  ;;  %7396 = vmatpush.bf16.msrb.mxu2 %v12846_v37  ;;  %v9391_v20 = vld [vmem:[%s15337_s11 + $0x160] sm:$0xf0] }
 0x140   : > { %v14613_v23 = vld [vmem:[%s15337_s11 + $0x181c] sm:$0xf0]  ;;  %v13945_v21 = vld [vmem:[%s15337_s11 + $0x344] sm:$0xf] }
 0x141   : > { %v12557_v26 = vld [vmem:[%s15337_s11 + $0x1a00] sm:$0xf]  ;;  %v12302_v51 = vor.u32 %v14613_v23, %v12301_v22  ;;  %7409 = vmatpush.bf16.msrb.mxu3 %v13102_v43  ;;  %v9647_v22 = vld [vmem:[%s15337_s11 + $0x360] sm:$0xf0] }
 0x142   : > { %v14677_v30 = vld [vmem:[%s15337_s11 + $0x1a1c] sm:$0xf0]  ;;  %v9650_v36 = vor.u32 %v13945_v21, %v9647_v22  ;;  %v13913_v21 = vld [vmem:[%s15337_s11 + $0x244] sm:$0xf] }
 0x143   : > { %v12813_v33 = vld [vmem:[%s15337_s11 + $0x1c00] sm:$0xf]  ;;  %v12558_v54 = vor.u32 %v14677_v30, %v12557_v26  ;;  %7371 = vmatpush.bf16.msrb.mxu0 %v12302_v51  ;;  %v9394_v26 = vor.u32 %v13881_v19, %v9391_v20  ;;  %v13849_v19 = vld [vmem:[%s15337_s11 + $0x44] sm:$0xf] }
 0x144   : > { %v14741_v35 = vld [vmem:[%s15337_s11 + $0x1c1c] sm:$0xf0]  ;;  %v9263_v20 = vld [vmem:[%s15337_s11 + $0x60] sm:$0xf0] }
 0x145   : > { %v13069_v39 = vld [vmem:[%s15337_s11 + $0x1e00] sm:$0xf]  ;;  %v12814_v55 = vor.u32 %v14741_v35, %v12813_v33  ;;  %7384 = vmatpush.bf16.msrb.mxu1 %v12558_v54  ;;  %v9519_v22 = vld [vmem:[%s15337_s11 + $0x260] sm:$0xf0] }
 0x146   : > { %v14805_v40 = vld [vmem:[%s15337_s11 + $0x1e1c] sm:$0xf0] }
 0x147   : > { %v13549_v41 = vld [vmem:[%s15337_s11 + $0x21c0] sm:$0xf]  ;;  %v13070_v58 = vor.u32 %v14805_v40, %v13069_v39  ;;  %7397 = vmatpush.bf16.msrb.mxu2 %v12814_v55  ;;  %v13873_v39 = vld [vmem:[%s15337_s11 + $0x104] sm:$0xf] }
 0x148   : > { %v14925_v42 = vld [vmem:[%s15337_s11 + $0x21dc] sm:$0xf0]  ;;  %7385 = vmatmul.bf16.vlgmr.msrb.gmra.mxu1 %v15657_v48  ;;  %v9359_v40 = vld [vmem:[%s15337_s11 + $0x120] sm:$0xf0] }
 0x149   : > { %v13805_v44 = vld [vmem:[%s15337_s11 + $0x23c0] sm:$0xf]  ;;  %v13550_v59 = vor.u32 %v14925_v42, %v13549_v41  ;;  %7410 = vmatpush.bf16.msrb.mxu3 %v13070_v58  ;;  %v13937_v41 = vld [vmem:[%s15337_s11 + $0x304] sm:$0xf] }
 0x14a   : > { %v14989_v45 = vld [vmem:[%s15337_s11 + $0x23dc] sm:$0xf0]  ;;  %7398 = vmatmul.bf16.vlgmr.msrb.gmra.mxu2 %v15655_v47  ;;  %v9615_v42 = vld [vmem:[%s15337_s11 + $0x320] sm:$0xf0] }
 0x14b   : > { %v15653_v46 = vld [vmem:[#allocation1 + $0x24] sm:$0xff]  ;;  %v13806_v60 = vor.u32 %v14989_v45, %v13805_v44  ;;  %7416 = vmatpush.bf16.msra.mxu0 %v13550_v59  ;;  %7442 = vmatpush.bf16.msra.mxu2 %v9458_v61  ;;  %v9362_v45 = vor.u32 %v13873_v39, %v9359_v40  ;;  %v9618_v53 = vor.u32 %v13937_v41, %v9615_v42  ;;  %v13865_v55 = vld [vmem:[%s15337_s11 + $0xc4] sm:$0xf] }
 0x14c   : > { %1427 = vst [vmem:[#allocation1] ss:$9 sm:$0xff] %v235_v50  ;;  %v13517_v62 = vld [vmem:[%s15337_s11 + $0x2180] sm:$0xf]  ;;  %7372 = vmatmul.bf16.vlgmr.msrb.gmra.mxu0 %v15653_v46  ;;  %7411 = vmatmul.bf16.vlgmr.msrb.gmra.mxu3 %v15659_v49  ;;  %v9583_v58 = vld [vmem:[%s15337_s11 + $0x2e0] sm:$0xf0]  ;;  %v9330_v61 = vor.u32 %v13865_v55, %v9327_v56  ;;  %v9522_v39 = vor.u32 %v13913_v21, %v9519_v22 }
 0x14d   : > { %v14917_v63 = vld [vmem:[%s15337_s11 + $0x219c] sm:$0xf0]  ;;  %7429 = vmatpush.bf16.msra.mxu1 %v13806_v60  ;;  %7455 = vmatpush.bf16.msra.mxu3 %v9714_v1  ;;  %v9586_v1 = vor.u32 %v13929_v57, %v9583_v58  ;;  %v9231_v40 = vld [vmem:[%s15337_s11 + $0x20] sm:$0xf0] }
 0x14e   : > { %v13773_v0 = vld [vmem:[%s15337_s11 + $0x2380] sm:$0xf]  ;;  %v13518_v7 = vor.u32 %v14917_v63, %v13517_v62  ;;  %v13905_v41 = vld [vmem:[%s15337_s11 + $0x204] sm:$0xf] }
 0x14f   : > { %v14981_v2 = vld [vmem:[%s15337_s11 + $0x239c] sm:$0xf0]  ;;  %7443 = vmatpush.bf16.msra.mxu2 %v9426_v10  ;;  %v9298_v10 = vor.u32 %v13857_v3, %v9295_v4  ;;  %v9487_v42 = vld [vmem:[%s15337_s11 + $0x220] sm:$0xf0] }
 0x150   : > { %v13774_v9 = vor.u32 %v14981_v2, %v13773_v0  ;;  %v13485_v13 = vld [vmem:[%s15337_s11 + $0x2140] sm:$0xf]  ;;  %7417 = vmatpush.bf16.msra.mxu0 %v13518_v7  ;;  %v14217_v56 = vld [vmem:[%s15337_s11 + $0xbc4] sm:$0xf]  ;;  %v9490_v58 = vor.u32 %v13905_v41, %v9487_v42 }
 0x151   : > { %v14909_v14 = vld [vmem:[%s15337_s11 + $0x215c] sm:$0xf0]  ;;  %7456 = vmatpush.bf16.msra.mxu3 %v9682_v17  ;;  %v9554_v17 = vor.u32 %v13921_v5, %v9551_v6  ;;  %v10735_v57 = vld [vmem:[%s15337_s11 + $0xbe0] sm:$0xf0] }
 0x152   : > { %v13741_v16 = vld [vmem:[%s15337_s11 + $0x2340] sm:$0xf]  ;;  %v13486_v23 = vor.u32 %v14909_v14, %v13485_v13  ;;  %7430 = vmatpush.bf16.msra.mxu1 %v13774_v9  ;;  %v14145_v3 = vld [vmem:[%s15337_s11 + $0x984] sm:$0xf] }
 0x153   : > { %v14973_v18 = vld [vmem:[%s15337_s11 + $0x235c] sm:$0xf0]  ;;  %7444 = vmatpush.bf16.msra.mxu2 %v9394_v26  ;;  %v10447_v4 = vld [vmem:[%s15337_s11 + $0x9a0] sm:$0xf0]  ;;  %v1428_v5 = vld [vmem:[#allocation1] sm:$0xff] }
 0x154   : > { %v13742_v24 = vor.u32 %v14973_v18, %v13741_v16  ;;  %v13453_v30 = vld [vmem:[%s15337_s11 + $0x2100] sm:$0xf]  ;;  %7418 = vmatpush.bf16.msra.mxu0 %v13486_v23  ;;  %v14209_v6 = vld [vmem:[%s15337_s11 + $0xb84] sm:$0xf] }
 0x155   : > { %v14901_v33 = vld [vmem:[%s15337_s11 + $0x211c] sm:$0xf0]  ;;  %7457 = vmatpush.bf16.msra.mxu3 %v9650_v36  ;;  %v14137_v21 = vld [vmem:[%s15337_s11 + $0x944] sm:$0xf] }
 0x156   : > { %v13709_v35 = vld [vmem:[%s15337_s11 + $0x2300] sm:$0xf]  ;;  %v13454_v43 = vor.u32 %v14901_v33, %v13453_v30  ;;  %7431 = vmatpush.bf16.msra.mxu1 %v13742_v24  ;;  %v9266_v33 = vor.u32 %v13849_v19, %v9263_v20  ;;  %v10159_v20 = vld [vmem:[%s15337_s11 + $0x760] sm:$0xf0] }
 0x157   : > { %v14965_v37 = vld [vmem:[%s15337_s11 + $0x231c] sm:$0xf0]  ;;  %7445 = vmatpush.bf16.msra.mxu2 %v9362_v45  ;;  %v14089_v45 = vld [vmem:[%s15337_s11 + $0x7c4] sm:$0xf] }
 0x158   : > { %v13710_v44 = vor.u32 %v14965_v37, %v13709_v35  ;;  %v13421_v50 = vld [vmem:[%s15337_s11 + $0x20c0] sm:$0xf]  ;;  %7419 = vmatpush.bf16.msra.mxu0 %v13454_v43  ;;  %v13841_v37 = vld [vmem:[%s15337_s11 + $0x4] sm:$0xf] }
 0x159   : > { %v14893_v51 = vld [vmem:[%s15337_s11 + $0x20dc] sm:$0xf0]  ;;  %7458 = vmatpush.bf16.msra.mxu3 %v9618_v53  ;;  %v14025_v43 = vld [vmem:[%s15337_s11 + $0x5c4] sm:$0xf]  ;;  %v9234_v55 = vor.u32 %v13841_v37, %v9231_v40 }
 0x15a   : > { %v13677_v52 = vld [vmem:[%s15337_s11 + $0x22c0] sm:$0xf]  ;;  %v13422_v59 = vor.u32 %v14893_v51, %v13421_v50  ;;  %7432 = vmatpush.bf16.msra.mxu1 %v13710_v44  ;;  %v9967_v44 = vld [vmem:[%s15337_s11 + $0x5e0] sm:$0xf0] }
 0x15b   : > { %v14957_v54 = vld [vmem:[%s15337_s11 + $0x22dc] sm:$0xf0]  ;;  %7446 = vmatpush.bf16.msra.mxu2 %v9330_v61  ;;  %v10223_v51 = vld [vmem:[%s15337_s11 + $0x7e0] sm:$0xf0] }
 0x15c   : > { %v13678_v60 = vor.u32 %v14957_v54, %v13677_v52  ;;  %v13389_v62 = vld [vmem:[%s15337_s11 + $0x2080] sm:$0xf]  ;;  %7420 = vmatpush.bf16.msra.mxu0 %v13422_v59  ;;  %v14153_v52 = vld [vmem:[%s15337_s11 + $0x9c4] sm:$0xf]  ;;  %v9970_v59 = vor.u32 %v14025_v43, %v9967_v44 }
 0x15d   : > { %v14885_v63 = vld [vmem:[%s15337_s11 + $0x209c] sm:$0xf0]  ;;  %7459 = vmatpush.bf16.msra.mxu3 %v9586_v1  ;;  %v10479_v53 = vld [vmem:[%s15337_s11 + $0x9e0] sm:$0xf0]  ;;  %v10738_v1 = vor.u32 %v14217_v56, %v10735_v57 }
 0x15e   : > { %v13645_v0 = vld [vmem:[%s15337_s11 + $0x2280] sm:$0xf]  ;;  %v13390_v7 = vor.u32 %v14885_v63, %v13389_v62  ;;  %7433 = vmatpush.bf16.msra.mxu1 %v13678_v60  ;;  %v10226_v60 = vor.u32 %v14089_v45, %v10223_v51  ;;  %v10482_v61 = vor.u32 %v14153_v52, %v10479_v53  ;;  %v14017_v62 = vld [vmem:[%s15337_s11 + $0x584] sm:$0xf] }
 0x15f   : > { %v14949_v2 = vld [vmem:[%s15337_s11 + $0x229c] sm:$0xf0]  ;;  %7447 = vmatpush.bf16.msra.mxu2 %v9298_v10  ;;  %v9935_v63 = vld [vmem:[%s15337_s11 + $0x5a0] sm:$0xf0] }
 0x160   : > { %v13646_v9 = vor.u32 %v14949_v2, %v13645_v0  ;;  %v13357_v13 = vld [vmem:[%s15337_s11 + $0x2040] sm:$0xf]  ;;  %7421 = vmatpush.bf16.msra.mxu0 %v13390_v7  ;;  %v14081_v0 = vld [vmem:[%s15337_s11 + $0x784] sm:$0xf]  ;;  %v9938_v10 = vor.u32 %v14017_v62, %v9935_v63 }
 0x161   : > { %v14877_v14 = vld [vmem:[%s15337_s11 + $0x205c] sm:$0xf0]  ;;  %7460 = vmatpush.bf16.msra.mxu3 %v9554_v17  ;;  %v10191_v2 = vld [vmem:[%s15337_s11 + $0x7a0] sm:$0xf0] }
 0x162   : > { %v13613_v16 = vld [vmem:[%s15337_s11 + $0x2240] sm:$0xf]  ;;  %v13358_v23 = vor.u32 %v14877_v14, %v13357_v13  ;;  %7434 = vmatpush.bf16.msra.mxu1 %v13646_v9  ;;  %v10703_v7 = vld [vmem:[%s15337_s11 + $0xba0] sm:$0xf0]  ;;  %v10194_v13 = vor.u32 %v14081_v0, %v10191_v2  ;;  %v10450_v14 = vor.u32 %v14145_v3, %v10447_v4 }
 0x163   : > { %v14941_v18 = vld [vmem:[%s15337_s11 + $0x225c] sm:$0xf0]  ;;  %7448 = vmatpush.bf16.msra.mxu2 %v9266_v33  ;;  %v9903_v17 = vld [vmem:[%s15337_s11 + $0x560] sm:$0xf0]  ;;  %v10706_v19 = vor.u32 %v14209_v6, %v10703_v7 }
 0x164   : > { %v13325_v24 = vld [vmem:[%s15337_s11 + $0x2000] sm:$0xf]  ;;  %v13614_v30 = vor.u32 %v14941_v18, %v13613_v16  ;;  %7422 = vmatpush.bf16.msra.mxu0 %v13358_v23  ;;  %v14009_v16 = vld [vmem:[%s15337_s11 + $0x544] sm:$0xf] }
 0x165   : > { %v14869_v26 = vld [vmem:[%s15337_s11 + $0x201c] sm:$0xf0]  ;;  %7461 = vmatpush.bf16.msra.mxu3 %v9522_v39  ;;  %v14073_v18 = vld [vmem:[%s15337_s11 + $0x744] sm:$0xf] }
 0x166   : > { %v13581_v35 = vld [vmem:[%s15337_s11 + $0x2200] sm:$0xf]  ;;  %v13326_v50 = vor.u32 %v14869_v26, %v13325_v24  ;;  %7435 = vmatpush.bf16.msra.mxu1 %v13614_v30  ;;  %v10415_v22 = vld [vmem:[%s15337_s11 + $0x960] sm:$0xf0]  ;;  %v9906_v26 = vor.u32 %v14009_v16, %v9903_v17  ;;  %v10162_v30 = vor.u32 %v14073_v18, %v10159_v20 }
 0x167   : > { %v14933_v36 = vld [vmem:[%s15337_s11 + $0x221c] sm:$0xf0]  ;;  %7449 = vmatpush.bf16.msra.mxu2 %v9234_v55  ;;  %v14201_v23 = vld [vmem:[%s15337_s11 + $0xb44] sm:$0xf]  ;;  %v10418_v33 = vor.u32 %v14137_v21, %v10415_v22 }
 0x168   : > { %v13582_v54 = vor.u32 %v14933_v36, %v13581_v35  ;;  %7423 = vmatpush.bf16.msra.mxu0 %v13326_v50  ;;  %v1429_v9 = vld [vmem:[#allocation1 + $0x9] sm:$0xff] }
 0x169   : > { %7462 = vmatpush.bf16.msra.mxu3 %v9490_v58  ;;  %v10671_v24 = vld [vmem:[%s15337_s11 + $0xb60] sm:$0xf0] }
 0x16a   : > { %7436 = vmatpush.bf16.msra.mxu1 %v13582_v54  ;;  %7450 = vmatmul.bf16.vlgmr.msra.gmra.mxu2 %v15461_v28  ;;  %v14001_v35 = vld [vmem:[%s15337_s11 + $0x504] sm:$0xf]  ;;  %v10674_v39 = vor.u32 %v14201_v23, %v10671_v24 }
 0x16b   : > { %7494 = vmatpush.bf16.msrb.mxu2 %v10482_v61  ;;  %7424 = vmatmul.bf16.vlgmr.msra.gmra.mxu0 %v1428_v5  ;;  %v9871_v36 = vld [vmem:[%s15337_s11 + $0x520] sm:$0xf0] }
 0x16c   : > { %7468 = vmatpush.bf16.msrb.mxu0 %v9970_v59  ;;  %7463 = vmatmul.bf16.vlgmr.msra.gmra.mxu3 %v15467_v34  ;;  %v14065_v37 = vld [vmem:[%s15337_s11 + $0x704] sm:$0xf]  ;;  %v9874_v45 = vor.u32 %v14001_v35, %v9871_v36 }
 0x16d   : > { %7507 = vmatpush.bf16.msrb.mxu3 %v10738_v1  ;;  %7437 = vmatmul.bf16.vlgmr.msra.gmra.mxu1 %v1429_v9  ;;  %v10127_v40 = vld [vmem:[%s15337_s11 + $0x720] sm:$0xf0] }
 0x16e   : > { %7481 = vmatpush.bf16.msrb.mxu1 %v10226_v60  ;;  %v14129_v41 = vld [vmem:[%s15337_s11 + $0x904] sm:$0xf]  ;;  %v10130_v50 = vor.u32 %v14065_v37, %v10127_v40  ;;  %v7217_v37 = vpop.f32.mrf.mxu0 }
 0x16f   : > { %7495 = vmatpush.bf16.msrb.mxu2 %v10450_v14  ;;  %v10383_v42 = vld [vmem:[%s15337_s11 + $0x920] sm:$0xf0] }
 0x170   : > { %7469 = vmatpush.bf16.msrb.mxu0 %v9938_v10  ;;  %v14193_v43 = vld [vmem:[%s15337_s11 + $0xb04] sm:$0xf]  ;;  %v10386_v51 = vor.u32 %v14129_v41, %v10383_v42 }
 0x171   : > { %7508 = vmatpush.bf16.msrb.mxu3 %v10706_v19  ;;  %v10639_v44 = vld [vmem:[%s15337_s11 + $0xb20] sm:$0xf0] }
 0x172   : > { %7482 = vmatpush.bf16.msrb.mxu1 %v10194_v13  ;;  %v13993_v52 = vld [vmem:[%s15337_s11 + $0x4c4] sm:$0xf]  ;;  %v10642_v55 = vor.u32 %v14193_v43, %v10639_v44 }
 0x173   : > { %7496 = vmatpush.bf16.msrb.mxu2 %v10418_v33  ;;  %v9839_v53 = vld [vmem:[%s15337_s11 + $0x4e0] sm:$0xf0] }
 0x174   : > { %7470 = vmatpush.bf16.msrb.mxu0 %v9906_v26  ;;  %v14057_v54 = vld [vmem:[%s15337_s11 + $0x6c4] sm:$0xf]  ;;  %v9842_v61 = vor.u32 %v13993_v52, %v9839_v53 }
 0x175   : > { %7509 = vmatpush.bf16.msrb.mxu3 %v10674_v39  ;;  %v10095_v56 = vld [vmem:[%s15337_s11 + $0x6e0] sm:$0xf0] }
 0x176   : > { %7483 = vmatpush.bf16.msrb.mxu1 %v10162_v30  ;;  %v14121_v57 = vld [vmem:[%s15337_s11 + $0x8c4] sm:$0xf]  ;;  %v10098_v63 = vor.u32 %v14057_v54, %v10095_v56 }
 0x177   : > { %v10351_v58 = vld [vmem:[%s15337_s11 + $0x8e0] sm:$0xf0]  ;;  %7497 = vmatpush.bf16.msrb.mxu2 %v10386_v51 }
 0x178   : > { %v14185_v59 = vld [vmem:[%s15337_s11 + $0xac4] sm:$0xf]  ;;  %7471 = vmatpush.bf16.msrb.mxu0 %v9874_v45  ;;  %v10354_v0 = vor.u32 %v14121_v57, %v10351_v58  ;;  %v7230_v45 = vpop.f32.mrf.mxu1 }
 0x179   : > { %v10607_v60 = vld [vmem:[%s15337_s11 + $0xae0] sm:$0xf0]  ;;  %7510 = vmatpush.bf16.msrb.mxu3 %v10642_v55 }
 0x17a   : > { %v13985_v62 = vld [vmem:[%s15337_s11 + $0x484] sm:$0xf]  ;;  %7484 = vmatpush.bf16.msrb.mxu1 %v10130_v50  ;;  %v10610_v4 = vor.u32 %v14185_v59, %v10607_v60 }
 0x17b   : > { %v9807_v1 = vld [vmem:[%s15337_s11 + $0x4a0] sm:$0xf0]  ;;  %7498 = vmatpush.bf16.msrb.mxu2 %v10354_v0 }
 0x17c   : > { %v14049_v2 = vld [vmem:[%s15337_s11 + $0x684] sm:$0xf]  ;;  %7472 = vmatpush.bf16.msrb.mxu0 %v9842_v61  ;;  %v9810_v13 = vor.u32 %v13985_v62, %v9807_v1 }
 0x17d   : > { %v10063_v3 = vld [vmem:[%s15337_s11 + $0x6a0] sm:$0xf0]  ;;  %7511 = vmatpush.bf16.msrb.mxu3 %v10610_v4 }
 0x17e   : > { %v14113_v5 = vld [vmem:[%s15337_s11 + $0x884] sm:$0xf]  ;;  %7485 = vmatpush.bf16.msrb.mxu1 %v10098_v63  ;;  %v10066_v16 = vor.u32 %v14049_v2, %v10063_v3  ;;  %v7243_v2 = vpop.f32.mrf.mxu2 }
 0x17f   : > { %v10319_v6 = vld [vmem:[%s15337_s11 + $0x8a0] sm:$0xf0] }
 0x180   : > { %v1388_v7 = vld [vmem:[%s15345_s9] sm:$0xff]  ;;  %v10322_v17 = vor.u32 %v14113_v5, %v10319_v6  ;;  %7473 = vmatpush.bf16.msrb.mxu0 %v9810_v13  ;;  %v7256_v6 = vpop.f32.mrf.mxu3 }
 0x181   : > { %v14177_v9 = vld [vmem:[%s15337_s11 + $0xa84] sm:$0xf]  ;;  %v1390_v20 = vperm.slane %v1388_v7, 0 }
 0x182   : > { %v10575_v10 = vld [vmem:[%s15337_s11 + $0xaa0] sm:$0xf0]  ;;  %7486 = vmatpush.bf16.msrb.mxu1 %v10066_v16  ;;  %7499 = vmatpush.bf16.msrb.mxu2 %v10322_v17 }
 0x183   : > { %v13977_v14 = vld [vmem:[%s15337_s11 + $0x444] sm:$0xf]  ;;  %v10578_v21 = vor.u32 %v14177_v9, %v10575_v10  ;;  %v7218_v44 = vadd.f32 %v7217_v37, %v1390_v20 }
 0x184   : > { %v9775_v18 = vld [vmem:[%s15337_s11 + $0x460] sm:$0xf0] }
 0x185   : > { %v14041_v19 = vld [vmem:[%s15337_s11 + $0x644] sm:$0xf]  ;;  %v9778_v33 = vor.u32 %v13977_v14, %v9775_v18  ;;  %7512 = vmatpush.bf16.msrb.mxu3 %v10578_v21  ;;  %v7231_v57 = vadd.f32 %v7230_v45, %v7218_v44  ;;  %v7219_v21 = vpop.f32.mrf.mxu0 }
 0x186   : > { %v10031_v22 = vld [vmem:[%s15337_s11 + $0x660] sm:$0xf0]  ;;  %v7245_v45 = vpop.f32.mrf.mxu2 }
 0x187   : > { %v14105_v23 = vld [vmem:[%s15337_s11 + $0x844] sm:$0xf]  ;;  %v10034_v39 = vor.u32 %v14041_v19, %v10031_v22  ;;  %7474 = vmatpush.bf16.msrb.mxu0 %v9778_v33  ;;  %v7244_v5 = vadd.f32 %v7243_v2, %v7231_v57 }
 0x188   : > { %v10287_v24 = vld [vmem:[%s15337_s11 + $0x860] sm:$0xf0] }
 0x189   : > { %v14169_v26 = vld [vmem:[%s15337_s11 + $0xa44] sm:$0xf]  ;;  %v10290_v40 = vor.u32 %v14105_v23, %v10287_v24  ;;  %7487 = vmatpush.bf16.msrb.mxu1 %v10034_v39  ;;  %v7257_v20 = vadd.f32 %v7256_v6, %v7244_v5  ;;  %v7232_v24 = vpop.f32.mrf.mxu1 }
 0x18a   : > { %v10543_v30 = vld [vmem:[%s15337_s11 + $0xa60] sm:$0xf0] }
 0x18b   : > { %v13969_v35 = vld [vmem:[%s15337_s11 + $0x404] sm:$0xf]  ;;  %v10546_v50 = vor.u32 %v14169_v26, %v10543_v30  ;;  %7500 = vmatpush.bf16.msrb.mxu2 %v10290_v40 }
 0x18c   : > { %v9743_v36 = vld [vmem:[%s15337_s11 + $0x420] sm:$0xf0] }
 0x18d   : > { %v14033_v41 = vld [vmem:[%s15337_s11 + $0x604] sm:$0xf]  ;;  %v9746_v58 = vor.u32 %v13969_v35, %v9743_v36  ;;  %7513 = vmatpush.bf16.msrb.mxu3 %v10546_v50 }
 0x18e   : > { %v9999_v42 = vld [vmem:[%s15337_s11 + $0x620] sm:$0xf0] }
 0x18f   : > { %v14097_v43 = vld [vmem:[%s15337_s11 + $0x804] sm:$0xf]  ;;  %v10002_v62 = vor.u32 %v14033_v41, %v9999_v42  ;;  %7475 = vmatpush.bf16.msrb.mxu0 %v9746_v58 }
 0x190   : > { %v10255_v51 = vld [vmem:[%s15337_s11 + $0x820] sm:$0xf0] }
 0x191   : > { %v14161_v52 = vld [vmem:[%s15337_s11 + $0xa04] sm:$0xf]  ;;  %v10258_v63 = vor.u32 %v14097_v43, %v10255_v51  ;;  %7488 = vmatpush.bf16.msrb.mxu1 %v10002_v62  ;;  %v7258_v51 = vpop.f32.mrf.mxu3 }
 0x192   : > { %v10511_v53 = vld [vmem:[%s15337_s11 + $0xa20] sm:$0xf0]  ;;  %7476 = vmatmul.bf16.vlgmr.msrb.gmra.mxu0 %v15459_v27 }
 0x193   : > { %v14281_v54 = vld [vmem:[%s15337_s11 + $0xdc4] sm:$0xf]  ;;  %v10514_v3 = vor.u32 %v14161_v52, %v10511_v53  ;;  %7501 = vmatpush.bf16.msrb.mxu2 %v10258_v63 }
 0x194   : > { %v10991_v55 = vld [vmem:[%s15337_s11 + $0xde0] sm:$0xf0]  ;;  %7489 = vmatmul.bf16.vlgmr.msrb.gmra.mxu1 %v15463_v29 }
 0x195   : > { %v14345_v56 = vld [vmem:[%s15337_s11 + $0xfc4] sm:$0xf]  ;;  %v10994_v4 = vor.u32 %v14281_v54, %v10991_v55  ;;  %7514 = vmatpush.bf16.msrb.mxu3 %v10514_v3 }
 0x196   : > { %v11247_v59 = vld [vmem:[%s15337_s11 + $0xfe0] sm:$0xf0]  ;;  %7502 = vmatmul.bf16.vlgmr.msrb.gmra.mxu2 %v15513_v31 }
 0x197   : > { %v14409_v60 = vld [vmem:[%s15337_s11 + $0x11c4] sm:$0xf]  ;;  %v11250_v7 = vor.u32 %v14345_v56, %v11247_v59  ;;  %7520 = vmatpush.bf16.msra.mxu0 %v10994_v4 }
 0x198   : > { %v11503_v61 = vld [vmem:[%s15337_s11 + $0x11e0] sm:$0xf0]  ;;  %7515 = vmatmul.bf16.vlgmr.msrb.gmra.mxu3 %v15519_v38 }
 0x199   : > { %v14473_v0 = vld [vmem:[%s15337_s11 + $0x13c4] sm:$0xf]  ;;  %v11506_v9 = vor.u32 %v14409_v60, %v11503_v61  ;;  %7533 = vmatpush.bf16.msra.mxu1 %v11250_v7  ;;  %v7282_v7 = vpop.f32.mrf.mxu1 }
 0x19a   : > { %v11759_v1 = vld [vmem:[%s15337_s11 + $0x13e0] sm:$0xf0] }
 0x19b   : > { %v14273_v10 = vld [vmem:[%s15337_s11 + $0xd84] sm:$0xf]  ;;  %v11762_v16 = vor.u32 %v14473_v0, %v11759_v1  ;;  %7546 = vmatpush.bf16.msra.mxu2 %v11506_v9  ;;  %v7269_v0 = vpop.f32.mrf.mxu0 }
 0x19c   : > { %v10959_v13 = vld [vmem:[%s15337_s11 + $0xda0] sm:$0xf0]  ;;  %v7270_v6 = vadd.f32 %v7269_v0, %v7257_v20 }
 0x19d   : > { %v14337_v14 = vld [vmem:[%s15337_s11 + $0xf84] sm:$0xf]  ;;  %v10962_v26 = vor.u32 %v14273_v10, %v10959_v13  ;;  %7559 = vmatpush.bf16.msra.mxu3 %v11762_v16 }
 0x19e   : > { %v11215_v17 = vld [vmem:[%s15337_s11 + $0xfa0] sm:$0xf0] }
 0x19f   : > { %v14401_v18 = vld [vmem:[%s15337_s11 + $0x1184] sm:$0xf]  ;;  %v11218_v30 = vor.u32 %v14337_v14, %v11215_v17  ;;  %7521 = vmatpush.bf16.msra.mxu0 %v10962_v26  ;;  %v7295_v26 = vpop.f32.mrf.mxu2 }
 0x1a0   : > { %v11471_v19 = vld [vmem:[%s15337_s11 + $0x11a0] sm:$0xf0] }
 0x1a1   : > { %v14465_v22 = vld [vmem:[%s15337_s11 + $0x1384] sm:$0xf]  ;;  %v11474_v33 = vor.u32 %v14401_v18, %v11471_v19  ;;  %7534 = vmatpush.bf16.msra.mxu1 %v11218_v30  ;;  %v7283_v18 = vadd.f32 %v7282_v7, %v7270_v6 }
 0x1a2   : > { %v11727_v23 = vld [vmem:[%s15337_s11 + $0x13a0] sm:$0xf0] }
 0x1a3   : > { %v14265_v35 = vld [vmem:[%s15337_s11 + $0xd44] sm:$0xf]  ;;  %v11730_v39 = vor.u32 %v14465_v22, %v11727_v23  ;;  %7547 = vmatpush.bf16.msra.mxu2 %v11474_v33 }
 0x1a4   : > { %v10927_v36 = vld [vmem:[%s15337_s11 + $0xd60] sm:$0xf0] }
 0x1a5   : > { %v14329_v37 = vld [vmem:[%s15337_s11 + $0xf44] sm:$0xf]  ;;  %v10930_v50 = vor.u32 %v14265_v35, %v10927_v36  ;;  %7560 = vmatpush.bf16.msra.mxu3 %v11730_v39  ;;  %v7308_v39 = vpop.f32.mrf.mxu3 }
 0x1a6   : > { %v11183_v40 = vld [vmem:[%s15337_s11 + $0xf60] sm:$0xf0] }
 0x1a7   : > { %v14393_v41 = vld [vmem:[%s15337_s11 + $0x1144] sm:$0xf]  ;;  %v11186_v52 = vor.u32 %v14329_v37, %v11183_v40  ;;  %7522 = vmatpush.bf16.msra.mxu0 %v10930_v50  ;;  %v7296_v37 = vadd.f32 %v7295_v26, %v7283_v18 }
 0x1a8   : > { %v11439_v42 = vld [vmem:[%s15337_s11 + $0x1160] sm:$0xf0] }
 0x1a9   : > { %v14457_v43 = vld [vmem:[%s15337_s11 + $0x1344] sm:$0xf]  ;;  %v11442_v53 = vor.u32 %v14393_v41, %v11439_v42  ;;  %7535 = vmatpush.bf16.msra.mxu1 %v11186_v52 }
 0x1aa   : > { %v11695_v44 = vld [vmem:[%s15337_s11 + $0x1360] sm:$0xf0] }
 0x1ab   : > { %v14257_v54 = vld [vmem:[%s15337_s11 + $0xd04] sm:$0xf]  ;;  %v11698_v57 = vor.u32 %v14457_v43, %v11695_v44  ;;  %7548 = vmatpush.bf16.msra.mxu2 %v11442_v53  ;;  %v15847_v43 = vadd.f32 %v7308_v39, %v7296_v37  ;;  %v7271_v44 = vpop.f32.mrf.mxu0 }
 0x1ac   : > { %v10895_v55 = vld [vmem:[%s15337_s11 + $0xd20] sm:$0xf0] }
 0x1ad   : > { %v14321_v56 = vld [vmem:[%s15337_s11 + $0xf04] sm:$0xf]  ;;  %v10898_v63 = vor.u32 %v14257_v54, %v10895_v55  ;;  %7561 = vmatpush.bf16.msra.mxu3 %v11698_v57  ;;  %v7284_v54 = vpop.f32.mrf.mxu1 }
 0x1ae   : > { %v11151_v58 = vld [vmem:[%s15337_s11 + $0xf20] sm:$0xf0] }
 0x1af   : > { %v14385_v59 = vld [vmem:[%s15337_s11 + $0x1104] sm:$0xf]  ;;  %v11154_v1 = vor.u32 %v14321_v56, %v11151_v58  ;;  %7523 = vmatpush.bf16.msra.mxu0 %v10898_v63 }
 0x1b0   : > { %v11407_v60 = vld [vmem:[%s15337_s11 + $0x1120] sm:$0xf0] }
 0x1b1   : > { %v14449_v61 = vld [vmem:[%s15337_s11 + $0x1304] sm:$0xf]  ;;  %v11410_v2 = vor.u32 %v14385_v59, %v11407_v60  ;;  %7536 = vmatpush.bf16.msra.mxu1 %v11154_v1 }
 0x1b2   : > { %v11663_v62 = vld [vmem:[%s15337_s11 + $0x1320] sm:$0xf0] }
 0x1b3   : > { %v14249_v3 = vld [vmem:[%s15337_s11 + $0xcc4] sm:$0xf]  ;;  %v11666_v9 = vor.u32 %v14449_v61, %v11663_v62  ;;  %7549 = vmatpush.bf16.msra.mxu2 %v11410_v2 }
 0x1b4   : > { %v10863_v4 = vld [vmem:[%s15337_s11 + $0xce0] sm:$0xf0] }
 0x1b5   : > { %v14313_v5 = vld [vmem:[%s15337_s11 + $0xec4] sm:$0xf]  ;;  %v10866_v19 = vor.u32 %v14249_v3, %v10863_v4  ;;  %7562 = vmatpush.bf16.msra.mxu3 %v11666_v9 }
 0x1b6   : > { %v11119_v10 = vld [vmem:[%s15337_s11 + $0xee0] sm:$0xf0] }
 0x1b7   : > { %v14377_v13 = vld [vmem:[%s15337_s11 + $0x10c4] sm:$0xf]  ;;  %v11122_v20 = vor.u32 %v14313_v5, %v11119_v10  ;;  %7524 = vmatpush.bf16.msra.mxu0 %v10866_v19  ;;  %v7297_v5 = vpop.f32.mrf.mxu2 }
 0x1b8   : > { %v11375_v14 = vld [vmem:[%s15337_s11 + $0x10e0] sm:$0xf0] }
 0x1b9   : > { %v14441_v16 = vld [vmem:[%s15337_s11 + $0x12c4] sm:$0xf]  ;;  %v11378_v21 = vor.u32 %v14377_v13, %v11375_v14  ;;  %7537 = vmatpush.bf16.msra.mxu1 %v11122_v20  ;;  %v7310_v13 = vpop.f32.mrf.mxu3 }
 0x1ba   : > { %v11631_v17 = vld [vmem:[%s15337_s11 + $0x12e0] sm:$0xf0]  ;;  %v7321_v13 = vpop.f32.mrf.mxu0 }
 0x1bb   : > { %v14241_v22 = vld [vmem:[%s15337_s11 + $0xc84] sm:$0xf]  ;;  %v11634_v30 = vor.u32 %v14441_v16, %v11631_v17  ;;  %7550 = vmatpush.bf16.msra.mxu2 %v11378_v21 }
 0x1bc   : > { %v10831_v23 = vld [vmem:[%s15337_s11 + $0xca0] sm:$0xf0] }
 0x1bd   : > { %v14305_v24 = vld [vmem:[%s15337_s11 + $0xe84] sm:$0xf]  ;;  %v10834_v42 = vor.u32 %v14241_v22, %v10831_v23  ;;  %7563 = vmatpush.bf16.msra.mxu3 %v11634_v30 }
 0x1be   : > { %v11087_v33 = vld [vmem:[%s15337_s11 + $0xea0] sm:$0xf0] }
 0x1bf   : > { %v14369_v35 = vld [vmem:[%s15337_s11 + $0x1084] sm:$0xf]  ;;  %v11090_v45 = vor.u32 %v14305_v24, %v11087_v33  ;;  %7525 = vmatpush.bf16.msra.mxu0 %v10834_v42 }
 0x1c0   : > { %v11343_v36 = vld [vmem:[%s15337_s11 + $0x10a0] sm:$0xf0] }
 0x1c1   : > { %v14433_v40 = vld [vmem:[%s15337_s11 + $0x1284] sm:$0xf]  ;;  %v11346_v50 = vor.u32 %v14369_v35, %v11343_v36  ;;  %7538 = vmatpush.bf16.msra.mxu1 %v11090_v45 }
 0x1c2   : > { %v11599_v41 = vld [vmem:[%s15337_s11 + $0x12a0] sm:$0xf0] }
 0x1c3   : > { %v14233_v51 = vld [vmem:[%s15337_s11 + $0xc44] sm:$0xf]  ;;  %v11602_v55 = vor.u32 %v14433_v40, %v11599_v41  ;;  %7551 = vmatpush.bf16.msra.mxu2 %v11346_v50 }
 0x1c4   : > { %v10799_v52 = vld [vmem:[%s15337_s11 + $0xc60] sm:$0xf0] }
 0x1c5   : > { %v14297_v53 = vld [vmem:[%s15337_s11 + $0xe44] sm:$0xf]  ;;  %v10802_v61 = vor.u32 %v14233_v51, %v10799_v52  ;;  %7564 = vmatpush.bf16.msra.mxu3 %v11602_v55 }
 0x1c6   : > { %v11055_v56 = vld [vmem:[%s15337_s11 + $0xe60] sm:$0xf0] }
 0x1c7   : > { %v14361_v57 = vld [vmem:[%s15337_s11 + $0x1044] sm:$0xf]  ;;  %v11058_v0 = vor.u32 %v14297_v53, %v11055_v56  ;;  %7526 = vmatpush.bf16.msra.mxu0 %v10802_v61 }
 0x1c8   : > { %v11311_v58 = vld [vmem:[%s15337_s11 + $0x1060] sm:$0xf0] }
 0x1c9   : > { %v14425_v59 = vld [vmem:[%s15337_s11 + $0x1244] sm:$0xf]  ;;  %v11314_v1 = vor.u32 %v14361_v57, %v11311_v58  ;;  %7539 = vmatpush.bf16.msra.mxu1 %v11058_v0 }
 0x1ca   : > { %v11567_v60 = vld [vmem:[%s15337_s11 + $0x1260] sm:$0xf0] }
 0x1cb   : > { %v14225_v62 = vld [vmem:[%s15337_s11 + $0xc04] sm:$0xf]  ;;  %v11570_v6 = vor.u32 %v14425_v59, %v11567_v60  ;;  %7552 = vmatpush.bf16.msra.mxu2 %v11314_v1 }
 0x1cc   : > { %v10767_v63 = vld [vmem:[%s15337_s11 + $0xc20] sm:$0xf0] }
 0x1cd   : > { %v14289_v2 = vld [vmem:[%s15337_s11 + $0xe04] sm:$0xf]  ;;  %v10770_v18 = vor.u32 %v14225_v62, %v10767_v63  ;;  %7565 = vmatpush.bf16.msra.mxu3 %v11570_v6 }
 0x1ce   : > { %v11023_v3 = vld [vmem:[%s15337_s11 + $0xe20] sm:$0xf0] }
 0x1cf   : > { %v14353_v4 = vld [vmem:[%s15337_s11 + $0x1004] sm:$0xf]  ;;  %v11026_v22 = vor.u32 %v14289_v2, %v11023_v3  ;;  %7527 = vmatpush.bf16.msra.mxu0 %v10770_v18 }
 0x1d0   : > { %v11279_v7 = vld [vmem:[%s15337_s11 + $0x1020] sm:$0xf0] }
 0x1d1   : > { %v14417_v9 = vld [vmem:[%s15337_s11 + $0x1204] sm:$0xf]  ;;  %v11282_v23 = vor.u32 %v14353_v4, %v11279_v7  ;;  %7540 = vmatpush.bf16.msra.mxu1 %v11026_v22 }
 0x1d2   : > { %v11535_v10 = vld [vmem:[%s15337_s11 + $0x1220] sm:$0xf0]  ;;  %7528 = vmatmul.bf16.vlgmr.msra.gmra.mxu0 %v15510_v25 }
 0x1d3   : > { %v14537_v14 = vld [vmem:[%s15337_s11 + $0x15c4] sm:$0xf]  ;;  %v11538_v30 = vor.u32 %v14417_v9, %v11535_v10  ;;  %7553 = vmatpush.bf16.msra.mxu2 %v11282_v23 }
 0x1d4   : > { %v12015_v16 = vld [vmem:[%s15337_s11 + $0x15e0] sm:$0xf0]  ;;  %7541 = vmatmul.bf16.vlgmr.msra.gmra.mxu1 %v15515_v32 }
 0x1d5   : > { %v14601_v17 = vld [vmem:[%s15337_s11 + $0x17c4] sm:$0xf]  ;;  %v12018_v33 = vor.u32 %v14537_v14, %v12015_v16  ;;  %7566 = vmatpush.bf16.msra.mxu3 %v11538_v30 }
 0x1d6   : > { %v12271_v19 = vld [vmem:[%s15337_s11 + $0x17e0] sm:$0xf0]  ;;  %7554 = vmatmul.bf16.vlgmr.msra.gmra.mxu2 %v15587_v8 }
 0x1d7   : > { %v14665_v20 = vld [vmem:[%s15337_s11 + $0x19c4] sm:$0xf]  ;;  %v12274_v35 = vor.u32 %v14601_v17, %v12271_v19  ;;  %7572 = vmatpush.bf16.msrb.mxu0 %v12018_v33  ;;  %v7322_v17 = vadd.f32 %v7321_v13, %v15847_v43  ;;  %v7334_v19 = vpop.f32.mrf.mxu1 }
 0x1d8   : > { %v12527_v21 = vld [vmem:[%s15337_s11 + $0x19e0] sm:$0xf0]  ;;  %7567 = vmatmul.bf16.vlgmr.msra.gmra.mxu3 %v15593_v12 }
 0x1d9   : > { %v14729_v24 = vld [vmem:[%s15337_s11 + $0x1bc4] sm:$0xf]  ;;  %v12530_v36 = vor.u32 %v14665_v20, %v12527_v21  ;;  %7585 = vmatpush.bf16.msrb.mxu1 %v12274_v35  ;;  %v7335_v30 = vadd.f32 %v7334_v19, %v7322_v17 }
 0x1da   : > { %v12783_v26 = vld [vmem:[%s15337_s11 + $0x1be0] sm:$0xf0] }
 0x1db   : > { %v14529_v37 = vld [vmem:[%s15337_s11 + $0x1584] sm:$0xf]  ;;  %v12786_v41 = vor.u32 %v14729_v24, %v12783_v26  ;;  %7598 = vmatpush.bf16.msrb.mxu2 %v12530_v36 }
 0x1dc   : > { %v11983_v39 = vld [vmem:[%s15337_s11 + $0x15a0] sm:$0xf0] }
 0x1dd   : > { %v14593_v40 = vld [vmem:[%s15337_s11 + $0x1784] sm:$0xf]  ;;  %v11986_v52 = vor.u32 %v14529_v37, %v11983_v39  ;;  %7611 = vmatpush.bf16.msrb.mxu3 %v12786_v41 }
 0x1de   : > { %v12239_v42 = vld [vmem:[%s15337_s11 + $0x17a0] sm:$0xf0] }
 0x1df   : > { %v14657_v44 = vld [vmem:[%s15337_s11 + $0x1984] sm:$0xf]  ;;  %v12242_v53 = vor.u32 %v14593_v40, %v12239_v42  ;;  %7573 = vmatpush.bf16.msrb.mxu0 %v11986_v52 }
 0x1e0   : > { %v12495_v45 = vld [vmem:[%s15337_s11 + $0x19a0] sm:$0xf0] }
 0x1e1   : > { %v14721_v50 = vld [vmem:[%s15337_s11 + $0x1b84] sm:$0xf]  ;;  %v12498_v54 = vor.u32 %v14657_v44, %v12495_v45  ;;  %7586 = vmatpush.bf16.msrb.mxu1 %v12242_v53 }
 0x1e2   : > { %v12751_v51 = vld [vmem:[%s15337_s11 + $0x1ba0] sm:$0xf0] }
 0x1e3   : > { %v14521_v55 = vld [vmem:[%s15337_s11 + $0x1544] sm:$0xf]  ;;  %v12754_v58 = vor.u32 %v14721_v50, %v12751_v51  ;;  %7599 = vmatpush.bf16.msrb.mxu2 %v12498_v54  ;;  %v7347_v51 = vpop.f32.mrf.mxu2 }
 0x1e4   : > { %v11951_v56 = vld [vmem:[%s15337_s11 + $0x1560] sm:$0xf0] }
 0x1e5   : > { %v14585_v57 = vld [vmem:[%s15337_s11 + $0x1744] sm:$0xf]  ;;  %v11954_v0 = vor.u32 %v14521_v55, %v11951_v56  ;;  %7612 = vmatpush.bf16.msrb.mxu3 %v12754_v58  ;;  %v7348_v55 = vadd.f32 %v7347_v51, %v7335_v30  ;;  %v7360_v56 = vpop.f32.mrf.mxu3 }
 0x1e6   : > { %v12207_v59 = vld [vmem:[%s15337_s11 + $0x1760] sm:$0xf0] }
 0x1e7   : > { %v14649_v60 = vld [vmem:[%s15337_s11 + $0x1944] sm:$0xf]  ;;  %v12210_v1 = vor.u32 %v14585_v57, %v12207_v59  ;;  %7574 = vmatpush.bf16.msrb.mxu0 %v11954_v0  ;;  %v7323_v59 = vpop.f32.mrf.mxu0 }
 0x1e8   : > { %v12463_v61 = vld [vmem:[%s15337_s11 + $0x1960] sm:$0xf0] }
 0x1e9   : > { %v14713_v62 = vld [vmem:[%s15337_s11 + $0x1b44] sm:$0xf]  ;;  %v12466_v2 = vor.u32 %v14649_v60, %v12463_v61  ;;  %7587 = vmatpush.bf16.msrb.mxu1 %v12210_v1  ;;  %v7336_v61 = vpop.f32.mrf.mxu1 }
 0x1ea   : > { %v12719_v63 = vld [vmem:[%s15337_s11 + $0x1b60] sm:$0xf0] }
 0x1eb   : > { %v14513_v3 = vld [vmem:[%s15337_s11 + $0x1504] sm:$0xf]  ;;  %v12722_v6 = vor.u32 %v14713_v62, %v12719_v63  ;;  %7600 = vmatpush.bf16.msrb.mxu2 %v12466_v2  ;;  %v15918_v62 = vadd.f32 %v7360_v56, %v7348_v55  ;;  %v7349_v30 = vpop.f32.mrf.mxu2 }
 0x1ec   : > { %v11919_v4 = vld [vmem:[%s15337_s11 + $0x1520] sm:$0xf0] }
 0x1ed   : > { %v14577_v5 = vld [vmem:[%s15337_s11 + $0x1704] sm:$0xf]  ;;  %v11922_v18 = vor.u32 %v14513_v3, %v11919_v4  ;;  %7613 = vmatpush.bf16.msrb.mxu3 %v12722_v6 }
 0x1ee   : > { %v12175_v7 = vld [vmem:[%s15337_s11 + $0x1720] sm:$0xf0] }
 0x1ef   : > { %v14641_v9 = vld [vmem:[%s15337_s11 + $0x1904] sm:$0xf]  ;;  %v12178_v20 = vor.u32 %v14577_v5, %v12175_v7  ;;  %7575 = vmatpush.bf16.msrb.mxu0 %v11922_v18 }
 0x1f0   : > { %v12431_v10 = vld [vmem:[%s15337_s11 + $0x1920] sm:$0xf0] }
 0x1f1   : > { %v14705_v14 = vld [vmem:[%s15337_s11 + $0x1b04] sm:$0xf]  ;;  %v12434_v21 = vor.u32 %v14641_v9, %v12431_v10  ;;  %7588 = vmatpush.bf16.msrb.mxu1 %v12178_v20 }
 0x1f2   : > { %v12687_v16 = vld [vmem:[%s15337_s11 + $0x1b20] sm:$0xf0] }
 0x1f3   : > { %v14505_v22 = vld [vmem:[%s15337_s11 + $0x14c4] sm:$0xf]  ;;  %v12690_v26 = vor.u32 %v14705_v14, %v12687_v16  ;;  %7601 = vmatpush.bf16.msrb.mxu2 %v12434_v21 }
 0x1f4   : > { %v11887_v23 = vld [vmem:[%s15337_s11 + $0x14e0] sm:$0xf0] }
 0x1f5   : > { %v14569_v24 = vld [vmem:[%s15337_s11 + $0x16c4] sm:$0xf]  ;;  %v11890_v39 = vor.u32 %v14505_v22, %v11887_v23  ;;  %7614 = vmatpush.bf16.msrb.mxu3 %v12690_v26 }
 0x1f6   : > { %v12143_v33 = vld [vmem:[%s15337_s11 + $0x16e0] sm:$0xf0] }
 0x1f7   : > { %v14633_v35 = vld [vmem:[%s15337_s11 + $0x18c4] sm:$0xf]  ;;  %v12146_v40 = vor.u32 %v14569_v24, %v12143_v33  ;;  %7576 = vmatpush.bf16.msrb.mxu0 %v11890_v39 }
 0x1f8   : > { %v12399_v43 = vld [vmem:[%s15337_s11 + $0x18e0] sm:$0xf0] }
 0x1f9   : > { %v14697_v36 = vld [vmem:[%s15337_s11 + $0x1ac4] sm:$0xf]  ;;  %v12402_v41 = vor.u32 %v14633_v35, %v12399_v43  ;;  %7589 = vmatpush.bf16.msrb.mxu1 %v12146_v40 }
 0x1fa   : > { %v12655_v37 = vld [vmem:[%s15337_s11 + $0x1ae0] sm:$0xf0] }
 0x1fb   : > { %v14497_v42 = vld [vmem:[%s15337_s11 + $0x1484] sm:$0xf]  ;;  %v12658_v50 = vor.u32 %v14697_v36, %v12655_v37  ;;  %7602 = vmatpush.bf16.msrb.mxu2 %v12402_v41  ;;  %v7362_v36 = vpop.f32.mrf.mxu3 }
 0x1fc   : > { %v11855_v44 = vld [vmem:[%s15337_s11 + $0x14a0] sm:$0xf0] }
 0x1fd   : > { %v14561_v45 = vld [vmem:[%s15337_s11 + $0x1684] sm:$0xf]  ;;  %v11858_v60 = vor.u32 %v14497_v42, %v11855_v44  ;;  %7615 = vmatpush.bf16.msrb.mxu3 %v12658_v50 }
 0x1fe   : > { %v12111_v52 = vld [vmem:[%s15337_s11 + $0x16a0] sm:$0xf0] }
 0x1ff   : > { %v14625_v53 = vld [vmem:[%s15337_s11 + $0x1884] sm:$0xf]  ;;  %v12114_v63 = vor.u32 %v14561_v45, %v12111_v52  ;;  %7577 = vmatpush.bf16.msrb.mxu0 %v11858_v60 }
 0x200   : > { %v12367_v54 = vld [vmem:[%s15337_s11 + $0x18a0] sm:$0xf0] }
 0x201   : > { %v14689_v57 = vld [vmem:[%s15337_s11 + $0x1a84] sm:$0xf]  ;;  %v12370_v0 = vor.u32 %v14625_v53, %v12367_v54  ;;  %7590 = vmatpush.bf16.msrb.mxu1 %v12114_v63 }
 0x202   : > { %v12623_v58 = vld [vmem:[%s15337_s11 + $0x1aa0] sm:$0xf0] }
 0x203   : > { %v14489_v1 = vld [vmem:[%s15337_s11 + $0x1444] sm:$0xf]  ;;  %v12626_v4 = vor.u32 %v14689_v57, %v12623_v58  ;;  %7603 = vmatpush.bf16.msrb.mxu2 %v12370_v0 }
 0x204   : > { %v11823_v2 = vld [vmem:[%s15337_s11 + $0x1460] sm:$0xf0] }
 0x205   : > { %v14553_v3 = vld [vmem:[%s15337_s11 + $0x1644] sm:$0xf]  ;;  %v11826_v13 = vor.u32 %v14489_v1, %v11823_v2  ;;  %7616 = vmatpush.bf16.msrb.mxu3 %v12626_v4 }
 0x206   : > { %v12079_v5 = vld [vmem:[%s15337_s11 + $0x1660] sm:$0xf0] }
 0x207   : > { %v14617_v6 = vld [vmem:[%s15337_s11 + $0x1844] sm:$0xf]  ;;  %v12082_v17 = vor.u32 %v14553_v3, %v12079_v5  ;;  %7578 = vmatpush.bf16.msrb.mxu0 %v11826_v13 }
 0x208   : > { %v12335_v7 = vld [vmem:[%s15337_s11 + $0x1860] sm:$0xf0] }
 0x209   : > { %v14681_v9 = vld [vmem:[%s15337_s11 + $0x1a44] sm:$0xf]  ;;  %v12338_v18 = vor.u32 %v14617_v6, %v12335_v7  ;;  %7591 = vmatpush.bf16.msrb.mxu1 %v12082_v17 }
 0x20a   : > { %v12591_v10 = vld [vmem:[%s15337_s11 + $0x1a60] sm:$0xf0] }
 0x20b   : > { %v14481_v14 = vld [vmem:[%s15337_s11 + $0x1404] sm:$0xf]  ;;  %v12594_v22 = vor.u32 %v14681_v9, %v12591_v10  ;;  %7604 = vmatpush.bf16.msrb.mxu2 %v12338_v18 }
 0x20c   : > { %v11791_v16 = vld [vmem:[%s15337_s11 + $0x1420] sm:$0xf0] }
 0x20d   : > { %v14545_v19 = vld [vmem:[%s15337_s11 + $0x1604] sm:$0xf]  ;;  %v11794_v37 = vor.u32 %v14481_v14, %v11791_v16  ;;  %7617 = vmatpush.bf16.msrb.mxu3 %v12594_v22 }
 0x20e   : > { %v12047_v20 = vld [vmem:[%s15337_s11 + $0x1620] sm:$0xf0] }
 0x20f   : > { %v14609_v21 = vld [vmem:[%s15337_s11 + $0x1804] sm:$0xf]  ;;  %v12050_v42 = vor.u32 %v14545_v19, %v12047_v20  ;;  %7579 = vmatpush.bf16.msrb.mxu0 %v11794_v37 }
 0x210   : > { %v12303_v23 = vld [vmem:[%s15337_s11 + $0x1820] sm:$0xf0] }
 0x211   : > { %v14673_v24 = vld [vmem:[%s15337_s11 + $0x1a04] sm:$0xf]  ;;  %v12306_v44 = vor.u32 %v14609_v21, %v12303_v23  ;;  %7592 = vmatpush.bf16.msrb.mxu1 %v12050_v42 }
 0x212   : > { %v12559_v26 = vld [vmem:[%s15337_s11 + $0x1a20] sm:$0xf0]  ;;  %7580 = vmatmul.bf16.vlgmr.msrb.gmra.mxu0 %v15591_v11 }
 0x213   : > { %v14793_v33 = vld [vmem:[%s15337_s11 + $0x1dc4] sm:$0xf]  ;;  %v12562_v51 = vor.u32 %v14673_v24, %v12559_v26  ;;  %7605 = vmatpush.bf16.msrb.mxu2 %v12306_v44 }
 0x214   : > { %v13039_v35 = vld [vmem:[%s15337_s11 + $0x1de0] sm:$0xf0]  ;;  %7593 = vmatmul.bf16.vlgmr.msrb.gmra.mxu1 %v15596_v15 }
 0x215   : > { %v14857_v43 = vld [vmem:[%s15337_s11 + $0x1fc4] sm:$0xf]  ;;  %v13042_v52 = vor.u32 %v14793_v33, %v13039_v35  ;;  %7618 = vmatpush.bf16.msrb.mxu3 %v12562_v51  ;;  %v7373_v33 = vpop.f32.mrf.mxu0 }
 0x216   : > { %v13295_v39 = vld [vmem:[%s15337_s11 + $0x1fe0] sm:$0xf0]  ;;  %7606 = vmatmul.bf16.vlgmr.msrb.gmra.mxu2 %v15653_v46  ;;  %v7374_v36 = vadd.f32 %v7373_v33, %v15918_v62 }
 0x217   : > { %v14921_v40 = vld [vmem:[%s15337_s11 + $0x21c4] sm:$0xf]  ;;  %v13298_v53 = vor.u32 %v14857_v43, %v13295_v39  ;;  %7624 = vmatpush.bf16.msra.mxu0 %v13042_v52  ;;  %v7386_v39 = vpop.f32.mrf.mxu1 }
 0x218   : > { %v13551_v41 = vld [vmem:[%s15337_s11 + $0x21e0] sm:$0xf0]  ;;  %7619 = vmatmul.bf16.vlgmr.msrb.gmra.mxu3 %v15657_v48  ;;  %v7387_v51 = vadd.f32 %v7386_v39, %v7374_v36 }
 0x219   : > { %v14985_v45 = vld [vmem:[%s15337_s11 + $0x23c4] sm:$0xf]  ;;  %v13554_v54 = vor.u32 %v14921_v40, %v13551_v41  ;;  %7637 = vmatpush.bf16.msra.mxu1 %v13298_v53 }
 0x21a   : > { %v13807_v50 = vld [vmem:[%s15337_s11 + $0x23e0] sm:$0xf0] }
 0x21b   : > { %v14785_v55 = vld [vmem:[%s15337_s11 + $0x1d84] sm:$0xf]  ;;  %v13810_v58 = vor.u32 %v14985_v45, %v13807_v50  ;;  %7650 = vmatpush.bf16.msra.mxu2 %v13554_v54 }
 0x21c   : > { %v13007_v56 = vld [vmem:[%s15337_s11 + $0x1da0] sm:$0xf0] }
 0x21d   : > { %v14849_v57 = vld [vmem:[%s15337_s11 + $0x1f84] sm:$0xf]  ;;  %v13010_v1 = vor.u32 %v14785_v55, %v13007_v56  ;;  %7663 = vmatpush.bf16.msra.mxu3 %v13810_v58 }
 0x21e   : > { %v13263_v59 = vld [vmem:[%s15337_s11 + $0x1fa0] sm:$0xf0] }
 0x21f   : > { %v14913_v60 = vld [vmem:[%s15337_s11 + $0x2184] sm:$0xf]  ;;  %v13266_v2 = vor.u32 %v14849_v57, %v13263_v59  ;;  %7625 = vmatpush.bf16.msra.mxu0 %v13010_v1 }
 0x220   : > { %v13519_v61 = vld [vmem:[%s15337_s11 + $0x21a0] sm:$0xf0] }
 0x221   : > { %v14977_v63 = vld [vmem:[%s15337_s11 + $0x2384] sm:$0xf]  ;;  %v13522_v3 = vor.u32 %v14913_v60, %v13519_v61  ;;  %7638 = vmatpush.bf16.msra.mxu1 %v13266_v2 }
 0x222   : > { %v13775_v0 = vld [vmem:[%s15337_s11 + $0x23a0] sm:$0xf0] }
 0x223   : > { %v14777_v4 = vld [vmem:[%s15337_s11 + $0x1d44] sm:$0xf]  ;;  %v13778_v7 = vor.u32 %v14977_v63, %v13775_v0  ;;  %7651 = vmatpush.bf16.msra.mxu2 %v13522_v3  ;;  %v7399_v0 = vpop.f32.mrf.mxu2 }
 0x224   : > { %v12975_v5 = vld [vmem:[%s15337_s11 + $0x1d60] sm:$0xf0] }
 0x225   : > { %v14841_v6 = vld [vmem:[%s15337_s11 + $0x1f44] sm:$0xf]  ;;  %v12978_v17 = vor.u32 %v14777_v4, %v12975_v5  ;;  %7664 = vmatpush.bf16.msra.mxu3 %v13778_v7  ;;  %v7400_v4 = vadd.f32 %v7399_v0, %v7387_v51  ;;  %v7412_v5 = vpop.f32.mrf.mxu3 }
 0x226   : > { %v13231_v9 = vld [vmem:[%s15337_s11 + $0x1f60] sm:$0xf0] }
 0x227   : > { %v14905_v10 = vld [vmem:[%s15337_s11 + $0x2144] sm:$0xf]  ;;  %v13234_v18 = vor.u32 %v14841_v6, %v13231_v9  ;;  %7626 = vmatpush.bf16.msra.mxu0 %v12978_v17  ;;  %v7375_v9 = vpop.f32.mrf.mxu0 }
 0x228   : > { %v13487_v13 = vld [vmem:[%s15337_s11 + $0x2160] sm:$0xf0]  ;;  %v13958_v9 = vld [vmem:[%s15337_s11 + $0x3a4] sm:$0xf0] }
 0x229   : > { %v14969_v14 = vld [vmem:[%s15337_s11 + $0x2344] sm:$0xf]  ;;  %v13490_v19 = vor.u32 %v14905_v10, %v13487_v13  ;;  %7639 = vmatpush.bf16.msra.mxu1 %v13234_v18  ;;  %v7388_v13 = vpop.f32.mrf.mxu1 }
 0x22a   : > { %v13743_v16 = vld [vmem:[%s15337_s11 + $0x2360] sm:$0xf0]  ;;  %v14022_v13 = vld [vmem:[%s15337_s11 + $0x5a4] sm:$0xf0] }
 0x22b   : > { %v14769_v20 = vld [vmem:[%s15337_s11 + $0x1d04] sm:$0xf]  ;;  %v13746_v23 = vor.u32 %v14969_v14, %v13743_v16  ;;  %7652 = vmatpush.bf16.msra.mxu2 %v13490_v19  ;;  %v15989_v14 = vadd.f32 %v7412_v5, %v7400_v4  ;;  %v7401_v51 = vpop.f32.mrf.mxu2  ;;  %v9429_v4 = vld [vmem:[%s15337_s11 + $0x188] sm:$0xf] }
 0x22c   : > { %v12943_v21 = vld [vmem:[%s15337_s11 + $0x1d20] sm:$0xf0]  ;;  %v13894_v5 = vld [vmem:[%s15337_s11 + $0x1a4] sm:$0xf0] }
 0x22d   : > { %v14833_v22 = vld [vmem:[%s15337_s11 + $0x1f04] sm:$0xf]  ;;  %v12946_v37 = vor.u32 %v14769_v20, %v12943_v21  ;;  %7665 = vmatpush.bf16.msra.mxu3 %v13746_v23  ;;  %v13942_v51 = vld [vmem:[%s15337_s11 + $0x324] sm:$0xf0] }
 0x22e   : > { %v13199_v24 = vld [vmem:[%s15337_s11 + $0x1f20] sm:$0xf0] }
 0x22f   : > { %v14897_v26 = vld [vmem:[%s15337_s11 + $0x2104] sm:$0xf]  ;;  %v13202_v40 = vor.u32 %v14833_v22, %v13199_v24  ;;  %7627 = vmatpush.bf16.msra.mxu0 %v12946_v37 }
 0x230   : > { %v13455_v30 = vld [vmem:[%s15337_s11 + $0x2120] sm:$0xf0] }
 0x231   : > { %v14961_v35 = vld [vmem:[%s15337_s11 + $0x2304] sm:$0xf]  ;;  %v13458_v41 = vor.u32 %v14897_v26, %v13455_v30  ;;  %7640 = vmatpush.bf16.msra.mxu1 %v13202_v40 }
 0x232   : > { %v13711_v43 = vld [vmem:[%s15337_s11 + $0x2320] sm:$0xf0] }
 0x233   : > { %v14761_v42 = vld [vmem:[%s15337_s11 + $0x1cc4] sm:$0xf]  ;;  %v13714_v50 = vor.u32 %v14961_v35, %v13711_v43  ;;  %7653 = vmatpush.bf16.msra.mxu2 %v13458_v41 }
 0x234   : > { %v12911_v44 = vld [vmem:[%s15337_s11 + $0x1ce0] sm:$0xf0] }
 0x235   : > { %v14825_v45 = vld [vmem:[%s15337_s11 + $0x1ec4] sm:$0xf]  ;;  %v12914_v56 = vor.u32 %v14761_v42, %v12911_v44  ;;  %7666 = vmatpush.bf16.msra.mxu3 %v13714_v50 }
 0x236   : > { %v13167_v52 = vld [vmem:[%s15337_s11 + $0x1ee0] sm:$0xf0] }
 0x237   : > { %v14889_v53 = vld [vmem:[%s15337_s11 + $0x20c4] sm:$0xf]  ;;  %v13170_v57 = vor.u32 %v14825_v45, %v13167_v52  ;;  %7628 = vmatpush.bf16.msra.mxu0 %v12914_v56  ;;  %v9461_v52 = vld [vmem:[%s15337_s11 + $0x1c8] sm:$0xf] }
 0x238   : > { %v13423_v62 = vld [vmem:[%s15337_s11 + $0x20e0] sm:$0xf0]  ;;  %v13966_v56 = vld [vmem:[%s15337_s11 + $0x3e4] sm:$0xf0] }
 0x239   : > { %v14953_v54 = vld [vmem:[%s15337_s11 + $0x22c4] sm:$0xf]  ;;  %v13426_v58 = vor.u32 %v14889_v53, %v13423_v62  ;;  %7641 = vmatpush.bf16.msra.mxu1 %v13170_v57  ;;  %v13902_v53 = vld [vmem:[%s15337_s11 + $0x1e4] sm:$0xf0] }
 0x23a   : > { %v13679_v55 = vld [vmem:[%s15337_s11 + $0x22e0] sm:$0xf0]  ;;  %v9717_v62 = vld [vmem:[%s15337_s11 + $0x3c8] sm:$0xf] }
 0x23b   : > { %v14753_v59 = vld [vmem:[%s15337_s11 + $0x1c84] sm:$0xf]  ;;  %v13682_v63 = vor.u32 %v14953_v54, %v13679_v55  ;;  %7654 = vmatpush.bf16.msra.mxu2 %v13426_v58  ;;  %v7414_v54 = vpop.f32.mrf.mxu3  ;;  %v9973_v57 = vld [vmem:[%s15337_s11 + $0x5c8] sm:$0xf] }
 0x23c   : > { %v12879_v60 = vld [vmem:[%s15337_s11 + $0x1ca0] sm:$0xf0]  ;;  %v14030_v58 = vld [vmem:[%s15337_s11 + $0x5e4] sm:$0xf0] }
 0x23d   : > { %v14817_v61 = vld [vmem:[%s15337_s11 + $0x1e84] sm:$0xf]  ;;  %v12882_v10 = vor.u32 %v14753_v59, %v12879_v60  ;;  %7667 = vmatpush.bf16.msra.mxu3 %v13682_v63  ;;  %v14094_v63 = vld [vmem:[%s15337_s11 + $0x7e4] sm:$0xf0] }
 0x23e   : > { %v13135_v1 = vld [vmem:[%s15337_s11 + $0x1ea0] sm:$0xf0]  ;;  %v10133_v54 = vld [vmem:[%s15337_s11 + $0x708] sm:$0xf] }
 0x23f   : > { %v14881_v2 = vld [vmem:[%s15337_s11 + $0x2084] sm:$0xf]  ;;  %v13138_v16 = vor.u32 %v14817_v61, %v13135_v1  ;;  %7629 = vmatpush.bf16.msra.mxu0 %v12882_v10  ;;  %v10229_v61 = vld [vmem:[%s15337_s11 + $0x7c8] sm:$0xf]  ;;  %v9462_v1 = vor.u32 %v13902_v53, %v9461_v52 }
 0x240   : > { %v13391_v3 = vld [vmem:[%s15337_s11 + $0x20a0] sm:$0xf0]  ;;  %v9941_v10 = vld [vmem:[%s15337_s11 + $0x588] sm:$0xf] }
 0x241   : > { %v14945_v6 = vld [vmem:[%s15337_s11 + $0x2284] sm:$0xf]  ;;  %v13394_v17 = vor.u32 %v14881_v2, %v13391_v3  ;;  %7642 = vmatpush.bf16.msra.mxu1 %v13138_v16  ;;  %v9718_v2 = vor.u32 %v13966_v56, %v9717_v62  ;;  %v9974_v3 = vor.u32 %v14030_v58, %v9973_v57  ;;  %v10197_v16 = vld [vmem:[%s15337_s11 + $0x788] sm:$0xf]  ;;  %v7425_v62 = vpop.f32.mrf.mxu0  ;;  %v7438_v58 = vpop.f32.mrf.mxu1 }
 0x242   : > { %v13647_v7 = vld [vmem:[%s15337_s11 + $0x22a0] sm:$0xf0]  ;;  %v9877_v52 = vld [vmem:[%s15337_s11 + $0x508] sm:$0xf]  ;;  %v7426_v56 = vadd.f32 %v7425_v62, %v15989_v14 }
 0x243   : > { %v14745_v18 = vld [vmem:[%s15337_s11 + $0x1c44] sm:$0xf]  ;;  %v13650_v21 = vor.u32 %v14945_v6, %v13647_v7  ;;  %7655 = vmatpush.bf16.msra.mxu2 %v13394_v17  ;;  %v9685_v6 = vld [vmem:[%s15337_s11 + $0x388] sm:$0xf]  ;;  %v10230_v7 = vor.u32 %v14094_v63, %v10229_v61 }
 0x244   : > { %v12847_v19 = vld [vmem:[%s15337_s11 + $0x1c60] sm:$0xf0]  ;;  %v14086_v17 = vld [vmem:[%s15337_s11 + $0x7a4] sm:$0xf0] }
 0x245   : > { %v14809_v20 = vld [vmem:[%s15337_s11 + $0x1e44] sm:$0xf]  ;;  %v12850_v33 = vor.u32 %v14745_v18, %v12847_v19  ;;  %7668 = vmatpush.bf16.msra.mxu3 %v13650_v21  ;;  %v9430_v18 = vor.u32 %v13894_v5, %v9429_v4  ;;  %v9686_v19 = vor.u32 %v13958_v9, %v9685_v6  ;;  %v9397_v21 = vld [vmem:[%s15337_s11 + $0x148] sm:$0xf] }
 0x246   : > { %v13103_v22 = vld [vmem:[%s15337_s11 + $0x1e60] sm:$0xf0]  ;;  %v14006_v53 = vld [vmem:[%s15337_s11 + $0x524] sm:$0xf0] }
 0x247   : > { %v14873_v23 = vld [vmem:[%s15337_s11 + $0x2044] sm:$0xf]  ;;  %v13106_v36 = vor.u32 %v14809_v20, %v13103_v22  ;;  %7630 = vmatpush.bf16.msra.mxu0 %v12850_v33  ;;  %v9942_v20 = vor.u32 %v14022_v13, %v9941_v10  ;;  %v13886_v22 = vld [vmem:[%s15337_s11 + $0x164] sm:$0xf0] }
 0x248   : > { %v13359_v24 = vld [vmem:[%s15337_s11 + $0x2060] sm:$0xf0]  ;;  %v14014_v33 = vld [vmem:[%s15337_s11 + $0x564] sm:$0xf0] }
 0x249   : > { %v14937_v26 = vld [vmem:[%s15337_s11 + $0x2244] sm:$0xf]  ;;  %v13362_v37 = vor.u32 %v14873_v23, %v13359_v24  ;;  %7643 = vmatpush.bf16.msra.mxu1 %v13106_v36  ;;  %v9653_v23 = vld [vmem:[%s15337_s11 + $0x348] sm:$0xf]  ;;  %v10198_v24 = vor.u32 %v14086_v17, %v10197_v16 }
 0x24a   : > { %v13615_v30 = vld [vmem:[%s15337_s11 + $0x2260] sm:$0xf0]  ;;  %v14078_v36 = vld [vmem:[%s15337_s11 + $0x764] sm:$0xf0] }
 0x24b   : > { %v14737_v35 = vld [vmem:[%s15337_s11 + $0x1c04] sm:$0xf]  ;;  %v13618_v42 = vor.u32 %v14937_v26, %v13615_v30  ;;  %7656 = vmatpush.bf16.msra.mxu2 %v13362_v37  ;;  %v13950_v26 = vld [vmem:[%s15337_s11 + $0x364] sm:$0xf0] }
 0x24c   : > { %v12815_v43 = vld [vmem:[%s15337_s11 + $0x1c20] sm:$0xf0]  ;;  %v9909_v30 = vld [vmem:[%s15337_s11 + $0x548] sm:$0xf] }
 0x24d   : > { %v14801_v39 = vld [vmem:[%s15337_s11 + $0x1e04] sm:$0xf]  ;;  %v12818_v55 = vor.u32 %v14737_v35, %v12815_v43  ;;  %7669 = vmatpush.bf16.msra.mxu3 %v13618_v42  ;;  %v15050_v35 = vld [vmem:[#allocation1] sm:$0xff]  ;;  %v10165_v43 = vld [vmem:[%s15337_s11 + $0x748] sm:$0xf] }
 0x24e   : > { %v13071_v40 = vld [vmem:[%s15337_s11 + $0x1e20] sm:$0xf0]  ;;  %v9365_v42 = vld [vmem:[%s15337_s11 + $0x108] sm:$0xf] }
 0x24f   : > { %v14865_v41 = vld [vmem:[%s15337_s11 + $0x2004] sm:$0xf]  ;;  %v13074_v59 = vor.u32 %v14801_v39, %v13071_v40  ;;  %7631 = vmatpush.bf16.msra.mxu0 %v12818_v55  ;;  %v9398_v39 = vor.u32 %v13886_v22, %v9397_v21  ;;  %v9654_v40 = vor.u32 %v13950_v26, %v9653_v23  ;;  %v14070_v55 = vld [vmem:[%s15337_s11 + $0x724] sm:$0xf0] }
 0x250   : > { %v13327_v44 = vld [vmem:[%s15337_s11 + $0x2020] sm:$0xf0]  ;;  %v9333_v61 = vld [vmem:[%s15337_s11 + $0xc8] sm:$0xf] }
 0x251   : > { %v14929_v45 = vld [vmem:[%s15337_s11 + $0x2204] sm:$0xf]  ;;  %v13330_v60 = vor.u32 %v14865_v41, %v13327_v44  ;;  %7644 = vmatpush.bf16.msra.mxu1 %v13074_v59  ;;  %v9910_v41 = vor.u32 %v14014_v33, %v9909_v30  ;;  %v13878_v44 = vld [vmem:[%s15337_s11 + $0x124] sm:$0xf0] }
 0x252   : > { %v13583_v50 = vld [vmem:[%s15337_s11 + $0x2220] sm:$0xf0]  ;;  %7632 = vmatmul.bf16.vlgmr.msra.gmra.mxu0 %v15655_v47  ;;  %v9366_v57 = vor.u32 %v13878_v44, %v9365_v42  ;;  %v13870_v63 = vld [vmem:[%s15337_s11 + $0xe4] sm:$0xf0] }
 0x253   : > { %v13586_v0 = vor.u32 %v14929_v45, %v13583_v50  ;;  %7657 = vmatpush.bf16.msra.mxu2 %v13330_v60  ;;  %7676 = vmatpush.bf16.msrb.mxu0 %v9462_v1  ;;  %v15051_v37 = vld [vmem:[#allocation1 + $0x9] sm:$0xff]  ;;  %v10166_v50 = vor.u32 %v14078_v36, %v10165_v43  ;;  %v9878_v60 = vor.u32 %v14006_v53, %v9877_v52  ;;  %v7427_v43 = vpop.f32.mrf.mxu0 }
 0x254   : > { %7645 = vmatmul.bf16.vlgmr.msra.gmra.mxu1 %v15659_v49  ;;  %v9621_v45 = vld [vmem:[%s15337_s11 + $0x308] sm:$0xf]  ;;  %v10134_v1 = vor.u32 %v14070_v55, %v10133_v54  ;;  %v9334_v10 = vor.u32 %v13870_v63, %v9333_v61 }
 0x255   : > { %7670 = vmatpush.bf16.msra.mxu3 %v13586_v0  ;;  %7689 = vmatpush.bf16.msrb.mxu1 %v9718_v2  ;;  %v9622_v59 = vor.u32 %v13942_v51, %v9621_v45  ;;  %v9589_v0 = vld [vmem:[%s15337_s11 + $0x2c8] sm:$0xf]  ;;  %v16045_v2 = vadd.f32 %v7438_v58, %v7426_v56 }
 0x256   : > { %7658 = vmatmul.bf16.vlgmr.msra.gmra.mxu2 %v15050_v35  ;;  %v13934_v14 = vld [vmem:[%s15337_s11 + $0x2e4] sm:$0xf0]  ;;  %v7464_v35 = vpop.f32.mrf.mxu3 }
 0x257   : > { %7702 = vmatpush.bf16.msrb.mxu2 %v9974_v3  ;;  %7677 = vmatpush.bf16.msrb.mxu0 %v9430_v18  ;;  %v9845_v3 = vld [vmem:[%s15337_s11 + $0x4c8] sm:$0xf]  ;;  %v9590_v13 = vor.u32 %v13934_v14, %v9589_v0 }
 0x258   : > { %7671 = vmatmul.bf16.vlgmr.msra.gmra.mxu3 %v15051_v37  ;;  %v13998_v4 = vld [vmem:[%s15337_s11 + $0x4e4] sm:$0xf0]  ;;  %v7440_v37 = vpop.f32.mrf.mxu1 }
 0x259   : > { %7715 = vmatpush.bf16.msrb.mxu3 %v10230_v7  ;;  %7690 = vmatpush.bf16.msrb.mxu1 %v9686_v19  ;;  %v10101_v5 = vld [vmem:[%s15337_s11 + $0x6c8] sm:$0xf]  ;;  %v9846_v16 = vor.u32 %v13998_v4, %v9845_v3 }
 0x25a   : > { %v14062_v6 = vld [vmem:[%s15337_s11 + $0x6e4] sm:$0xf0] }
 0x25b   : > { %7703 = vmatpush.bf16.msrb.mxu2 %v9942_v20  ;;  %7678 = vmatpush.bf16.msrb.mxu0 %v9398_v39  ;;  %v15052_v7 = vld [vmem:[%s15345_s9] sm:$0xff]  ;;  %v10102_v20 = vor.u32 %v14062_v6, %v10101_v5 }
 0x25c   : > { %v1391_v9 = vperm.slane %v15052_v7, 1  ;;  %v9301_v17 = vld [vmem:[%s15337_s11 + $0x88] sm:$0xf] }
 0x25d   : > { %7716 = vmatpush.bf16.msrb.mxu3 %v10198_v24  ;;  %7691 = vmatpush.bf16.msrb.mxu1 %v9654_v40  ;;  %v13862_v18 = vld [vmem:[%s15337_s11 + $0xa4] sm:$0xf0]  ;;  %v7451_v24 = vpop.f32.mrf.mxu2 }
 0x25e   : > { %v9557_v19 = vld [vmem:[%s15337_s11 + $0x288] sm:$0xf]  ;;  %v7452_v33 = vadd.f32 %v7451_v24, %v1391_v9  ;;  %v9302_v36 = vor.u32 %v13862_v18, %v9301_v17  ;;  %v7466_v9 = vpop.f32.mrf.mxu3 }
 0x25f   : > { %7704 = vmatpush.bf16.msrb.mxu2 %v9910_v41  ;;  %7679 = vmatpush.bf16.msrb.mxu0 %v9366_v57  ;;  %v13926_v21 = vld [vmem:[%s15337_s11 + $0x2a4] sm:$0xf0] }
 0x260   : > { %v9813_v22 = vld [vmem:[%s15337_s11 + $0x488] sm:$0xf]  ;;  %v9558_v39 = vor.u32 %v13926_v21, %v9557_v19  ;;  %v16064_v45 = vadd.f32 %v7464_v35, %v7452_v33 }
 0x261   : > { %7717 = vmatpush.bf16.msrb.mxu3 %v10166_v50  ;;  %7692 = vmatpush.bf16.msrb.mxu1 %v9622_v59  ;;  %v13990_v23 = vld [vmem:[%s15337_s11 + $0x4a4] sm:$0xf0] }
 0x262   : > { %v10069_v26 = vld [vmem:[%s15337_s11 + $0x688] sm:$0xf]  ;;  %v9814_v40 = vor.u32 %v13990_v23, %v9813_v22 }
 0x263   : > { %7705 = vmatpush.bf16.msrb.mxu2 %v9878_v60  ;;  %v14054_v30 = vld [vmem:[%s15337_s11 + $0x6a4] sm:$0xf0]  ;;  %7680 = vmatpush.bf16.msrb.mxu0 %v9334_v10 }
 0x264   : > { %v9269_v41 = vld [vmem:[%s15337_s11 + $0x48] sm:$0xf]  ;;  %v10070_v50 = vor.u32 %v14054_v30, %v10069_v26 }
 0x265   : > { %7718 = vmatpush.bf16.msrb.mxu3 %v10134_v1  ;;  %7693 = vmatpush.bf16.msrb.mxu1 %v9590_v13  ;;  %v13854_v42 = vld [vmem:[%s15337_s11 + $0x64] sm:$0xf0]  ;;  %v7453_v4 = vpop.f32.mrf.mxu2 }
 0x266   : > { %v9525_v44 = vld [vmem:[%s15337_s11 + $0x248] sm:$0xf]  ;;  %v9270_v55 = vor.u32 %v13854_v42, %v9269_v41 }
 0x267   : > { %7706 = vmatpush.bf16.msrb.mxu2 %v9846_v16  ;;  %v13918_v51 = vld [vmem:[%s15337_s11 + $0x264] sm:$0xf0]  ;;  %7681 = vmatpush.bf16.msrb.mxu0 %v9302_v36 }
 0x268   : > { %v9781_v52 = vld [vmem:[%s15337_s11 + $0x448] sm:$0xf]  ;;  %v9526_v58 = vor.u32 %v13918_v51, %v9525_v44 }
 0x269   : > { %7719 = vmatpush.bf16.msrb.mxu3 %v10102_v20  ;;  %v13982_v53 = vld [vmem:[%s15337_s11 + $0x464] sm:$0xf0]  ;;  %7694 = vmatpush.bf16.msrb.mxu1 %v9558_v39 }
 0x26a   : > { %v10037_v62 = vld [vmem:[%s15337_s11 + $0x648] sm:$0xf]  ;;  %v9782_v59 = vor.u32 %v13982_v53, %v9781_v52 }
 0x26b   : > { %v14046_v54 = vld [vmem:[%s15337_s11 + $0x664] sm:$0xf0]  ;;  %7707 = vmatpush.bf16.msrb.mxu2 %v9814_v40  ;;  %7682 = vmatpush.bf16.msrb.mxu0 %v9270_v55 }
 0x26c   : > { %v9237_v56 = vld [vmem:[%s15337_s11 + $0x8] sm:$0xf]  ;;  %v10038_v0 = vor.u32 %v14046_v54, %v10037_v62 }
 0x26d   : > { %v13846_v57 = vld [vmem:[%s15337_s11 + $0x24] sm:$0xf0]  ;;  %7720 = vmatpush.bf16.msrb.mxu3 %v10070_v50  ;;  %7695 = vmatpush.bf16.msrb.mxu1 %v9526_v58 }
 0x26e   : > { %v9493_v60 = vld [vmem:[%s15337_s11 + $0x208] sm:$0xf]  ;;  %v9238_v10 = vor.u32 %v13846_v57, %v9237_v56 }
 0x26f   : > { %v13910_v61 = vld [vmem:[%s15337_s11 + $0x224] sm:$0xf0]  ;;  %7708 = vmatpush.bf16.msrb.mxu2 %v9782_v59 }
 0x270   : > { %v9749_v63 = vld [vmem:[%s15337_s11 + $0x408] sm:$0xf]  ;;  %v9494_v18 = vor.u32 %v13910_v61, %v9493_v60  ;;  %7683 = vmatpush.bf16.msrb.mxu0 %v9238_v10  ;;  %v7477_v10 = vpop.f32.mrf.mxu0 }
 0x271   : > { %v13974_v1 = vld [vmem:[%s15337_s11 + $0x424] sm:$0xf0]  ;;  %7721 = vmatpush.bf16.msrb.mxu3 %v10038_v0 }
 0x272   : > { %v10005_v14 = vld [vmem:[%s15337_s11 + $0x608] sm:$0xf]  ;;  %v9750_v19 = vor.u32 %v13974_v1, %v9749_v63  ;;  %7696 = vmatpush.bf16.msrb.mxu1 %v9494_v18 }
 0x273   : > { %v14038_v3 = vld [vmem:[%s15337_s11 + $0x624] sm:$0xf0]  ;;  %7684 = vmatmul.bf16.vlgmr.msrb.gmra.mxu0 %v15461_v28 }
 0x274   : > { %v10485_v5 = vld [vmem:[%s15337_s11 + $0x9c8] sm:$0xf]  ;;  %v10006_v22 = vor.u32 %v14038_v3, %v10005_v14  ;;  %7709 = vmatpush.bf16.msrb.mxu2 %v9750_v19 }
 0x275   : > { %v14158_v6 = vld [vmem:[%s15337_s11 + $0x9e4] sm:$0xf0]  ;;  %7697 = vmatmul.bf16.vlgmr.msrb.gmra.mxu1 %v15467_v34 }
 0x276   : > { %v10741_v7 = vld [vmem:[%s15337_s11 + $0xbc8] sm:$0xf]  ;;  %v10486_v23 = vor.u32 %v14158_v6, %v10485_v5  ;;  %7722 = vmatpush.bf16.msrb.mxu3 %v10006_v22 }
 0x277   : > { %v14222_v13 = vld [vmem:[%s15337_s11 + $0xbe4] sm:$0xf0]  ;;  %7710 = vmatmul.bf16.vlgmr.msrb.gmra.mxu2 %v15459_v27 }
 0x278   : > { %v10997_v16 = vld [vmem:[%s15337_s11 + $0xdc8] sm:$0xf]  ;;  %v10742_v24 = vor.u32 %v14222_v13, %v10741_v7  ;;  %7728 = vmatpush.bf16.msra.mxu0 %v10486_v23 }
 0x279   : > { %v14286_v17 = vld [vmem:[%s15337_s11 + $0xde4] sm:$0xf0]  ;;  %7723 = vmatmul.bf16.vlgmr.msrb.gmra.mxu3 %v15463_v29 }
 0x27a   : > { %v11253_v20 = vld [vmem:[%s15337_s11 + $0xfc8] sm:$0xf]  ;;  %v10998_v26 = vor.u32 %v14286_v17, %v10997_v16  ;;  %7741 = vmatpush.bf16.msra.mxu1 %v10742_v24 }
 0x27b   : > { %v14350_v21 = vld [vmem:[%s15337_s11 + $0xfe4] sm:$0xf0] }
 0x27c   : > { %v10453_v30 = vld [vmem:[%s15337_s11 + $0x988] sm:$0xf]  ;;  %v11254_v43 = vor.u32 %v14350_v21, %v11253_v20  ;;  %7754 = vmatpush.bf16.msra.mxu2 %v10998_v26  ;;  %v7478_v20 = vadd.f32 %v7477_v10, %v16064_v45  ;;  %v7490_v21 = vpop.f32.mrf.mxu1 }
 0x27d   : > { %v14150_v33 = vld [vmem:[%s15337_s11 + $0x9a4] sm:$0xf0] }
 0x27e   : > { %v10709_v35 = vld [vmem:[%s15337_s11 + $0xb88] sm:$0xf]  ;;  %v10454_v42 = vor.u32 %v14150_v33, %v10453_v30  ;;  %7767 = vmatpush.bf16.msra.mxu3 %v11254_v43 }
 0x27f   : > { %v14214_v36 = vld [vmem:[%s15337_s11 + $0xba4] sm:$0xf0] }
 0x280   : > { %v10965_v37 = vld [vmem:[%s15337_s11 + $0xd88] sm:$0xf]  ;;  %v10710_v44 = vor.u32 %v14214_v36, %v10709_v35  ;;  %7729 = vmatpush.bf16.msra.mxu0 %v10454_v42  ;;  %v7491_v35 = vadd.f32 %v7490_v21, %v7478_v20 }
 0x281   : > { %v14278_v39 = vld [vmem:[%s15337_s11 + $0xda4] sm:$0xf0] }
 0x282   : > { %v11221_v40 = vld [vmem:[%s15337_s11 + $0xf88] sm:$0xf]  ;;  %v10966_v50 = vor.u32 %v14278_v39, %v10965_v37  ;;  %7742 = vmatpush.bf16.msra.mxu1 %v10710_v44 }
 0x283   : > { %v14342_v41 = vld [vmem:[%s15337_s11 + $0xfa4] sm:$0xf0] }
 0x284   : > { %v10421_v51 = vld [vmem:[%s15337_s11 + $0x948] sm:$0xf]  ;;  %v11222_v62 = vor.u32 %v14342_v41, %v11221_v40  ;;  %7755 = vmatpush.bf16.msra.mxu2 %v10966_v50  ;;  %v7503_v41 = vpop.f32.mrf.mxu2 }
 0x285   : > { %v14142_v52 = vld [vmem:[%s15337_s11 + $0x964] sm:$0xf0] }
 0x286   : > { %v10677_v53 = vld [vmem:[%s15337_s11 + $0xb48] sm:$0xf]  ;;  %v10422_v59 = vor.u32 %v14142_v52, %v10421_v51  ;;  %7768 = vmatpush.bf16.msra.mxu3 %v11222_v62  ;;  %v7504_v52 = vadd.f32 %v7503_v41, %v7491_v35 }
 0x287   : > { %v14206_v54 = vld [vmem:[%s15337_s11 + $0xb64] sm:$0xf0] }
 0x288   : > { %v10933_v55 = vld [vmem:[%s15337_s11 + $0xd48] sm:$0xf]  ;;  %v10678_v60 = vor.u32 %v14206_v54, %v10677_v53  ;;  %7730 = vmatpush.bf16.msra.mxu0 %v10422_v59  ;;  %v7516_v53 = vpop.f32.mrf.mxu3 }
 0x289   : > { %v14270_v56 = vld [vmem:[%s15337_s11 + $0xd64] sm:$0xf0] }
 0x28a   : > { %v11189_v57 = vld [vmem:[%s15337_s11 + $0xf48] sm:$0xf]  ;;  %v10934_v61 = vor.u32 %v14270_v56, %v10933_v55  ;;  %7743 = vmatpush.bf16.msra.mxu1 %v10678_v60  ;;  %v16132_v56 = vadd.f32 %v7516_v53, %v7504_v52 }
 0x28b   : > { %v14334_v58 = vld [vmem:[%s15337_s11 + $0xf64] sm:$0xf0] }
 0x28c   : > { %v10389_v63 = vld [vmem:[%s15337_s11 + $0x908] sm:$0xf]  ;;  %v11190_v14 = vor.u32 %v14334_v58, %v11189_v57  ;;  %7756 = vmatpush.bf16.msra.mxu2 %v10934_v61  ;;  %v7479_v57 = vpop.f32.mrf.mxu0  ;;  %v7505_v20 = vpop.f32.mrf.mxu2 }
 0x28d   : > { %v14134_v0 = vld [vmem:[%s15337_s11 + $0x924] sm:$0xf0] }
 0x28e   : > { %v10645_v1 = vld [vmem:[%s15337_s11 + $0xb08] sm:$0xf]  ;;  %v10390_v9 = vor.u32 %v14134_v0, %v10389_v63  ;;  %7769 = vmatpush.bf16.msra.mxu3 %v11190_v14  ;;  %v7492_v0 = vpop.f32.mrf.mxu1 }
 0x28f   : > { %v14198_v3 = vld [vmem:[%s15337_s11 + $0xb24] sm:$0xf0] }
 0x290   : > { %v10901_v4 = vld [vmem:[%s15337_s11 + $0xd08] sm:$0xf]  ;;  %v10646_v13 = vor.u32 %v14198_v3, %v10645_v1  ;;  %7731 = vmatpush.bf16.msra.mxu0 %v10390_v9 }
 0x291   : > { %v14262_v5 = vld [vmem:[%s15337_s11 + $0xd24] sm:$0xf0] }
 0x292   : > { %v11157_v6 = vld [vmem:[%s15337_s11 + $0xf08] sm:$0xf]  ;;  %v10902_v16 = vor.u32 %v14262_v5, %v10901_v4  ;;  %7744 = vmatpush.bf16.msra.mxu1 %v10646_v13 }
 0x293   : > { %v14326_v7 = vld [vmem:[%s15337_s11 + $0xf24] sm:$0xf0] }
 0x294   : > { %v10357_v17 = vld [vmem:[%s15337_s11 + $0x8c8] sm:$0xf]  ;;  %v11158_v22 = vor.u32 %v14326_v7, %v11157_v6  ;;  %7757 = vmatpush.bf16.msra.mxu2 %v10902_v16 }
 0x295   : > { %v14126_v18 = vld [vmem:[%s15337_s11 + $0x8e4] sm:$0xf0] }
 0x296   : > { %v10613_v19 = vld [vmem:[%s15337_s11 + $0xac8] sm:$0xf]  ;;  %v10358_v43 = vor.u32 %v14126_v18, %v10357_v17  ;;  %7770 = vmatpush.bf16.msra.mxu3 %v11158_v22 }
 0x297   : > { %v14190_v23 = vld [vmem:[%s15337_s11 + $0xae4] sm:$0xf0] }
 0x298   : > { %v10869_v24 = vld [vmem:[%s15337_s11 + $0xcc8] sm:$0xf]  ;;  %v10614_v45 = vor.u32 %v14190_v23, %v10613_v19  ;;  %7732 = vmatpush.bf16.msra.mxu0 %v10358_v43 }
 0x299   : > { %v14254_v26 = vld [vmem:[%s15337_s11 + $0xce4] sm:$0xf0] }
 0x29a   : > { %v11125_v30 = vld [vmem:[%s15337_s11 + $0xec8] sm:$0xf]  ;;  %v10870_v36 = vor.u32 %v14254_v26, %v10869_v24  ;;  %7745 = vmatpush.bf16.msra.mxu1 %v10614_v45  ;;  %v7518_v26 = vpop.f32.mrf.mxu3 }
 0x29b   : > { %v14318_v33 = vld [vmem:[%s15337_s11 + $0xee4] sm:$0xf0] }
 0x29c   : > { %v10325_v37 = vld [vmem:[%s15337_s11 + $0x888] sm:$0xf]  ;;  %v11126_v42 = vor.u32 %v14318_v33, %v11125_v30  ;;  %7758 = vmatpush.bf16.msra.mxu2 %v10870_v36 }
 0x29d   : > { %v14118_v39 = vld [vmem:[%s15337_s11 + $0x8a4] sm:$0xf0] }
 0x29e   : > { %v10581_v40 = vld [vmem:[%s15337_s11 + $0xa88] sm:$0xf]  ;;  %v10326_v55 = vor.u32 %v14118_v39, %v10325_v37  ;;  %7771 = vmatpush.bf16.msra.mxu3 %v11126_v42 }
 0x29f   : > { %v14182_v44 = vld [vmem:[%s15337_s11 + $0xaa4] sm:$0xf0] }
 0x2a0   : > { %v10837_v50 = vld [vmem:[%s15337_s11 + $0xc88] sm:$0xf]  ;;  %v10582_v58 = vor.u32 %v14182_v44, %v10581_v40  ;;  %7733 = vmatpush.bf16.msra.mxu0 %v10326_v55 }
 0x2a1   : > { %v14246_v51 = vld [vmem:[%s15337_s11 + $0xca4] sm:$0xf0] }
 0x2a2   : > { %v11093_v62 = vld [vmem:[%s15337_s11 + $0xe88] sm:$0xf]  ;;  %v10838_v59 = vor.u32 %v14246_v51, %v10837_v50  ;;  %7746 = vmatpush.bf16.msra.mxu1 %v10582_v58 }
 0x2a3   : > { %v14310_v54 = vld [vmem:[%s15337_s11 + $0xea4] sm:$0xf0] }
 0x2a4   : > { %v10293_v60 = vld [vmem:[%s15337_s11 + $0x848] sm:$0xf]  ;;  %v11094_v1 = vor.u32 %v14310_v54, %v11093_v62  ;;  %7759 = vmatpush.bf16.msra.mxu2 %v10838_v59 }
 0x2a5   : > { %v14110_v61 = vld [vmem:[%s15337_s11 + $0x864] sm:$0xf0] }
 0x2a6   : > { %v10549_v63 = vld [vmem:[%s15337_s11 + $0xa48] sm:$0xf]  ;;  %v10294_v7 = vor.u32 %v14110_v61, %v10293_v60  ;;  %7772 = vmatpush.bf16.msra.mxu3 %v11094_v1 }
 0x2a7   : > { %v14174_v14 = vld [vmem:[%s15337_s11 + $0xa64] sm:$0xf0] }
 0x2a8   : > { %v10805_v3 = vld [vmem:[%s15337_s11 + $0xc48] sm:$0xf]  ;;  %v10550_v13 = vor.u32 %v14174_v14, %v10549_v63  ;;  %7734 = vmatpush.bf16.msra.mxu0 %v10294_v7 }
 0x2a9   : > { %v14238_v4 = vld [vmem:[%s15337_s11 + $0xc64] sm:$0xf0] }
 0x2aa   : > { %v11061_v5 = vld [vmem:[%s15337_s11 + $0xe48] sm:$0xf]  ;;  %v10806_v16 = vor.u32 %v14238_v4, %v10805_v3  ;;  %7747 = vmatpush.bf16.msra.mxu1 %v10550_v13 }
 0x2ab   : > { %v14302_v6 = vld [vmem:[%s15337_s11 + $0xe64] sm:$0xf0] }
 0x2ac   : > { %v10261_v9 = vld [vmem:[%s15337_s11 + $0x808] sm:$0xf]  ;;  %v11062_v21 = vor.u32 %v14302_v6, %v11061_v5  ;;  %7760 = vmatpush.bf16.msra.mxu2 %v10806_v16 }
 0x2ad   : > { %v14102_v10 = vld [vmem:[%s15337_s11 + $0x824] sm:$0xf0] }
 0x2ae   : > { %v10517_v17 = vld [vmem:[%s15337_s11 + $0xa08] sm:$0xf]  ;;  %v10262_v43 = vor.u32 %v14102_v10, %v10261_v9  ;;  %7773 = vmatpush.bf16.msra.mxu3 %v11062_v21 }
 0x2af   : > { %v14166_v18 = vld [vmem:[%s15337_s11 + $0xa24] sm:$0xf0] }
 0x2b0   : > { %v10773_v19 = vld [vmem:[%s15337_s11 + $0xc08] sm:$0xf]  ;;  %v10518_v39 = vor.u32 %v14166_v18, %v10517_v17  ;;  %7735 = vmatpush.bf16.msra.mxu0 %v10262_v43 }
 0x2b1   : > { %v14230_v22 = vld [vmem:[%s15337_s11 + $0xc24] sm:$0xf0] }
 0x2b2   : > { %v11029_v23 = vld [vmem:[%s15337_s11 + $0xe08] sm:$0xf]  ;;  %v10774_v40 = vor.u32 %v14230_v22, %v10773_v19  ;;  %7748 = vmatpush.bf16.msra.mxu1 %v10518_v39 }
 0x2b3   : > { %v14294_v24 = vld [vmem:[%s15337_s11 + $0xe24] sm:$0xf0]  ;;  %7736 = vmatmul.bf16.vlgmr.msra.gmra.mxu0 %v15513_v31 }
 0x2b4   : > { %v11509_v30 = vld [vmem:[%s15337_s11 + $0x11c8] sm:$0xf]  ;;  %v11030_v44 = vor.u32 %v14294_v24, %v11029_v23  ;;  %7761 = vmatpush.bf16.msra.mxu2 %v10774_v40 }
 0x2b5   : > { %v14414_v33 = vld [vmem:[%s15337_s11 + $0x11e4] sm:$0xf0]  ;;  %7749 = vmatmul.bf16.vlgmr.msra.gmra.mxu1 %v15519_v38 }
 0x2b6   : > { %v11765_v35 = vld [vmem:[%s15337_s11 + $0x13c8] sm:$0xf]  ;;  %v11510_v50 = vor.u32 %v14414_v33, %v11509_v30  ;;  %7774 = vmatpush.bf16.msra.mxu3 %v11030_v44  ;;  %v7529_v30 = vpop.f32.mrf.mxu0 }
 0x2b7   : > { %v14478_v45 = vld [vmem:[%s15337_s11 + $0x13e4] sm:$0xf0]  ;;  %7762 = vmatmul.bf16.vlgmr.msra.gmra.mxu2 %v15510_v25  ;;  %v7530_v43 = vadd.f32 %v7529_v30, %v16132_v56 }
 0x2b8   : > { %v12021_v36 = vld [vmem:[%s15337_s11 + $0x15c8] sm:$0xf]  ;;  %v11766_v51 = vor.u32 %v14478_v45, %v11765_v35  ;;  %7780 = vmatpush.bf16.msrb.mxu0 %v11510_v50 }
 0x2b9   : > { %v14542_v37 = vld [vmem:[%s15337_s11 + $0x15e4] sm:$0xf0]  ;;  %7775 = vmatmul.bf16.vlgmr.msra.gmra.mxu3 %v15515_v32 }
 0x2ba   : > { %v12277_v41 = vld [vmem:[%s15337_s11 + $0x17c8] sm:$0xf]  ;;  %v12022_v52 = vor.u32 %v14542_v37, %v12021_v36  ;;  %7793 = vmatpush.bf16.msrb.mxu1 %v11766_v51  ;;  %v7542_v36 = vpop.f32.mrf.mxu1 }
 0x2bb   : > { %v14606_v42 = vld [vmem:[%s15337_s11 + $0x17e4] sm:$0xf0]  ;;  %v7543_v50 = vadd.f32 %v7542_v36, %v7530_v43 }
 0x2bc   : > { %v11477_v53 = vld [vmem:[%s15337_s11 + $0x1188] sm:$0xf]  ;;  %v12278_v55 = vor.u32 %v14606_v42, %v12277_v41  ;;  %7806 = vmatpush.bf16.msrb.mxu2 %v12022_v52 }
 0x2bd   : > { %v14406_v62 = vld [vmem:[%s15337_s11 + $0x11a4] sm:$0xf0] }
 0x2be   : > { %v11733_v54 = vld [vmem:[%s15337_s11 + $0x1388] sm:$0xf]  ;;  %v11478_v63 = vor.u32 %v14406_v62, %v11477_v53  ;;  %7819 = vmatpush.bf16.msrb.mxu3 %v12278_v55 }
 0x2bf   : > { %v14470_v57 = vld [vmem:[%s15337_s11 + $0x13a4] sm:$0xf0] }
 0x2c0   : > { %v11989_v58 = vld [vmem:[%s15337_s11 + $0x1588] sm:$0xf]  ;;  %v11734_v0 = vor.u32 %v14470_v57, %v11733_v54  ;;  %7781 = vmatpush.bf16.msrb.mxu0 %v11478_v63  ;;  %v7555_v63 = vpop.f32.mrf.mxu2 }
 0x2c1   : > { %v14534_v59 = vld [vmem:[%s15337_s11 + $0x15a4] sm:$0xf0] }
 0x2c2   : > { %v12245_v60 = vld [vmem:[%s15337_s11 + $0x1788] sm:$0xf]  ;;  %v11990_v1 = vor.u32 %v14534_v59, %v11989_v58  ;;  %7794 = vmatpush.bf16.msrb.mxu1 %v11734_v0 }
 0x2c3   : > { %v14598_v61 = vld [vmem:[%s15337_s11 + $0x17a4] sm:$0xf0] }
 0x2c4   : > { %v11445_v14 = vld [vmem:[%s15337_s11 + $0x1148] sm:$0xf]  ;;  %v12246_v5 = vor.u32 %v14598_v61, %v12245_v60  ;;  %7807 = vmatpush.bf16.msrb.mxu2 %v11990_v1 }
 0x2c5   : > { %v14398_v3 = vld [vmem:[%s15337_s11 + $0x1164] sm:$0xf0] }
 0x2c6   : > { %v11701_v4 = vld [vmem:[%s15337_s11 + $0x1348] sm:$0xf]  ;;  %v11446_v16 = vor.u32 %v14398_v3, %v11445_v14  ;;  %7820 = vmatpush.bf16.msrb.mxu3 %v12246_v5  ;;  %v7556_v3 = vadd.f32 %v7555_v63, %v7543_v50 }
 0x2c7   : > { %v14462_v6 = vld [vmem:[%s15337_s11 + $0x1364] sm:$0xf0] }
 0x2c8   : > { %v11957_v7 = vld [vmem:[%s15337_s11 + $0x1548] sm:$0xf]  ;;  %v11702_v17 = vor.u32 %v14462_v6, %v11701_v4  ;;  %7782 = vmatpush.bf16.msrb.mxu0 %v11446_v16  ;;  %v7568_v4 = vpop.f32.mrf.mxu3 }
 0x2c9   : > { %v14526_v9 = vld [vmem:[%s15337_s11 + $0x1564] sm:$0xf0] }
 0x2ca   : > { %v12213_v10 = vld [vmem:[%s15337_s11 + $0x1748] sm:$0xf]  ;;  %v11958_v18 = vor.u32 %v14526_v9, %v11957_v7  ;;  %7795 = vmatpush.bf16.msrb.mxu1 %v11702_v17  ;;  %v7531_v7 = vpop.f32.mrf.mxu0 }
 0x2cb   : > { %v14590_v13 = vld [vmem:[%s15337_s11 + $0x1764] sm:$0xf0] }
 0x2cc   : > { %v11413_v19 = vld [vmem:[%s15337_s11 + $0x1108] sm:$0xf]  ;;  %v12214_v22 = vor.u32 %v14590_v13, %v12213_v10  ;;  %7808 = vmatpush.bf16.msrb.mxu2 %v11958_v18  ;;  %v7544_v10 = vpop.f32.mrf.mxu1  ;;  %v16203_v13 = vadd.f32 %v7568_v4, %v7556_v3 }
 0x2cd   : > { %v14390_v20 = vld [vmem:[%s15337_s11 + $0x1124] sm:$0xf0] }
 0x2ce   : > { %v11669_v21 = vld [vmem:[%s15337_s11 + $0x1308] sm:$0xf]  ;;  %v11414_v45 = vor.u32 %v14390_v20, %v11413_v19  ;;  %7821 = vmatpush.bf16.msrb.mxu3 %v12214_v22 }
 0x2cf   : > { %v14454_v23 = vld [vmem:[%s15337_s11 + $0x1324] sm:$0xf0] }
 0x2d0   : > { %v11925_v24 = vld [vmem:[%s15337_s11 + $0x1508] sm:$0xf]  ;;  %v11670_v37 = vor.u32 %v14454_v23, %v11669_v21  ;;  %7783 = vmatpush.bf16.msrb.mxu0 %v11414_v45 }
 0x2d1   : > { %v14518_v26 = vld [vmem:[%s15337_s11 + $0x1524] sm:$0xf0] }
 0x2d2   : > { %v12181_v33 = vld [vmem:[%s15337_s11 + $0x1708] sm:$0xf]  ;;  %v11926_v39 = vor.u32 %v14518_v26, %v11925_v24  ;;  %7796 = vmatpush.bf16.msrb.mxu1 %v11670_v37 }
 0x2d3   : > { %v14582_v35 = vld [vmem:[%s15337_s11 + $0x1724] sm:$0xf0] }
 0x2d4   : > { %v11381_v40 = vld [vmem:[%s15337_s11 + $0x10c8] sm:$0xf]  ;;  %v12182_v44 = vor.u32 %v14582_v35, %v12181_v33  ;;  %7809 = vmatpush.bf16.msrb.mxu2 %v11926_v39 }
 0x2d5   : > { %v14382_v41 = vld [vmem:[%s15337_s11 + $0x10e4] sm:$0xf0] }
 0x2d6   : > { %v11637_v42 = vld [vmem:[%s15337_s11 + $0x12c8] sm:$0xf]  ;;  %v11382_v54 = vor.u32 %v14382_v41, %v11381_v40  ;;  %7822 = vmatpush.bf16.msrb.mxu3 %v12182_v44 }
 0x2d7   : > { %v14446_v51 = vld [vmem:[%s15337_s11 + $0x12e4] sm:$0xf0] }
 0x2d8   : > { %v11893_v52 = vld [vmem:[%s15337_s11 + $0x14c8] sm:$0xf]  ;;  %v11638_v55 = vor.u32 %v14446_v51, %v11637_v42  ;;  %7784 = vmatpush.bf16.msrb.mxu0 %v11382_v54  ;;  %v7557_v51 = vpop.f32.mrf.mxu2 }
 0x2d9   : > { %v14510_v56 = vld [vmem:[%s15337_s11 + $0x14e4] sm:$0xf0] }
 0x2da   : > { %v12149_v53 = vld [vmem:[%s15337_s11 + $0x16c8] sm:$0xf]  ;;  %v11894_v57 = vor.u32 %v14510_v56, %v11893_v52  ;;  %7797 = vmatpush.bf16.msrb.mxu1 %v11638_v55 }
 0x2db   : > { %v14574_v62 = vld [vmem:[%s15337_s11 + $0x16e4] sm:$0xf0] }
 0x2dc   : > { %v11349_v58 = vld [vmem:[%s15337_s11 + $0x1088] sm:$0xf]  ;;  %v12150_v61 = vor.u32 %v14574_v62, %v12149_v53  ;;  %7810 = vmatpush.bf16.msrb.mxu2 %v11894_v57  ;;  %v7570_v62 = vpop.f32.mrf.mxu3 }
 0x2dd   : > { %v14374_v59 = vld [vmem:[%s15337_s11 + $0x10a4] sm:$0xf0] }
 0x2de   : > { %v11605_v60 = vld [vmem:[%s15337_s11 + $0x1288] sm:$0xf]  ;;  %v11350_v9 = vor.u32 %v14374_v59, %v11349_v58  ;;  %7823 = vmatpush.bf16.msrb.mxu3 %v12150_v61 }
 0x2df   : > { %v14438_v0 = vld [vmem:[%s15337_s11 + $0x12a4] sm:$0xf0] }
 0x2e0   : > { %v11861_v1 = vld [vmem:[%s15337_s11 + $0x1488] sm:$0xf]  ;;  %v11606_v16 = vor.u32 %v14438_v0, %v11605_v60  ;;  %7785 = vmatpush.bf16.msrb.mxu0 %v11350_v9 }
 0x2e1   : > { %v14502_v14 = vld [vmem:[%s15337_s11 + $0x14a4] sm:$0xf0] }
 0x2e2   : > { %v12117_v5 = vld [vmem:[%s15337_s11 + $0x1688] sm:$0xf]  ;;  %v11862_v17 = vor.u32 %v14502_v14, %v11861_v1  ;;  %7798 = vmatpush.bf16.msrb.mxu1 %v11606_v16 }
 0x2e3   : > { %v14566_v6 = vld [vmem:[%s15337_s11 + $0x16a4] sm:$0xf0] }
 0x2e4   : > { %v11317_v18 = vld [vmem:[%s15337_s11 + $0x1048] sm:$0xf]  ;;  %v12118_v21 = vor.u32 %v14566_v6, %v12117_v5  ;;  %7811 = vmatpush.bf16.msrb.mxu2 %v11862_v17 }
 0x2e5   : > { %v14366_v19 = vld [vmem:[%s15337_s11 + $0x1064] sm:$0xf0] }
 0x2e6   : > { %v11573_v20 = vld [vmem:[%s15337_s11 + $0x1248] sm:$0xf]  ;;  %v11318_v33 = vor.u32 %v14366_v19, %v11317_v18  ;;  %7824 = vmatpush.bf16.msrb.mxu3 %v12118_v21 }
 0x2e7   : > { %v14430_v22 = vld [vmem:[%s15337_s11 + $0x1264] sm:$0xf0] }
 0x2e8   : > { %v11829_v23 = vld [vmem:[%s15337_s11 + $0x1448] sm:$0xf]  ;;  %v11574_v45 = vor.u32 %v14430_v22, %v11573_v20  ;;  %7786 = vmatpush.bf16.msrb.mxu0 %v11318_v33 }
 0x2e9   : > { %v14494_v24 = vld [vmem:[%s15337_s11 + $0x1464] sm:$0xf0] }
 0x2ea   : > { %v12085_v26 = vld [vmem:[%s15337_s11 + $0x1648] sm:$0xf]  ;;  %v11830_v36 = vor.u32 %v14494_v24, %v11829_v23  ;;  %7799 = vmatpush.bf16.msrb.mxu1 %v11574_v45 }
 0x2eb   : > { %v14558_v30 = vld [vmem:[%s15337_s11 + $0x1664] sm:$0xf0] }
 0x2ec   : > { %v11285_v35 = vld [vmem:[%s15337_s11 + $0x1008] sm:$0xf]  ;;  %v12086_v41 = vor.u32 %v14558_v30, %v12085_v26  ;;  %7812 = vmatpush.bf16.msrb.mxu2 %v11830_v36 }
 0x2ed   : > { %v14358_v43 = vld [vmem:[%s15337_s11 + $0x1024] sm:$0xf0] }
 0x2ee   : > { %v11541_v37 = vld [vmem:[%s15337_s11 + $0x1208] sm:$0xf]  ;;  %v11286_v54 = vor.u32 %v14358_v43, %v11285_v35  ;;  %7825 = vmatpush.bf16.msrb.mxu3 %v12086_v41 }
 0x2ef   : > { %v14422_v39 = vld [vmem:[%s15337_s11 + $0x1224] sm:$0xf0] }
 0x2f0   : > { %v11797_v40 = vld [vmem:[%s15337_s11 + $0x1408] sm:$0xf]  ;;  %v11542_v59 = vor.u32 %v14422_v39, %v11541_v37  ;;  %7787 = vmatpush.bf16.msrb.mxu0 %v11286_v54 }
 0x2f1   : > { %v14486_v42 = vld [vmem:[%s15337_s11 + $0x1424] sm:$0xf0] }
 0x2f2   : > { %v12053_v44 = vld [vmem:[%s15337_s11 + $0x1608] sm:$0xf]  ;;  %v11798_v60 = vor.u32 %v14486_v42, %v11797_v40  ;;  %7800 = vmatpush.bf16.msrb.mxu1 %v11542_v59 }
 0x2f3   : > { %v14550_v50 = vld [vmem:[%s15337_s11 + $0x1624] sm:$0xf0]  ;;  %7788 = vmatmul.bf16.vlgmr.msrb.gmra.mxu0 %v15587_v8 }
 0x2f4   : > { %v12533_v52 = vld [vmem:[%s15337_s11 + $0x19c8] sm:$0xf]  ;;  %v12054_v0 = vor.u32 %v14550_v50, %v12053_v44  ;;  %7813 = vmatpush.bf16.msrb.mxu2 %v11798_v60 }
 0x2f5   : > { %v14670_v56 = vld [vmem:[%s15337_s11 + $0x19e4] sm:$0xf0]  ;;  %7801 = vmatmul.bf16.vlgmr.msrb.gmra.mxu1 %v15593_v12 }
 0x2f6   : > { %v12789_v53 = vld [vmem:[%s15337_s11 + $0x1bc8] sm:$0xf]  ;;  %v12534_v1 = vor.u32 %v14670_v56, %v12533_v52  ;;  %7826 = vmatpush.bf16.msrb.mxu3 %v12054_v0  ;;  %v7581_v56 = vpop.f32.mrf.mxu0 }
 0x2f7   : > { %v14734_v55 = vld [vmem:[%s15337_s11 + $0x1be4] sm:$0xf0]  ;;  %7814 = vmatmul.bf16.vlgmr.msrb.gmra.mxu2 %v15591_v11  ;;  %v7582_v54 = vadd.f32 %v7581_v56, %v16203_v13 }
 0x2f8   : > { %v13045_v57 = vld [vmem:[%s15337_s11 + $0x1dc8] sm:$0xf]  ;;  %v12790_v14 = vor.u32 %v14734_v55, %v12789_v53  ;;  %7832 = vmatpush.bf16.msra.mxu0 %v12534_v1 }
 0x2f9   : > { %v14798_v58 = vld [vmem:[%s15337_s11 + $0x1de4] sm:$0xf0]  ;;  %7827 = vmatmul.bf16.vlgmr.msrb.gmra.mxu3 %v15596_v15 }
 0x2fa   : > { %v13301_v61 = vld [vmem:[%s15337_s11 + $0x1fc8] sm:$0xf]  ;;  %v13046_v3 = vor.u32 %v14798_v58, %v13045_v57  ;;  %7845 = vmatpush.bf16.msra.mxu1 %v12790_v14  ;;  %v7594_v57 = vpop.f32.mrf.mxu1 }
 0x2fb   : > { %v14862_v63 = vld [vmem:[%s15337_s11 + $0x1fe4] sm:$0xf0]  ;;  %v7595_v1 = vadd.f32 %v7594_v57, %v7582_v54 }
 0x2fc   : > { %v12501_v4 = vld [vmem:[%s15337_s11 + $0x1988] sm:$0xf]  ;;  %v13302_v7 = vor.u32 %v14862_v63, %v13301_v61  ;;  %7858 = vmatpush.bf16.msra.mxu2 %v13046_v3 }
 0x2fd   : > { %v14662_v5 = vld [vmem:[%s15337_s11 + $0x19a4] sm:$0xf0] }
 0x2fe   : > { %v12757_v6 = vld [vmem:[%s15337_s11 + $0x1b88] sm:$0xf]  ;;  %v12502_v19 = vor.u32 %v14662_v5, %v12501_v4  ;;  %7871 = vmatpush.bf16.msra.mxu3 %v13302_v7 }
 0x2ff   : > { %v14726_v9 = vld [vmem:[%s15337_s11 + $0x1ba4] sm:$0xf0] }
 0x300   : > { %v13013_v10 = vld [vmem:[%s15337_s11 + $0x1d88] sm:$0xf]  ;;  %v12758_v20 = vor.u32 %v14726_v9, %v12757_v6  ;;  %7833 = vmatpush.bf16.msra.mxu0 %v12502_v19  ;;  %v7607_v19 = vpop.f32.mrf.mxu2 }
 0x301   : > { %v14790_v16 = vld [vmem:[%s15337_s11 + $0x1da4] sm:$0xf0] }
 0x302   : > { %v13269_v17 = vld [vmem:[%s15337_s11 + $0x1f88] sm:$0xf]  ;;  %v13014_v21 = vor.u32 %v14790_v16, %v13013_v10  ;;  %7846 = vmatpush.bf16.msra.mxu1 %v12758_v20 }
 0x303   : > { %v14854_v18 = vld [vmem:[%s15337_s11 + $0x1fa4] sm:$0xf0] }
 0x304   : > { %v12469_v22 = vld [vmem:[%s15337_s11 + $0x1948] sm:$0xf]  ;;  %v13270_v26 = vor.u32 %v14854_v18, %v13269_v17  ;;  %7859 = vmatpush.bf16.msra.mxu2 %v13014_v21 }
 0x305   : > { %v14654_v23 = vld [vmem:[%s15337_s11 + $0x1964] sm:$0xf0] }
 0x306   : > { %v12725_v24 = vld [vmem:[%s15337_s11 + $0x1b48] sm:$0xf]  ;;  %v12470_v36 = vor.u32 %v14654_v23, %v12469_v22  ;;  %7872 = vmatpush.bf16.msra.mxu3 %v13270_v26  ;;  %v7608_v23 = vadd.f32 %v7607_v19, %v7595_v1  ;;  %v9719_v19 = vld [vmem:[%s15337_s11 + $0x3e8] sm:$0xf0] }
 0x307   : > { %v14718_v30 = vld [vmem:[%s15337_s11 + $0x1b64] sm:$0xf0] }
 0x308   : > { %v12981_v33 = vld [vmem:[%s15337_s11 + $0x1d48] sm:$0xf]  ;;  %v12726_v37 = vor.u32 %v14718_v30, %v12725_v24  ;;  %7834 = vmatpush.bf16.msra.mxu0 %v12470_v36  ;;  %v7620_v24 = vpop.f32.mrf.mxu3 }
 0x309   : > { %v14782_v35 = vld [vmem:[%s15337_s11 + $0x1d64] sm:$0xf0] }
 0x30a   : > { %v13237_v43 = vld [vmem:[%s15337_s11 + $0x1f48] sm:$0xf]  ;;  %v12982_v39 = vor.u32 %v14782_v35, %v12981_v33  ;;  %7847 = vmatpush.bf16.msra.mxu1 %v12726_v37  ;;  %v7583_v33 = vpop.f32.mrf.mxu0 }
 0x30b   : > { %v14846_v45 = vld [vmem:[%s15337_s11 + $0x1f64] sm:$0xf0] }
 0x30c   : > { %v12437_v40 = vld [vmem:[%s15337_s11 + $0x1908] sm:$0xf]  ;;  %v13238_v44 = vor.u32 %v14846_v45, %v13237_v43  ;;  %7860 = vmatpush.bf16.msra.mxu2 %v12982_v39  ;;  %v7596_v43 = vpop.f32.mrf.mxu1  ;;  %v16274_v45 = vadd.f32 %v7620_v24, %v7608_v23 }
 0x30d   : > { %v14646_v41 = vld [vmem:[%s15337_s11 + $0x1924] sm:$0xf0]  ;;  %v13890_v43 = vld [vmem:[%s15337_s11 + $0x18c] sm:$0xf] }
 0x30e   : > { %v12693_v42 = vld [vmem:[%s15337_s11 + $0x1b08] sm:$0xf]  ;;  %v12438_v55 = vor.u32 %v14646_v41, %v12437_v40  ;;  %7873 = vmatpush.bf16.msra.mxu3 %v13238_v44 }
 0x30f   : > { %v14710_v50 = vld [vmem:[%s15337_s11 + $0x1b24] sm:$0xf0] }
 0x310   : > { %v12949_v51 = vld [vmem:[%s15337_s11 + $0x1d08] sm:$0xf]  ;;  %v12694_v58 = vor.u32 %v14710_v50, %v12693_v42  ;;  %7835 = vmatpush.bf16.msra.mxu0 %v12438_v55 }
 0x311   : > { %v14774_v52 = vld [vmem:[%s15337_s11 + $0x1d24] sm:$0xf0] }
 0x312   : > { %v13205_v53 = vld [vmem:[%s15337_s11 + $0x1f08] sm:$0xf]  ;;  %v12950_v59 = vor.u32 %v14774_v52, %v12949_v51  ;;  %7848 = vmatpush.bf16.msra.mxu1 %v12694_v58 }
 0x313   : > { %v14838_v62 = vld [vmem:[%s15337_s11 + $0x1f24] sm:$0xf0] }
 0x314   : > { %v12405_v60 = vld [vmem:[%s15337_s11 + $0x18c8] sm:$0xf]  ;;  %v13206_v0 = vor.u32 %v14838_v62, %v13205_v53  ;;  %7861 = vmatpush.bf16.msra.mxu2 %v12950_v59 }
 0x315   : > { %v14638_v61 = vld [vmem:[%s15337_s11 + $0x18e4] sm:$0xf0] }
 0x316   : > { %v12661_v63 = vld [vmem:[%s15337_s11 + $0x1ac8] sm:$0xf]  ;;  %v12406_v6 = vor.u32 %v14638_v61, %v12405_v60  ;;  %7874 = vmatpush.bf16.msra.mxu3 %v13206_v0 }
 0x317   : > { %v14702_v14 = vld [vmem:[%s15337_s11 + $0x1ae4] sm:$0xf0] }
 0x318   : > { %v12917_v3 = vld [vmem:[%s15337_s11 + $0x1cc8] sm:$0xf]  ;;  %v12662_v7 = vor.u32 %v14702_v14, %v12661_v63  ;;  %7836 = vmatpush.bf16.msra.mxu0 %v12406_v6  ;;  %v7609_v14 = vpop.f32.mrf.mxu2 }
 0x319   : > { %v14766_v13 = vld [vmem:[%s15337_s11 + $0x1ce4] sm:$0xf0]  ;;  %v13874_v14 = vld [vmem:[%s15337_s11 + $0x10c] sm:$0xf] }
 0x31a   : > { %v13173_v4 = vld [vmem:[%s15337_s11 + $0x1ec8] sm:$0xf]  ;;  %v12918_v9 = vor.u32 %v14766_v13, %v12917_v3  ;;  %7849 = vmatpush.bf16.msra.mxu1 %v12662_v7 }
 0x31b   : > { %v14830_v5 = vld [vmem:[%s15337_s11 + $0x1ee4] sm:$0xf0] }
 0x31c   : > { %v12373_v10 = vld [vmem:[%s15337_s11 + $0x1888] sm:$0xf]  ;;  %v13174_v18 = vor.u32 %v14830_v5, %v13173_v4  ;;  %7862 = vmatpush.bf16.msra.mxu2 %v12918_v9  ;;  %v7622_v5 = vpop.f32.mrf.mxu3  ;;  %v13898_v9 = vld [vmem:[%s15337_s11 + $0x1cc] sm:$0xf] }
 0x31d   : > { %v14630_v16 = vld [vmem:[%s15337_s11 + $0x18a4] sm:$0xf0]  ;;  %v9623_v5 = vld [vmem:[%s15337_s11 + $0x328] sm:$0xf0] }
 0x31e   : > { %v12629_v17 = vld [vmem:[%s15337_s11 + $0x1a88] sm:$0xf]  ;;  %v12374_v35 = vor.u32 %v14630_v16, %v12373_v10  ;;  %7875 = vmatpush.bf16.msra.mxu3 %v13174_v18  ;;  %v9463_v10 = vld [vmem:[%s15337_s11 + $0x1e8] sm:$0xf0] }
 0x31f   : > { %v14694_v20 = vld [vmem:[%s15337_s11 + $0x1aa4] sm:$0xf0]  ;;  %v13962_v18 = vld [vmem:[%s15337_s11 + $0x3cc] sm:$0xf]  ;;  %v9466_v23 = vor.u32 %v13898_v9, %v9463_v10  ;;  %v7646_v9 = vpop.f32.mrf.mxu1 }
 0x320   : > { %v12885_v21 = vld [vmem:[%s15337_s11 + $0x1c88] sm:$0xf]  ;;  %v12630_v36 = vor.u32 %v14694_v20, %v12629_v17  ;;  %7837 = vmatpush.bf16.msra.mxu0 %v12374_v35  ;;  %v9722_v33 = vor.u32 %v13962_v18, %v9719_v19 }
 0x321   : > { %v14758_v22 = vld [vmem:[%s15337_s11 + $0x1ca4] sm:$0xf0] }
 0x322   : > { %v13141_v26 = vld [vmem:[%s15337_s11 + $0x1e88] sm:$0xf]  ;;  %v12886_v37 = vor.u32 %v14758_v22, %v12885_v21  ;;  %7850 = vmatpush.bf16.msra.mxu1 %v12630_v36  ;;  %v9431_v36 = vld [vmem:[%s15337_s11 + $0x1a8] sm:$0xf0] }
 0x323   : > { %v14822_v30 = vld [vmem:[%s15337_s11 + $0x1ea4] sm:$0xf0] }
 0x324   : > { %v12341_v39 = vld [vmem:[%s15337_s11 + $0x1848] sm:$0xf]  ;;  %v13142_v42 = vor.u32 %v14822_v30, %v13141_v26  ;;  %7863 = vmatpush.bf16.msra.mxu2 %v12886_v37  ;;  %v13954_v37 = vld [vmem:[%s15337_s11 + $0x38c] sm:$0xf] }
 0x325   : > { %v14622_v40 = vld [vmem:[%s15337_s11 + $0x1864] sm:$0xf0] }
 0x326   : > { %v12597_v41 = vld [vmem:[%s15337_s11 + $0x1a48] sm:$0xf]  ;;  %v12342_v53 = vor.u32 %v14622_v40, %v12341_v39  ;;  %7876 = vmatpush.bf16.msra.mxu3 %v13142_v42  ;;  %v9687_v39 = vld [vmem:[%s15337_s11 + $0x3a8] sm:$0xf0]  ;;  %v9434_v42 = vor.u32 %v13890_v43, %v9431_v36 }
 0x327   : > { %v14686_v44 = vld [vmem:[%s15337_s11 + $0x1a64] sm:$0xf0] }
 0x328   : > { %v12853_v50 = vld [vmem:[%s15337_s11 + $0x1c48] sm:$0xf]  ;;  %v12598_v55 = vor.u32 %v14686_v44, %v12597_v41  ;;  %7838 = vmatpush.bf16.msra.mxu0 %v12342_v53  ;;  %v13882_v53 = vld [vmem:[%s15337_s11 + $0x14c] sm:$0xf] }
 0x329   : > { %v14750_v51 = vld [vmem:[%s15337_s11 + $0x1c64] sm:$0xf0] }
 0x32a   : > { %v13109_v52 = vld [vmem:[%s15337_s11 + $0x1e48] sm:$0xf]  ;;  %v12854_v57 = vor.u32 %v14750_v51, %v12853_v50  ;;  %7851 = vmatpush.bf16.msra.mxu1 %v12598_v55  ;;  %v9655_v55 = vld [vmem:[%s15337_s11 + $0x368] sm:$0xf0] }
 0x32b   : > { %v14814_v56 = vld [vmem:[%s15337_s11 + $0x1e64] sm:$0xf0] }
 0x32c   : > { %v12309_v62 = vld [vmem:[%s15337_s11 + $0x1808] sm:$0xf]  ;;  %v13110_v61 = vor.u32 %v14814_v56, %v13109_v52  ;;  %7864 = vmatpush.bf16.msra.mxu2 %v12854_v57  ;;  %v9690_v52 = vor.u32 %v13954_v37, %v9687_v39 }
 0x32d   : > { %v14614_v54 = vld [vmem:[%s15337_s11 + $0x1824] sm:$0xf0] }
 0x32e   : > { %v12565_v58 = vld [vmem:[%s15337_s11 + $0x1a08] sm:$0xf]  ;;  %v12310_v6 = vor.u32 %v14614_v54, %v12309_v62  ;;  %7877 = vmatpush.bf16.msra.mxu3 %v13110_v61  ;;  %v9399_v62 = vld [vmem:[%s15337_s11 + $0x168] sm:$0xf0] }
 0x32f   : > { %v14678_v59 = vld [vmem:[%s15337_s11 + $0x1a24] sm:$0xf0]  ;;  %v13946_v54 = vld [vmem:[%s15337_s11 + $0x34c] sm:$0xf] }
 0x330   : > { %v12821_v60 = vld [vmem:[%s15337_s11 + $0x1c08] sm:$0xf]  ;;  %v12566_v16 = vor.u32 %v14678_v59, %v12565_v58  ;;  %7839 = vmatpush.bf16.msra.mxu0 %v12310_v6  ;;  %v9402_v59 = vor.u32 %v13882_v53, %v9399_v62 }
 0x331   : > { %v14742_v63 = vld [vmem:[%s15337_s11 + $0x1c24] sm:$0xf0] }
 0x332   : > { %v13077_v0 = vld [vmem:[%s15337_s11 + $0x1e08] sm:$0xf]  ;;  %v12822_v17 = vor.u32 %v14742_v63, %v12821_v60  ;;  %7852 = vmatpush.bf16.msra.mxu1 %v12566_v16 }
 0x333   : > { %v14806_v1 = vld [vmem:[%s15337_s11 + $0x1e24] sm:$0xf0]  ;;  %7840 = vmatmul.bf16.vlgmr.msra.gmra.mxu0 %v15653_v46 }
 0x334   : > { %v13557_v3 = vld [vmem:[%s15337_s11 + $0x21c8] sm:$0xf]  ;;  %v13078_v20 = vor.u32 %v14806_v1, %v13077_v0  ;;  %7865 = vmatpush.bf16.msra.mxu2 %v12822_v17  ;;  %v9658_v0 = vor.u32 %v13946_v54, %v9655_v55  ;;  %v7648_v54 = vpop.f32.mrf.mxu1 }
 0x335   : > { %v14926_v13 = vld [vmem:[%s15337_s11 + $0x21e4] sm:$0xf0]  ;;  %7853 = vmatmul.bf16.vlgmr.msra.gmra.mxu1 %v15657_v48  ;;  %v10199_v54 = vld [vmem:[%s15337_s11 + $0x7a8] sm:$0xf0] }
 0x336   : > { %v13813_v4 = vld [vmem:[%s15337_s11 + $0x23c8] sm:$0xf]  ;;  %v13558_v21 = vor.u32 %v14926_v13, %v13557_v3  ;;  %7878 = vmatpush.bf16.msra.mxu3 %v13078_v20  ;;  %v9367_v3 = vld [vmem:[%s15337_s11 + $0x128] sm:$0xf0]  ;;  %v7633_v13 = vpop.f32.mrf.mxu0 }
 0x337   : > { %v14990_v7 = vld [vmem:[%s15337_s11 + $0x23e4] sm:$0xf0]  ;;  %7866 = vmatmul.bf16.vlgmr.msra.gmra.mxu2 %v15655_v47  ;;  %v7634_v6 = vadd.f32 %v7633_v13, %v16274_v45  ;;  %v9370_v16 = vor.u32 %v13874_v14, %v9367_v3  ;;  %v9335_v45 = vld [vmem:[%s15337_s11 + $0xe8] sm:$0xf0] }
 0x338   : > { %v13814_v22 = vor.u32 %v14990_v7, %v13813_v4  ;;  %v13525_v24 = vld [vmem:[%s15337_s11 + $0x2188] sm:$0xf]  ;;  %7884 = vmatpush.bf16.msrb.mxu0 %v13558_v21  ;;  %7910 = vmatpush.bf16.msrb.mxu2 %v9466_v23  ;;  %v13938_v4 = vld [vmem:[%s15337_s11 + $0x30c] sm:$0xf] }
 0x339   : > { %v14918_v26 = vld [vmem:[%s15337_s11 + $0x21a4] sm:$0xf0]  ;;  %7879 = vmatmul.bf16.vlgmr.msra.gmra.mxu3 %v15659_v49  ;;  %v9626_v20 = vor.u32 %v13938_v4, %v9623_v5  ;;  %v7647_v21 = vadd.f32 %v7646_v9, %v7634_v6  ;;  %v13866_v23 = vld [vmem:[%s15337_s11 + $0xcc] sm:$0xf] }
 0x33a   : > { %v13781_v30 = vld [vmem:[%s15337_s11 + $0x2388] sm:$0xf]  ;;  %v13526_v40 = vor.u32 %v14918_v26, %v13525_v24  ;;  %7897 = vmatpush.bf16.msrb.mxu1 %v13814_v22  ;;  %7923 = vmatpush.bf16.msrb.mxu3 %v9722_v33  ;;  %v13930_v24 = vld [vmem:[%s15337_s11 + $0x2cc] sm:$0xf] }
 0x33b   : > { %v14982_v35 = vld [vmem:[%s15337_s11 + $0x23a4] sm:$0xf0]  ;;  %v9591_v26 = vld [vmem:[%s15337_s11 + $0x2e8] sm:$0xf0] }
 0x33c   : > { %v13782_v41 = vor.u32 %v14982_v35, %v13781_v30  ;;  %v13493_v44 = vld [vmem:[%s15337_s11 + $0x2148] sm:$0xf]  ;;  %7885 = vmatpush.bf16.msrb.mxu0 %v13526_v40  ;;  %7911 = vmatpush.bf16.msrb.mxu2 %v9434_v42  ;;  %v9338_v35 = vor.u32 %v13866_v23, %v9335_v45  ;;  %v9594_v39 = vor.u32 %v13930_v24, %v9591_v26  ;;  %v7659_v40 = vpop.f32.mrf.mxu2  ;;  %v13858_v42 = vld [vmem:[%s15337_s11 + $0x8c] sm:$0xf] }
 0x33d   : > { %v14910_v50 = vld [vmem:[%s15337_s11 + $0x2164] sm:$0xf0]  ;;  %v9271_v14 = vld [vmem:[%s15337_s11 + $0x68] sm:$0xf0] }
 0x33e   : > { %v13749_v51 = vld [vmem:[%s15337_s11 + $0x2348] sm:$0xf]  ;;  %v13494_v57 = vor.u32 %v14910_v50, %v13493_v44  ;;  %7898 = vmatpush.bf16.msrb.mxu1 %v13782_v41  ;;  %7924 = vmatpush.bf16.msrb.mxu3 %v9690_v52  ;;  %v9303_v44 = vld [vmem:[%s15337_s11 + $0xa8] sm:$0xf0]  ;;  %v7660_v50 = vadd.f32 %v7659_v40, %v7647_v21  ;;  %v7635_v53 = vpop.f32.mrf.mxu0 }
 0x33f   : > { %v14974_v56 = vld [vmem:[%s15337_s11 + $0x2364] sm:$0xf0]  ;;  %v13922_v52 = vld [vmem:[%s15337_s11 + $0x28c] sm:$0xf] }
 0x340   : > { %v13750_v58 = vor.u32 %v14974_v56, %v13749_v51  ;;  %v13461_v60 = vld [vmem:[%s15337_s11 + $0x2108] sm:$0xf]  ;;  %7886 = vmatpush.bf16.msrb.mxu0 %v13494_v57  ;;  %7912 = vmatpush.bf16.msrb.mxu2 %v9402_v59  ;;  %v7672_v51 = vpop.f32.mrf.mxu3  ;;  %v9559_v56 = vld [vmem:[%s15337_s11 + $0x2a8] sm:$0xf0] }
 0x341   : > { %v14902_v61 = vld [vmem:[%s15337_s11 + $0x2124] sm:$0xf0]  ;;  %v7673_v55 = vadd.f32 %v7672_v51, %v7660_v50  ;;  %v13914_v13 = vld [vmem:[%s15337_s11 + $0x24c] sm:$0xf] }
 0x342   : > { %v13717_v63 = vld [vmem:[%s15337_s11 + $0x2308] sm:$0xf]  ;;  %v13462_v7 = vor.u32 %v14902_v61, %v13461_v60  ;;  %7899 = vmatpush.bf16.msrb.mxu1 %v13750_v58  ;;  %7925 = vmatpush.bf16.msrb.mxu3 %v9658_v0  ;;  %v9306_v58 = vor.u32 %v13858_v42, %v9303_v44  ;;  %v9527_v4 = vld [vmem:[%s15337_s11 + $0x268] sm:$0xf0] }
 0x343   : > { %v14966_v1 = vld [vmem:[%s15337_s11 + $0x2324] sm:$0xf0]  ;;  %v9088_v3 = vrot.slane %v7673_v55, 6  ;;  %v9239_v21 = vld [vmem:[%s15337_s11 + $0x28] sm:$0xf0] }
 0x344   : > { %v13718_v10 = vor.u32 %v14966_v1, %v13717_v63  ;;  %v13429_v17 = vld [vmem:[%s15337_s11 + $0x20c8] sm:$0xf]  ;;  %7887 = vmatpush.bf16.msrb.mxu0 %v13462_v7  ;;  %7913 = vmatpush.bf16.msrb.mxu2 %v9370_v16  ;;  %v9562_v63 = vor.u32 %v13922_v52, %v9559_v56  ;;  %v13850_v1 = vld [vmem:[%s15337_s11 + $0x4c] sm:$0xf] }
 0x345   : > { %v14894_v18 = vld [vmem:[%s15337_s11 + $0x20e4] sm:$0xf0]  ;;  %v16357_v9 = vsel %vm9094_vm0, %v16045_v2, %v9088_v3  ;;  %v9274_v16 = vor.u32 %v13850_v1, %v9271_v14  ;;  %v9495_v23 = vld [vmem:[%s15337_s11 + $0x228] sm:$0xf0]  ;;  %v7661_v2 = vpop.f32.mrf.mxu2  ;;  %v15053_v3 = vld [vmem:[#allocation1] sm:$0xff] }
 0x346   : > { %v13685_v19 = vld [vmem:[%s15337_s11 + $0x22c8] sm:$0xf]  ;;  %v13430_v30 = vor.u32 %v14894_v18, %v13429_v17  ;;  %7900 = vmatpush.bf16.msrb.mxu1 %v13718_v10  ;;  %7926 = vmatpush.bf16.msrb.mxu3 %v9626_v20  ;;  %v9530_v20 = vor.u32 %v13914_v13, %v9527_v4  ;;  %v14026_v45 = vld [vmem:[%s15337_s11 + $0x5cc] sm:$0xf] }
 0x347   : > { %v14958_v22 = vld [vmem:[%s15337_s11 + $0x22e4] sm:$0xf0]  ;;  %v9975_v24 = vld [vmem:[%s15337_s11 + $0x5e8] sm:$0xf0] }
 0x348   : > { %v13686_v33 = vor.u32 %v14958_v22, %v13685_v19  ;;  %v13397_v43 = vld [vmem:[%s15337_s11 + $0x2088] sm:$0xf]  ;;  %7888 = vmatpush.bf16.msrb.mxu0 %v13430_v30  ;;  %7914 = vmatpush.bf16.msrb.mxu2 %v9338_v35  ;;  %v13842_v19 = vld [vmem:[%s15337_s11 + $0xc] sm:$0xf]  ;;  %v7674_v30 = vpop.f32.mrf.mxu3  ;;  %v9978_v44 = vor.u32 %v14026_v45, %v9975_v24 }
 0x349   : > { %v14886_v36 = vld [vmem:[%s15337_s11 + $0x20a4] sm:$0xf0]  ;;  %v13906_v22 = vld [vmem:[%s15337_s11 + $0x20c] sm:$0xf] }
 0x34a   : > { %v13653_v37 = vld [vmem:[%s15337_s11 + $0x2288] sm:$0xf]  ;;  %v13398_v62 = vor.u32 %v14886_v36, %v13397_v43  ;;  %7901 = vmatpush.bf16.msrb.mxu1 %v13686_v33  ;;  %7927 = vmatpush.bf16.msrb.mxu3 %v9594_v39  ;;  %v14090_v26 = vld [vmem:[%s15337_s11 + $0x7cc] sm:$0xf]  ;;  %v9242_v39 = vor.u32 %v13842_v19, %v9239_v21  ;;  %v9498_v42 = vor.u32 %v13906_v22, %v9495_v23 }
 0x34b   : > { %v14950_v41 = vld [vmem:[%s15337_s11 + $0x22a4] sm:$0xf0]  ;;  %v10231_v35 = vld [vmem:[%s15337_s11 + $0x7e8] sm:$0xf0] }
 0x34c   : > { %v13654_v57 = vor.u32 %v14950_v41, %v13653_v37  ;;  %v13365_v59 = vld [vmem:[%s15337_s11 + $0x2048] sm:$0xf]  ;;  %7889 = vmatpush.bf16.msrb.mxu0 %v13398_v62  ;;  %7915 = vmatpush.bf16.msrb.mxu2 %v9306_v58  ;;  %v14154_v43 = vld [vmem:[%s15337_s11 + $0x9cc] sm:$0xf]  ;;  %v10234_v50 = vor.u32 %v14090_v26, %v10231_v35 }
 0x34d   : > { %v14878_v60 = vld [vmem:[%s15337_s11 + $0x2064] sm:$0xf0]  ;;  %v10487_v36 = vld [vmem:[%s15337_s11 + $0x9e8] sm:$0xf0] }
 0x34e   : > { %v13621_v61 = vld [vmem:[%s15337_s11 + $0x2248] sm:$0xf]  ;;  %v13366_v5 = vor.u32 %v14878_v60, %v13365_v59  ;;  %7902 = vmatpush.bf16.msrb.mxu1 %v13654_v57  ;;  %7928 = vmatpush.bf16.msrb.mxu3 %v9562_v63  ;;  %v14218_v40 = vld [vmem:[%s15337_s11 + $0xbcc] sm:$0xf]  ;;  %v10490_v51 = vor.u32 %v14154_v43, %v10487_v36  ;;  %v7685_v36 = vpop.f32.mrf.mxu0 }
 0x34f   : > { %v14942_v0 = vld [vmem:[%s15337_s11 + $0x2264] sm:$0xf0]  ;;  %v10743_v41 = vld [vmem:[%s15337_s11 + $0xbe8] sm:$0xf0] }
 0x350   : > { %v13333_v6 = vld [vmem:[%s15337_s11 + $0x2008] sm:$0xf]  ;;  %v13622_v10 = vor.u32 %v14942_v0, %v13621_v61  ;;  %7890 = vmatpush.bf16.msrb.mxu0 %v13366_v5  ;;  %7916 = vmatpush.bf16.msrb.mxu2 %v9274_v16  ;;  %v14018_v52 = vld [vmem:[%s15337_s11 + $0x58c] sm:$0xf]  ;;  %v10746_v62 = vor.u32 %v14218_v40, %v10743_v41 }
 0x351   : > { %v14870_v7 = vld [vmem:[%s15337_s11 + $0x2024] sm:$0xf0]  ;;  %v9943_v56 = vld [vmem:[%s15337_s11 + $0x5a8] sm:$0xf0] }
 0x352   : > { %v13589_v17 = vld [vmem:[%s15337_s11 + $0x2208] sm:$0xf]  ;;  %v13334_v33 = vor.u32 %v14870_v7, %v13333_v6  ;;  %7903 = vmatpush.bf16.msrb.mxu1 %v13622_v10  ;;  %7929 = vmatpush.bf16.msrb.mxu3 %v9530_v20  ;;  %v14082_v53 = vld [vmem:[%s15337_s11 + $0x78c] sm:$0xf]  ;;  %v9946_v60 = vor.u32 %v14018_v52, %v9943_v56 }
 0x353   : > { %v14934_v18 = vld [vmem:[%s15337_s11 + $0x2224] sm:$0xf0]  ;;  %v14146_v55 = vld [vmem:[%s15337_s11 + $0x98c] sm:$0xf]  ;;  %v10202_v61 = vor.u32 %v14082_v53, %v10199_v54 }
 0x354   : > { %v13590_v37 = vor.u32 %v14934_v18, %v13589_v17  ;;  %7891 = vmatpush.bf16.msrb.mxu0 %v13334_v33  ;;  %v10455_v57 = vld [vmem:[%s15337_s11 + $0x9a8] sm:$0xf0]  ;;  %7917 = vmatpush.bf16.msrb.mxu2 %v9242_v39  ;;  %v15054_v7 = vld [vmem:[#allocation1 + $0x9] sm:$0xff] }
 0x355   : > { %v14210_v58 = vld [vmem:[%s15337_s11 + $0xb8c] sm:$0xf]  ;;  %v10458_v63 = vor.u32 %v14146_v55, %v10455_v57 }
 0x356   : > { %7904 = vmatpush.bf16.msrb.mxu1 %v13590_v37  ;;  %v10711_v59 = vld [vmem:[%s15337_s11 + $0xba8] sm:$0xf0]  ;;  %7930 = vmatpush.bf16.msrb.mxu3 %v9498_v42 }
 0x357   : > { %v14010_v0 = vld [vmem:[%s15337_s11 + $0x54c] sm:$0xf]  ;;  %7892 = vmatmul.bf16.vlgmr.msrb.gmra.mxu0 %v15053_v3  ;;  %v10714_v13 = vor.u32 %v14210_v58, %v10711_v59  ;;  %7918 = vmatmul.bf16.vlgmr.msrb.gmra.mxu2 %v15461_v28 }
 0x358   : > { %7936 = vmatpush.bf16.msra.mxu0 %v9978_v44  ;;  %7962 = vmatpush.bf16.msra.mxu2 %v10490_v51  ;;  %v9911_v1 = vld [vmem:[%s15337_s11 + $0x568] sm:$0xf0] }
 0x359   : > { %v14074_v14 = vld [vmem:[%s15337_s11 + $0x74c] sm:$0xf]  ;;  %7905 = vmatmul.bf16.vlgmr.msrb.gmra.mxu1 %v15054_v7  ;;  %v9914_v17 = vor.u32 %v14010_v0, %v9911_v1  ;;  %7931 = vmatmul.bf16.vlgmr.msrb.gmra.mxu3 %v15467_v34  ;;  %v7711_v0 = vpop.f32.mrf.mxu2 }
 0x35a   : > { %7949 = vmatpush.bf16.msra.mxu1 %v10234_v50  ;;  %7975 = vmatpush.bf16.msra.mxu3 %v10746_v62  ;;  %v10167_v4 = vld [vmem:[%s15337_s11 + $0x768] sm:$0xf0]  ;;  %v7698_v50 = vpop.f32.mrf.mxu1 }
 0x35b   : > { %v14138_v5 = vld [vmem:[%s15337_s11 + $0x94c] sm:$0xf]  ;;  %v10170_v19 = vor.u32 %v14074_v14, %v10167_v4 }
 0x35c   : > { %v10423_v6 = vld [vmem:[%s15337_s11 + $0x968] sm:$0xf0]  ;;  %7937 = vmatpush.bf16.msra.mxu0 %v9946_v60  ;;  %7963 = vmatpush.bf16.msra.mxu2 %v10458_v63 }
 0x35d   : > { %v14202_v10 = vld [vmem:[%s15337_s11 + $0xb4c] sm:$0xf]  ;;  %v10426_v20 = vor.u32 %v14138_v5, %v10423_v6  ;;  %v7724_v5 = vpop.f32.mrf.mxu3 }
 0x35e   : > { %v10679_v16 = vld [vmem:[%s15337_s11 + $0xb68] sm:$0xf0]  ;;  %7950 = vmatpush.bf16.msra.mxu1 %v10202_v61  ;;  %7976 = vmatpush.bf16.msra.mxu3 %v10714_v13 }
 0x35f   : > { %v14002_v18 = vld [vmem:[%s15337_s11 + $0x50c] sm:$0xf]  ;;  %v10682_v45 = vor.u32 %v14202_v10, %v10679_v16 }
 0x360   : > { %v9879_v21 = vld [vmem:[%s15337_s11 + $0x528] sm:$0xf0]  ;;  %7938 = vmatpush.bf16.msra.mxu0 %v9914_v17  ;;  %7964 = vmatpush.bf16.msra.mxu2 %v10426_v20  ;;  %v7687_v17 = vpop.f32.mrf.mxu0 }
 0x361   : > { %v14066_v22 = vld [vmem:[%s15337_s11 + $0x70c] sm:$0xf]  ;;  %v9882_v43 = vor.u32 %v14002_v18, %v9879_v21 }
 0x362   : > { %v15055_v23 = vld [vmem:[%s15345_s9] sm:$0xff]  ;;  %7951 = vmatpush.bf16.msra.mxu1 %v10170_v19  ;;  %7977 = vmatpush.bf16.msra.mxu3 %v10682_v45 }
 0x363   : > { %v1392_v2 = vperm.slane %v15055_v23, 2  ;;  %v10135_v24 = vld [vmem:[%s15337_s11 + $0x728] sm:$0xf0]  ;;  %v7700_v23 = vpop.f32.mrf.mxu1 }
 0x364   : > { %v14130_v26 = vld [vmem:[%s15337_s11 + $0x90c] sm:$0xf]  ;;  %v10138_v37 = vor.u32 %v14066_v22, %v10135_v24  ;;  %7939 = vmatpush.bf16.msra.mxu0 %v9882_v43 }
 0x365   : > { %v10391_v30 = vld [vmem:[%s15337_s11 + $0x928] sm:$0xf0]  ;;  %v7686_v44 = vadd.f32 %v7685_v36, %v1392_v2 }
 0x366   : > { %v14194_v33 = vld [vmem:[%s15337_s11 + $0xb0c] sm:$0xf]  ;;  %v10394_v39 = vor.u32 %v14130_v26, %v10391_v30  ;;  %7952 = vmatpush.bf16.msra.mxu1 %v10138_v37 }
 0x367   : > { %v10647_v35 = vld [vmem:[%s15337_s11 + $0xb28] sm:$0xf0]  ;;  %v7699_v55 = vadd.f32 %v7698_v50, %v7686_v44  ;;  %v7713_v44 = vpop.f32.mrf.mxu2 }
 0x368   : > { %v13994_v40 = vld [vmem:[%s15337_s11 + $0x4cc] sm:$0xf]  ;;  %v10650_v51 = vor.u32 %v14194_v33, %v10647_v35  ;;  %7965 = vmatpush.bf16.msra.mxu2 %v10394_v39 }
 0x369   : > { %v9847_v41 = vld [vmem:[%s15337_s11 + $0x4e8] sm:$0xf0]  ;;  %v7712_v4 = vadd.f32 %v7711_v0, %v7699_v55 }
 0x36a   : > { %v14058_v42 = vld [vmem:[%s15337_s11 + $0x6cc] sm:$0xf]  ;;  %v9850_v57 = vor.u32 %v13994_v40, %v9847_v41  ;;  %7978 = vmatpush.bf16.msra.mxu3 %v10650_v51 }
 0x36b   : > { %v10103_v52 = vld [vmem:[%s15337_s11 + $0x6e8] sm:$0xf0]  ;;  %v16416_v16 = vadd.f32 %v7724_v5, %v7712_v4 }
 0x36c   : > { %v14122_v56 = vld [vmem:[%s15337_s11 + $0x8cc] sm:$0xf]  ;;  %v10106_v58 = vor.u32 %v14058_v42, %v10103_v52  ;;  %7940 = vmatpush.bf16.msra.mxu0 %v9850_v57 }
 0x36d   : > { %v10359_v53 = vld [vmem:[%s15337_s11 + $0x8e8] sm:$0xf0] }
 0x36e   : > { %v14186_v62 = vld [vmem:[%s15337_s11 + $0xacc] sm:$0xf]  ;;  %v10362_v59 = vor.u32 %v14122_v56, %v10359_v53  ;;  %7953 = vmatpush.bf16.msra.mxu1 %v10106_v58  ;;  %v7726_v53 = vpop.f32.mrf.mxu3 }
 0x36f   : > { %v10615_v54 = vld [vmem:[%s15337_s11 + $0xae8] sm:$0xf0] }
 0x370   : > { %v13986_v60 = vld [vmem:[%s15337_s11 + $0x48c] sm:$0xf]  ;;  %v10618_v1 = vor.u32 %v14186_v62, %v10615_v54  ;;  %7966 = vmatpush.bf16.msra.mxu2 %v10362_v59 }
 0x371   : > { %v9815_v61 = vld [vmem:[%s15337_s11 + $0x4a8] sm:$0xf0] }
 0x372   : > { %v14050_v63 = vld [vmem:[%s15337_s11 + $0x68c] sm:$0xf]  ;;  %v9818_v10 = vor.u32 %v13986_v60, %v9815_v61  ;;  %7979 = vmatpush.bf16.msra.mxu3 %v10618_v1 }
 0x373   : > { %v10071_v14 = vld [vmem:[%s15337_s11 + $0x6a8] sm:$0xf0] }
 0x374   : > { %v14114_v3 = vld [vmem:[%s15337_s11 + $0x88c] sm:$0xf]  ;;  %v10074_v18 = vor.u32 %v14050_v63, %v10071_v14  ;;  %7941 = vmatpush.bf16.msra.mxu0 %v9818_v10 }
 0x375   : > { %v10327_v13 = vld [vmem:[%s15337_s11 + $0x8a8] sm:$0xf0] }
 0x376   : > { %v14178_v6 = vld [vmem:[%s15337_s11 + $0xa8c] sm:$0xf]  ;;  %v10330_v19 = vor.u32 %v14114_v3, %v10327_v13  ;;  %7954 = vmatpush.bf16.msra.mxu1 %v10074_v18 }
 0x377   : > { %v10583_v7 = vld [vmem:[%s15337_s11 + $0xaa8] sm:$0xf0] }
 0x378   : > { %v13978_v20 = vld [vmem:[%s15337_s11 + $0x44c] sm:$0xf]  ;;  %v10586_v2 = vor.u32 %v14178_v6, %v10583_v7  ;;  %7967 = vmatpush.bf16.msra.mxu2 %v10330_v19 }
 0x379   : > { %v9783_v21 = vld [vmem:[%s15337_s11 + $0x468] sm:$0xf0] }
 0x37a   : > { %v14042_v22 = vld [vmem:[%s15337_s11 + $0x64c] sm:$0xf]  ;;  %v9786_v35 = vor.u32 %v13978_v20, %v9783_v21  ;;  %7980 = vmatpush.bf16.msra.mxu3 %v10586_v2 }
 0x37b   : > { %v10039_v45 = vld [vmem:[%s15337_s11 + $0x668] sm:$0xf0] }
 0x37c   : > { %v14106_v24 = vld [vmem:[%s15337_s11 + $0x84c] sm:$0xf]  ;;  %v10042_v37 = vor.u32 %v14042_v22, %v10039_v45  ;;  %7942 = vmatpush.bf16.msra.mxu0 %v9786_v35 }
 0x37d   : > { %v10295_v26 = vld [vmem:[%s15337_s11 + $0x868] sm:$0xf0] }
 0x37e   : > { %v14170_v30 = vld [vmem:[%s15337_s11 + $0xa4c] sm:$0xf]  ;;  %v10298_v39 = vor.u32 %v14106_v24, %v10295_v26  ;;  %7955 = vmatpush.bf16.msra.mxu1 %v10042_v37 }
 0x37f   : > { %v10551_v33 = vld [vmem:[%s15337_s11 + $0xa68] sm:$0xf0] }
 0x380   : > { %v13970_v43 = vld [vmem:[%s15337_s11 + $0x40c] sm:$0xf]  ;;  %v10554_v50 = vor.u32 %v14170_v30, %v10551_v33  ;;  %7968 = vmatpush.bf16.msra.mxu2 %v10298_v39 }
 0x381   : > { %v9751_v36 = vld [vmem:[%s15337_s11 + $0x428] sm:$0xf0] }
 0x382   : > { %v14034_v40 = vld [vmem:[%s15337_s11 + $0x60c] sm:$0xf]  ;;  %v9754_v57 = vor.u32 %v13970_v43, %v9751_v36  ;;  %7981 = vmatpush.bf16.msra.mxu3 %v10554_v50 }
 0x383   : > { %v10007_v41 = vld [vmem:[%s15337_s11 + $0x628] sm:$0xf0] }
 0x384   : > { %v14098_v42 = vld [vmem:[%s15337_s11 + $0x80c] sm:$0xf]  ;;  %v10010_v61 = vor.u32 %v14034_v40, %v10007_v41  ;;  %7943 = vmatpush.bf16.msra.mxu0 %v9754_v57  ;;  %v7737_v57 = vpop.f32.mrf.mxu0 }
 0x385   : > { %v10263_v51 = vld [vmem:[%s15337_s11 + $0x828] sm:$0xf0] }
 0x386   : > { %v14162_v52 = vld [vmem:[%s15337_s11 + $0xa0c] sm:$0xf]  ;;  %v10266_v63 = vor.u32 %v14098_v42, %v10263_v51  ;;  %7956 = vmatpush.bf16.msra.mxu1 %v10010_v61 }
 0x387   : > { %v10519_v56 = vld [vmem:[%s15337_s11 + $0xa28] sm:$0xf0]  ;;  %7944 = vmatmul.bf16.vlgmr.msra.gmra.mxu0 %v15459_v27 }
 0x388   : > { %v14282_v62 = vld [vmem:[%s15337_s11 + $0xdcc] sm:$0xf]  ;;  %v10522_v14 = vor.u32 %v14162_v52, %v10519_v56  ;;  %7969 = vmatpush.bf16.msra.mxu2 %v10266_v63 }
 0x389   : > { %v10999_v54 = vld [vmem:[%s15337_s11 + $0xde8] sm:$0xf0]  ;;  %7957 = vmatmul.bf16.vlgmr.msra.gmra.mxu1 %v15463_v29 }
 0x38a   : > { %v14346_v55 = vld [vmem:[%s15337_s11 + $0xfcc] sm:$0xf]  ;;  %v11002_v3 = vor.u32 %v14282_v62, %v10999_v54  ;;  %7982 = vmatpush.bf16.msra.mxu3 %v10522_v14 }
 0x38b   : > { %v11255_v58 = vld [vmem:[%s15337_s11 + $0xfe8] sm:$0xf0]  ;;  %7970 = vmatmul.bf16.vlgmr.msra.gmra.mxu2 %v15513_v31 }
 0x38c   : > { %v14410_v59 = vld [vmem:[%s15337_s11 + $0x11cc] sm:$0xf]  ;;  %v11258_v13 = vor.u32 %v14346_v55, %v11255_v58  ;;  %7988 = vmatpush.bf16.msrb.mxu0 %v11002_v3 }
 0x38d   : > { %v11511_v60 = vld [vmem:[%s15337_s11 + $0x11e8] sm:$0xf0]  ;;  %7983 = vmatmul.bf16.vlgmr.msra.gmra.mxu3 %v15519_v38 }
 0x38e   : > { %v14474_v0 = vld [vmem:[%s15337_s11 + $0x13cc] sm:$0xf]  ;;  %v11514_v4 = vor.u32 %v14410_v59, %v11511_v60  ;;  %8001 = vmatpush.bf16.msrb.mxu1 %v11258_v13 }
 0x38f   : > { %v11767_v1 = vld [vmem:[%s15337_s11 + $0x13e8] sm:$0xf0] }
 0x390   : > { %v14274_v5 = vld [vmem:[%s15337_s11 + $0xd8c] sm:$0xf]  ;;  %v11770_v10 = vor.u32 %v14474_v0, %v11767_v1  ;;  %8014 = vmatpush.bf16.msrb.mxu2 %v11514_v4  ;;  %v7738_v0 = vadd.f32 %v7737_v57, %v16416_v16  ;;  %v7750_v1 = vpop.f32.mrf.mxu1 }
 0x391   : > { %v10967_v6 = vld [vmem:[%s15337_s11 + $0xda8] sm:$0xf0] }
 0x392   : > { %v14338_v7 = vld [vmem:[%s15337_s11 + $0xf8c] sm:$0xf]  ;;  %v10970_v22 = vor.u32 %v14274_v5, %v10967_v6  ;;  %8027 = vmatpush.bf16.msrb.mxu3 %v11770_v10 }
 0x393   : > { %v11223_v17 = vld [vmem:[%s15337_s11 + $0xfa8] sm:$0xf0] }
 0x394   : > { %v14402_v18 = vld [vmem:[%s15337_s11 + $0x118c] sm:$0xf]  ;;  %v11226_v23 = vor.u32 %v14338_v7, %v11223_v17  ;;  %7989 = vmatpush.bf16.msrb.mxu0 %v10970_v22  ;;  %v7751_v7 = vadd.f32 %v7750_v1, %v7738_v0 }
 0x395   : > { %v11479_v19 = vld [vmem:[%s15337_s11 + $0x11a8] sm:$0xf0] }
 0x396   : > { %v14466_v20 = vld [vmem:[%s15337_s11 + $0x138c] sm:$0xf]  ;;  %v11482_v2 = vor.u32 %v14402_v18, %v11479_v19  ;;  %8002 = vmatpush.bf16.msrb.mxu1 %v11226_v23 }
 0x397   : > { %v11735_v21 = vld [vmem:[%s15337_s11 + $0x13a8] sm:$0xf0] }
 0x398   : > { %v14266_v45 = vld [vmem:[%s15337_s11 + $0xd4c] sm:$0xf]  ;;  %v11738_v30 = vor.u32 %v14466_v20, %v11735_v21  ;;  %8015 = vmatpush.bf16.msrb.mxu2 %v11482_v2  ;;  %v7763_v21 = vpop.f32.mrf.mxu2 }
 0x399   : > { %v10935_v24 = vld [vmem:[%s15337_s11 + $0xd68] sm:$0xf0] }
 0x39a   : > { %v14330_v26 = vld [vmem:[%s15337_s11 + $0xf4c] sm:$0xf]  ;;  %v10938_v39 = vor.u32 %v14266_v45, %v10935_v24  ;;  %8028 = vmatpush.bf16.msrb.mxu3 %v11738_v30  ;;  %v7764_v24 = vadd.f32 %v7763_v21, %v7751_v7 }
 0x39b   : > { %v11191_v33 = vld [vmem:[%s15337_s11 + $0xf68] sm:$0xf0] }
 0x39c   : > { %v14394_v35 = vld [vmem:[%s15337_s11 + $0x114c] sm:$0xf]  ;;  %v11194_v40 = vor.u32 %v14330_v26, %v11191_v33  ;;  %7990 = vmatpush.bf16.msrb.mxu0 %v10938_v39  ;;  %v7776_v26 = vpop.f32.mrf.mxu3 }
 0x39d   : > { %v11447_v43 = vld [vmem:[%s15337_s11 + $0x1168] sm:$0xf0] }
 0x39e   : > { %v14458_v36 = vld [vmem:[%s15337_s11 + $0x134c] sm:$0xf]  ;;  %v11450_v41 = vor.u32 %v14394_v35, %v11447_v43  ;;  %8003 = vmatpush.bf16.msrb.mxu1 %v11194_v40  ;;  %v16487_v43 = vadd.f32 %v7776_v26, %v7764_v24 }
 0x39f   : > { %v11703_v37 = vld [vmem:[%s15337_s11 + $0x1368] sm:$0xf0] }
 0x3a0   : > { %v14258_v42 = vld [vmem:[%s15337_s11 + $0xd0c] sm:$0xf]  ;;  %v11706_v51 = vor.u32 %v14458_v36, %v11703_v37  ;;  %8016 = vmatpush.bf16.msrb.mxu2 %v11450_v41  ;;  %v7739_v36 = vpop.f32.mrf.mxu0  ;;  %v7765_v0 = vpop.f32.mrf.mxu2 }
 0x3a1   : > { %v10903_v44 = vld [vmem:[%s15337_s11 + $0xd28] sm:$0xf0] }
 0x3a2   : > { %v14322_v50 = vld [vmem:[%s15337_s11 + $0xf0c] sm:$0xf]  ;;  %v10906_v55 = vor.u32 %v14258_v42, %v10903_v44  ;;  %8029 = vmatpush.bf16.msrb.mxu3 %v11706_v51  ;;  %v7752_v44 = vpop.f32.mrf.mxu1 }
 0x3a3   : > { %v11159_v52 = vld [vmem:[%s15337_s11 + $0xf28] sm:$0xf0] }
 0x3a4   : > { %v14386_v56 = vld [vmem:[%s15337_s11 + $0x110c] sm:$0xf]  ;;  %v11162_v58 = vor.u32 %v14322_v50, %v11159_v52  ;;  %7991 = vmatpush.bf16.msrb.mxu0 %v10906_v55 }
 0x3a5   : > { %v11415_v53 = vld [vmem:[%s15337_s11 + $0x1128] sm:$0xf0] }
 0x3a6   : > { %v14450_v62 = vld [vmem:[%s15337_s11 + $0x130c] sm:$0xf]  ;;  %v11418_v59 = vor.u32 %v14386_v56, %v11415_v53  ;;  %8004 = vmatpush.bf16.msrb.mxu1 %v11162_v58 }
 0x3a7   : > { %v11671_v54 = vld [vmem:[%s15337_s11 + $0x1328] sm:$0xf0] }
 0x3a8   : > { %v14250_v60 = vld [vmem:[%s15337_s11 + $0xccc] sm:$0xf]  ;;  %v11674_v14 = vor.u32 %v14450_v62, %v11671_v54  ;;  %8017 = vmatpush.bf16.msrb.mxu2 %v11418_v59 }
 0x3a9   : > { %v10871_v61 = vld [vmem:[%s15337_s11 + $0xce8] sm:$0xf0] }
 0x3aa   : > { %v14314_v63 = vld [vmem:[%s15337_s11 + $0xecc] sm:$0xf]  ;;  %v10874_v10 = vor.u32 %v14250_v60, %v10871_v61  ;;  %8030 = vmatpush.bf16.msrb.mxu3 %v11674_v14 }
 0x3ab   : > { %v11127_v3 = vld [vmem:[%s15337_s11 + $0xee8] sm:$0xf0] }
 0x3ac   : > { %v14378_v13 = vld [vmem:[%s15337_s11 + $0x10cc] sm:$0xf]  ;;  %v11130_v16 = vor.u32 %v14314_v63, %v11127_v3  ;;  %7992 = vmatpush.bf16.msrb.mxu0 %v10874_v10 }
 0x3ad   : > { %v11383_v4 = vld [vmem:[%s15337_s11 + $0x10e8] sm:$0xf0] }
 0x3ae   : > { %v14442_v5 = vld [vmem:[%s15337_s11 + $0x12cc] sm:$0xf]  ;;  %v11386_v17 = vor.u32 %v14378_v13, %v11383_v4  ;;  %8005 = vmatpush.bf16.msrb.mxu1 %v11130_v16  ;;  %v7778_v4 = vpop.f32.mrf.mxu3 }
 0x3af   : > { %v11639_v6 = vld [vmem:[%s15337_s11 + $0x12e8] sm:$0xf0] }
 0x3b0   : > { %v14242_v18 = vld [vmem:[%s15337_s11 + $0xc8c] sm:$0xf]  ;;  %v11642_v22 = vor.u32 %v14442_v5, %v11639_v6  ;;  %8018 = vmatpush.bf16.msrb.mxu2 %v11386_v17 }
 0x3b1   : > { %v10839_v19 = vld [vmem:[%s15337_s11 + $0xca8] sm:$0xf0] }
 0x3b2   : > { %v14306_v20 = vld [vmem:[%s15337_s11 + $0xe8c] sm:$0xf]  ;;  %v10842_v35 = vor.u32 %v14242_v18, %v10839_v19  ;;  %8031 = vmatpush.bf16.msrb.mxu3 %v11642_v22 }
 0x3b3   : > { %v11095_v23 = vld [vmem:[%s15337_s11 + $0xea8] sm:$0xf0] }
 0x3b4   : > { %v14370_v2 = vld [vmem:[%s15337_s11 + $0x108c] sm:$0xf]  ;;  %v11098_v37 = vor.u32 %v14306_v20, %v11095_v23  ;;  %7993 = vmatpush.bf16.msrb.mxu0 %v10842_v35 }
 0x3b5   : > { %v11351_v45 = vld [vmem:[%s15337_s11 + $0x10a8] sm:$0xf0] }
 0x3b6   : > { %v14434_v30 = vld [vmem:[%s15337_s11 + $0x128c] sm:$0xf]  ;;  %v11354_v39 = vor.u32 %v14370_v2, %v11351_v45  ;;  %8006 = vmatpush.bf16.msrb.mxu1 %v11098_v37 }
 0x3b7   : > { %v11607_v33 = vld [vmem:[%s15337_s11 + $0x12a8] sm:$0xf0] }
 0x3b8   : > { %v14234_v40 = vld [vmem:[%s15337_s11 + $0xc4c] sm:$0xf]  ;;  %v11610_v50 = vor.u32 %v14434_v30, %v11607_v33  ;;  %8019 = vmatpush.bf16.msrb.mxu2 %v11354_v39 }
 0x3b9   : > { %v10807_v41 = vld [vmem:[%s15337_s11 + $0xc68] sm:$0xf0] }
 0x3ba   : > { %v14298_v42 = vld [vmem:[%s15337_s11 + $0xe4c] sm:$0xf]  ;;  %v10810_v54 = vor.u32 %v14234_v40, %v10807_v41  ;;  %8032 = vmatpush.bf16.msrb.mxu3 %v11610_v50 }
 0x3bb   : > { %v11063_v51 = vld [vmem:[%s15337_s11 + $0xe68] sm:$0xf0] }
 0x3bc   : > { %v14362_v52 = vld [vmem:[%s15337_s11 + $0x104c] sm:$0xf]  ;;  %v11066_v58 = vor.u32 %v14298_v42, %v11063_v51  ;;  %7994 = vmatpush.bf16.msrb.mxu0 %v10810_v54 }
 0x3bd   : > { %v11319_v56 = vld [vmem:[%s15337_s11 + $0x1068] sm:$0xf0] }
 0x3be   : > { %v14426_v53 = vld [vmem:[%s15337_s11 + $0x124c] sm:$0xf]  ;;  %v11322_v59 = vor.u32 %v14362_v52, %v11319_v56  ;;  %8007 = vmatpush.bf16.msrb.mxu1 %v11066_v58 }
 0x3bf   : > { %v11575_v62 = vld [vmem:[%s15337_s11 + $0x1268] sm:$0xf0] }
 0x3c0   : > { %v14226_v55 = vld [vmem:[%s15337_s11 + $0xc0c] sm:$0xf]  ;;  %v11578_v1 = vor.u32 %v14426_v53, %v11575_v62  ;;  %8020 = vmatpush.bf16.msrb.mxu2 %v11322_v59 }
 0x3c1   : > { %v10775_v57 = vld [vmem:[%s15337_s11 + $0xc28] sm:$0xf0] }
 0x3c2   : > { %v14290_v60 = vld [vmem:[%s15337_s11 + $0xe0c] sm:$0xf]  ;;  %v10778_v10 = vor.u32 %v14226_v55, %v10775_v57  ;;  %8033 = vmatpush.bf16.msrb.mxu3 %v11578_v1 }
 0x3c3   : > { %v11031_v61 = vld [vmem:[%s15337_s11 + $0xe28] sm:$0xf0] }
 0x3c4   : > { %v14354_v63 = vld [vmem:[%s15337_s11 + $0x100c] sm:$0xf]  ;;  %v11034_v19 = vor.u32 %v14290_v60, %v11031_v61  ;;  %7995 = vmatpush.bf16.msrb.mxu0 %v10778_v10 }
 0x3c5   : > { %v11287_v14 = vld [vmem:[%s15337_s11 + $0x1028] sm:$0xf0] }
 0x3c6   : > { %v14418_v3 = vld [vmem:[%s15337_s11 + $0x120c] sm:$0xf]  ;;  %v11290_v20 = vor.u32 %v14354_v63, %v11287_v14  ;;  %8008 = vmatpush.bf16.msrb.mxu1 %v11034_v19 }
 0x3c7   : > { %v11543_v13 = vld [vmem:[%s15337_s11 + $0x1228] sm:$0xf0]  ;;  %7996 = vmatmul.bf16.vlgmr.msrb.gmra.mxu0 %v15510_v25 }
 0x3c8   : > { %v14538_v5 = vld [vmem:[%s15337_s11 + $0x15cc] sm:$0xf]  ;;  %v11546_v23 = vor.u32 %v14418_v3, %v11543_v13  ;;  %8021 = vmatpush.bf16.msrb.mxu2 %v11290_v20 }
 0x3c9   : > { %v12023_v6 = vld [vmem:[%s15337_s11 + $0x15e8] sm:$0xf0]  ;;  %8009 = vmatmul.bf16.vlgmr.msrb.gmra.mxu1 %v15515_v32 }
 0x3ca   : > { %v14602_v7 = vld [vmem:[%s15337_s11 + $0x17cc] sm:$0xf]  ;;  %v12026_v2 = vor.u32 %v14538_v5, %v12023_v6  ;;  %8034 = vmatpush.bf16.msrb.mxu3 %v11546_v23  ;;  %v7789_v5 = vpop.f32.mrf.mxu0 }
 0x3cb   : > { %v12279_v16 = vld [vmem:[%s15337_s11 + $0x17e8] sm:$0xf0]  ;;  %8022 = vmatmul.bf16.vlgmr.msrb.gmra.mxu2 %v15587_v8  ;;  %v7790_v10 = vadd.f32 %v7789_v5, %v16487_v43 }
 0x3cc   : > { %v14666_v17 = vld [vmem:[%s15337_s11 + $0x19cc] sm:$0xf]  ;;  %v12282_v45 = vor.u32 %v14602_v7, %v12279_v16  ;;  %8040 = vmatpush.bf16.msra.mxu0 %v12026_v2 }
 0x3cd   : > { %v12535_v18 = vld [vmem:[%s15337_s11 + $0x19e8] sm:$0xf0]  ;;  %8035 = vmatmul.bf16.vlgmr.msrb.gmra.mxu3 %v15593_v12 }
 0x3ce   : > { %v14730_v21 = vld [vmem:[%s15337_s11 + $0x1bcc] sm:$0xf]  ;;  %v12538_v24 = vor.u32 %v14666_v17, %v12535_v18  ;;  %8053 = vmatpush.bf16.msra.mxu1 %v12282_v45  ;;  %v7802_v17 = vpop.f32.mrf.mxu1 }
 0x3cf   : > { %v12791_v22 = vld [vmem:[%s15337_s11 + $0x1be8] sm:$0xf0]  ;;  %v7803_v2 = vadd.f32 %v7802_v17, %v7790_v10 }
 0x3d0   : > { %v14530_v26 = vld [vmem:[%s15337_s11 + $0x158c] sm:$0xf]  ;;  %v12794_v35 = vor.u32 %v14730_v21, %v12791_v22  ;;  %8066 = vmatpush.bf16.msra.mxu2 %v12538_v24 }
 0x3d1   : > { %v11991_v30 = vld [vmem:[%s15337_s11 + $0x15a8] sm:$0xf0] }
 0x3d2   : > { %v14594_v33 = vld [vmem:[%s15337_s11 + $0x178c] sm:$0xf]  ;;  %v11994_v42 = vor.u32 %v14530_v26, %v11991_v30  ;;  %8079 = vmatpush.bf16.msra.mxu3 %v12794_v35 }
 0x3d3   : > { %v12247_v36 = vld [vmem:[%s15337_s11 + $0x17a8] sm:$0xf0] }
 0x3d4   : > { %v14658_v37 = vld [vmem:[%s15337_s11 + $0x198c] sm:$0xf]  ;;  %v12250_v44 = vor.u32 %v14594_v33, %v12247_v36  ;;  %8041 = vmatpush.bf16.msra.mxu0 %v11994_v42  ;;  %v7815_v42 = vpop.f32.mrf.mxu2 }
 0x3d5   : > { %v12503_v39 = vld [vmem:[%s15337_s11 + $0x19a8] sm:$0xf0] }
 0x3d6   : > { %v14722_v40 = vld [vmem:[%s15337_s11 + $0x1b8c] sm:$0xf]  ;;  %v12506_v50 = vor.u32 %v14658_v37, %v12503_v39  ;;  %8054 = vmatpush.bf16.msra.mxu1 %v12250_v44 }
 0x3d7   : > { %v12759_v41 = vld [vmem:[%s15337_s11 + $0x1ba8] sm:$0xf0] }
 0x3d8   : > { %v14522_v51 = vld [vmem:[%s15337_s11 + $0x154c] sm:$0xf]  ;;  %v12762_v53 = vor.u32 %v14722_v40, %v12759_v41  ;;  %8067 = vmatpush.bf16.msra.mxu2 %v12506_v50 }
 0x3d9   : > { %v11959_v52 = vld [vmem:[%s15337_s11 + $0x1568] sm:$0xf0] }
 0x3da   : > { %v14586_v56 = vld [vmem:[%s15337_s11 + $0x174c] sm:$0xf]  ;;  %v11962_v59 = vor.u32 %v14522_v51, %v11959_v52  ;;  %8080 = vmatpush.bf16.msra.mxu3 %v12762_v53  ;;  %v7816_v52 = vadd.f32 %v7815_v42, %v7803_v2 }
 0x3db   : > { %v12215_v62 = vld [vmem:[%s15337_s11 + $0x1768] sm:$0xf0] }
 0x3dc   : > { %v14650_v54 = vld [vmem:[%s15337_s11 + $0x194c] sm:$0xf]  ;;  %v12218_v60 = vor.u32 %v14586_v56, %v12215_v62  ;;  %8042 = vmatpush.bf16.msra.mxu0 %v11962_v59  ;;  %v7828_v56 = vpop.f32.mrf.mxu3 }
 0x3dd   : > { %v12471_v55 = vld [vmem:[%s15337_s11 + $0x1968] sm:$0xf0] }
 0x3de   : > { %v14714_v57 = vld [vmem:[%s15337_s11 + $0x1b4c] sm:$0xf]  ;;  %v12474_v61 = vor.u32 %v14650_v54, %v12471_v55  ;;  %8055 = vmatpush.bf16.msra.mxu1 %v12218_v60  ;;  %v7791_v54 = vpop.f32.mrf.mxu0 }
 0x3df   : > { %v12727_v58 = vld [vmem:[%s15337_s11 + $0x1b68] sm:$0xf0] }
 0x3e0   : > { %v14514_v63 = vld [vmem:[%s15337_s11 + $0x150c] sm:$0xf]  ;;  %v12730_v14 = vor.u32 %v14714_v57, %v12727_v58  ;;  %8068 = vmatpush.bf16.msra.mxu2 %v12474_v61  ;;  %v7804_v57 = vpop.f32.mrf.mxu1  ;;  %v16558_v58 = vadd.f32 %v7828_v56, %v7816_v52 }
 0x3e1   : > { %v11927_v0 = vld [vmem:[%s15337_s11 + $0x1528] sm:$0xf0] }
 0x3e2   : > { %v14578_v1 = vld [vmem:[%s15337_s11 + $0x170c] sm:$0xf]  ;;  %v11930_v16 = vor.u32 %v14514_v63, %v11927_v0  ;;  %8081 = vmatpush.bf16.msra.mxu3 %v12730_v14 }
 0x3e3   : > { %v12183_v3 = vld [vmem:[%s15337_s11 + $0x1728] sm:$0xf0] }
 0x3e4   : > { %v14642_v13 = vld [vmem:[%s15337_s11 + $0x190c] sm:$0xf]  ;;  %v12186_v18 = vor.u32 %v14578_v1, %v12183_v3  ;;  %8043 = vmatpush.bf16.msra.mxu0 %v11930_v16 }
 0x3e5   : > { %v12439_v4 = vld [vmem:[%s15337_s11 + $0x1928] sm:$0xf0] }
 0x3e6   : > { %v14706_v6 = vld [vmem:[%s15337_s11 + $0x1b0c] sm:$0xf]  ;;  %v12442_v19 = vor.u32 %v14642_v13, %v12439_v4  ;;  %8056 = vmatpush.bf16.msra.mxu1 %v12186_v18 }
 0x3e7   : > { %v12695_v7 = vld [vmem:[%s15337_s11 + $0x1b28] sm:$0xf0] }
 0x3e8   : > { %v14506_v20 = vld [vmem:[%s15337_s11 + $0x14cc] sm:$0xf]  ;;  %v12698_v23 = vor.u32 %v14706_v6, %v12695_v7  ;;  %8069 = vmatpush.bf16.msra.mxu2 %v12442_v19 }
 0x3e9   : > { %v11895_v21 = vld [vmem:[%s15337_s11 + $0x14e8] sm:$0xf0] }
 0x3ea   : > { %v14570_v22 = vld [vmem:[%s15337_s11 + $0x16cc] sm:$0xf]  ;;  %v11898_v33 = vor.u32 %v14506_v20, %v11895_v21  ;;  %8082 = vmatpush.bf16.msra.mxu3 %v12698_v23 }
 0x3eb   : > { %v12151_v45 = vld [vmem:[%s15337_s11 + $0x16e8] sm:$0xf0] }
 0x3ec   : > { %v14634_v24 = vld [vmem:[%s15337_s11 + $0x18cc] sm:$0xf]  ;;  %v12154_v35 = vor.u32 %v14570_v22, %v12151_v45  ;;  %8044 = vmatpush.bf16.msra.mxu0 %v11898_v33  ;;  %v7817_v45 = vpop.f32.mrf.mxu2 }
 0x3ed   : > { %v12407_v43 = vld [vmem:[%s15337_s11 + $0x18e8] sm:$0xf0] }
 0x3ee   : > { %v14698_v26 = vld [vmem:[%s15337_s11 + $0x1acc] sm:$0xf]  ;;  %v12410_v36 = vor.u32 %v14634_v24, %v12407_v43  ;;  %8057 = vmatpush.bf16.msra.mxu1 %v12154_v35 }
 0x3ef   : > { %v12663_v30 = vld [vmem:[%s15337_s11 + $0x1ae8] sm:$0xf0] }
 0x3f0   : > { %v14498_v37 = vld [vmem:[%s15337_s11 + $0x148c] sm:$0xf]  ;;  %v12666_v41 = vor.u32 %v14698_v26, %v12663_v30  ;;  %8070 = vmatpush.bf16.msra.mxu2 %v12410_v36  ;;  %v7830_v30 = vpop.f32.mrf.mxu3 }
 0x3f1   : > { %v11863_v39 = vld [vmem:[%s15337_s11 + $0x14a8] sm:$0xf0] }
 0x3f2   : > { %v14562_v40 = vld [vmem:[%s15337_s11 + $0x168c] sm:$0xf]  ;;  %v11866_v55 = vor.u32 %v14498_v37, %v11863_v39  ;;  %8083 = vmatpush.bf16.msra.mxu3 %v12666_v41 }
 0x3f3   : > { %v12119_v44 = vld [vmem:[%s15337_s11 + $0x16a8] sm:$0xf0] }
 0x3f4   : > { %v14626_v50 = vld [vmem:[%s15337_s11 + $0x188c] sm:$0xf]  ;;  %v12122_v59 = vor.u32 %v14562_v40, %v12119_v44  ;;  %8045 = vmatpush.bf16.msra.mxu0 %v11866_v55 }
 0x3f5   : > { %v12375_v51 = vld [vmem:[%s15337_s11 + $0x18a8] sm:$0xf0] }
 0x3f6   : > { %v14690_v53 = vld [vmem:[%s15337_s11 + $0x1a8c] sm:$0xf]  ;;  %v12378_v60 = vor.u32 %v14626_v50, %v12375_v51  ;;  %8058 = vmatpush.bf16.msra.mxu1 %v12122_v59 }
 0x3f7   : > { %v12631_v62 = vld [vmem:[%s15337_s11 + $0x1aa8] sm:$0xf0] }
 0x3f8   : > { %v14490_v61 = vld [vmem:[%s15337_s11 + $0x144c] sm:$0xf]  ;;  %v12634_v1 = vor.u32 %v14690_v53, %v12631_v62  ;;  %8071 = vmatpush.bf16.msra.mxu2 %v12378_v60 }
 0x3f9   : > { %v11831_v63 = vld [vmem:[%s15337_s11 + $0x1468] sm:$0xf0] }
 0x3fa   : > { %v14554_v0 = vld [vmem:[%s15337_s11 + $0x164c] sm:$0xf]  ;;  %v11834_v6 = vor.u32 %v14490_v61, %v11831_v63  ;;  %8084 = vmatpush.bf16.msra.mxu3 %v12634_v1 }
 0x3fb   : > { %v12087_v14 = vld [vmem:[%s15337_s11 + $0x1668] sm:$0xf0] }
 0x3fc   : > { %v14618_v3 = vld [vmem:[%s15337_s11 + $0x184c] sm:$0xf]  ;;  %v12090_v16 = vor.u32 %v14554_v0, %v12087_v14  ;;  %8046 = vmatpush.bf16.msra.mxu0 %v11834_v6 }
 0x3fd   : > { %v12343_v13 = vld [vmem:[%s15337_s11 + $0x1868] sm:$0xf0] }
 0x3fe   : > { %v14682_v4 = vld [vmem:[%s15337_s11 + $0x1a4c] sm:$0xf]  ;;  %v12346_v17 = vor.u32 %v14618_v3, %v12343_v13  ;;  %8059 = vmatpush.bf16.msra.mxu1 %v12090_v16 }
 0x3ff   : > { %v12599_v5 = vld [vmem:[%s15337_s11 + $0x1a68] sm:$0xf0] }
 0x400   : > { %v14482_v7 = vld [vmem:[%s15337_s11 + $0x140c] sm:$0xf]  ;;  %v12602_v21 = vor.u32 %v14682_v4, %v12599_v5  ;;  %8072 = vmatpush.bf16.msra.mxu2 %v12346_v17 }
 0x401   : > { %v11799_v10 = vld [vmem:[%s15337_s11 + $0x1428] sm:$0xf0] }
 0x402   : > { %v14546_v18 = vld [vmem:[%s15337_s11 + $0x160c] sm:$0xf]  ;;  %v11802_v33 = vor.u32 %v14482_v7, %v11799_v10  ;;  %8085 = vmatpush.bf16.msra.mxu3 %v12602_v21 }
 0x403   : > { %v12055_v19 = vld [vmem:[%s15337_s11 + $0x1628] sm:$0xf0] }
 0x404   : > { %v14610_v20 = vld [vmem:[%s15337_s11 + $0x180c] sm:$0xf]  ;;  %v12058_v39 = vor.u32 %v14546_v18, %v12055_v19  ;;  %8047 = vmatpush.bf16.msra.mxu0 %v11802_v33 }
 0x405   : > { %v12311_v22 = vld [vmem:[%s15337_s11 + $0x1828] sm:$0xf0] }
 0x406   : > { %v14674_v23 = vld [vmem:[%s15337_s11 + $0x1a0c] sm:$0xf]  ;;  %v12314_v40 = vor.u32 %v14610_v20, %v12311_v22  ;;  %8060 = vmatpush.bf16.msra.mxu1 %v12058_v39 }
 0x407   : > { %v12567_v2 = vld [vmem:[%s15337_s11 + $0x1a28] sm:$0xf0]  ;;  %8048 = vmatmul.bf16.vlgmr.msra.gmra.mxu0 %v15591_v11 }
 0x408   : > { %v14794_v24 = vld [vmem:[%s15337_s11 + $0x1dcc] sm:$0xf]  ;;  %v12570_v44 = vor.u32 %v14674_v23, %v12567_v2  ;;  %8073 = vmatpush.bf16.msra.mxu2 %v12314_v40 }
 0x409   : > { %v13047_v43 = vld [vmem:[%s15337_s11 + $0x1de8] sm:$0xf0]  ;;  %8061 = vmatmul.bf16.vlgmr.msra.gmra.mxu1 %v15596_v15 }
 0x40a   : > { %v14858_v26 = vld [vmem:[%s15337_s11 + $0x1fcc] sm:$0xf]  ;;  %v13050_v50 = vor.u32 %v14794_v24, %v13047_v43  ;;  %8086 = vmatpush.bf16.msra.mxu3 %v12570_v44  ;;  %v7841_v43 = vpop.f32.mrf.mxu0 }
 0x40b   : > { %v13303_v35 = vld [vmem:[%s15337_s11 + $0x1fe8] sm:$0xf0]  ;;  %8074 = vmatmul.bf16.vlgmr.msra.gmra.mxu2 %v15653_v46  ;;  %v7842_v33 = vadd.f32 %v7841_v43, %v16558_v58 }
 0x40c   : > { %v14922_v36 = vld [vmem:[%s15337_s11 + $0x21cc] sm:$0xf]  ;;  %v13306_v51 = vor.u32 %v14858_v26, %v13303_v35  ;;  %8092 = vmatpush.bf16.msrb.mxu0 %v13050_v50 }
 0x40d   : > { %v13559_v37 = vld [vmem:[%s15337_s11 + $0x21e8] sm:$0xf0]  ;;  %8087 = vmatmul.bf16.vlgmr.msra.gmra.mxu3 %v15657_v48 }
 0x40e   : > { %v14986_v41 = vld [vmem:[%s15337_s11 + $0x23cc] sm:$0xf]  ;;  %v13562_v52 = vor.u32 %v14922_v36, %v13559_v37  ;;  %8105 = vmatpush.bf16.msrb.mxu1 %v13306_v51  ;;  %v7854_v36 = vpop.f32.mrf.mxu1 }
 0x40f   : > { %v13815_v42 = vld [vmem:[%s15337_s11 + $0x23e8] sm:$0xf0]  ;;  %v7855_v50 = vadd.f32 %v7854_v36, %v7842_v33 }
 0x410   : > { %v14786_v56 = vld [vmem:[%s15337_s11 + $0x1d8c] sm:$0xf]  ;;  %v13818_v54 = vor.u32 %v14986_v41, %v13815_v42  ;;  %8118 = vmatpush.bf16.msrb.mxu2 %v13562_v52 }
 0x411   : > { %v13015_v53 = vld [vmem:[%s15337_s11 + $0x1da8] sm:$0xf0] }
 0x412   : > { %v14850_v62 = vld [vmem:[%s15337_s11 + $0x1f8c] sm:$0xf]  ;;  %v13018_v63 = vor.u32 %v14786_v56, %v13015_v53  ;;  %8131 = vmatpush.bf16.msrb.mxu3 %v13818_v54 }
 0x413   : > { %v13271_v55 = vld [vmem:[%s15337_s11 + $0x1fa8] sm:$0xf0] }
 0x414   : > { %v14914_v57 = vld [vmem:[%s15337_s11 + $0x218c] sm:$0xf]  ;;  %v13274_v0 = vor.u32 %v14850_v62, %v13271_v55  ;;  %8093 = vmatpush.bf16.msrb.mxu0 %v13018_v63  ;;  %v7867_v63 = vpop.f32.mrf.mxu2 }
 0x415   : > { %v13527_v59 = vld [vmem:[%s15337_s11 + $0x21a8] sm:$0xf0] }
 0x416   : > { %v14978_v60 = vld [vmem:[%s15337_s11 + $0x238c] sm:$0xf]  ;;  %v13530_v1 = vor.u32 %v14914_v57, %v13527_v59  ;;  %8106 = vmatpush.bf16.msrb.mxu1 %v13274_v0 }
 0x417   : > { %v13783_v61 = vld [vmem:[%s15337_s11 + $0x23a8] sm:$0xf0] }
 0x418   : > { %v14778_v14 = vld [vmem:[%s15337_s11 + $0x1d4c] sm:$0xf]  ;;  %v13786_v4 = vor.u32 %v14978_v60, %v13783_v61  ;;  %8119 = vmatpush.bf16.msrb.mxu2 %v13530_v1 }
 0x419   : > { %v12983_v3 = vld [vmem:[%s15337_s11 + $0x1d68] sm:$0xf0] }
 0x41a   : > { %v14842_v13 = vld [vmem:[%s15337_s11 + $0x1f4c] sm:$0xf]  ;;  %v12986_v17 = vor.u32 %v14778_v14, %v12983_v3  ;;  %8132 = vmatpush.bf16.msrb.mxu3 %v13786_v4  ;;  %v7868_v3 = vadd.f32 %v7867_v63, %v7855_v50  ;;  %v14095_v63 = vld [vmem:[%s15337_s11 + $0x7ec] sm:$0xf0] }
 0x41b   : > { %v13239_v5 = vld [vmem:[%s15337_s11 + $0x1f68] sm:$0xf0] }
 0x41c   : > { %v14906_v6 = vld [vmem:[%s15337_s11 + $0x214c] sm:$0xf]  ;;  %v13242_v18 = vor.u32 %v14842_v13, %v13239_v5  ;;  %8094 = vmatpush.bf16.msrb.mxu0 %v12986_v17  ;;  %v7880_v13 = vpop.f32.mrf.mxu3 }
 0x41d   : > { %v13495_v7 = vld [vmem:[%s15337_s11 + $0x2168] sm:$0xf0] }
 0x41e   : > { %v14970_v10 = vld [vmem:[%s15337_s11 + $0x234c] sm:$0xf]  ;;  %v13498_v19 = vor.u32 %v14906_v6, %v13495_v7  ;;  %8107 = vmatpush.bf16.msrb.mxu1 %v13242_v18  ;;  %v7843_v6 = vpop.f32.mrf.mxu0 }
 0x41f   : > { %v13751_v16 = vld [vmem:[%s15337_s11 + $0x2368] sm:$0xf0] }
 0x420   : > { %v14770_v20 = vld [vmem:[%s15337_s11 + $0x1d0c] sm:$0xf]  ;;  %v13754_v23 = vor.u32 %v14970_v10, %v13751_v16  ;;  %8120 = vmatpush.bf16.msrb.mxu2 %v13498_v19  ;;  %v7856_v10 = vpop.f32.mrf.mxu1  ;;  %v16629_v16 = vadd.f32 %v7880_v13, %v7868_v3  ;;  %v9437_v13 = vld [vmem:[%s15337_s11 + $0x190] sm:$0xf] }
 0x421   : > { %v12951_v21 = vld [vmem:[%s15337_s11 + $0x1d28] sm:$0xf0]  ;;  %v9949_v10 = vld [vmem:[%s15337_s11 + $0x590] sm:$0xf] }
 0x422   : > { %v14834_v22 = vld [vmem:[%s15337_s11 + $0x1f0c] sm:$0xf]  ;;  %v12954_v35 = vor.u32 %v14770_v20, %v12951_v21  ;;  %8133 = vmatpush.bf16.msrb.mxu3 %v13754_v23 }
 0x423   : > { %v13207_v2 = vld [vmem:[%s15337_s11 + $0x1f28] sm:$0xf0] }
 0x424   : > { %v14898_v45 = vld [vmem:[%s15337_s11 + $0x210c] sm:$0xf]  ;;  %v13210_v37 = vor.u32 %v14834_v22, %v13207_v2  ;;  %8095 = vmatpush.bf16.msrb.mxu0 %v12954_v35 }
 0x425   : > { %v13463_v24 = vld [vmem:[%s15337_s11 + $0x2128] sm:$0xf0] }
 0x426   : > { %v14962_v26 = vld [vmem:[%s15337_s11 + $0x230c] sm:$0xf]  ;;  %v13466_v39 = vor.u32 %v14898_v45, %v13463_v24  ;;  %8108 = vmatpush.bf16.msrb.mxu1 %v13210_v37 }
 0x427   : > { %v13719_v30 = vld [vmem:[%s15337_s11 + $0x2328] sm:$0xf0] }
 0x428   : > { %v14762_v40 = vld [vmem:[%s15337_s11 + $0x1ccc] sm:$0xf]  ;;  %v13722_v44 = vor.u32 %v14962_v26, %v13719_v30  ;;  %8121 = vmatpush.bf16.msrb.mxu2 %v13466_v39 }
 0x429   : > { %v12919_v41 = vld [vmem:[%s15337_s11 + $0x1ce8] sm:$0xf0] }
 0x42a   : > { %v14826_v42 = vld [vmem:[%s15337_s11 + $0x1ecc] sm:$0xf]  ;;  %v12922_v62 = vor.u32 %v14762_v40, %v12919_v41  ;;  %8134 = vmatpush.bf16.msrb.mxu3 %v13722_v44 }
 0x42b   : > { %v13175_v51 = vld [vmem:[%s15337_s11 + $0x1ee8] sm:$0xf0] }
 0x42c   : > { %v14890_v52 = vld [vmem:[%s15337_s11 + $0x20cc] sm:$0xf]  ;;  %v13178_v54 = vor.u32 %v14826_v42, %v13175_v51  ;;  %8096 = vmatpush.bf16.msrb.mxu0 %v12922_v62  ;;  %v7869_v51 = vpop.f32.mrf.mxu2 }
 0x42d   : > { %v13431_v58 = vld [vmem:[%s15337_s11 + $0x20e8] sm:$0xf0] }
 0x42e   : > { %v14954_v56 = vld [vmem:[%s15337_s11 + $0x22cc] sm:$0xf]  ;;  %v13434_v55 = vor.u32 %v14890_v52, %v13431_v58  ;;  %8109 = vmatpush.bf16.msrb.mxu1 %v13178_v54  ;;  %v9469_v52 = vld [vmem:[%s15337_s11 + $0x1d0] sm:$0xf] }
 0x42f   : > { %v13687_v53 = vld [vmem:[%s15337_s11 + $0x22e8] sm:$0xf0]  ;;  %v13903_v58 = vld [vmem:[%s15337_s11 + $0x1ec] sm:$0xf0] }
 0x430   : > { %v14754_v57 = vld [vmem:[%s15337_s11 + $0x1c8c] sm:$0xf]  ;;  %v13690_v61 = vor.u32 %v14954_v56, %v13687_v53  ;;  %8122 = vmatpush.bf16.msrb.mxu2 %v13434_v55  ;;  %v9725_v56 = vld [vmem:[%s15337_s11 + $0x3d0] sm:$0xf]  ;;  %v7882_v53 = vpop.f32.mrf.mxu3 }
 0x431   : > { %v12887_v59 = vld [vmem:[%s15337_s11 + $0x1ca8] sm:$0xf0]  ;;  %v13967_v54 = vld [vmem:[%s15337_s11 + $0x3ec] sm:$0xf0]  ;;  %v7893_v53 = vpop.f32.mrf.mxu0 }
 0x432   : > { %v14818_v60 = vld [vmem:[%s15337_s11 + $0x1e8c] sm:$0xf]  ;;  %v12890_v7 = vor.u32 %v14754_v57, %v12887_v59  ;;  %8135 = vmatpush.bf16.msrb.mxu3 %v13690_v61  ;;  %v9981_v55 = vld [vmem:[%s15337_s11 + $0x5d0] sm:$0xf] }
 0x433   : > { %v13143_v0 = vld [vmem:[%s15337_s11 + $0x1ea8] sm:$0xf0]  ;;  %v14031_v57 = vld [vmem:[%s15337_s11 + $0x5ec] sm:$0xf0] }
 0x434   : > { %v14882_v1 = vld [vmem:[%s15337_s11 + $0x208c] sm:$0xf]  ;;  %v13146_v17 = vor.u32 %v14818_v60, %v13143_v0  ;;  %8097 = vmatpush.bf16.msrb.mxu0 %v12890_v7  ;;  %v10237_v61 = vld [vmem:[%s15337_s11 + $0x7d0] sm:$0xf]  ;;  %v9982_v3 = vor.u32 %v14031_v57, %v9981_v55  ;;  %v7894_v55 = vadd.f32 %v7893_v53, %v16629_v16 }
 0x435   : > { %v13399_v14 = vld [vmem:[%s15337_s11 + $0x20a8] sm:$0xf0]  ;;  %v10238_v6 = vor.u32 %v14095_v63, %v10237_v61  ;;  %v13959_v7 = vld [vmem:[%s15337_s11 + $0x3ac] sm:$0xf0] }
 0x436   : > { %v14946_v4 = vld [vmem:[%s15337_s11 + $0x228c] sm:$0xf]  ;;  %v13402_v18 = vor.u32 %v14882_v1, %v13399_v14  ;;  %8110 = vmatpush.bf16.msrb.mxu1 %v13146_v17  ;;  %v9470_v1 = vor.u32 %v13903_v58, %v9469_v52  ;;  %v9726_v14 = vor.u32 %v13967_v54, %v9725_v56  ;;  %v14023_v17 = vld [vmem:[%s15337_s11 + $0x5ac] sm:$0xf0] }
 0x437   : > { %v13655_v5 = vld [vmem:[%s15337_s11 + $0x22a8] sm:$0xf0]  ;;  %v13943_v52 = vld [vmem:[%s15337_s11 + $0x32c] sm:$0xf0] }
 0x438   : > { %v14746_v19 = vld [vmem:[%s15337_s11 + $0x1c4c] sm:$0xf]  ;;  %v13658_v22 = vor.u32 %v14946_v4, %v13655_v5  ;;  %8123 = vmatpush.bf16.msrb.mxu2 %v13402_v18  ;;  %v13895_v4 = vld [vmem:[%s15337_s11 + $0x1ac] sm:$0xf0] }
 0x439   : > { %v12855_v20 = vld [vmem:[%s15337_s11 + $0x1c68] sm:$0xf0]  ;;  %v9693_v5 = vld [vmem:[%s15337_s11 + $0x390] sm:$0xf] }
 0x43a   : > { %v14810_v21 = vld [vmem:[%s15337_s11 + $0x1e4c] sm:$0xf]  ;;  %v12858_v26 = vor.u32 %v14746_v19, %v12855_v20  ;;  %8136 = vmatpush.bf16.msrb.mxu3 %v13658_v22  ;;  %v10205_v18 = vld [vmem:[%s15337_s11 + $0x790] sm:$0xf]  ;;  %v9438_v20 = vor.u32 %v13895_v4, %v9437_v13  ;;  %v9950_v22 = vor.u32 %v14023_v17, %v9949_v10 }
 0x43b   : > { %v13111_v23 = vld [vmem:[%s15337_s11 + $0x1e68] sm:$0xf0]  ;;  %v14087_v19 = vld [vmem:[%s15337_s11 + $0x7ac] sm:$0xf0] }
 0x43c   : > { %v14874_v2 = vld [vmem:[%s15337_s11 + $0x204c] sm:$0xf]  ;;  %v13114_v35 = vor.u32 %v14810_v21, %v13111_v23  ;;  %8098 = vmatpush.bf16.msrb.mxu0 %v12858_v26  ;;  %v9694_v21 = vor.u32 %v13959_v7, %v9693_v5  ;;  %v9405_v23 = vld [vmem:[%s15337_s11 + $0x150] sm:$0xf] }
 0x43d   : > { %v13367_v45 = vld [vmem:[%s15337_s11 + $0x2068] sm:$0xf0]  ;;  %v9917_v26 = vld [vmem:[%s15337_s11 + $0x550] sm:$0xf] }
 0x43e   : > { %v14938_v24 = vld [vmem:[%s15337_s11 + $0x224c] sm:$0xf]  ;;  %v13370_v36 = vor.u32 %v14874_v2, %v13367_v45  ;;  %8111 = vmatpush.bf16.msrb.mxu1 %v13114_v35  ;;  %v13887_v2 = vld [vmem:[%s15337_s11 + $0x16c] sm:$0xf0] }
 0x43f   : > { %v13623_v43 = vld [vmem:[%s15337_s11 + $0x2268] sm:$0xf0]  ;;  %v9661_v45 = vld [vmem:[%s15337_s11 + $0x350] sm:$0xf] }
 0x440   : > { %v14738_v30 = vld [vmem:[%s15337_s11 + $0x1c0c] sm:$0xf]  ;;  %v13626_v41 = vor.u32 %v14938_v24, %v13623_v43  ;;  %8124 = vmatpush.bf16.msrb.mxu2 %v13370_v36  ;;  %v10206_v24 = vor.u32 %v14087_v19, %v10205_v18  ;;  %v13951_v43 = vld [vmem:[%s15337_s11 + $0x36c] sm:$0xf0] }
 0x441   : > { %v12823_v33 = vld [vmem:[%s15337_s11 + $0x1c28] sm:$0xf0]  ;;  %v10173_v35 = vld [vmem:[%s15337_s11 + $0x750] sm:$0xf] }
 0x442   : > { %v14802_v37 = vld [vmem:[%s15337_s11 + $0x1e0c] sm:$0xf]  ;;  %v12826_v62 = vor.u32 %v14738_v30, %v12823_v33  ;;  %8137 = vmatpush.bf16.msrb.mxu3 %v13626_v41  ;;  %v14015_v30 = vld [vmem:[%s15337_s11 + $0x56c] sm:$0xf0]  ;;  %v15056_v33 = vld [vmem:[#allocation1] sm:$0xff] }
 0x443   : > { %v13079_v39 = vld [vmem:[%s15337_s11 + $0x1e28] sm:$0xf0]  ;;  %v14079_v36 = vld [vmem:[%s15337_s11 + $0x76c] sm:$0xf0]  ;;  %v9918_v41 = vor.u32 %v14015_v30, %v9917_v26 }
 0x444   : > { %v14866_v40 = vld [vmem:[%s15337_s11 + $0x200c] sm:$0xf]  ;;  %v13082_v59 = vor.u32 %v14802_v37, %v13079_v39  ;;  %8099 = vmatpush.bf16.msrb.mxu0 %v12826_v62  ;;  %v15057_v37 = vld [vmem:[#allocation1 + $0x9] sm:$0xff]  ;;  %v9406_v39 = vor.u32 %v13887_v2, %v9405_v23  ;;  %v10174_v51 = vor.u32 %v14079_v36, %v10173_v35  ;;  %v9885_v58 = vld [vmem:[%s15337_s11 + $0x510] sm:$0xf]  ;;  %v7932_v35 = vpop.f32.mrf.mxu3  ;;  %v7895_v36 = vpop.f32.mrf.mxu0 }
 0x445   : > { %v13335_v42 = vld [vmem:[%s15337_s11 + $0x2028] sm:$0xf0]  ;;  %v14007_v56 = vld [vmem:[%s15337_s11 + $0x52c] sm:$0xf0] }
 0x446   : > { %v14930_v44 = vld [vmem:[%s15337_s11 + $0x220c] sm:$0xf]  ;;  %v13338_v60 = vor.u32 %v14866_v40, %v13335_v42  ;;  %8112 = vmatpush.bf16.msrb.mxu1 %v13082_v59  ;;  %v9662_v40 = vor.u32 %v13951_v43, %v9661_v45  ;;  %v9373_v42 = vld [vmem:[%s15337_s11 + $0x110] sm:$0xf]  ;;  %v7906_v59 = vpop.f32.mrf.mxu1  ;;  %v9886_v61 = vor.u32 %v14007_v56, %v9885_v58  ;;  %v7919_v43 = vpop.f32.mrf.mxu2 }
 0x447   : > { %v13591_v50 = vld [vmem:[%s15337_s11 + $0x2228] sm:$0xf0]  ;;  %8100 = vmatmul.bf16.vlgmr.msrb.gmra.mxu0 %v15655_v47  ;;  %v10141_v62 = vld [vmem:[%s15337_s11 + $0x710] sm:$0xf] }
 0x448   : > { %v13594_v0 = vor.u32 %v14930_v44, %v13591_v50  ;;  %8125 = vmatpush.bf16.msrb.mxu2 %v13338_v60  ;;  %8144 = vmatpush.bf16.msra.mxu0 %v9470_v1  ;;  %v13879_v44 = vld [vmem:[%s15337_s11 + $0x12c] sm:$0xf0]  ;;  %v15058_v7 = vld [vmem:[%s15345_s9] sm:$0xff] }
 0x449   : > { %8113 = vmatmul.bf16.vlgmr.msrb.gmra.mxu1 %v15659_v49  ;;  %v9629_v50 = vld [vmem:[%s15337_s11 + $0x310] sm:$0xf]  ;;  %v9374_v57 = vor.u32 %v13879_v44, %v9373_v42  ;;  %v1393_v10 = vperm.slane %v15058_v7, 3 }
 0x44a   : > { %8138 = vmatpush.bf16.msrb.mxu3 %v13594_v0  ;;  %8157 = vmatpush.bf16.msra.mxu1 %v9726_v14  ;;  %v14071_v54 = vld [vmem:[%s15337_s11 + $0x72c] sm:$0xf0]  ;;  %v9630_v60 = vor.u32 %v13943_v52, %v9629_v50 }
 0x44b   : > { %8126 = vmatmul.bf16.vlgmr.msrb.gmra.mxu2 %v15056_v33  ;;  %v9341_v63 = vld [vmem:[%s15337_s11 + $0xd0] sm:$0xf]  ;;  %v10142_v14 = vor.u32 %v14071_v54, %v10141_v62  ;;  %v7920_v33 = vadd.f32 %v7919_v43, %v1393_v10 }
 0x44c   : > { %8170 = vmatpush.bf16.msra.mxu2 %v9982_v3  ;;  %8145 = vmatpush.bf16.msra.mxu0 %v9438_v20  ;;  %v13871_v0 = vld [vmem:[%s15337_s11 + $0xec] sm:$0xf0]  ;;  %v16685_v3 = vadd.f32 %v7906_v59, %v7894_v55 }
 0x44d   : > { %8139 = vmatmul.bf16.vlgmr.msrb.gmra.mxu3 %v15057_v37  ;;  %v9597_v1 = vld [vmem:[%s15337_s11 + $0x2d0] sm:$0xf]  ;;  %v9342_v17 = vor.u32 %v13871_v0, %v9341_v63 }
 0x44e   : > { %8183 = vmatpush.bf16.msra.mxu3 %v10238_v6  ;;  %8158 = vmatpush.bf16.msra.mxu1 %v9694_v21  ;;  %v13935_v16 = vld [vmem:[%s15337_s11 + $0x2ec] sm:$0xf0] }
 0x44f   : > { %v9853_v13 = vld [vmem:[%s15337_s11 + $0x4d0] sm:$0xf]  ;;  %v9598_v18 = vor.u32 %v13935_v16, %v9597_v1 }
 0x450   : > { %8171 = vmatpush.bf16.msra.mxu2 %v9950_v22  ;;  %8146 = vmatpush.bf16.msra.mxu0 %v9406_v39  ;;  %v13999_v4 = vld [vmem:[%s15337_s11 + $0x4ec] sm:$0xf0]  ;;  %v7908_v39 = vpop.f32.mrf.mxu1 }
 0x451   : > { %v10109_v5 = vld [vmem:[%s15337_s11 + $0x6d0] sm:$0xf]  ;;  %v9854_v19 = vor.u32 %v13999_v4, %v9853_v13 }
 0x452   : > { %8184 = vmatpush.bf16.msra.mxu3 %v10206_v24  ;;  %8159 = vmatpush.bf16.msra.mxu1 %v9662_v40  ;;  %v14063_v6 = vld [vmem:[%s15337_s11 + $0x6ec] sm:$0xf0] }
 0x453   : > { %v9309_v20 = vld [vmem:[%s15337_s11 + $0x90] sm:$0xf]  ;;  %v10110_v23 = vor.u32 %v14063_v6, %v10109_v5  ;;  %v7921_v5 = vpop.f32.mrf.mxu2 }
 0x454   : > { %8172 = vmatpush.bf16.msra.mxu2 %v9918_v41  ;;  %8147 = vmatpush.bf16.msra.mxu0 %v9374_v57  ;;  %v13863_v21 = vld [vmem:[%s15337_s11 + $0xac] sm:$0xf0] }
 0x455   : > { %v9565_v22 = vld [vmem:[%s15337_s11 + $0x290] sm:$0xf]  ;;  %v9310_v37 = vor.u32 %v13863_v21, %v9309_v20 }
 0x456   : > { %8185 = vmatpush.bf16.msra.mxu3 %v10174_v51  ;;  %8160 = vmatpush.bf16.msra.mxu1 %v9630_v60  ;;  %v13927_v2 = vld [vmem:[%s15337_s11 + $0x2ac] sm:$0xf0]  ;;  %v16704_v51 = vadd.f32 %v7932_v35, %v7920_v33 }
 0x457   : > { %v9821_v45 = vld [vmem:[%s15337_s11 + $0x490] sm:$0xf]  ;;  %v9566_v40 = vor.u32 %v13927_v2, %v9565_v22 }
 0x458   : > { %8173 = vmatpush.bf16.msra.mxu2 %v9886_v61  ;;  %v13991_v24 = vld [vmem:[%s15337_s11 + $0x4ac] sm:$0xf0]  ;;  %8148 = vmatpush.bf16.msra.mxu0 %v9342_v17  ;;  %v7934_v17 = vpop.f32.mrf.mxu3 }
 0x459   : > { %v10077_v26 = vld [vmem:[%s15337_s11 + $0x690] sm:$0xf]  ;;  %v9822_v41 = vor.u32 %v13991_v24, %v9821_v45 }
 0x45a   : > { %8186 = vmatpush.bf16.msra.mxu3 %v10142_v14  ;;  %v14055_v30 = vld [vmem:[%s15337_s11 + $0x6ac] sm:$0xf0]  ;;  %8161 = vmatpush.bf16.msra.mxu1 %v9598_v18 }
 0x45b   : > { %v9277_v42 = vld [vmem:[%s15337_s11 + $0x50] sm:$0xf]  ;;  %v10078_v52 = vor.u32 %v14055_v30, %v10077_v26 }
 0x45c   : > { %8174 = vmatpush.bf16.msra.mxu2 %v9854_v19  ;;  %v13855_v44 = vld [vmem:[%s15337_s11 + $0x6c] sm:$0xf0]  ;;  %8149 = vmatpush.bf16.msra.mxu0 %v9310_v37 }
 0x45d   : > { %v9533_v50 = vld [vmem:[%s15337_s11 + $0x250] sm:$0xf]  ;;  %v9278_v55 = vor.u32 %v13855_v44, %v9277_v42 }
 0x45e   : > { %8187 = vmatpush.bf16.msra.mxu3 %v10110_v23  ;;  %v13919_v58 = vld [vmem:[%s15337_s11 + $0x26c] sm:$0xf0]  ;;  %8162 = vmatpush.bf16.msra.mxu1 %v9566_v40 }
 0x45f   : > { %v9789_v56 = vld [vmem:[%s15337_s11 + $0x450] sm:$0xf]  ;;  %v9534_v60 = vor.u32 %v13919_v58, %v9533_v50 }
 0x460   : > { %v13983_v53 = vld [vmem:[%s15337_s11 + $0x46c] sm:$0xf0]  ;;  %8175 = vmatpush.bf16.msra.mxu2 %v9822_v41  ;;  %8150 = vmatpush.bf16.msra.mxu0 %v9278_v55 }
 0x461   : > { %v10045_v62 = vld [vmem:[%s15337_s11 + $0x650] sm:$0xf]  ;;  %v9790_v61 = vor.u32 %v13983_v53, %v9789_v56 }
 0x462   : > { %v14047_v54 = vld [vmem:[%s15337_s11 + $0x66c] sm:$0xf0]  ;;  %8188 = vmatpush.bf16.msra.mxu3 %v10078_v52  ;;  %8163 = vmatpush.bf16.msra.mxu1 %v9534_v60 }
 0x463   : > { %v9245_v57 = vld [vmem:[%s15337_s11 + $0x10] sm:$0xf]  ;;  %v10046_v14 = vor.u32 %v14047_v54, %v10045_v62 }
 0x464   : > { %v13847_v59 = vld [vmem:[%s15337_s11 + $0x2c] sm:$0xf0]  ;;  %8176 = vmatpush.bf16.msra.mxu2 %v9790_v61 }
 0x465   : > { %v9501_v63 = vld [vmem:[%s15337_s11 + $0x210] sm:$0xf]  ;;  %v9246_v18 = vor.u32 %v13847_v59, %v9245_v57 }
 0x466   : > { %v13911_v0 = vld [vmem:[%s15337_s11 + $0x22c] sm:$0xf0]  ;;  %8189 = vmatpush.bf16.msra.mxu3 %v10046_v14 }
 0x467   : > { %v9757_v1 = vld [vmem:[%s15337_s11 + $0x410] sm:$0xf]  ;;  %v9502_v22 = vor.u32 %v13911_v0, %v9501_v63  ;;  %8151 = vmatpush.bf16.msra.mxu0 %v9246_v18 }
 0x468   : > { %v13975_v16 = vld [vmem:[%s15337_s11 + $0x42c] sm:$0xf0] }
 0x469   : > { %v10013_v13 = vld [vmem:[%s15337_s11 + $0x610] sm:$0xf]  ;;  %v9758_v23 = vor.u32 %v13975_v16, %v9757_v1  ;;  %8164 = vmatpush.bf16.msra.mxu1 %v9502_v22 }
 0x46a   : > { %v14039_v4 = vld [vmem:[%s15337_s11 + $0x62c] sm:$0xf0]  ;;  %8152 = vmatmul.bf16.vlgmr.msra.gmra.mxu0 %v15461_v28 }
 0x46b   : > { %v10493_v6 = vld [vmem:[%s15337_s11 + $0x9d0] sm:$0xf]  ;;  %v10014_v24 = vor.u32 %v14039_v4, %v10013_v13  ;;  %8177 = vmatpush.bf16.msra.mxu2 %v9758_v23 }
 0x46c   : > { %v14159_v7 = vld [vmem:[%s15337_s11 + $0x9ec] sm:$0xf0]  ;;  %8165 = vmatmul.bf16.vlgmr.msra.gmra.mxu1 %v15467_v34 }
 0x46d   : > { %v10749_v10 = vld [vmem:[%s15337_s11 + $0xbd0] sm:$0xf]  ;;  %v10494_v43 = vor.u32 %v14159_v7, %v10493_v6  ;;  %8190 = vmatpush.bf16.msra.mxu3 %v10014_v24  ;;  %v7958_v24 = vpop.f32.mrf.mxu1 }
 0x46e   : > { %v14223_v19 = vld [vmem:[%s15337_s11 + $0xbec] sm:$0xf0]  ;;  %8178 = vmatmul.bf16.vlgmr.msra.gmra.mxu2 %v15459_v27 }
 0x46f   : > { %v11005_v20 = vld [vmem:[%s15337_s11 + $0xdd0] sm:$0xf]  ;;  %v10750_v26 = vor.u32 %v14223_v19, %v10749_v10  ;;  %8196 = vmatpush.bf16.msrb.mxu0 %v10494_v43  ;;  %v7945_v19 = vpop.f32.mrf.mxu0 }
 0x470   : > { %v14287_v21 = vld [vmem:[%s15337_s11 + $0xdec] sm:$0xf0]  ;;  %8191 = vmatmul.bf16.vlgmr.msra.gmra.mxu3 %v15463_v29 }
 0x471   : > { %v11261_v2 = vld [vmem:[%s15337_s11 + $0xfd0] sm:$0xf]  ;;  %v11006_v30 = vor.u32 %v14287_v21, %v11005_v20  ;;  %8209 = vmatpush.bf16.msrb.mxu1 %v10750_v26 }
 0x472   : > { %v14351_v45 = vld [vmem:[%s15337_s11 + $0xfec] sm:$0xf0] }
 0x473   : > { %v10461_v33 = vld [vmem:[%s15337_s11 + $0x990] sm:$0xf]  ;;  %v11262_v37 = vor.u32 %v14351_v45, %v11261_v2  ;;  %8222 = vmatpush.bf16.msrb.mxu2 %v11006_v30  ;;  %v7946_v45 = vadd.f32 %v7945_v19, %v16704_v51 }
 0x474   : > { %v14151_v35 = vld [vmem:[%s15337_s11 + $0x9ac] sm:$0xf0] }
 0x475   : > { %v10717_v36 = vld [vmem:[%s15337_s11 + $0xb90] sm:$0xf]  ;;  %v10462_v50 = vor.u32 %v14151_v35, %v10461_v33  ;;  %8235 = vmatpush.bf16.msrb.mxu3 %v11262_v37  ;;  %v7959_v37 = vadd.f32 %v7958_v24, %v7946_v45 }
 0x476   : > { %v14215_v39 = vld [vmem:[%s15337_s11 + $0xbac] sm:$0xf0] }
 0x477   : > { %v10973_v40 = vld [vmem:[%s15337_s11 + $0xd90] sm:$0xf]  ;;  %v10718_v52 = vor.u32 %v14215_v39, %v10717_v36  ;;  %8197 = vmatpush.bf16.msrb.mxu0 %v10462_v50  ;;  %v7971_v50 = vpop.f32.mrf.mxu2 }
 0x478   : > { %v14279_v41 = vld [vmem:[%s15337_s11 + $0xdac] sm:$0xf0] }
 0x479   : > { %v11229_v42 = vld [vmem:[%s15337_s11 + $0xf90] sm:$0xf]  ;;  %v10974_v58 = vor.u32 %v14279_v41, %v10973_v40  ;;  %8210 = vmatpush.bf16.msrb.mxu1 %v10718_v52 }
 0x47a   : > { %v14343_v44 = vld [vmem:[%s15337_s11 + $0xfac] sm:$0xf0] }
 0x47b   : > { %v10429_v56 = vld [vmem:[%s15337_s11 + $0x950] sm:$0xf]  ;;  %v11230_v54 = vor.u32 %v14343_v44, %v11229_v42  ;;  %8223 = vmatpush.bf16.msrb.mxu2 %v10974_v58 }
 0x47c   : > { %v14143_v53 = vld [vmem:[%s15337_s11 + $0x96c] sm:$0xf0] }
 0x47d   : > { %v10685_v62 = vld [vmem:[%s15337_s11 + $0xb50] sm:$0xf]  ;;  %v10430_v63 = vor.u32 %v14143_v53, %v10429_v56  ;;  %8236 = vmatpush.bf16.msrb.mxu3 %v11230_v54  ;;  %v7984_v54 = vpop.f32.mrf.mxu3 }
 0x47e   : > { %v14207_v55 = vld [vmem:[%s15337_s11 + $0xb6c] sm:$0xf0] }
 0x47f   : > { %v10941_v57 = vld [vmem:[%s15337_s11 + $0xd50] sm:$0xf]  ;;  %v10686_v0 = vor.u32 %v14207_v55, %v10685_v62  ;;  %8198 = vmatpush.bf16.msrb.mxu0 %v10430_v63  ;;  %v7972_v62 = vadd.f32 %v7971_v50, %v7959_v37  ;;  %v7973_v24 = vpop.f32.mrf.mxu2 }
 0x480   : > { %v14271_v59 = vld [vmem:[%s15337_s11 + $0xd6c] sm:$0xf0] }
 0x481   : > { %v11197_v60 = vld [vmem:[%s15337_s11 + $0xf50] sm:$0xf]  ;;  %v10942_v1 = vor.u32 %v14271_v59, %v10941_v57  ;;  %8211 = vmatpush.bf16.msrb.mxu1 %v10686_v0 }
 0x482   : > { %v14335_v61 = vld [vmem:[%s15337_s11 + $0xf6c] sm:$0xf0] }
 0x483   : > { %v10397_v14 = vld [vmem:[%s15337_s11 + $0x910] sm:$0xf]  ;;  %v11198_v4 = vor.u32 %v14335_v61, %v11197_v60  ;;  %8224 = vmatpush.bf16.msrb.mxu2 %v10942_v1  ;;  %v16772_v60 = vadd.f32 %v7984_v54, %v7972_v62  ;;  %v7947_v61 = vpop.f32.mrf.mxu0 }
 0x484   : > { %v14135_v16 = vld [vmem:[%s15337_s11 + $0x92c] sm:$0xf0] }
 0x485   : > { %v10653_v13 = vld [vmem:[%s15337_s11 + $0xb10] sm:$0xf]  ;;  %v10398_v18 = vor.u32 %v14135_v16, %v10397_v14  ;;  %8237 = vmatpush.bf16.msrb.mxu3 %v11198_v4 }
 0x486   : > { %v14199_v5 = vld [vmem:[%s15337_s11 + $0xb2c] sm:$0xf0] }
 0x487   : > { %v10909_v6 = vld [vmem:[%s15337_s11 + $0xd10] sm:$0xf]  ;;  %v10654_v20 = vor.u32 %v14199_v5, %v10653_v13  ;;  %8199 = vmatpush.bf16.msrb.mxu0 %v10398_v18  ;;  %v7960_v13 = vpop.f32.mrf.mxu1 }
 0x488   : > { %v14263_v7 = vld [vmem:[%s15337_s11 + $0xd2c] sm:$0xf0] }
 0x489   : > { %v11165_v10 = vld [vmem:[%s15337_s11 + $0xf10] sm:$0xf]  ;;  %v10910_v21 = vor.u32 %v14263_v7, %v10909_v6  ;;  %8212 = vmatpush.bf16.msrb.mxu1 %v10654_v20 }
 0x48a   : > { %v14327_v17 = vld [vmem:[%s15337_s11 + $0xf2c] sm:$0xf0] }
 0x48b   : > { %v10365_v22 = vld [vmem:[%s15337_s11 + $0x8d0] sm:$0xf]  ;;  %v11166_v43 = vor.u32 %v14327_v17, %v11165_v10  ;;  %8225 = vmatpush.bf16.msrb.mxu2 %v10910_v21 }
 0x48c   : > { %v14127_v23 = vld [vmem:[%s15337_s11 + $0x8ec] sm:$0xf0] }
 0x48d   : > { %v10621_v2 = vld [vmem:[%s15337_s11 + $0xad0] sm:$0xf]  ;;  %v10366_v39 = vor.u32 %v14127_v23, %v10365_v22  ;;  %8238 = vmatpush.bf16.msrb.mxu3 %v11166_v43 }
 0x48e   : > { %v14191_v26 = vld [vmem:[%s15337_s11 + $0xaec] sm:$0xf0] }
 0x48f   : > { %v10877_v30 = vld [vmem:[%s15337_s11 + $0xcd0] sm:$0xf]  ;;  %v10622_v51 = vor.u32 %v14191_v26, %v10621_v2  ;;  %8200 = vmatpush.bf16.msrb.mxu0 %v10366_v39 }
 0x490   : > { %v14255_v33 = vld [vmem:[%s15337_s11 + $0xcec] sm:$0xf0] }
 0x491   : > { %v11133_v35 = vld [vmem:[%s15337_s11 + $0xed0] sm:$0xf]  ;;  %v10878_v40 = vor.u32 %v14255_v33, %v10877_v30  ;;  %8213 = vmatpush.bf16.msrb.mxu1 %v10622_v51 }
 0x492   : > { %v14319_v36 = vld [vmem:[%s15337_s11 + $0xeec] sm:$0xf0] }
 0x493   : > { %v10333_v41 = vld [vmem:[%s15337_s11 + $0x890] sm:$0xf]  ;;  %v11134_v52 = vor.u32 %v14319_v36, %v11133_v35  ;;  %8226 = vmatpush.bf16.msrb.mxu2 %v10878_v40  ;;  %v7986_v35 = vpop.f32.mrf.mxu3 }
 0x494   : > { %v14119_v42 = vld [vmem:[%s15337_s11 + $0x8ac] sm:$0xf0] }
 0x495   : > { %v10589_v44 = vld [vmem:[%s15337_s11 + $0xa90] sm:$0xf]  ;;  %v10334_v59 = vor.u32 %v14119_v42, %v10333_v41  ;;  %8239 = vmatpush.bf16.msrb.mxu3 %v11134_v52 }
 0x496   : > { %v14183_v58 = vld [vmem:[%s15337_s11 + $0xaac] sm:$0xf0] }
 0x497   : > { %v10845_v56 = vld [vmem:[%s15337_s11 + $0xc90] sm:$0xf]  ;;  %v10590_v63 = vor.u32 %v14183_v58, %v10589_v44  ;;  %8201 = vmatpush.bf16.msrb.mxu0 %v10334_v59 }
 0x498   : > { %v14247_v53 = vld [vmem:[%s15337_s11 + $0xcac] sm:$0xf0] }
 0x499   : > { %v11101_v55 = vld [vmem:[%s15337_s11 + $0xe90] sm:$0xf]  ;;  %v10846_v0 = vor.u32 %v14247_v53, %v10845_v56  ;;  %8214 = vmatpush.bf16.msrb.mxu1 %v10590_v63 }
 0x49a   : > { %v14311_v57 = vld [vmem:[%s15337_s11 + $0xeac] sm:$0xf0] }
 0x49b   : > { %v10301_v1 = vld [vmem:[%s15337_s11 + $0x850] sm:$0xf]  ;;  %v11102_v4 = vor.u32 %v14311_v57, %v11101_v55  ;;  %8227 = vmatpush.bf16.msrb.mxu2 %v10846_v0 }
 0x49c   : > { %v14111_v14 = vld [vmem:[%s15337_s11 + $0x86c] sm:$0xf0] }
 0x49d   : > { %v10557_v16 = vld [vmem:[%s15337_s11 + $0xa50] sm:$0xf]  ;;  %v10302_v18 = vor.u32 %v14111_v14, %v10301_v1  ;;  %8240 = vmatpush.bf16.msrb.mxu3 %v11102_v4 }
 0x49e   : > { %v14175_v5 = vld [vmem:[%s15337_s11 + $0xa6c] sm:$0xf0] }
 0x49f   : > { %v10813_v6 = vld [vmem:[%s15337_s11 + $0xc50] sm:$0xf]  ;;  %v10558_v21 = vor.u32 %v14175_v5, %v10557_v16  ;;  %8202 = vmatpush.bf16.msrb.mxu0 %v10302_v18 }
 0x4a0   : > { %v14239_v7 = vld [vmem:[%s15337_s11 + $0xc6c] sm:$0xf0] }
 0x4a1   : > { %v11069_v10 = vld [vmem:[%s15337_s11 + $0xe50] sm:$0xf]  ;;  %v10814_v22 = vor.u32 %v14239_v7, %v10813_v6  ;;  %8215 = vmatpush.bf16.msrb.mxu1 %v10558_v21 }
 0x4a2   : > { %v14303_v17 = vld [vmem:[%s15337_s11 + $0xe6c] sm:$0xf0] }
 0x4a3   : > { %v10269_v19 = vld [vmem:[%s15337_s11 + $0x810] sm:$0xf]  ;;  %v11070_v43 = vor.u32 %v14303_v17, %v11069_v10  ;;  %8228 = vmatpush.bf16.msrb.mxu2 %v10814_v22 }
 0x4a4   : > { %v14103_v20 = vld [vmem:[%s15337_s11 + $0x82c] sm:$0xf0] }
 0x4a5   : > { %v10525_v23 = vld [vmem:[%s15337_s11 + $0xa10] sm:$0xf]  ;;  %v10270_v51 = vor.u32 %v14103_v20, %v10269_v19  ;;  %8241 = vmatpush.bf16.msrb.mxu3 %v11070_v43 }
 0x4a6   : > { %v14167_v2 = vld [vmem:[%s15337_s11 + $0xa2c] sm:$0xf0] }
 0x4a7   : > { %v10781_v45 = vld [vmem:[%s15337_s11 + $0xc10] sm:$0xf]  ;;  %v10526_v44 = vor.u32 %v14167_v2, %v10525_v23  ;;  %8203 = vmatpush.bf16.msrb.mxu0 %v10270_v51 }
 0x4a8   : > { %v14231_v26 = vld [vmem:[%s15337_s11 + $0xc2c] sm:$0xf0] }
 0x4a9   : > { %v11037_v30 = vld [vmem:[%s15337_s11 + $0xe10] sm:$0xf]  ;;  %v10782_v50 = vor.u32 %v14231_v26, %v10781_v45  ;;  %8216 = vmatpush.bf16.msrb.mxu1 %v10526_v44 }
 0x4aa   : > { %v14295_v33 = vld [vmem:[%s15337_s11 + $0xe2c] sm:$0xf0]  ;;  %8204 = vmatmul.bf16.vlgmr.msrb.gmra.mxu0 %v15513_v31 }
 0x4ab   : > { %v11517_v36 = vld [vmem:[%s15337_s11 + $0x11d0] sm:$0xf]  ;;  %v11038_v56 = vor.u32 %v14295_v33, %v11037_v30  ;;  %8229 = vmatpush.bf16.msrb.mxu2 %v10782_v50 }
 0x4ac   : > { %v14415_v37 = vld [vmem:[%s15337_s11 + $0x11ec] sm:$0xf0]  ;;  %8217 = vmatmul.bf16.vlgmr.msrb.gmra.mxu1 %v15519_v38 }
 0x4ad   : > { %v11773_v39 = vld [vmem:[%s15337_s11 + $0x13d0] sm:$0xf]  ;;  %v11518_v53 = vor.u32 %v14415_v37, %v11517_v36  ;;  %8242 = vmatpush.bf16.msrb.mxu3 %v11038_v56  ;;  %v16824_v37 = vpop.f32.mrf.mxu0 }
 0x4ae   : > { %v14479_v40 = vld [vmem:[%s15337_s11 + $0x13ec] sm:$0xf0]  ;;  %8230 = vmatmul.bf16.vlgmr.msrb.gmra.mxu2 %v15510_v25 }
 0x4af   : > { %v12029_v41 = vld [vmem:[%s15337_s11 + $0x15d0] sm:$0xf]  ;;  %v11774_v62 = vor.u32 %v14479_v40, %v11773_v39  ;;  %8248 = vmatpush.bf16.msra.mxu0 %v11518_v53 }
 0x4b0   : > { %v14543_v42 = vld [vmem:[%s15337_s11 + $0x15ec] sm:$0xf0]  ;;  %8243 = vmatmul.bf16.vlgmr.msrb.gmra.mxu3 %v15515_v32 }
 0x4b1   : > { %v12285_v52 = vld [vmem:[%s15337_s11 + $0x17d0] sm:$0xf]  ;;  %v12030_v54 = vor.u32 %v14543_v42, %v12029_v41  ;;  %8261 = vmatpush.bf16.msra.mxu1 %v11774_v62  ;;  %v16828_v41 = vpop.f32.mrf.mxu1 }
 0x4b2   : > { %v14607_v58 = vld [vmem:[%s15337_s11 + $0x17ec] sm:$0xf0] }
 0x4b3   : > { %v11485_v55 = vld [vmem:[%s15337_s11 + $0x1190] sm:$0xf]  ;;  %v12286_v61 = vor.u32 %v14607_v58, %v12285_v52  ;;  %8274 = vmatpush.bf16.msra.mxu2 %v12030_v54 }
 0x4b4   : > { %v14407_v57 = vld [vmem:[%s15337_s11 + $0x11ac] sm:$0xf0] }
 0x4b5   : > { %v11741_v59 = vld [vmem:[%s15337_s11 + $0x1390] sm:$0xf]  ;;  %v11486_v13 = vor.u32 %v14407_v57, %v11485_v55  ;;  %8287 = vmatpush.bf16.msra.mxu3 %v12286_v61 }
 0x4b6   : > { %v14471_v63 = vld [vmem:[%s15337_s11 + $0x13ac] sm:$0xf0] }
 0x4b7   : > { %v11997_v0 = vld [vmem:[%s15337_s11 + $0x1590] sm:$0xf]  ;;  %v11742_v4 = vor.u32 %v14471_v63, %v11741_v59  ;;  %8249 = vmatpush.bf16.msra.mxu0 %v11486_v13  ;;  %v16841_v13 = vpop.f32.mrf.mxu2 }
 0x4b8   : > { %v14535_v1 = vld [vmem:[%s15337_s11 + $0x15ac] sm:$0xf0] }
 0x4b9   : > { %v12253_v14 = vld [vmem:[%s15337_s11 + $0x1790] sm:$0xf]  ;;  %v11998_v5 = vor.u32 %v14535_v1, %v11997_v0  ;;  %8262 = vmatpush.bf16.msra.mxu1 %v11742_v4 }
 0x4ba   : > { %v14599_v16 = vld [vmem:[%s15337_s11 + $0x17ac] sm:$0xf0] }
 0x4bb   : > { %v11453_v6 = vld [vmem:[%s15337_s11 + $0x1150] sm:$0xf]  ;;  %v12254_v17 = vor.u32 %v14599_v16, %v12253_v14  ;;  %8275 = vmatpush.bf16.msra.mxu2 %v11998_v5 }
 0x4bc   : > { %v14399_v7 = vld [vmem:[%s15337_s11 + $0x116c] sm:$0xf0] }
 0x4bd   : > { %v11709_v10 = vld [vmem:[%s15337_s11 + $0x1350] sm:$0xf]  ;;  %v11454_v23 = vor.u32 %v14399_v7, %v11453_v6  ;;  %8288 = vmatpush.bf16.msra.mxu3 %v12254_v17  ;;  %v16846_v7 = vpop.f32.mrf.mxu3 }
 0x4be   : > { %v14463_v18 = vld [vmem:[%s15337_s11 + $0x136c] sm:$0xf0] }
 0x4bf   : > { %v11965_v19 = vld [vmem:[%s15337_s11 + $0x1550] sm:$0xf]  ;;  %v11710_v2 = vor.u32 %v14463_v18, %v11709_v10  ;;  %8250 = vmatpush.bf16.msra.mxu0 %v11454_v23  ;;  %v7999_v18 = vpop.f32.mrf.mxu0 }
 0x4c0   : > { %v14527_v20 = vld [vmem:[%s15337_s11 + $0x156c] sm:$0xf0] }
 0x4c1   : > { %v12221_v21 = vld [vmem:[%s15337_s11 + $0x1750] sm:$0xf]  ;;  %v11966_v45 = vor.u32 %v14527_v20, %v11965_v19  ;;  %8263 = vmatpush.bf16.msra.mxu1 %v11710_v2  ;;  %v8012_v20 = vpop.f32.mrf.mxu1 }
 0x4c2   : > { %v14591_v22 = vld [vmem:[%s15337_s11 + $0x176c] sm:$0xf0] }
 0x4c3   : > { %v11421_v24 = vld [vmem:[%s15337_s11 + $0x1110] sm:$0xf]  ;;  %v12222_v30 = vor.u32 %v14591_v22, %v12221_v21  ;;  %8276 = vmatpush.bf16.msra.mxu2 %v11966_v45 }
 0x4c4   : > { %v14391_v43 = vld [vmem:[%s15337_s11 + $0x112c] sm:$0xf0] }
 0x4c5   : > { %v11677_v26 = vld [vmem:[%s15337_s11 + $0x1310] sm:$0xf]  ;;  %v11422_v40 = vor.u32 %v14391_v43, %v11421_v24  ;;  %8289 = vmatpush.bf16.msra.mxu3 %v12222_v30 }
 0x4c6   : > { %v14455_v33 = vld [vmem:[%s15337_s11 + $0x132c] sm:$0xf0] }
 0x4c7   : > { %v11933_v35 = vld [vmem:[%s15337_s11 + $0x1510] sm:$0xf]  ;;  %v11678_v42 = vor.u32 %v14455_v33, %v11677_v26  ;;  %8251 = vmatpush.bf16.msra.mxu0 %v11422_v40 }
 0x4c8   : > { %v14519_v36 = vld [vmem:[%s15337_s11 + $0x152c] sm:$0xf0] }
 0x4c9   : > { %v12189_v39 = vld [vmem:[%s15337_s11 + $0x1710] sm:$0xf]  ;;  %v11934_v44 = vor.u32 %v14519_v36, %v11933_v35  ;;  %8264 = vmatpush.bf16.msra.mxu1 %v11678_v42 }
 0x4ca   : > { %v14583_v51 = vld [vmem:[%s15337_s11 + $0x172c] sm:$0xf0] }
 0x4cb   : > { %v11389_v50 = vld [vmem:[%s15337_s11 + $0x10d0] sm:$0xf]  ;;  %v12190_v56 = vor.u32 %v14583_v51, %v12189_v39  ;;  %8277 = vmatpush.bf16.msra.mxu2 %v11934_v44 }
 0x4cc   : > { %v14383_v52 = vld [vmem:[%s15337_s11 + $0x10ec] sm:$0xf0] }
 0x4cd   : > { %v11645_v58 = vld [vmem:[%s15337_s11 + $0x12d0] sm:$0xf]  ;;  %v11390_v59 = vor.u32 %v14383_v52, %v11389_v50  ;;  %8290 = vmatpush.bf16.msra.mxu3 %v12190_v56 }
 0x4ce   : > { %v14447_v53 = vld [vmem:[%s15337_s11 + $0x12ec] sm:$0xf0] }
 0x4cf   : > { %v11901_v62 = vld [vmem:[%s15337_s11 + $0x14d0] sm:$0xf]  ;;  %v11646_v61 = vor.u32 %v14447_v53, %v11645_v58  ;;  %8252 = vmatpush.bf16.msra.mxu0 %v11390_v59 }
 0x4d0   : > { %v14511_v54 = vld [vmem:[%s15337_s11 + $0x14ec] sm:$0xf0] }
 0x4d1   : > { %v12157_v55 = vld [vmem:[%s15337_s11 + $0x16d0] sm:$0xf]  ;;  %v11902_v63 = vor.u32 %v14511_v54, %v11901_v62  ;;  %8265 = vmatpush.bf16.msra.mxu1 %v11646_v61  ;;  %v8025_v54 = vpop.f32.mrf.mxu2  ;;  %v8038_v61 = vpop.f32.mrf.mxu3 }
 0x4d2   : > { %v14575_v57 = vld [vmem:[%s15337_s11 + $0x16ec] sm:$0xf0] }
 0x4d3   : > { %v11357_v0 = vld [vmem:[%s15337_s11 + $0x1090] sm:$0xf]  ;;  %v12158_v16 = vor.u32 %v14575_v57, %v12157_v55  ;;  %8278 = vmatpush.bf16.msra.mxu2 %v11902_v63 }
 0x4d4   : > { %v14375_v1 = vld [vmem:[%s15337_s11 + $0x10ac] sm:$0xf0] }
 0x4d5   : > { %v11613_v14 = vld [vmem:[%s15337_s11 + $0x1290] sm:$0xf]  ;;  %v11358_v19 = vor.u32 %v14375_v1, %v11357_v0  ;;  %8291 = vmatpush.bf16.msra.mxu3 %v12158_v16 }
 0x4d6   : > { %v14439_v4 = vld [vmem:[%s15337_s11 + $0x12ac] sm:$0xf0] }
 0x4d7   : > { %v11869_v5 = vld [vmem:[%s15337_s11 + $0x1490] sm:$0xf]  ;;  %v11614_v21 = vor.u32 %v14439_v4, %v11613_v14  ;;  %8253 = vmatpush.bf16.msra.mxu0 %v11358_v19 }
 0x4d8   : > { %v14503_v6 = vld [vmem:[%s15337_s11 + $0x14ac] sm:$0xf0] }
 0x4d9   : > { %v12125_v10 = vld [vmem:[%s15337_s11 + $0x1690] sm:$0xf]  ;;  %v11870_v22 = vor.u32 %v14503_v6, %v11869_v5  ;;  %8266 = vmatpush.bf16.msra.mxu1 %v11614_v21 }
 0x4da   : > { %v14567_v17 = vld [vmem:[%s15337_s11 + $0x16ac] sm:$0xf0] }
 0x4db   : > { %v11325_v23 = vld [vmem:[%s15337_s11 + $0x1050] sm:$0xf]  ;;  %v12126_v24 = vor.u32 %v14567_v17, %v12125_v10  ;;  %8279 = vmatpush.bf16.msra.mxu2 %v11870_v22 }
 0x4dc   : > { %v14367_v2 = vld [vmem:[%s15337_s11 + $0x106c] sm:$0xf0] }
 0x4dd   : > { %v11581_v45 = vld [vmem:[%s15337_s11 + $0x1250] sm:$0xf]  ;;  %v11326_v36 = vor.u32 %v14367_v2, %v11325_v23  ;;  %8292 = vmatpush.bf16.msra.mxu3 %v12126_v24 }
 0x4de   : > { %v14431_v43 = vld [vmem:[%s15337_s11 + $0x126c] sm:$0xf0] }
 0x4df   : > { %v11837_v26 = vld [vmem:[%s15337_s11 + $0x1450] sm:$0xf]  ;;  %v11582_v40 = vor.u32 %v14431_v43, %v11581_v45  ;;  %8254 = vmatpush.bf16.msra.mxu0 %v11326_v36 }
 0x4e0   : > { %v14495_v30 = vld [vmem:[%s15337_s11 + $0x146c] sm:$0xf0] }
 0x4e1   : > { %v12093_v33 = vld [vmem:[%s15337_s11 + $0x1650] sm:$0xf]  ;;  %v11838_v42 = vor.u32 %v14495_v30, %v11837_v26  ;;  %8267 = vmatpush.bf16.msra.mxu1 %v11582_v40 }
 0x4e2   : > { %v14559_v35 = vld [vmem:[%s15337_s11 + $0x166c] sm:$0xf0] }
 0x4e3   : > { %v11293_v39 = vld [vmem:[%s15337_s11 + $0x1010] sm:$0xf]  ;;  %v12094_v58 = vor.u32 %v14559_v35, %v12093_v33  ;;  %8280 = vmatpush.bf16.msra.mxu2 %v11838_v42 }
 0x4e4   : > { %v14359_v51 = vld [vmem:[%s15337_s11 + $0x102c] sm:$0xf0] }
 0x4e5   : > { %v11549_v44 = vld [vmem:[%s15337_s11 + $0x1210] sm:$0xf]  ;;  %v11294_v63 = vor.u32 %v14359_v51, %v11293_v39  ;;  %8293 = vmatpush.bf16.msra.mxu3 %v12094_v58 }
 0x4e6   : > { %v14423_v50 = vld [vmem:[%s15337_s11 + $0x122c] sm:$0xf0] }
 0x4e7   : > { %v11805_v52 = vld [vmem:[%s15337_s11 + $0x1410] sm:$0xf]  ;;  %v11550_v16 = vor.u32 %v14423_v50, %v11549_v44  ;;  %8255 = vmatpush.bf16.msra.mxu0 %v11294_v63 }
 0x4e8   : > { %v14487_v56 = vld [vmem:[%s15337_s11 + $0x142c] sm:$0xf0] }
 0x4e9   : > { %v12061_v53 = vld [vmem:[%s15337_s11 + $0x1610] sm:$0xf]  ;;  %v11806_v4 = vor.u32 %v14487_v56, %v11805_v52  ;;  %8268 = vmatpush.bf16.msra.mxu1 %v11550_v16 }
 0x4ea   : > { %v14551_v62 = vld [vmem:[%s15337_s11 + $0x162c] sm:$0xf0]  ;;  %8256 = vmatmul.bf16.vlgmr.msra.gmra.mxu0 %v15587_v8 }
 0x4eb   : > { %v12541_v55 = vld [vmem:[%s15337_s11 + $0x19d0] sm:$0xf]  ;;  %v12062_v10 = vor.u32 %v14551_v62, %v12061_v53  ;;  %8281 = vmatpush.bf16.msra.mxu2 %v11806_v4 }
 0x4ec   : > { %v14671_v57 = vld [vmem:[%s15337_s11 + $0x19ec] sm:$0xf0]  ;;  %8269 = vmatmul.bf16.vlgmr.msra.gmra.mxu1 %v15593_v12 }
 0x4ed   : > { %v12797_v59 = vld [vmem:[%s15337_s11 + $0x1bd0] sm:$0xf]  ;;  %v12542_v17 = vor.u32 %v14671_v57, %v12541_v55  ;;  %8294 = vmatpush.bf16.msra.mxu3 %v12062_v10 }
 0x4ee   : > { %v14735_v0 = vld [vmem:[%s15337_s11 + $0x1bec] sm:$0xf0]  ;;  %8282 = vmatmul.bf16.vlgmr.msra.gmra.mxu2 %v15591_v11 }
 0x4ef   : > { %v13053_v1 = vld [vmem:[%s15337_s11 + $0x1dd0] sm:$0xf]  ;;  %v12798_v18 = vor.u32 %v14735_v0, %v12797_v59  ;;  %8300 = vmatpush.bf16.msrb.mxu0 %v12542_v17 }
 0x4f0   : > { %v14799_v14 = vld [vmem:[%s15337_s11 + $0x1dec] sm:$0xf0]  ;;  %8295 = vmatmul.bf16.vlgmr.msra.gmra.mxu3 %v15596_v15 }
 0x4f1   : > { %v13309_v5 = vld [vmem:[%s15337_s11 + $0x1fd0] sm:$0xf]  ;;  %v13054_v19 = vor.u32 %v14799_v14, %v13053_v1  ;;  %8313 = vmatpush.bf16.msrb.mxu1 %v12798_v18  ;;  %v16900_v1 = vpop.f32.mrf.mxu0 }
 0x4f2   : > { %v14863_v6 = vld [vmem:[%s15337_s11 + $0x1fec] sm:$0xf0] }
 0x4f3   : > { %v12509_v20 = vld [vmem:[%s15337_s11 + $0x1990] sm:$0xf]  ;;  %v13310_v23 = vor.u32 %v14863_v6, %v13309_v5  ;;  %8326 = vmatpush.bf16.msrb.mxu2 %v13054_v19  ;;  %v16904_v5 = vpop.f32.mrf.mxu1 }
 0x4f4   : > { %v14663_v21 = vld [vmem:[%s15337_s11 + $0x19ac] sm:$0xf0] }
 0x4f5   : > { %v12765_v22 = vld [vmem:[%s15337_s11 + $0x1b90] sm:$0xf]  ;;  %v12510_v30 = vor.u32 %v14663_v21, %v12509_v20  ;;  %8339 = vmatpush.bf16.msrb.mxu3 %v13310_v23 }
 0x4f6   : > { %v14727_v2 = vld [vmem:[%s15337_s11 + $0x1bac] sm:$0xf0] }
 0x4f7   : > { %v13021_v45 = vld [vmem:[%s15337_s11 + $0x1d90] sm:$0xf]  ;;  %v12766_v33 = vor.u32 %v14727_v2, %v12765_v22  ;;  %8301 = vmatpush.bf16.msrb.mxu0 %v12510_v30 }
 0x4f8   : > { %v14791_v24 = vld [vmem:[%s15337_s11 + $0x1dac] sm:$0xf0] }
 0x4f9   : > { %v13277_v43 = vld [vmem:[%s15337_s11 + $0x1f90] sm:$0xf]  ;;  %v13022_v35 = vor.u32 %v14791_v24, %v13021_v45  ;;  %8314 = vmatpush.bf16.msrb.mxu1 %v12766_v33 }
 0x4fa   : > { %v14855_v26 = vld [vmem:[%s15337_s11 + $0x1fac] sm:$0xf0] }
 0x4fb   : > { %v12477_v36 = vld [vmem:[%s15337_s11 + $0x1950] sm:$0xf]  ;;  %v13278_v40 = vor.u32 %v14855_v26, %v13277_v43  ;;  %8327 = vmatpush.bf16.msrb.mxu2 %v13022_v35 }
 0x4fc   : > { %v14655_v39 = vld [vmem:[%s15337_s11 + $0x196c] sm:$0xf0] }
 0x4fd   : > { %v12733_v51 = vld [vmem:[%s15337_s11 + $0x1b50] sm:$0xf]  ;;  %v12478_v56 = vor.u32 %v14655_v39, %v12477_v36  ;;  %8340 = vmatpush.bf16.msrb.mxu3 %v13278_v40  ;;  %v16917_v39 = vpop.f32.mrf.mxu2 }
 0x4fe   : > { %v14719_v42 = vld [vmem:[%s15337_s11 + $0x1b6c] sm:$0xf0] }
 0x4ff   : > { %v12989_v44 = vld [vmem:[%s15337_s11 + $0x1d50] sm:$0xf]  ;;  %v12734_v53 = vor.u32 %v14719_v42, %v12733_v51  ;;  %8302 = vmatpush.bf16.msrb.mxu0 %v12478_v56  ;;  %v8051_v56 = vpop.f32.mrf.mxu0 }
 0x500   : > { %v14783_v50 = vld [vmem:[%s15337_s11 + $0x1d6c] sm:$0xf0]  ;;  %v9727_v56 = vld [vmem:[%s15337_s11 + $0x3f0] sm:$0xf0] }
 0x501   : > { %v13245_v52 = vld [vmem:[%s15337_s11 + $0x1f50] sm:$0xf]  ;;  %v12990_v62 = vor.u32 %v14783_v50, %v12989_v44  ;;  %8315 = vmatpush.bf16.msrb.mxu1 %v12734_v53  ;;  %v7998_v44 = vadd.f32 %v16824_v37, %v16772_v60  ;;  %v16924_v50 = vpop.f32.mrf.mxu3 }
 0x502   : > { %v14847_v58 = vld [vmem:[%s15337_s11 + $0x1f6c] sm:$0xf0] }
 0x503   : > { %v12445_v54 = vld [vmem:[%s15337_s11 + $0x1910] sm:$0xf]  ;;  %v13246_v59 = vor.u32 %v14847_v58, %v13245_v52  ;;  %8328 = vmatpush.bf16.msrb.mxu2 %v12990_v62  ;;  %v8064_v62 = vpop.f32.mrf.mxu1 }
 0x504   : > { %v14647_v55 = vld [vmem:[%s15337_s11 + $0x192c] sm:$0xf0] }
 0x505   : > { %v12701_v57 = vld [vmem:[%s15337_s11 + $0x1b10] sm:$0xf]  ;;  %v12446_v4 = vor.u32 %v14647_v55, %v12445_v54  ;;  %8341 = vmatpush.bf16.msrb.mxu3 %v13246_v59 }
 0x506   : > { %v14711_v61 = vld [vmem:[%s15337_s11 + $0x1b2c] sm:$0xf0] }
 0x507   : > { %v12957_v63 = vld [vmem:[%s15337_s11 + $0x1d10] sm:$0xf]  ;;  %v12702_v6 = vor.u32 %v14711_v61, %v12701_v57  ;;  %8303 = vmatpush.bf16.msrb.mxu0 %v12446_v4 }
 0x508   : > { %v14775_v0 = vld [vmem:[%s15337_s11 + $0x1d2c] sm:$0xf0] }
 0x509   : > { %v13213_v14 = vld [vmem:[%s15337_s11 + $0x1f10] sm:$0xf]  ;;  %v12958_v10 = vor.u32 %v14775_v0, %v12957_v63  ;;  %8316 = vmatpush.bf16.msrb.mxu1 %v12702_v6 }
 0x50a   : > { %v14839_v16 = vld [vmem:[%s15337_s11 + $0x1f2c] sm:$0xf0] }
 0x50b   : > { %v12413_v17 = vld [vmem:[%s15337_s11 + $0x18d0] sm:$0xf]  ;;  %v13214_v20 = vor.u32 %v14839_v16, %v13213_v14  ;;  %8329 = vmatpush.bf16.msrb.mxu2 %v12958_v10  ;;  %v8011_v14 = vadd.f32 %v16828_v41, %v7998_v44 }
 0x50c   : > { %v14639_v18 = vld [vmem:[%s15337_s11 + $0x18ec] sm:$0xf0] }
 0x50d   : > { %v12669_v19 = vld [vmem:[%s15337_s11 + $0x1ad0] sm:$0xf]  ;;  %v12414_v24 = vor.u32 %v14639_v18, %v12413_v17  ;;  %8342 = vmatpush.bf16.msrb.mxu3 %v13214_v20  ;;  %v8024_v18 = vadd.f32 %v16841_v13, %v8011_v14  ;;  %v13955_v14 = vld [vmem:[%s15337_s11 + $0x394] sm:$0xf] }
 0x50e   : > { %v14703_v21 = vld [vmem:[%s15337_s11 + $0x1aec] sm:$0xf0] }
 0x50f   : > { %v12925_v22 = vld [vmem:[%s15337_s11 + $0x1cd0] sm:$0xf]  ;;  %v12670_v43 = vor.u32 %v14703_v21, %v12669_v19  ;;  %8304 = vmatpush.bf16.msrb.mxu0 %v12414_v24 }
 0x510   : > { %v14767_v23 = vld [vmem:[%s15337_s11 + $0x1cec] sm:$0xf0] }
 0x511   : > { %v13181_v2 = vld [vmem:[%s15337_s11 + $0x1ed0] sm:$0xf]  ;;  %v12926_v26 = vor.u32 %v14767_v23, %v12925_v22  ;;  %8317 = vmatpush.bf16.msrb.mxu1 %v12670_v43  ;;  %v8077_v43 = vpop.f32.mrf.mxu2 }
 0x512   : > { %v14831_v45 = vld [vmem:[%s15337_s11 + $0x1eec] sm:$0xf0] }
 0x513   : > { %v12381_v30 = vld [vmem:[%s15337_s11 + $0x1890] sm:$0xf]  ;;  %v13182_v36 = vor.u32 %v14831_v45, %v13181_v2  ;;  %8330 = vmatpush.bf16.msrb.mxu2 %v12926_v26 }
 0x514   : > { %v14631_v33 = vld [vmem:[%s15337_s11 + $0x18ac] sm:$0xf0] }
 0x515   : > { %v12637_v35 = vld [vmem:[%s15337_s11 + $0x1a90] sm:$0xf]  ;;  %v12382_v53 = vor.u32 %v14631_v33, %v12381_v30  ;;  %8343 = vmatpush.bf16.msrb.mxu3 %v13182_v36  ;;  %v8090_v33 = vpop.f32.mrf.mxu3 }
 0x516   : > { %v14695_v51 = vld [vmem:[%s15337_s11 + $0x1aac] sm:$0xf0] }
 0x517   : > { %v12893_v40 = vld [vmem:[%s15337_s11 + $0x1c90] sm:$0xf]  ;;  %v12638_v54 = vor.u32 %v14695_v51, %v12637_v35  ;;  %8305 = vmatpush.bf16.msrb.mxu0 %v12382_v53  ;;  %v13899_v51 = vld [vmem:[%s15337_s11 + $0x1d4] sm:$0xf] }
 0x518   : > { %v14759_v42 = vld [vmem:[%s15337_s11 + $0x1cac] sm:$0xf0] }
 0x519   : > { %v13149_v52 = vld [vmem:[%s15337_s11 + $0x1e90] sm:$0xf]  ;;  %v12894_v55 = vor.u32 %v14759_v42, %v12893_v40  ;;  %8318 = vmatpush.bf16.msrb.mxu1 %v12638_v54  ;;  %v9471_v40 = vld [vmem:[%s15337_s11 + $0x1f0] sm:$0xf0]  ;;  %v8037_v42 = vadd.f32 %v16846_v7, %v8024_v18 }
 0x51a   : > { %v14823_v58 = vld [vmem:[%s15337_s11 + $0x1eac] sm:$0xf0] }
 0x51b   : > { %v12349_v60 = vld [vmem:[%s15337_s11 + $0x1850] sm:$0xf]  ;;  %v13150_v59 = vor.u32 %v14823_v58, %v13149_v52  ;;  %8331 = vmatpush.bf16.msrb.mxu2 %v12894_v55  ;;  %v13963_v58 = vld [vmem:[%s15337_s11 + $0x3d4] sm:$0xf]  ;;  %v8050_v54 = vadd.f32 %v16900_v1, %v8037_v42 }
 0x51c   : > { %v14623_v37 = vld [vmem:[%s15337_s11 + $0x186c] sm:$0xf0]  ;;  %v13939_v42 = vld [vmem:[%s15337_s11 + $0x314] sm:$0xf] }
 0x51d   : > { %v12605_v57 = vld [vmem:[%s15337_s11 + $0x1a50] sm:$0xf]  ;;  %v12350_v6 = vor.u32 %v14623_v37, %v12349_v60  ;;  %8344 = vmatpush.bf16.msrb.mxu3 %v13150_v59  ;;  %v9474_v60 = vor.u32 %v13899_v51, %v9471_v40  ;;  %v9730_v59 = vor.u32 %v13963_v58, %v9727_v56  ;;  %v8101_v40 = vpop.f32.mrf.mxu0  ;;  %v8114_v58 = vpop.f32.mrf.mxu1 }
 0x51e   : > { %v14687_v61 = vld [vmem:[%s15337_s11 + $0x1a6c] sm:$0xf0] }
 0x51f   : > { %v12861_v63 = vld [vmem:[%s15337_s11 + $0x1c50] sm:$0xf]  ;;  %v12606_v19 = vor.u32 %v14687_v61, %v12605_v57  ;;  %8306 = vmatpush.bf16.msrb.mxu0 %v12350_v6 }
 0x520   : > { %v14751_v0 = vld [vmem:[%s15337_s11 + $0x1c6c] sm:$0xf0] }
 0x521   : > { %v13117_v16 = vld [vmem:[%s15337_s11 + $0x1e50] sm:$0xf]  ;;  %v12862_v20 = vor.u32 %v14751_v0, %v12861_v63  ;;  %8319 = vmatpush.bf16.msrb.mxu1 %v12606_v19  ;;  %v13891_v63 = vld [vmem:[%s15337_s11 + $0x194] sm:$0xf] }
 0x522   : > { %v14815_v4 = vld [vmem:[%s15337_s11 + $0x1e6c] sm:$0xf0]  ;;  %v9439_v0 = vld [vmem:[%s15337_s11 + $0x1b0] sm:$0xf0] }
 0x523   : > { %v12317_v10 = vld [vmem:[%s15337_s11 + $0x1810] sm:$0xf]  ;;  %v13118_v23 = vor.u32 %v14815_v4, %v13117_v16  ;;  %8332 = vmatpush.bf16.msrb.mxu2 %v12862_v20  ;;  %v9695_v16 = vld [vmem:[%s15337_s11 + $0x3b0] sm:$0xf0]  ;;  %v8063_v4 = vadd.f32 %v16904_v5, %v8050_v54 }
 0x524   : > { %v14615_v17 = vld [vmem:[%s15337_s11 + $0x182c] sm:$0xf0]  ;;  %v9698_v20 = vor.u32 %v13955_v14, %v9695_v16 }
 0x525   : > { %v12573_v41 = vld [vmem:[%s15337_s11 + $0x1a10] sm:$0xf]  ;;  %v12318_v35 = vor.u32 %v14615_v17, %v12317_v10  ;;  %8345 = vmatpush.bf16.msrb.mxu3 %v13118_v23  ;;  %v9442_v10 = vor.u32 %v13891_v63, %v9439_v0  ;;  %v8076_v5 = vadd.f32 %v16917_v39, %v8063_v4  ;;  %v13947_v23 = vld [vmem:[%s15337_s11 + $0x354] sm:$0xf] }
 0x526   : > { %v14679_v21 = vld [vmem:[%s15337_s11 + $0x1a2c] sm:$0xf0] }
 0x527   : > { %v12829_v22 = vld [vmem:[%s15337_s11 + $0x1c10] sm:$0xf]  ;;  %v12574_v44 = vor.u32 %v14679_v21, %v12573_v41  ;;  %8307 = vmatpush.bf16.msrb.mxu0 %v12318_v35  ;;  %v13883_v21 = vld [vmem:[%s15337_s11 + $0x154] sm:$0xf]  ;;  %v8089_v51 = vadd.f32 %v16924_v50, %v8076_v5 }
 0x528   : > { %v14743_v2 = vld [vmem:[%s15337_s11 + $0x1c2c] sm:$0xf0]  ;;  %v13875_v35 = vld [vmem:[%s15337_s11 + $0x114] sm:$0xf] }
 0x529   : > { %v13085_v45 = vld [vmem:[%s15337_s11 + $0x1e10] sm:$0xf]  ;;  %v12830_v52 = vor.u32 %v14743_v2, %v12829_v22  ;;  %8320 = vmatpush.bf16.msrb.mxu1 %v12574_v44  ;;  %v9407_v22 = vld [vmem:[%s15337_s11 + $0x170] sm:$0xf0]  ;;  %v8102_v56 = vadd.f32 %v8101_v40, %v8089_v51 }
 0x52a   : > { %v14807_v24 = vld [vmem:[%s15337_s11 + $0x1e2c] sm:$0xf0]  ;;  %8308 = vmatmul.bf16.vlgmr.msrb.gmra.mxu0 %v15653_v46  ;;  %v9663_v2 = vld [vmem:[%s15337_s11 + $0x370] sm:$0xf0]  ;;  %v9410_v43 = vor.u32 %v13883_v21, %v9407_v22  ;;  %v8140_v21 = vpop.f32.mrf.mxu3 }
 0x52b   : > { %v13565_v13 = vld [vmem:[%s15337_s11 + $0x21d0] sm:$0xf]  ;;  %v13086_v53 = vor.u32 %v14807_v24, %v13085_v45  ;;  %8333 = vmatpush.bf16.msrb.mxu2 %v12830_v52  ;;  %v9631_v44 = vld [vmem:[%s15337_s11 + $0x330] sm:$0xf0]  ;;  %v8115_v0 = vadd.f32 %v8114_v58, %v8102_v56 }
 0x52c   : > { %v14927_v26 = vld [vmem:[%s15337_s11 + $0x21ec] sm:$0xf0]  ;;  %8321 = vmatmul.bf16.vlgmr.msrb.gmra.mxu1 %v15657_v48  ;;  %v13923_v22 = vld [vmem:[%s15337_s11 + $0x294] sm:$0xf] }
 0x52d   : > { %v13821_v30 = vld [vmem:[%s15337_s11 + $0x23d0] sm:$0xf]  ;;  %v13566_v62 = vor.u32 %v14927_v26, %v13565_v13  ;;  %8346 = vmatpush.bf16.msrb.mxu3 %v13086_v53  ;;  %v9567_v5 = vld [vmem:[%s15337_s11 + $0x2b0] sm:$0xf0] }
 0x52e   : > { %v14991_v36 = vld [vmem:[%s15337_s11 + $0x23ec] sm:$0xf0]  ;;  %8334 = vmatmul.bf16.vlgmr.msrb.gmra.mxu2 %v15655_v47  ;;  %v9279_v51 = vld [vmem:[%s15337_s11 + $0x70] sm:$0xf0] }
 0x52f   : > { %v13822_v55 = vor.u32 %v14991_v36, %v13821_v30  ;;  %v13533_v37 = vld [vmem:[%s15337_s11 + $0x2190] sm:$0xf]  ;;  %8352 = vmatpush.bf16.msra.mxu0 %v13566_v62  ;;  %8378 = vmatpush.bf16.msra.mxu2 %v9474_v60  ;;  %v9666_v30 = vor.u32 %v13947_v23, %v9663_v2  ;;  %v9375_v36 = vld [vmem:[%s15337_s11 + $0x130] sm:$0xf0]  ;;  %v9634_v60 = vor.u32 %v13939_v42, %v9631_v44  ;;  %v8103_v23 = vpop.f32.mrf.mxu0  ;;  %v9089_v2 = vrot.slane %v16685_v3, 4 }
 0x530   : > { %v14919_v7 = vld [vmem:[%s15337_s11 + $0x21ac] sm:$0xf0]  ;;  %8347 = vmatmul.bf16.vlgmr.msrb.gmra.mxu3 %v15659_v49  ;;  %v9378_v62 = vor.u32 %v13875_v35, %v9375_v36  ;;  %v13851_v36 = vld [vmem:[%s15337_s11 + $0x54] sm:$0xf] }
 0x531   : > { %v13789_v57 = vld [vmem:[%s15337_s11 + $0x2390] sm:$0xf]  ;;  %v13534_v1 = vor.u32 %v14919_v7, %v13533_v37  ;;  %8365 = vmatpush.bf16.msra.mxu1 %v13822_v55  ;;  %8391 = vmatpush.bf16.msra.mxu3 %v9730_v59  ;;  %v13867_v7 = vld [vmem:[%s15337_s11 + $0xd4] sm:$0xf] }
 0x532   : > { %v14983_v61 = vld [vmem:[%s15337_s11 + $0x23ac] sm:$0xf0]  ;;  %v13931_v59 = vld [vmem:[%s15337_s11 + $0x2d4] sm:$0xf] }
 0x533   : > { %v13790_v6 = vor.u32 %v14983_v61, %v13789_v57  ;;  %v13501_v17 = vld [vmem:[%s15337_s11 + $0x2150] sm:$0xf]  ;;  %8353 = vmatpush.bf16.msra.mxu0 %v13534_v1  ;;  %8379 = vmatpush.bf16.msra.mxu2 %v9442_v10  ;;  %v9343_v57 = vld [vmem:[%s15337_s11 + $0xf0] sm:$0xf0] }
 0x534   : > { %v14911_v18 = vld [vmem:[%s15337_s11 + $0x216c] sm:$0xf0]  ;;  %v9599_v61 = vld [vmem:[%s15337_s11 + $0x2f0] sm:$0xf0]  ;;  %v9346_v16 = vor.u32 %v13867_v7, %v9343_v57 }
 0x535   : > { %v13757_v19 = vld [vmem:[%s15337_s11 + $0x2350] sm:$0xf]  ;;  %v13502_v45 = vor.u32 %v14911_v18, %v13501_v17  ;;  %8366 = vmatpush.bf16.msra.mxu1 %v13790_v6  ;;  %8392 = vmatpush.bf16.msra.mxu3 %v9698_v20  ;;  %v9602_v10 = vor.u32 %v13931_v59, %v9599_v61  ;;  %v8127_v17 = vpop.f32.mrf.mxu2  ;;  %v9311_v20 = vld [vmem:[%s15337_s11 + $0xb0] sm:$0xf0] }
 0x536   : > { %v14975_v41 = vld [vmem:[%s15337_s11 + $0x236c] sm:$0xf0]  ;;  %v13915_v42 = vld [vmem:[%s15337_s11 + $0x254] sm:$0xf] }
 0x537   : > { %v13758_v24 = vor.u32 %v14975_v41, %v13757_v19  ;;  %v13469_v39 = vld [vmem:[%s15337_s11 + $0x2110] sm:$0xf]  ;;  %8354 = vmatpush.bf16.msra.mxu0 %v13502_v45  ;;  %8380 = vmatpush.bf16.msra.mxu2 %v9410_v43  ;;  %v13859_v19 = vld [vmem:[%s15337_s11 + $0x94] sm:$0xf]  ;;  %v8128_v41 = vadd.f32 %v8127_v17, %v8115_v0 }
 0x538   : > { %v14903_v13 = vld [vmem:[%s15337_s11 + $0x212c] sm:$0xf0]  ;;  %v9535_v44 = vld [vmem:[%s15337_s11 + $0x270] sm:$0xf0] }
 0x539   : > { %v13725_v26 = vld [vmem:[%s15337_s11 + $0x2310] sm:$0xf]  ;;  %v13470_v52 = vor.u32 %v14903_v13, %v13469_v39  ;;  %8367 = vmatpush.bf16.msra.mxu1 %v13758_v24  ;;  %8393 = vmatpush.bf16.msra.mxu3 %v9666_v30  ;;  %v8116_v24 = vpop.f32.mrf.mxu1  ;;  %v8141_v43 = vadd.f32 %v8140_v21, %v8128_v41  ;;  %v9314_v13 = vor.u32 %v13859_v19, %v9311_v20  ;;  %v9247_v57 = vld [vmem:[%s15337_s11 + $0x30] sm:$0xf0] }
 0x53a   : > { %v14967_v33 = vld [vmem:[%s15337_s11 + $0x232c] sm:$0xf0]  ;;  %v9538_v7 = vor.u32 %v13915_v42, %v9535_v44  ;;  %v13907_v59 = vld [vmem:[%s15337_s11 + $0x214] sm:$0xf]  ;;  %v15059_v42 = vld [vmem:[#allocation1] sm:$0xff] }
 0x53b   : > { %v13726_v53 = vor.u32 %v14967_v33, %v13725_v26  ;;  %v13437_v54 = vld [vmem:[%s15337_s11 + $0x20d0] sm:$0xf]  ;;  %8355 = vmatpush.bf16.msra.mxu0 %v13470_v52  ;;  %8381 = vmatpush.bf16.msra.mxu2 %v9378_v62  ;;  %v9570_v33 = vor.u32 %v13923_v22, %v9567_v5  ;;  %v9090_v40 = vrot.slane %v8141_v43, 2  ;;  %v9503_v61 = vld [vmem:[%s15337_s11 + $0x230] sm:$0xf0] }
 0x53c   : > { %v14895_v55 = vld [vmem:[%s15337_s11 + $0x20ec] sm:$0xf0]  ;;  %v14027_v0 = vld [vmem:[%s15337_s11 + $0x5d4] sm:$0xf]  ;;  %v9506_v41 = vor.u32 %v13907_v59, %v9503_v61  ;;  %v15061_v59 = vld [vmem:[%s15345_s9] sm:$0xff] }
 0x53d   : > { %v13693_v50 = vld [vmem:[%s15337_s11 + $0x22d0] sm:$0xf]  ;;  %v13438_v63 = vor.u32 %v14895_v55, %v13437_v54  ;;  %8368 = vmatpush.bf16.msra.mxu1 %v13726_v53  ;;  %8394 = vmatpush.bf16.msra.mxu3 %v9634_v60  ;;  %v9097_v53 = vsel %vm9096_vm1, %v9089_v2, %v9090_v40  ;;  %v9282_v54 = vor.u32 %v13851_v36, %v9279_v51  ;;  %v13843_v60 = vld [vmem:[%s15337_s11 + $0x14] sm:$0xf]  ;;  %v1394_v61 = vperm.slane %v15061_v59, 4 }
 0x53e   : > { %v14959_v37 = vld [vmem:[%s15337_s11 + $0x22ec] sm:$0xf0]  ;;  %v14219_v19 = vld [vmem:[%s15337_s11 + $0xbd4] sm:$0xf] }
 0x53f   : > { %v13694_v14 = vor.u32 %v14959_v37, %v13693_v50  ;;  %v13405_v1 = vld [vmem:[%s15337_s11 + $0x2090] sm:$0xf]  ;;  %8356 = vmatpush.bf16.msra.mxu0 %v13438_v63  ;;  %8382 = vmatpush.bf16.msra.mxu2 %v9346_v16  ;;  %v9099_v37 = vsel %vm9098_vm2, %v16357_v9, %v9097_v53  ;;  %v8129_v63 = vpop.f32.mrf.mxu2  ;;  %v14091_v16 = vld [vmem:[%s15337_s11 + $0x7d4] sm:$0xf]  ;;  %v15060_v53 = vld [vmem:[#allocation1 + $0x9] sm:$0xff] }
 0x540   : > { %v14887_v4 = vld [vmem:[%s15337_s11 + $0x20ac] sm:$0xf0]  ;;  %9105 = vst [vmem:[%s17029_s8] sm:$0xff] %v9099_v37  ;;  %v10751_v20 = vld [vmem:[%s15337_s11 + $0xbf0] sm:$0xf0] }
 0x541   : > { %v13661_v6 = vld [vmem:[%s15337_s11 + $0x2290] sm:$0xf]  ;;  %v13406_v45 = vor.u32 %v14887_v4, %v13405_v1  ;;  %8369 = vmatpush.bf16.msra.mxu1 %v13694_v14  ;;  %8395 = vmatpush.bf16.msra.mxu3 %v9602_v10  ;;  %v9983_v14 = vld [vmem:[%s15337_s11 + $0x5f0] sm:$0xf0]  ;;  %v8142_v1 = vpop.f32.mrf.mxu3  ;;  %v10754_v24 = vor.u32 %v14219_v19, %v10751_v20 }
 0x542   : > { %v14951_v18 = vld [vmem:[%s15337_s11 + $0x22ac] sm:$0xf0]  ;;  %v10239_v4 = vld [vmem:[%s15337_s11 + $0x7f0] sm:$0xf0]  ;;  %v9986_v21 = vor.u32 %v14027_v0, %v9983_v14 }
 0x543   : > { %v13662_v39 = vor.u32 %v14951_v18, %v13661_v6  ;;  %v13373_v26 = vld [vmem:[%s15337_s11 + $0x2050] sm:$0xf]  ;;  %8357 = vmatpush.bf16.msra.mxu0 %v13406_v45  ;;  %8383 = vmatpush.bf16.msra.mxu2 %v9314_v13  ;;  %v14155_v6 = vld [vmem:[%s15337_s11 + $0x9d4] sm:$0xf]  ;;  %v9250_v18 = vor.u32 %v13843_v60, %v9247_v57  ;;  %v10242_v22 = vor.u32 %v14091_v16, %v10239_v4 }
 0x544   : > { %v14879_v30 = vld [vmem:[%s15337_s11 + $0x206c] sm:$0xf0]  ;;  %v10495_v10 = vld [vmem:[%s15337_s11 + $0x9f0] sm:$0xf0] }
 0x545   : > { %v13629_v3 = vld [vmem:[%s15337_s11 + $0x2250] sm:$0xf]  ;;  %v13374_v52 = vor.u32 %v14879_v30, %v13373_v26  ;;  %8370 = vmatpush.bf16.msra.mxu1 %v13662_v39  ;;  %8396 = vmatpush.bf16.msra.mxu3 %v9570_v33  ;;  %v10498_v5 = vor.u32 %v14155_v6, %v10495_v10  ;;  %v14019_v23 = vld [vmem:[%s15337_s11 + $0x594] sm:$0xf]  ;;  %v8153_v6 = vpop.f32.mrf.mxu0 }
 0x546   : > { %v14943_v35 = vld [vmem:[%s15337_s11 + $0x226c] sm:$0xf0]  ;;  %v9951_v2 = vld [vmem:[%s15337_s11 + $0x5b0] sm:$0xf0] }
 0x547   : > { %v13341_v58 = vld [vmem:[%s15337_s11 + $0x2010] sm:$0xf]  ;;  %v13630_v62 = vor.u32 %v14943_v35, %v13629_v3  ;;  %8358 = vmatpush.bf16.msra.mxu0 %v13374_v52  ;;  %8384 = vmatpush.bf16.msra.mxu2 %v9282_v54  ;;  %v14083_v45 = vld [vmem:[%s15337_s11 + $0x794] sm:$0xf]  ;;  %v9954_v3 = vor.u32 %v14019_v23, %v9951_v2 }
 0x548   : > { %v14871_v56 = vld [vmem:[%s15337_s11 + $0x202c] sm:$0xf0]  ;;  %v10207_v43 = vld [vmem:[%s15337_s11 + $0x7b0] sm:$0xf0] }
 0x549   : > { %v13597_v55 = vld [vmem:[%s15337_s11 + $0x2210] sm:$0xf]  ;;  %v13342_v9 = vor.u32 %v14871_v56, %v13341_v58  ;;  %8371 = vmatpush.bf16.msra.mxu1 %v13630_v62  ;;  %8397 = vmatpush.bf16.msra.mxu3 %v9538_v7  ;;  %v14147_v39 = vld [vmem:[%s15337_s11 + $0x994] sm:$0xf]  ;;  %v10210_v33 = vor.u32 %v14083_v45, %v10207_v43 }
 0x54a   : > { %v14935_v50 = vld [vmem:[%s15337_s11 + $0x222c] sm:$0xf0]  ;;  %v10463_v13 = vld [vmem:[%s15337_s11 + $0x9b0] sm:$0xf0] }
 0x54b   : > { %v13598_v17 = vor.u32 %v14935_v50, %v13597_v55  ;;  %8359 = vmatpush.bf16.msra.mxu0 %v13342_v9  ;;  %8385 = vmatpush.bf16.msra.mxu2 %v9250_v18  ;;  %v14211_v26 = vld [vmem:[%s15337_s11 + $0xb94] sm:$0xf]  ;;  %v10466_v35 = vor.u32 %v14147_v39, %v10463_v13 }
 0x54c   : > { %v10719_v30 = vld [vmem:[%s15337_s11 + $0xbb0] sm:$0xf0] }
 0x54d   : > { %8372 = vmatpush.bf16.msra.mxu1 %v13598_v17  ;;  %8398 = vmatpush.bf16.msra.mxu3 %v9506_v41  ;;  %v14011_v36 = vld [vmem:[%s15337_s11 + $0x554] sm:$0xf]  ;;  %v10722_v44 = vor.u32 %v14211_v26, %v10719_v30  ;;  %v8154_v41 = vadd.f32 %v8153_v6, %v1394_v61 }
 0x54e   : > { %v9919_v51 = vld [vmem:[%s15337_s11 + $0x570] sm:$0xf0]  ;;  %8360 = vmatmul.bf16.vlgmr.msra.gmra.mxu0 %v15059_v42  ;;  %8386 = vmatmul.bf16.vlgmr.msra.gmra.mxu2 %v15461_v28 }
 0x54f   : > { %8404 = vmatpush.bf16.msrb.mxu0 %v9986_v21  ;;  %8430 = vmatpush.bf16.msrb.mxu2 %v10498_v5  ;;  %v14075_v40 = vld [vmem:[%s15337_s11 + $0x754] sm:$0xf]  ;;  %v9922_v55 = vor.u32 %v14011_v36, %v9919_v51  ;;  %v8166_v21 = vpop.f32.mrf.mxu1 }
 0x550   : > { %v10175_v52 = vld [vmem:[%s15337_s11 + $0x770] sm:$0xf0]  ;;  %8373 = vmatmul.bf16.vlgmr.msra.gmra.mxu1 %v15060_v53  ;;  %8399 = vmatmul.bf16.vlgmr.msra.gmra.mxu3 %v15467_v34  ;;  %v8167_v43 = vadd.f32 %v8166_v21, %v8154_v41 }
 0x551   : > { %8417 = vmatpush.bf16.msrb.mxu1 %v10242_v22  ;;  %8443 = vmatpush.bf16.msrb.mxu3 %v10754_v24  ;;  %v14139_v58 = vld [vmem:[%s15337_s11 + $0x954] sm:$0xf]  ;;  %v10178_v60 = vor.u32 %v14075_v40, %v10175_v52  ;;  %v8192_v52 = vpop.f32.mrf.mxu3 }
 0x552   : > { %v10431_v56 = vld [vmem:[%s15337_s11 + $0x970] sm:$0xf0] }
 0x553   : > { %v14203_v62 = vld [vmem:[%s15337_s11 + $0xb54] sm:$0xf]  ;;  %8405 = vmatpush.bf16.msrb.mxu0 %v9954_v3  ;;  %8431 = vmatpush.bf16.msrb.mxu2 %v10466_v35  ;;  %v10434_v37 = vor.u32 %v14139_v58, %v10431_v56  ;;  %v8179_v35 = vpop.f32.mrf.mxu2 }
 0x554   : > { %v10687_v54 = vld [vmem:[%s15337_s11 + $0xb70] sm:$0xf0] }
 0x555   : > { %v14003_v50 = vld [vmem:[%s15337_s11 + $0x514] sm:$0xf]  ;;  %8418 = vmatpush.bf16.msrb.mxu1 %v10210_v33  ;;  %8444 = vmatpush.bf16.msrb.mxu3 %v10722_v44  ;;  %v10690_v63 = vor.u32 %v14203_v62, %v10687_v54  ;;  %v8180_v44 = vadd.f32 %v8179_v35, %v8167_v43  ;;  %v8155_v54 = vpop.f32.mrf.mxu0 }
 0x556   : > { %v9887_v7 = vld [vmem:[%s15337_s11 + $0x530] sm:$0xf0] }
 0x557   : > { %v14067_v57 = vld [vmem:[%s15337_s11 + $0x714] sm:$0xf]  ;;  %8406 = vmatpush.bf16.msrb.mxu0 %v9922_v55  ;;  %v9890_v4 = vor.u32 %v14003_v50, %v9887_v7  ;;  %8432 = vmatpush.bf16.msrb.mxu2 %v10434_v37  ;;  %v17080_v62 = vadd.f32 %v8192_v52, %v8180_v44 }
 0x558   : > { %v10143_v0 = vld [vmem:[%s15337_s11 + $0x730] sm:$0xf0] }
 0x559   : > { %v14131_v14 = vld [vmem:[%s15337_s11 + $0x914] sm:$0xf]  ;;  %8419 = vmatpush.bf16.msrb.mxu1 %v10178_v60  ;;  %v10146_v10 = vor.u32 %v14067_v57, %v10143_v0  ;;  %8445 = vmatpush.bf16.msrb.mxu3 %v10690_v63  ;;  %v8168_v57 = vpop.f32.mrf.mxu1 }
 0x55a   : > { %v10399_v16 = vld [vmem:[%s15337_s11 + $0x930] sm:$0xf0] }
 0x55b   : > { %v14195_v1 = vld [vmem:[%s15337_s11 + $0xb14] sm:$0xf]  ;;  %v10402_v17 = vor.u32 %v14131_v14, %v10399_v16  ;;  %8407 = vmatpush.bf16.msrb.mxu0 %v9890_v4 }
 0x55c   : > { %v10655_v9 = vld [vmem:[%s15337_s11 + $0xb30] sm:$0xf0] }
 0x55d   : > { %v13995_v18 = vld [vmem:[%s15337_s11 + $0x4d4] sm:$0xf]  ;;  %v10658_v22 = vor.u32 %v14195_v1, %v10655_v9  ;;  %8420 = vmatpush.bf16.msrb.mxu1 %v10146_v10  ;;  %8433 = vmatpush.bf16.msrb.mxu2 %v10402_v17 }
 0x55e   : > { %v9855_v19 = vld [vmem:[%s15337_s11 + $0x4f0] sm:$0xf0] }
 0x55f   : > { %v14059_v20 = vld [vmem:[%s15337_s11 + $0x6d4] sm:$0xf]  ;;  %v9858_v39 = vor.u32 %v13995_v18, %v9855_v19  ;;  %8446 = vmatpush.bf16.msrb.mxu3 %v10658_v22 }
 0x560   : > { %v10111_v5 = vld [vmem:[%s15337_s11 + $0x6f0] sm:$0xf0] }
 0x561   : > { %v14123_v23 = vld [vmem:[%s15337_s11 + $0x8d4] sm:$0xf]  ;;  %v10114_v13 = vor.u32 %v14059_v20, %v10111_v5  ;;  %8408 = vmatpush.bf16.msrb.mxu0 %v9858_v39  ;;  %v8181_v20 = vpop.f32.mrf.mxu2 }
 0x562   : > { %v10367_v2 = vld [vmem:[%s15337_s11 + $0x8f0] sm:$0xf0] }
 0x563   : > { %v14187_v45 = vld [vmem:[%s15337_s11 + $0xad4] sm:$0xf]  ;;  %v10370_v26 = vor.u32 %v14123_v23, %v10367_v2  ;;  %8421 = vmatpush.bf16.msrb.mxu1 %v10114_v13  ;;  %v8194_v23 = vpop.f32.mrf.mxu3 }
 0x564   : > { %v10623_v24 = vld [vmem:[%s15337_s11 + $0xaf0] sm:$0xf0] }
 0x565   : > { %v13987_v30 = vld [vmem:[%s15337_s11 + $0x494] sm:$0xf]  ;;  %v10626_v36 = vor.u32 %v14187_v45, %v10623_v24  ;;  %8434 = vmatpush.bf16.msrb.mxu2 %v10370_v26 }
 0x566   : > { %v9823_v3 = vld [vmem:[%s15337_s11 + $0x4b0] sm:$0xf0] }
 0x567   : > { %v14051_v33 = vld [vmem:[%s15337_s11 + $0x694] sm:$0xf]  ;;  %v9826_v53 = vor.u32 %v13987_v30, %v9823_v3  ;;  %8447 = vmatpush.bf16.msrb.mxu3 %v10626_v36 }
 0x568   : > { %v10079_v51 = vld [vmem:[%s15337_s11 + $0x6b0] sm:$0xf0] }
 0x569   : > { %v14115_v40 = vld [vmem:[%s15337_s11 + $0x894] sm:$0xf]  ;;  %v10082_v55 = vor.u32 %v14051_v33, %v10079_v51  ;;  %8409 = vmatpush.bf16.msrb.mxu0 %v9826_v53 }
 0x56a   : > { %v10335_v42 = vld [vmem:[%s15337_s11 + $0x8b0] sm:$0xf0] }
 0x56b   : > { %v14179_v58 = vld [vmem:[%s15337_s11 + $0xa94] sm:$0xf]  ;;  %v10338_v50 = vor.u32 %v14115_v40, %v10335_v42  ;;  %8422 = vmatpush.bf16.msrb.mxu1 %v10082_v55 }
 0x56c   : > { %v10591_v56 = vld [vmem:[%s15337_s11 + $0xab0] sm:$0xf0] }
 0x56d   : > { %v13979_v60 = vld [vmem:[%s15337_s11 + $0x454] sm:$0xf]  ;;  %v10594_v59 = vor.u32 %v14179_v58, %v10591_v56  ;;  %8435 = vmatpush.bf16.msrb.mxu2 %v10338_v50 }
 0x56e   : > { %v9791_v37 = vld [vmem:[%s15337_s11 + $0x470] sm:$0xf0] }
 0x56f   : > { %v14043_v7 = vld [vmem:[%s15337_s11 + $0x654] sm:$0xf]  ;;  %v9794_v1 = vor.u32 %v13979_v60, %v9791_v37  ;;  %8448 = vmatpush.bf16.msrb.mxu3 %v10594_v59 }
 0x570   : > { %v10047_v61 = vld [vmem:[%s15337_s11 + $0x670] sm:$0xf0] }
 0x571   : > { %v14107_v63 = vld [vmem:[%s15337_s11 + $0x854] sm:$0xf]  ;;  %v10050_v6 = vor.u32 %v14043_v7, %v10047_v61  ;;  %8410 = vmatpush.bf16.msrb.mxu0 %v9794_v1 }
 0x572   : > { %v10303_v0 = vld [vmem:[%s15337_s11 + $0x870] sm:$0xf0] }
 0x573   : > { %v14171_v14 = vld [vmem:[%s15337_s11 + $0xa54] sm:$0xf]  ;;  %v10306_v10 = vor.u32 %v14107_v63, %v10303_v0  ;;  %8423 = vmatpush.bf16.msrb.mxu1 %v10050_v6 }
 0x574   : > { %v10559_v16 = vld [vmem:[%s15337_s11 + $0xa70] sm:$0xf0] }
 0x575   : > { %v13971_v9 = vld [vmem:[%s15337_s11 + $0x414] sm:$0xf]  ;;  %v10562_v41 = vor.u32 %v14171_v14, %v10559_v16  ;;  %8436 = vmatpush.bf16.msrb.mxu2 %v10306_v10 }
 0x576   : > { %v9759_v4 = vld [vmem:[%s15337_s11 + $0x430] sm:$0xf0] }
 0x577   : > { %v14035_v17 = vld [vmem:[%s15337_s11 + $0x614] sm:$0xf]  ;;  %v9762_v43 = vor.u32 %v13971_v9, %v9759_v4  ;;  %8449 = vmatpush.bf16.msrb.mxu3 %v10562_v41 }
 0x578   : > { %v10015_v18 = vld [vmem:[%s15337_s11 + $0x630] sm:$0xf0] }
 0x579   : > { %v14099_v19 = vld [vmem:[%s15337_s11 + $0x814] sm:$0xf]  ;;  %v10018_v30 = vor.u32 %v14035_v17, %v10015_v18  ;;  %8411 = vmatpush.bf16.msrb.mxu0 %v9762_v43 }
 0x57a   : > { %v10271_v21 = vld [vmem:[%s15337_s11 + $0x830] sm:$0xf0] }
 0x57b   : > { %v14163_v22 = vld [vmem:[%s15337_s11 + $0xa14] sm:$0xf]  ;;  %v10274_v3 = vor.u32 %v14099_v19, %v10271_v21  ;;  %8424 = vmatpush.bf16.msrb.mxu1 %v10018_v30 }
 0x57c   : > { %v10527_v5 = vld [vmem:[%s15337_s11 + $0xa30] sm:$0xf0]  ;;  %8412 = vmatmul.bf16.vlgmr.msrb.gmra.mxu0 %v15459_v27 }
 0x57d   : > { %v14283_v2 = vld [vmem:[%s15337_s11 + $0xdd4] sm:$0xf]  ;;  %v10530_v36 = vor.u32 %v14163_v22, %v10527_v5  ;;  %8437 = vmatpush.bf16.msrb.mxu2 %v10274_v3 }
 0x57e   : > { %v11007_v45 = vld [vmem:[%s15337_s11 + $0xdf0] sm:$0xf0]  ;;  %8425 = vmatmul.bf16.vlgmr.msrb.gmra.mxu1 %v15463_v29 }
 0x57f   : > { %v14347_v24 = vld [vmem:[%s15337_s11 + $0xfd4] sm:$0xf]  ;;  %v11010_v51 = vor.u32 %v14283_v2, %v11007_v45  ;;  %8450 = vmatpush.bf16.msrb.mxu3 %v10530_v36 }
 0x580   : > { %v11263_v39 = vld [vmem:[%s15337_s11 + $0xff0] sm:$0xf0]  ;;  %8438 = vmatmul.bf16.vlgmr.msrb.gmra.mxu2 %v15513_v31 }
 0x581   : > { %v14411_v13 = vld [vmem:[%s15337_s11 + $0x11d4] sm:$0xf]  ;;  %v11266_v40 = vor.u32 %v14347_v24, %v11263_v39  ;;  %8456 = vmatpush.bf16.msra.mxu0 %v11010_v51  ;;  %v8205_v24 = vpop.f32.mrf.mxu0 }
 0x582   : > { %v11519_v26 = vld [vmem:[%s15337_s11 + $0x11f0] sm:$0xf0]  ;;  %8451 = vmatmul.bf16.vlgmr.msrb.gmra.mxu3 %v15519_v38  ;;  %v8206_v3 = vadd.f32 %v8205_v24, %v17080_v62 }
 0x583   : > { %v14475_v33 = vld [vmem:[%s15337_s11 + $0x13d4] sm:$0xf]  ;;  %v11522_v42 = vor.u32 %v14411_v13, %v11519_v26  ;;  %8469 = vmatpush.bf16.msra.mxu1 %v11266_v40 }
 0x584   : > { %v11775_v35 = vld [vmem:[%s15337_s11 + $0x13f0] sm:$0xf0] }
 0x585   : > { %v14275_v44 = vld [vmem:[%s15337_s11 + $0xd94] sm:$0xf]  ;;  %v11778_v56 = vor.u32 %v14475_v33, %v11775_v35  ;;  %8482 = vmatpush.bf16.msra.mxu2 %v11522_v42  ;;  %v8218_v33 = vpop.f32.mrf.mxu1 }
 0x586   : > { %v10975_v52 = vld [vmem:[%s15337_s11 + $0xdb0] sm:$0xf0] }
 0x587   : > { %v14339_v58 = vld [vmem:[%s15337_s11 + $0xf94] sm:$0xf]  ;;  %v10978_v37 = vor.u32 %v14275_v44, %v10975_v52  ;;  %8495 = vmatpush.bf16.msra.mxu3 %v11778_v56  ;;  %v8219_v52 = vadd.f32 %v8218_v33, %v8206_v3 }
 0x588   : > { %v11231_v53 = vld [vmem:[%s15337_s11 + $0xfb0] sm:$0xf0] }
 0x589   : > { %v14403_v54 = vld [vmem:[%s15337_s11 + $0x1194] sm:$0xf]  ;;  %v11234_v7 = vor.u32 %v14339_v58, %v11231_v53  ;;  %8457 = vmatpush.bf16.msra.mxu0 %v10978_v37 }
 0x58a   : > { %v11487_v55 = vld [vmem:[%s15337_s11 + $0x11b0] sm:$0xf0] }
 0x58b   : > { %v14467_v50 = vld [vmem:[%s15337_s11 + $0x1394] sm:$0xf]  ;;  %v11490_v57 = vor.u32 %v14403_v54, %v11487_v55  ;;  %8470 = vmatpush.bf16.msra.mxu1 %v11234_v7 }
 0x58c   : > { %v11743_v60 = vld [vmem:[%s15337_s11 + $0x13b0] sm:$0xf0] }
 0x58d   : > { %v14267_v59 = vld [vmem:[%s15337_s11 + $0xd54] sm:$0xf]  ;;  %v11746_v0 = vor.u32 %v14467_v50, %v11743_v60  ;;  %8483 = vmatpush.bf16.msra.mxu2 %v11490_v57  ;;  %v8231_v50 = vpop.f32.mrf.mxu2 }
 0x58e   : > { %v10943_v61 = vld [vmem:[%s15337_s11 + $0xd70] sm:$0xf0] }
 0x58f   : > { %v14331_v63 = vld [vmem:[%s15337_s11 + $0xf54] sm:$0xf]  ;;  %v10946_v6 = vor.u32 %v14267_v59, %v10943_v61  ;;  %8496 = vmatpush.bf16.msra.mxu3 %v11746_v0  ;;  %v8232_v59 = vadd.f32 %v8231_v50, %v8219_v52  ;;  %v8244_v61 = vpop.f32.mrf.mxu3 }
 0x590   : > { %v11199_v14 = vld [vmem:[%s15337_s11 + $0xf70] sm:$0xf0] }
 0x591   : > { %v14395_v16 = vld [vmem:[%s15337_s11 + $0x1154] sm:$0xf]  ;;  %v11202_v10 = vor.u32 %v14331_v63, %v11199_v14  ;;  %8458 = vmatpush.bf16.msra.mxu0 %v10946_v6 }
 0x592   : > { %v11455_v1 = vld [vmem:[%s15337_s11 + $0x1170] sm:$0xf0] }
 0x593   : > { %v14459_v9 = vld [vmem:[%s15337_s11 + $0x1354] sm:$0xf]  ;;  %v11458_v17 = vor.u32 %v14395_v16, %v11455_v1  ;;  %8471 = vmatpush.bf16.msra.mxu1 %v11202_v10  ;;  %v17151_v16 = vadd.f32 %v8244_v61, %v8232_v59  ;;  %v8207_v1 = vpop.f32.mrf.mxu0 }
 0x594   : > { %v11711_v4 = vld [vmem:[%s15337_s11 + $0x1370] sm:$0xf0] }
 0x595   : > { %v14259_v18 = vld [vmem:[%s15337_s11 + $0xd14] sm:$0xf]  ;;  %v11714_v41 = vor.u32 %v14459_v9, %v11711_v4  ;;  %8484 = vmatpush.bf16.msra.mxu2 %v11458_v17 }
 0x596   : > { %v10911_v19 = vld [vmem:[%s15337_s11 + $0xd30] sm:$0xf0] }
 0x597   : > { %v14323_v20 = vld [vmem:[%s15337_s11 + $0xf14] sm:$0xf]  ;;  %v10914_v45 = vor.u32 %v14259_v18, %v10911_v19  ;;  %8497 = vmatpush.bf16.msra.mxu3 %v11714_v41  ;;  %v8220_v18 = vpop.f32.mrf.mxu1 }
 0x598   : > { %v11167_v21 = vld [vmem:[%s15337_s11 + $0xf30] sm:$0xf0] }
 0x599   : > { %v14387_v22 = vld [vmem:[%s15337_s11 + $0x1114] sm:$0xf]  ;;  %v11170_v43 = vor.u32 %v14323_v20, %v11167_v21  ;;  %8459 = vmatpush.bf16.msra.mxu0 %v10914_v45 }
 0x59a   : > { %v11423_v5 = vld [vmem:[%s15337_s11 + $0x1130] sm:$0xf0] }
 0x59b   : > { %v14451_v23 = vld [vmem:[%s15337_s11 + $0x1314] sm:$0xf]  ;;  %v11426_v39 = vor.u32 %v14387_v22, %v11423_v5  ;;  %8472 = vmatpush.bf16.msra.mxu1 %v11170_v43 }
 0x59c   : > { %v11679_v2 = vld [vmem:[%s15337_s11 + $0x1330] sm:$0xf0] }
 0x59d   : > { %v14251_v13 = vld [vmem:[%s15337_s11 + $0xcd4] sm:$0xf]  ;;  %v11682_v35 = vor.u32 %v14451_v23, %v11679_v2  ;;  %8485 = vmatpush.bf16.msra.mxu2 %v11426_v39 }
 0x59e   : > { %v10879_v26 = vld [vmem:[%s15337_s11 + $0xcf0] sm:$0xf0] }
 0x59f   : > { %v14315_v30 = vld [vmem:[%s15337_s11 + $0xed4] sm:$0xf]  ;;  %v10882_v58 = vor.u32 %v14251_v13, %v10879_v26  ;;  %8498 = vmatpush.bf16.msra.mxu3 %v11682_v35 }
 0x5a0   : > { %v11135_v36 = vld [vmem:[%s15337_s11 + $0xef0] sm:$0xf0] }
 0x5a1   : > { %v14379_v51 = vld [vmem:[%s15337_s11 + $0x10d4] sm:$0xf]  ;;  %v11138_v62 = vor.u32 %v14315_v30, %v11135_v36  ;;  %8460 = vmatpush.bf16.msra.mxu0 %v10882_v58  ;;  %v8233_v30 = vpop.f32.mrf.mxu2 }
 0x5a2   : > { %v11391_v40 = vld [vmem:[%s15337_s11 + $0x10f0] sm:$0xf0] }
 0x5a3   : > { %v14443_v42 = vld [vmem:[%s15337_s11 + $0x12d4] sm:$0xf]  ;;  %v11394_v56 = vor.u32 %v14379_v51, %v11391_v40  ;;  %8473 = vmatpush.bf16.msra.mxu1 %v11138_v62  ;;  %v8246_v51 = vpop.f32.mrf.mxu3 }
 0x5a4   : > { %v11647_v44 = vld [vmem:[%s15337_s11 + $0x12f0] sm:$0xf0]  ;;  %v8257_v51 = vpop.f32.mrf.mxu0 }
 0x5a5   : > { %v14243_v53 = vld [vmem:[%s15337_s11 + $0xc94] sm:$0xf]  ;;  %v11650_v60 = vor.u32 %v14443_v42, %v11647_v44  ;;  %8486 = vmatpush.bf16.msra.mxu2 %v11394_v56 }
 0x5a6   : > { %v10847_v54 = vld [vmem:[%s15337_s11 + $0xcb0] sm:$0xf0] }
 0x5a7   : > { %v14307_v55 = vld [vmem:[%s15337_s11 + $0xe94] sm:$0xf]  ;;  %v10850_v14 = vor.u32 %v14243_v53, %v10847_v54  ;;  %8499 = vmatpush.bf16.msra.mxu3 %v11650_v60 }
 0x5a8   : > { %v11103_v37 = vld [vmem:[%s15337_s11 + $0xeb0] sm:$0xf0] }
 0x5a9   : > { %v14371_v7 = vld [vmem:[%s15337_s11 + $0x1094] sm:$0xf]  ;;  %v11106_v9 = vor.u32 %v14307_v55, %v11103_v37  ;;  %8461 = vmatpush.bf16.msra.mxu0 %v10850_v14 }
 0x5aa   : > { %v11359_v57 = vld [vmem:[%s15337_s11 + $0x10b0] sm:$0xf0] }
 0x5ab   : > { %v14435_v63 = vld [vmem:[%s15337_s11 + $0x1294] sm:$0xf]  ;;  %v11362_v4 = vor.u32 %v14371_v7, %v11359_v57  ;;  %8474 = vmatpush.bf16.msra.mxu1 %v11106_v9 }
 0x5ac   : > { %v11615_v0 = vld [vmem:[%s15337_s11 + $0x12b0] sm:$0xf0] }
 0x5ad   : > { %v14235_v6 = vld [vmem:[%s15337_s11 + $0xc54] sm:$0xf]  ;;  %v11618_v19 = vor.u32 %v14435_v63, %v11615_v0  ;;  %8487 = vmatpush.bf16.msra.mxu2 %v11362_v4 }
 0x5ae   : > { %v10815_v10 = vld [vmem:[%s15337_s11 + $0xc70] sm:$0xf0] }
 0x5af   : > { %v14299_v17 = vld [vmem:[%s15337_s11 + $0xe54] sm:$0xf]  ;;  %v10818_v23 = vor.u32 %v14235_v6, %v10815_v10  ;;  %8500 = vmatpush.bf16.msra.mxu3 %v11618_v19 }
 0x5b0   : > { %v11071_v20 = vld [vmem:[%s15337_s11 + $0xe70] sm:$0xf0] }
 0x5b1   : > { %v14363_v41 = vld [vmem:[%s15337_s11 + $0x1054] sm:$0xf]  ;;  %v11074_v24 = vor.u32 %v14299_v17, %v11071_v20  ;;  %8462 = vmatpush.bf16.msra.mxu0 %v10818_v23 }
 0x5b2   : > { %v11327_v21 = vld [vmem:[%s15337_s11 + $0x1070] sm:$0xf0] }
 0x5b3   : > { %v14427_v22 = vld [vmem:[%s15337_s11 + $0x1254] sm:$0xf]  ;;  %v11330_v43 = vor.u32 %v14363_v41, %v11327_v21  ;;  %8475 = vmatpush.bf16.msra.mxu1 %v11074_v24 }
 0x5b4   : > { %v11583_v5 = vld [vmem:[%s15337_s11 + $0x1270] sm:$0xf0] }
 0x5b5   : > { %v14227_v2 = vld [vmem:[%s15337_s11 + $0xc14] sm:$0xf]  ;;  %v11586_v3 = vor.u32 %v14427_v22, %v11583_v5  ;;  %8488 = vmatpush.bf16.msra.mxu2 %v11330_v43 }
 0x5b6   : > { %v10783_v45 = vld [vmem:[%s15337_s11 + $0xc30] sm:$0xf0] }
 0x5b7   : > { %v14291_v39 = vld [vmem:[%s15337_s11 + $0xe14] sm:$0xf]  ;;  %v10786_v52 = vor.u32 %v14227_v2, %v10783_v45  ;;  %8501 = vmatpush.bf16.msra.mxu3 %v11586_v3 }
 0x5b8   : > { %v11039_v13 = vld [vmem:[%s15337_s11 + $0xe30] sm:$0xf0] }
 0x5b9   : > { %v14355_v26 = vld [vmem:[%s15337_s11 + $0x1014] sm:$0xf]  ;;  %v11042_v53 = vor.u32 %v14291_v39, %v11039_v13  ;;  %8463 = vmatpush.bf16.msra.mxu0 %v10786_v52 }
 0x5ba   : > { %v11295_v33 = vld [vmem:[%s15337_s11 + $0x1030] sm:$0xf0] }
 0x5bb   : > { %v14419_v35 = vld [vmem:[%s15337_s11 + $0x1214] sm:$0xf]  ;;  %v11298_v54 = vor.u32 %v14355_v26, %v11295_v33  ;;  %8476 = vmatpush.bf16.msra.mxu1 %v11042_v53 }
 0x5bc   : > { %v11551_v36 = vld [vmem:[%s15337_s11 + $0x1230] sm:$0xf0]  ;;  %8464 = vmatmul.bf16.vlgmr.msra.gmra.mxu0 %v15510_v25 }
 0x5bd   : > { %v14539_v40 = vld [vmem:[%s15337_s11 + $0x15d4] sm:$0xf]  ;;  %v11554_v60 = vor.u32 %v14419_v35, %v11551_v36  ;;  %8489 = vmatpush.bf16.msra.mxu2 %v11298_v54 }
 0x5be   : > { %v12031_v42 = vld [vmem:[%s15337_s11 + $0x15f0] sm:$0xf0]  ;;  %8477 = vmatmul.bf16.vlgmr.msra.gmra.mxu1 %v15515_v32 }
 0x5bf   : > { %v14603_v44 = vld [vmem:[%s15337_s11 + $0x17d4] sm:$0xf]  ;;  %v12034_v37 = vor.u32 %v14539_v40, %v12031_v42  ;;  %8502 = vmatpush.bf16.msra.mxu3 %v11554_v60 }
 0x5c0   : > { %v12287_v58 = vld [vmem:[%s15337_s11 + $0x17f0] sm:$0xf0]  ;;  %8490 = vmatmul.bf16.vlgmr.msra.gmra.mxu2 %v15587_v8 }
 0x5c1   : > { %v14667_v62 = vld [vmem:[%s15337_s11 + $0x19d4] sm:$0xf]  ;;  %v12290_v7 = vor.u32 %v14603_v44, %v12287_v58  ;;  %8508 = vmatpush.bf16.msrb.mxu0 %v12034_v37  ;;  %v8258_v44 = vadd.f32 %v8257_v51, %v17151_v16  ;;  %v8270_v58 = vpop.f32.mrf.mxu1 }
 0x5c2   : > { %v12543_v56 = vld [vmem:[%s15337_s11 + $0x19f0] sm:$0xf0]  ;;  %8503 = vmatmul.bf16.vlgmr.msra.gmra.mxu3 %v15593_v12 }
 0x5c3   : > { %v14731_v55 = vld [vmem:[%s15337_s11 + $0x1bd4] sm:$0xf]  ;;  %v12546_v57 = vor.u32 %v14667_v62, %v12543_v56  ;;  %8521 = vmatpush.bf16.msrb.mxu1 %v12290_v7  ;;  %v8271_v60 = vadd.f32 %v8270_v58, %v8258_v44 }
 0x5c4   : > { %v12799_v50 = vld [vmem:[%s15337_s11 + $0x1bf0] sm:$0xf0] }
 0x5c5   : > { %v14531_v59 = vld [vmem:[%s15337_s11 + $0x1594] sm:$0xf]  ;;  %v12802_v0 = vor.u32 %v14731_v55, %v12799_v50  ;;  %8534 = vmatpush.bf16.msrb.mxu2 %v12546_v57 }
 0x5c6   : > { %v11999_v61 = vld [vmem:[%s15337_s11 + $0x15b0] sm:$0xf0] }
 0x5c7   : > { %v14595_v63 = vld [vmem:[%s15337_s11 + $0x1794] sm:$0xf]  ;;  %v12002_v10 = vor.u32 %v14531_v59, %v11999_v61  ;;  %8547 = vmatpush.bf16.msrb.mxu3 %v12802_v0 }
 0x5c8   : > { %v12255_v14 = vld [vmem:[%s15337_s11 + $0x17b0] sm:$0xf0] }
 0x5c9   : > { %v14659_v1 = vld [vmem:[%s15337_s11 + $0x1994] sm:$0xf]  ;;  %v12258_v17 = vor.u32 %v14595_v63, %v12255_v14  ;;  %8509 = vmatpush.bf16.msrb.mxu0 %v12002_v10 }
 0x5ca   : > { %v12511_v9 = vld [vmem:[%s15337_s11 + $0x19b0] sm:$0xf0] }
 0x5cb   : > { %v14723_v4 = vld [vmem:[%s15337_s11 + $0x1b94] sm:$0xf]  ;;  %v12514_v18 = vor.u32 %v14659_v1, %v12511_v9  ;;  %8522 = vmatpush.bf16.msrb.mxu1 %v12258_v17 }
 0x5cc   : > { %v12767_v6 = vld [vmem:[%s15337_s11 + $0x1bb0] sm:$0xf0] }
 0x5cd   : > { %v14523_v19 = vld [vmem:[%s15337_s11 + $0x1554] sm:$0xf]  ;;  %v12770_v21 = vor.u32 %v14723_v4, %v12767_v6  ;;  %8535 = vmatpush.bf16.msrb.mxu2 %v12514_v18  ;;  %v8283_v6 = vpop.f32.mrf.mxu2 }
 0x5ce   : > { %v11967_v20 = vld [vmem:[%s15337_s11 + $0x1570] sm:$0xf0] }
 0x5cf   : > { %v14587_v41 = vld [vmem:[%s15337_s11 + $0x1754] sm:$0xf]  ;;  %v11970_v24 = vor.u32 %v14523_v19, %v11967_v20  ;;  %8548 = vmatpush.bf16.msrb.mxu3 %v12770_v21  ;;  %v8284_v19 = vadd.f32 %v8283_v6, %v8271_v60  ;;  %v8296_v20 = vpop.f32.mrf.mxu3 }
 0x5d0   : > { %v12223_v22 = vld [vmem:[%s15337_s11 + $0x1770] sm:$0xf0] }
 0x5d1   : > { %v14651_v5 = vld [vmem:[%s15337_s11 + $0x1954] sm:$0xf]  ;;  %v12226_v43 = vor.u32 %v14587_v41, %v12223_v22  ;;  %8510 = vmatpush.bf16.msrb.mxu0 %v11970_v24  ;;  %v8259_v22 = vpop.f32.mrf.mxu0 }
 0x5d2   : > { %v12479_v23 = vld [vmem:[%s15337_s11 + $0x1970] sm:$0xf0] }
 0x5d3   : > { %v14715_v2 = vld [vmem:[%s15337_s11 + $0x1b54] sm:$0xf]  ;;  %v12482_v39 = vor.u32 %v14651_v5, %v12479_v23  ;;  %8523 = vmatpush.bf16.msrb.mxu1 %v12226_v43  ;;  %v8272_v23 = vpop.f32.mrf.mxu1 }
 0x5d4   : > { %v12735_v45 = vld [vmem:[%s15337_s11 + $0x1b70] sm:$0xf0] }
 0x5d5   : > { %v14515_v13 = vld [vmem:[%s15337_s11 + $0x1514] sm:$0xf]  ;;  %v12738_v3 = vor.u32 %v14715_v2, %v12735_v45  ;;  %8536 = vmatpush.bf16.msrb.mxu2 %v12482_v39  ;;  %v17222_v2 = vadd.f32 %v8296_v20, %v8284_v19  ;;  %v8285_v60 = vpop.f32.mrf.mxu2 }
 0x5d6   : > { %v11935_v26 = vld [vmem:[%s15337_s11 + $0x1530] sm:$0xf0] }
 0x5d7   : > { %v14579_v30 = vld [vmem:[%s15337_s11 + $0x1714] sm:$0xf]  ;;  %v11938_v52 = vor.u32 %v14515_v13, %v11935_v26  ;;  %8549 = vmatpush.bf16.msrb.mxu3 %v12738_v3 }
 0x5d8   : > { %v12191_v33 = vld [vmem:[%s15337_s11 + $0x1730] sm:$0xf0] }
 0x5d9   : > { %v14643_v35 = vld [vmem:[%s15337_s11 + $0x1914] sm:$0xf]  ;;  %v12194_v62 = vor.u32 %v14579_v30, %v12191_v33  ;;  %8511 = vmatpush.bf16.msrb.mxu0 %v11938_v52 }
 0x5da   : > { %v12447_v36 = vld [vmem:[%s15337_s11 + $0x1930] sm:$0xf0] }
 0x5db   : > { %v14707_v40 = vld [vmem:[%s15337_s11 + $0x1b14] sm:$0xf]  ;;  %v12450_v56 = vor.u32 %v14643_v35, %v12447_v36  ;;  %8524 = vmatpush.bf16.msrb.mxu1 %v12194_v62 }
 0x5dc   : > { %v12703_v42 = vld [vmem:[%s15337_s11 + $0x1b30] sm:$0xf0] }
 0x5dd   : > { %v14507_v53 = vld [vmem:[%s15337_s11 + $0x14d4] sm:$0xf]  ;;  %v12706_v50 = vor.u32 %v14707_v40, %v12703_v42  ;;  %8537 = vmatpush.bf16.msrb.mxu2 %v12450_v56 }
 0x5de   : > { %v11903_v54 = vld [vmem:[%s15337_s11 + $0x14f0] sm:$0xf0] }
 0x5df   : > { %v14571_v55 = vld [vmem:[%s15337_s11 + $0x16d4] sm:$0xf]  ;;  %v11906_v61 = vor.u32 %v14507_v53, %v11903_v54  ;;  %8550 = vmatpush.bf16.msrb.mxu3 %v12706_v50 }
 0x5e0   : > { %v12159_v37 = vld [vmem:[%s15337_s11 + $0x16f0] sm:$0xf0] }
 0x5e1   : > { %v14635_v7 = vld [vmem:[%s15337_s11 + $0x18d4] sm:$0xf]  ;;  %v12162_v63 = vor.u32 %v14571_v55, %v12159_v37  ;;  %8512 = vmatpush.bf16.msrb.mxu0 %v11906_v61 }
 0x5e2   : > { %v12415_v16 = vld [vmem:[%s15337_s11 + $0x18f0] sm:$0xf0] }
 0x5e3   : > { %v14699_v57 = vld [vmem:[%s15337_s11 + $0x1ad4] sm:$0xf]  ;;  %v12418_v0 = vor.u32 %v14635_v7, %v12415_v16  ;;  %8525 = vmatpush.bf16.msrb.mxu1 %v12162_v63 }
 0x5e4   : > { %v12671_v59 = vld [vmem:[%s15337_s11 + $0x1af0] sm:$0xf0] }
 0x5e5   : > { %v14499_v14 = vld [vmem:[%s15337_s11 + $0x1494] sm:$0xf]  ;;  %v12674_v4 = vor.u32 %v14699_v57, %v12671_v59  ;;  %8538 = vmatpush.bf16.msrb.mxu2 %v12418_v0  ;;  %v8298_v57 = vpop.f32.mrf.mxu3 }
 0x5e6   : > { %v11871_v1 = vld [vmem:[%s15337_s11 + $0x14b0] sm:$0xf0] }
 0x5e7   : > { %v14563_v9 = vld [vmem:[%s15337_s11 + $0x1694] sm:$0xf]  ;;  %v11874_v5 = vor.u32 %v14499_v14, %v11871_v1  ;;  %8551 = vmatpush.bf16.msrb.mxu3 %v12674_v4 }
 0x5e8   : > { %v12127_v10 = vld [vmem:[%s15337_s11 + $0x16b0] sm:$0xf0] }
 0x5e9   : > { %v14627_v17 = vld [vmem:[%s15337_s11 + $0x1894] sm:$0xf]  ;;  %v12130_v45 = vor.u32 %v14563_v9, %v12127_v10  ;;  %8513 = vmatpush.bf16.msrb.mxu0 %v11874_v5 }
 0x5ea   : > { %v12383_v18 = vld [vmem:[%s15337_s11 + $0x18b0] sm:$0xf0] }
 0x5eb   : > { %v14691_v41 = vld [vmem:[%s15337_s11 + $0x1a94] sm:$0xf]  ;;  %v12386_v24 = vor.u32 %v14627_v17, %v12383_v18  ;;  %8526 = vmatpush.bf16.msrb.mxu1 %v12130_v45 }
 0x5ec   : > { %v12639_v21 = vld [vmem:[%s15337_s11 + $0x1ab0] sm:$0xf0] }
 0x5ed   : > { %v14491_v43 = vld [vmem:[%s15337_s11 + $0x1454] sm:$0xf]  ;;  %v12642_v26 = vor.u32 %v14691_v41, %v12639_v21  ;;  %8539 = vmatpush.bf16.msrb.mxu2 %v12386_v24 }
 0x5ee   : > { %v11839_v39 = vld [vmem:[%s15337_s11 + $0x1470] sm:$0xf0] }
 0x5ef   : > { %v14555_v13 = vld [vmem:[%s15337_s11 + $0x1654] sm:$0xf]  ;;  %v11842_v51 = vor.u32 %v14491_v43, %v11839_v39  ;;  %8552 = vmatpush.bf16.msrb.mxu3 %v12642_v26 }
 0x5f0   : > { %v12095_v30 = vld [vmem:[%s15337_s11 + $0x1670] sm:$0xf0] }
 0x5f1   : > { %v14619_v3 = vld [vmem:[%s15337_s11 + $0x1854] sm:$0xf]  ;;  %v12098_v44 = vor.u32 %v14555_v13, %v12095_v30  ;;  %8514 = vmatpush.bf16.msrb.mxu0 %v11842_v51 }
 0x5f2   : > { %v12351_v33 = vld [vmem:[%s15337_s11 + $0x1870] sm:$0xf0] }
 0x5f3   : > { %v14683_v35 = vld [vmem:[%s15337_s11 + $0x1a54] sm:$0xf]  ;;  %v12354_v52 = vor.u32 %v14619_v3, %v12351_v33  ;;  %8527 = vmatpush.bf16.msrb.mxu1 %v12098_v44 }
 0x5f4   : > { %v12607_v36 = vld [vmem:[%s15337_s11 + $0x1a70] sm:$0xf0] }
 0x5f5   : > { %v14483_v40 = vld [vmem:[%s15337_s11 + $0x1414] sm:$0xf]  ;;  %v12610_v53 = vor.u32 %v14683_v35, %v12607_v36  ;;  %8540 = vmatpush.bf16.msrb.mxu2 %v12354_v52 }
 0x5f6   : > { %v11807_v42 = vld [vmem:[%s15337_s11 + $0x1430] sm:$0xf0] }
 0x5f7   : > { %v14547_v58 = vld [vmem:[%s15337_s11 + $0x1614] sm:$0xf]  ;;  %v11810_v59 = vor.u32 %v14483_v40, %v11807_v42  ;;  %8553 = vmatpush.bf16.msrb.mxu3 %v12610_v53 }
 0x5f8   : > { %v12063_v62 = vld [vmem:[%s15337_s11 + $0x1630] sm:$0xf0] }
 0x5f9   : > { %v14611_v56 = vld [vmem:[%s15337_s11 + $0x1814] sm:$0xf]  ;;  %v12066_v14 = vor.u32 %v14547_v58, %v12063_v62  ;;  %8515 = vmatpush.bf16.msrb.mxu0 %v11810_v59 }
 0x5fa   : > { %v12319_v54 = vld [vmem:[%s15337_s11 + $0x1830] sm:$0xf0] }
 0x5fb   : > { %v14675_v55 = vld [vmem:[%s15337_s11 + $0x1a14] sm:$0xf]  ;;  %v12322_v1 = vor.u32 %v14611_v56, %v12319_v54  ;;  %8528 = vmatpush.bf16.msrb.mxu1 %v12066_v14 }
 0x5fc   : > { %v12575_v50 = vld [vmem:[%s15337_s11 + $0x1a30] sm:$0xf0]  ;;  %8516 = vmatmul.bf16.vlgmr.msrb.gmra.mxu0 %v15591_v11 }
 0x5fd   : > { %v14795_v37 = vld [vmem:[%s15337_s11 + $0x1dd4] sm:$0xf]  ;;  %v12578_v6 = vor.u32 %v14675_v55, %v12575_v50  ;;  %8541 = vmatpush.bf16.msrb.mxu2 %v12322_v1 }
 0x5fe   : > { %v13055_v7 = vld [vmem:[%s15337_s11 + $0x1df0] sm:$0xf0]  ;;  %8529 = vmatmul.bf16.vlgmr.msrb.gmra.mxu1 %v15596_v15 }
 0x5ff   : > { %v14859_v16 = vld [vmem:[%s15337_s11 + $0x1fd4] sm:$0xf]  ;;  %v13058_v10 = vor.u32 %v14795_v37, %v13055_v7  ;;  %8554 = vmatpush.bf16.msrb.mxu3 %v12578_v6  ;;  %v8309_v37 = vpop.f32.mrf.mxu0 }
 0x600   : > { %v13311_v61 = vld [vmem:[%s15337_s11 + $0x1ff0] sm:$0xf0]  ;;  %8542 = vmatmul.bf16.vlgmr.msrb.gmra.mxu2 %v15653_v46  ;;  %v8310_v57 = vadd.f32 %v8309_v37, %v17222_v2 }
 0x601   : > { %v14923_v63 = vld [vmem:[%s15337_s11 + $0x21d4] sm:$0xf]  ;;  %v13314_v17 = vor.u32 %v14859_v16, %v13311_v61  ;;  %8560 = vmatpush.bf16.msra.mxu0 %v13058_v10  ;;  %v8322_v61 = vpop.f32.mrf.mxu1 }
 0x602   : > { %v13567_v0 = vld [vmem:[%s15337_s11 + $0x21f0] sm:$0xf0]  ;;  %8555 = vmatmul.bf16.vlgmr.msrb.gmra.mxu3 %v15657_v48  ;;  %v8323_v6 = vadd.f32 %v8322_v61, %v8310_v57 }
 0x603   : > { %v14987_v9 = vld [vmem:[%s15337_s11 + $0x23d4] sm:$0xf]  ;;  %v13570_v18 = vor.u32 %v14923_v63, %v13567_v0  ;;  %8573 = vmatpush.bf16.msra.mxu1 %v13314_v17 }
 0x604   : > { %v13823_v4 = vld [vmem:[%s15337_s11 + $0x23f0] sm:$0xf0] }
 0x605   : > { %v14787_v19 = vld [vmem:[%s15337_s11 + $0x1d94] sm:$0xf]  ;;  %v13826_v21 = vor.u32 %v14987_v9, %v13823_v4  ;;  %8586 = vmatpush.bf16.msra.mxu2 %v13570_v18 }
 0x606   : > { %v13023_v20 = vld [vmem:[%s15337_s11 + $0x1db0] sm:$0xf0] }
 0x607   : > { %v14851_v41 = vld [vmem:[%s15337_s11 + $0x1f94] sm:$0xf]  ;;  %v13026_v43 = vor.u32 %v14787_v19, %v13023_v20  ;;  %8599 = vmatpush.bf16.msra.mxu3 %v13826_v21 }
 0x608   : > { %v13279_v22 = vld [vmem:[%s15337_s11 + $0x1fb0] sm:$0xf0] }
 0x609   : > { %v14915_v5 = vld [vmem:[%s15337_s11 + $0x2194] sm:$0xf]  ;;  %v13282_v39 = vor.u32 %v14851_v41, %v13279_v22  ;;  %8561 = vmatpush.bf16.msra.mxu0 %v13026_v43 }
 0x60a   : > { %v13535_v23 = vld [vmem:[%s15337_s11 + $0x21b0] sm:$0xf0] }
 0x60b   : > { %v14979_v45 = vld [vmem:[%s15337_s11 + $0x2394] sm:$0xf]  ;;  %v13538_v13 = vor.u32 %v14915_v5, %v13535_v23  ;;  %8574 = vmatpush.bf16.msra.mxu1 %v13282_v39 }
 0x60c   : > { %v13791_v24 = vld [vmem:[%s15337_s11 + $0x23b0] sm:$0xf0] }
 0x60d   : > { %v14779_v26 = vld [vmem:[%s15337_s11 + $0x1d54] sm:$0xf]  ;;  %v13794_v33 = vor.u32 %v14979_v45, %v13791_v24  ;;  %8587 = vmatpush.bf16.msra.mxu2 %v13538_v13  ;;  %v8335_v24 = vpop.f32.mrf.mxu2 }
 0x60e   : > { %v12991_v30 = vld [vmem:[%s15337_s11 + $0x1d70] sm:$0xf0] }
 0x60f   : > { %v14843_v3 = vld [vmem:[%s15337_s11 + $0x1f54] sm:$0xf]  ;;  %v12994_v44 = vor.u32 %v14779_v26, %v12991_v30  ;;  %8600 = vmatpush.bf16.msra.mxu3 %v13794_v33  ;;  %v8336_v26 = vadd.f32 %v8335_v24, %v8323_v6  ;;  %v8348_v30 = vpop.f32.mrf.mxu3 }
 0x610   : > { %v13247_v35 = vld [vmem:[%s15337_s11 + $0x1f70] sm:$0xf0] }
 0x611   : > { %v14907_v36 = vld [vmem:[%s15337_s11 + $0x2154] sm:$0xf]  ;;  %v13250_v52 = vor.u32 %v14843_v3, %v13247_v35  ;;  %8562 = vmatpush.bf16.msra.mxu0 %v12994_v44  ;;  %v8311_v35 = vpop.f32.mrf.mxu0 }
 0x612   : > { %v13503_v51 = vld [vmem:[%s15337_s11 + $0x2170] sm:$0xf0]  ;;  %v13960_v35 = vld [vmem:[%s15337_s11 + $0x3b4] sm:$0xf0] }
 0x613   : > { %v14971_v40 = vld [vmem:[%s15337_s11 + $0x2354] sm:$0xf]  ;;  %v13506_v58 = vor.u32 %v14907_v36, %v13503_v51  ;;  %8575 = vmatpush.bf16.msra.mxu1 %v13250_v52  ;;  %v8324_v51 = vpop.f32.mrf.mxu1 }
 0x614   : > { %v13759_v42 = vld [vmem:[%s15337_s11 + $0x2370] sm:$0xf0]  ;;  %v14024_v51 = vld [vmem:[%s15337_s11 + $0x5b4] sm:$0xf0] }
 0x615   : > { %v14771_v62 = vld [vmem:[%s15337_s11 + $0x1d14] sm:$0xf]  ;;  %v13762_v54 = vor.u32 %v14971_v40, %v13759_v42  ;;  %8588 = vmatpush.bf16.msra.mxu2 %v13506_v58  ;;  %v17293_v40 = vadd.f32 %v8348_v30, %v8336_v26  ;;  %v8337_v6 = vpop.f32.mrf.mxu2  ;;  %v9445_v26 = vld [vmem:[%s15337_s11 + $0x198] sm:$0xf] }
 0x616   : > { %v12959_v56 = vld [vmem:[%s15337_s11 + $0x1d30] sm:$0xf0]  ;;  %v13896_v30 = vld [vmem:[%s15337_s11 + $0x1b4] sm:$0xf0] }
 0x617   : > { %v14835_v53 = vld [vmem:[%s15337_s11 + $0x1f14] sm:$0xf]  ;;  %v12962_v59 = vor.u32 %v14771_v62, %v12959_v56  ;;  %8601 = vmatpush.bf16.msra.mxu3 %v13762_v54  ;;  %v13944_v6 = vld [vmem:[%s15337_s11 + $0x334] sm:$0xf0] }
 0x618   : > { %v13215_v55 = vld [vmem:[%s15337_s11 + $0x1f30] sm:$0xf0] }
 0x619   : > { %v14899_v50 = vld [vmem:[%s15337_s11 + $0x2114] sm:$0xf]  ;;  %v13218_v63 = vor.u32 %v14835_v53, %v13215_v55  ;;  %8563 = vmatpush.bf16.msra.mxu0 %v12962_v59 }
 0x61a   : > { %v13471_v60 = vld [vmem:[%s15337_s11 + $0x2130] sm:$0xf0] }
 0x61b   : > { %v14963_v7 = vld [vmem:[%s15337_s11 + $0x2314] sm:$0xf]  ;;  %v13474_v0 = vor.u32 %v14899_v50, %v13471_v60  ;;  %8576 = vmatpush.bf16.msra.mxu1 %v13218_v63 }
 0x61c   : > { %v13727_v16 = vld [vmem:[%s15337_s11 + $0x2330] sm:$0xf0] }
 0x61d   : > { %v14763_v14 = vld [vmem:[%s15337_s11 + $0x1cd4] sm:$0xf]  ;;  %v13730_v4 = vor.u32 %v14963_v7, %v13727_v16  ;;  %8589 = vmatpush.bf16.msra.mxu2 %v13474_v0 }
 0x61e   : > { %v12927_v1 = vld [vmem:[%s15337_s11 + $0x1cf0] sm:$0xf0] }
 0x61f   : > { %v14827_v9 = vld [vmem:[%s15337_s11 + $0x1ed4] sm:$0xf]  ;;  %v12930_v20 = vor.u32 %v14763_v14, %v12927_v1  ;;  %8602 = vmatpush.bf16.msra.mxu3 %v13730_v4 }
 0x620   : > { %v13183_v10 = vld [vmem:[%s15337_s11 + $0x1ef0] sm:$0xf0] }
 0x621   : > { %v14891_v17 = vld [vmem:[%s15337_s11 + $0x20d4] sm:$0xf]  ;;  %v13186_v41 = vor.u32 %v14827_v9, %v13183_v10  ;;  %8564 = vmatpush.bf16.msra.mxu0 %v12930_v20  ;;  %v9477_v10 = vld [vmem:[%s15337_s11 + $0x1d8] sm:$0xf] }
 0x622   : > { %v13439_v2 = vld [vmem:[%s15337_s11 + $0x20f0] sm:$0xf0]  ;;  %v13968_v20 = vld [vmem:[%s15337_s11 + $0x3f4] sm:$0xf0] }
 0x623   : > { %v14955_v18 = vld [vmem:[%s15337_s11 + $0x22d4] sm:$0xf]  ;;  %v13442_v21 = vor.u32 %v14891_v17, %v13439_v2  ;;  %8577 = vmatpush.bf16.msra.mxu1 %v13186_v41  ;;  %v13904_v17 = vld [vmem:[%s15337_s11 + $0x1f4] sm:$0xf0] }
 0x624   : > { %v13695_v19 = vld [vmem:[%s15337_s11 + $0x22f0] sm:$0xf0]  ;;  %v9733_v2 = vld [vmem:[%s15337_s11 + $0x3d8] sm:$0xf] }
 0x625   : > { %v14755_v22 = vld [vmem:[%s15337_s11 + $0x1c94] sm:$0xf]  ;;  %v13698_v45 = vor.u32 %v14955_v18, %v13695_v19  ;;  %8590 = vmatpush.bf16.msra.mxu2 %v13442_v21  ;;  %v8350_v18 = vpop.f32.mrf.mxu3  ;;  %v9989_v41 = vld [vmem:[%s15337_s11 + $0x5d8] sm:$0xf] }
 0x626   : > { %v12895_v5 = vld [vmem:[%s15337_s11 + $0x1cb0] sm:$0xf0]  ;;  %v14032_v21 = vld [vmem:[%s15337_s11 + $0x5f4] sm:$0xf0] }
 0x627   : > { %v14819_v23 = vld [vmem:[%s15337_s11 + $0x1e94] sm:$0xf]  ;;  %v12898_v36 = vor.u32 %v14755_v22, %v12895_v5  ;;  %8603 = vmatpush.bf16.msra.mxu3 %v13698_v45  ;;  %v14096_v45 = vld [vmem:[%s15337_s11 + $0x7f4] sm:$0xf0] }
 0x628   : > { %v13151_v43 = vld [vmem:[%s15337_s11 + $0x1eb0] sm:$0xf0]  ;;  %v10149_v18 = vld [vmem:[%s15337_s11 + $0x718] sm:$0xf] }
 0x629   : > { %v14883_v39 = vld [vmem:[%s15337_s11 + $0x2094] sm:$0xf]  ;;  %v13154_v42 = vor.u32 %v14819_v23, %v13151_v43  ;;  %8565 = vmatpush.bf16.msra.mxu0 %v12898_v36  ;;  %v10245_v23 = vld [vmem:[%s15337_s11 + $0x7d8] sm:$0xf]  ;;  %v9478_v43 = vor.u32 %v13904_v17, %v9477_v10 }
 0x62a   : > { %v13407_v13 = vld [vmem:[%s15337_s11 + $0x20b0] sm:$0xf0]  ;;  %v9957_v36 = vld [vmem:[%s15337_s11 + $0x598] sm:$0xf] }
 0x62b   : > { %v14947_v3 = vld [vmem:[%s15337_s11 + $0x2294] sm:$0xf]  ;;  %v13410_v44 = vor.u32 %v14883_v39, %v13407_v13  ;;  %8578 = vmatpush.bf16.msra.mxu1 %v13154_v42  ;;  %v9734_v39 = vor.u32 %v13968_v20, %v9733_v2  ;;  %v9990_v13 = vor.u32 %v14032_v21, %v9989_v41  ;;  %v10213_v42 = vld [vmem:[%s15337_s11 + $0x798] sm:$0xf]  ;;  %v8361_v2 = vpop.f32.mrf.mxu0  ;;  %v8374_v21 = vpop.f32.mrf.mxu1 }
 0x62c   : > { %v13663_v33 = vld [vmem:[%s15337_s11 + $0x22b0] sm:$0xf0]  ;;  %v9893_v10 = vld [vmem:[%s15337_s11 + $0x518] sm:$0xf]  ;;  %v8362_v20 = vadd.f32 %v8361_v2, %v17293_v40 }
 0x62d   : > { %v14747_v52 = vld [vmem:[%s15337_s11 + $0x1c54] sm:$0xf]  ;;  %v13666_v56 = vor.u32 %v14947_v3, %v13663_v33  ;;  %8591 = vmatpush.bf16.msra.mxu2 %v13410_v44  ;;  %v9701_v3 = vld [vmem:[%s15337_s11 + $0x398] sm:$0xf]  ;;  %v10246_v33 = vor.u32 %v14096_v45, %v10245_v23 }
 0x62e   : > { %v12863_v58 = vld [vmem:[%s15337_s11 + $0x1c70] sm:$0xf0]  ;;  %v14088_v44 = vld [vmem:[%s15337_s11 + $0x7b4] sm:$0xf0] }
 0x62f   : > { %v14811_v62 = vld [vmem:[%s15337_s11 + $0x1e54] sm:$0xf]  ;;  %v12866_v37 = vor.u32 %v14747_v52, %v12863_v58  ;;  %8604 = vmatpush.bf16.msra.mxu3 %v13666_v56  ;;  %v9446_v52 = vor.u32 %v13896_v30, %v9445_v26  ;;  %v9702_v58 = vor.u32 %v13960_v35, %v9701_v3  ;;  %v9413_v56 = vld [vmem:[%s15337_s11 + $0x158] sm:$0xf] }
 0x630   : > { %v13119_v53 = vld [vmem:[%s15337_s11 + $0x1e70] sm:$0xf0]  ;;  %v14008_v17 = vld [vmem:[%s15337_s11 + $0x534] sm:$0xf0] }
 0x631   : > { %v14875_v54 = vld [vmem:[%s15337_s11 + $0x2054] sm:$0xf]  ;;  %v13122_v57 = vor.u32 %v14811_v62, %v13119_v53  ;;  %8566 = vmatpush.bf16.msra.mxu0 %v12866_v37  ;;  %v9958_v62 = vor.u32 %v14024_v51, %v9957_v36  ;;  %v13888_v53 = vld [vmem:[%s15337_s11 + $0x174] sm:$0xf0] }
 0x632   : > { %v13375_v55 = vld [vmem:[%s15337_s11 + $0x2070] sm:$0xf0]  ;;  %v14016_v37 = vld [vmem:[%s15337_s11 + $0x574] sm:$0xf0] }
 0x633   : > { %v14939_v50 = vld [vmem:[%s15337_s11 + $0x2254] sm:$0xf]  ;;  %v13378_v59 = vor.u32 %v14875_v54, %v13375_v55  ;;  %8579 = vmatpush.bf16.msra.mxu1 %v13122_v57  ;;  %v9669_v54 = vld [vmem:[%s15337_s11 + $0x358] sm:$0xf]  ;;  %v10214_v55 = vor.u32 %v14088_v44, %v10213_v42 }
 0x634   : > { %v13631_v60 = vld [vmem:[%s15337_s11 + $0x2270] sm:$0xf0]  ;;  %v14080_v57 = vld [vmem:[%s15337_s11 + $0x774] sm:$0xf0] }
 0x635   : > { %v14739_v7 = vld [vmem:[%s15337_s11 + $0x1c14] sm:$0xf]  ;;  %v13634_v14 = vor.u32 %v14939_v50, %v13631_v60  ;;  %8592 = vmatpush.bf16.msra.mxu2 %v13378_v59  ;;  %v13952_v50 = vld [vmem:[%s15337_s11 + $0x374] sm:$0xf0]  ;;  %v15063_v59 = vld [vmem:[#allocation1 + $0x9] sm:$0xff] }
 0x636   : > { %v12831_v16 = vld [vmem:[%s15337_s11 + $0x1c30] sm:$0xf0]  ;;  %v9925_v60 = vld [vmem:[%s15337_s11 + $0x558] sm:$0xf] }
 0x637   : > { %v14803_v61 = vld [vmem:[%s15337_s11 + $0x1e14] sm:$0xf]  ;;  %v12834_v19 = vor.u32 %v14739_v7, %v12831_v16  ;;  %8605 = vmatpush.bf16.msra.mxu3 %v13634_v14  ;;  %v15062_v7 = vld [vmem:[#allocation1] sm:$0xff] }
 0x638   : > { %v13087_v63 = vld [vmem:[%s15337_s11 + $0x1e30] sm:$0xf0]  ;;  %v10181_v16 = vld [vmem:[%s15337_s11 + $0x758] sm:$0xf] }
 0x639   : > { %v14867_v0 = vld [vmem:[%s15337_s11 + $0x2014] sm:$0xf]  ;;  %v13090_v22 = vor.u32 %v14803_v61, %v13087_v63  ;;  %8567 = vmatpush.bf16.msra.mxu0 %v12834_v19  ;;  %v9414_v61 = vor.u32 %v13888_v53, %v9413_v56  ;;  %v9670_v63 = vor.u32 %v13952_v50, %v9669_v54  ;;  %v9381_v14 = vld [vmem:[%s15337_s11 + $0x118] sm:$0xf] }
 0x63a   : > { %v13343_v1 = vld [vmem:[%s15337_s11 + $0x2030] sm:$0xf0]  ;;  %v14072_v19 = vld [vmem:[%s15337_s11 + $0x734] sm:$0xf0] }
 0x63b   : > { %v14931_v9 = vld [vmem:[%s15337_s11 + $0x2214] sm:$0xf]  ;;  %v13346_v5 = vor.u32 %v14867_v0, %v13343_v1  ;;  %8580 = vmatpush.bf16.msra.mxu1 %v13090_v22  ;;  %v9926_v0 = vor.u32 %v14016_v37, %v9925_v60  ;;  %v13880_v1 = vld [vmem:[%s15337_s11 + $0x134] sm:$0xf0] }
 0x63c   : > { %v13599_v4 = vld [vmem:[%s15337_s11 + $0x2230] sm:$0xf0]  ;;  %8568 = vmatmul.bf16.vlgmr.msra.gmra.mxu0 %v15655_v47  ;;  %v9382_v41 = vor.u32 %v13880_v1, %v9381_v14  ;;  %v9349_v23 = vld [vmem:[%s15337_s11 + $0xd8] sm:$0xf] }
 0x63d   : > { %v13602_v24 = vor.u32 %v14931_v9, %v13599_v4  ;;  %8593 = vmatpush.bf16.msra.mxu2 %v13346_v5  ;;  %8612 = vmatpush.bf16.msrb.mxu0 %v9478_v43  ;;  %v9637_v9 = vld [vmem:[%s15337_s11 + $0x318] sm:$0xf]  ;;  %v10182_v4 = vor.u32 %v14080_v57, %v10181_v16  ;;  %v9894_v5 = vor.u32 %v14008_v17, %v9893_v10  ;;  %v8363_v16 = vpop.f32.mrf.mxu0 }
 0x63e   : > { %8581 = vmatmul.bf16.vlgmr.msra.gmra.mxu1 %v15659_v49  ;;  %v9638_v22 = vor.u32 %v13944_v6, %v9637_v9  ;;  %v13872_v45 = vld [vmem:[%s15337_s11 + $0xf4] sm:$0xf0]  ;;  %v10150_v43 = vor.u32 %v14072_v19, %v10149_v18 }
 0x63f   : > { %8606 = vmatpush.bf16.msra.mxu3 %v13602_v24  ;;  %8625 = vmatpush.bf16.msrb.mxu1 %v9734_v39  ;;  %v9605_v24 = vld [vmem:[%s15337_s11 + $0x2d8] sm:$0xf]  ;;  %v17349_v39 = vadd.f32 %v8374_v21, %v8362_v20  ;;  %v9350_v36 = vor.u32 %v13872_v45, %v9349_v23 }
 0x640   : > { %8594 = vmatmul.bf16.vlgmr.msra.gmra.mxu2 %v15062_v7  ;;  %v13936_v40 = vld [vmem:[%s15337_s11 + $0x2f4] sm:$0xf0]  ;;  %v8400_v7 = vpop.f32.mrf.mxu3 }
 0x641   : > { %8638 = vmatpush.bf16.msrb.mxu2 %v9990_v13  ;;  %8613 = vmatpush.bf16.msrb.mxu0 %v9446_v52  ;;  %v9861_v13 = vld [vmem:[%s15337_s11 + $0x4d8] sm:$0xf]  ;;  %v9606_v51 = vor.u32 %v13936_v40, %v9605_v24 }
 0x642   : > { %8607 = vmatmul.bf16.vlgmr.msra.gmra.mxu3 %v15063_v59  ;;  %v14000_v26 = vld [vmem:[%s15337_s11 + $0x4f4] sm:$0xf0]  ;;  %v8376_v59 = vpop.f32.mrf.mxu1 }
 0x643   : > { %8651 = vmatpush.bf16.msrb.mxu3 %v10246_v33  ;;  %8626 = vmatpush.bf16.msrb.mxu1 %v9702_v58  ;;  %v10117_v30 = vld [vmem:[%s15337_s11 + $0x6d8] sm:$0xf]  ;;  %v15064_v33 = vld [vmem:[%s15345_s9] sm:$0xff]  ;;  %v9862_v42 = vor.u32 %v14000_v26, %v9861_v13 }
 0x644   : > { %v14064_v3 = vld [vmem:[%s15337_s11 + $0x6f4] sm:$0xf0]  ;;  %v1395_v35 = vperm.slane %v15064_v33, 5 }
 0x645   : > { %8639 = vmatpush.bf16.msrb.mxu2 %v9958_v62  ;;  %8614 = vmatpush.bf16.msrb.mxu0 %v9414_v61  ;;  %v9317_v44 = vld [vmem:[%s15337_s11 + $0x98] sm:$0xf]  ;;  %v10118_v62 = vor.u32 %v14064_v3, %v10117_v30 }
 0x646   : > { %v13864_v52 = vld [vmem:[%s15337_s11 + $0xb4] sm:$0xf0] }
 0x647   : > { %8652 = vmatpush.bf16.msrb.mxu3 %v10214_v55  ;;  %8627 = vmatpush.bf16.msrb.mxu1 %v9670_v63  ;;  %v9573_v58 = vld [vmem:[%s15337_s11 + $0x298] sm:$0xf]  ;;  %v8387_v55 = vpop.f32.mrf.mxu2  ;;  %v9318_v57 = vor.u32 %v13864_v52, %v9317_v44 }
 0x648   : > { %v13928_v56 = vld [vmem:[%s15337_s11 + $0x2b4] sm:$0xf0]  ;;  %v8388_v37 = vadd.f32 %v8387_v55, %v1395_v35  ;;  %v8402_v35 = vpop.f32.mrf.mxu3 }
 0x649   : > { %8640 = vmatpush.bf16.msrb.mxu2 %v9926_v0  ;;  %8615 = vmatpush.bf16.msrb.mxu0 %v9382_v41  ;;  %v9829_v53 = vld [vmem:[%s15337_s11 + $0x498] sm:$0xf]  ;;  %v9574_v61 = vor.u32 %v13928_v56, %v9573_v58 }
 0x64a   : > { %v13992_v54 = vld [vmem:[%s15337_s11 + $0x4b4] sm:$0xf0]  ;;  %v17368_v9 = vadd.f32 %v8400_v7, %v8388_v37 }
 0x64b   : > { %8653 = vmatpush.bf16.msrb.mxu3 %v10182_v4  ;;  %8628 = vmatpush.bf16.msrb.mxu1 %v9638_v22  ;;  %v10085_v50 = vld [vmem:[%s15337_s11 + $0x698] sm:$0xf]  ;;  %v9830_v63 = vor.u32 %v13992_v54, %v9829_v53 }
 0x64c   : > { %v14056_v60 = vld [vmem:[%s15337_s11 + $0x6b4] sm:$0xf0] }
 0x64d   : > { %8641 = vmatpush.bf16.msrb.mxu2 %v9894_v5  ;;  %8616 = vmatpush.bf16.msrb.mxu0 %v9350_v36  ;;  %v9285_v0 = vld [vmem:[%s15337_s11 + $0x58] sm:$0xf]  ;;  %v10086_v4 = vor.u32 %v14056_v60, %v10085_v50 }
 0x64e   : > { %v13856_v14 = vld [vmem:[%s15337_s11 + $0x74] sm:$0xf0] }
 0x64f   : > { %8654 = vmatpush.bf16.msrb.mxu3 %v10150_v43  ;;  %8629 = vmatpush.bf16.msrb.mxu1 %v9606_v51  ;;  %v9541_v1 = vld [vmem:[%s15337_s11 + $0x258] sm:$0xf]  ;;  %v9286_v19 = vor.u32 %v13856_v14, %v9285_v0  ;;  %v8389_v26 = vpop.f32.mrf.mxu2 }
 0x650   : > { %v13920_v6 = vld [vmem:[%s15337_s11 + $0x274] sm:$0xf0] }
 0x651   : > { %8642 = vmatpush.bf16.msrb.mxu2 %v9862_v42  ;;  %v9797_v10 = vld [vmem:[%s15337_s11 + $0x458] sm:$0xf]  ;;  %8617 = vmatpush.bf16.msrb.mxu0 %v9318_v57  ;;  %v9542_v21 = vor.u32 %v13920_v6, %v9541_v1 }
 0x652   : > { %v13984_v17 = vld [vmem:[%s15337_s11 + $0x474] sm:$0xf0] }
 0x653   : > { %8655 = vmatpush.bf16.msrb.mxu3 %v10118_v62  ;;  %v10053_v2 = vld [vmem:[%s15337_s11 + $0x658] sm:$0xf]  ;;  %8630 = vmatpush.bf16.msrb.mxu1 %v9574_v61  ;;  %v9798_v22 = vor.u32 %v13984_v17, %v9797_v10 }
 0x654   : > { %v14048_v18 = vld [vmem:[%s15337_s11 + $0x674] sm:$0xf0] }
 0x655   : > { %v9253_v20 = vld [vmem:[%s15337_s11 + $0x18] sm:$0xf]  ;;  %8643 = vmatpush.bf16.msrb.mxu2 %v9830_v63  ;;  %v10054_v24 = vor.u32 %v14048_v18, %v10053_v2  ;;  %8618 = vmatpush.bf16.msrb.mxu0 %v9286_v19 }
 0x656   : > { %v13848_v41 = vld [vmem:[%s15337_s11 + $0x34] sm:$0xf0] }
 0x657   : > { %v9509_v5 = vld [vmem:[%s15337_s11 + $0x218] sm:$0xf]  ;;  %8656 = vmatpush.bf16.msrb.mxu3 %v10086_v4  ;;  %v9254_v36 = vor.u32 %v13848_v41, %v9253_v20  ;;  %8631 = vmatpush.bf16.msrb.mxu1 %v9542_v21 }
 0x658   : > { %v13912_v23 = vld [vmem:[%s15337_s11 + $0x234] sm:$0xf0] }
 0x659   : > { %v9765_v45 = vld [vmem:[%s15337_s11 + $0x418] sm:$0xf]  ;;  %8644 = vmatpush.bf16.msrb.mxu2 %v9798_v22  ;;  %v9510_v52 = vor.u32 %v13912_v23, %v9509_v5  ;;  %8619 = vmatpush.bf16.msrb.mxu0 %v9254_v36  ;;  %v8413_v36 = vpop.f32.mrf.mxu0 }
 0x65a   : > { %v13976_v43 = vld [vmem:[%s15337_s11 + $0x434] sm:$0xf0] }
 0x65b   : > { %v10021_v40 = vld [vmem:[%s15337_s11 + $0x618] sm:$0xf]  ;;  %v9766_v58 = vor.u32 %v13976_v43, %v9765_v45  ;;  %8657 = vmatpush.bf16.msrb.mxu3 %v10054_v24  ;;  %8632 = vmatpush.bf16.msrb.mxu1 %v9510_v52 }
 0x65c   : > { %v14040_v13 = vld [vmem:[%s15337_s11 + $0x634] sm:$0xf0]  ;;  %8620 = vmatmul.bf16.vlgmr.msrb.gmra.mxu0 %v15461_v28 }
 0x65d   : > { %v10501_v30 = vld [vmem:[%s15337_s11 + $0x9d8] sm:$0xf]  ;;  %v10022_v53 = vor.u32 %v14040_v13, %v10021_v40  ;;  %8645 = vmatpush.bf16.msrb.mxu2 %v9766_v58 }
 0x65e   : > { %v14160_v3 = vld [vmem:[%s15337_s11 + $0x9f4] sm:$0xf0]  ;;  %8633 = vmatmul.bf16.vlgmr.msrb.gmra.mxu1 %v15467_v34 }
 0x65f   : > { %v10757_v33 = vld [vmem:[%s15337_s11 + $0xbd8] sm:$0xf]  ;;  %v10502_v54 = vor.u32 %v14160_v3, %v10501_v30  ;;  %8658 = vmatpush.bf16.msrb.mxu3 %v10022_v53 }
 0x660   : > { %v14224_v51 = vld [vmem:[%s15337_s11 + $0xbf4] sm:$0xf0]  ;;  %8646 = vmatmul.bf16.vlgmr.msrb.gmra.mxu2 %v15459_v27 }
 0x661   : > { %v11013_v42 = vld [vmem:[%s15337_s11 + $0xdd8] sm:$0xf]  ;;  %v10758_v55 = vor.u32 %v14224_v51, %v10757_v33  ;;  %8664 = vmatpush.bf16.msra.mxu0 %v10502_v54 }
 0x662   : > { %v14288_v44 = vld [vmem:[%s15337_s11 + $0xdf4] sm:$0xf0]  ;;  %8659 = vmatmul.bf16.vlgmr.msrb.gmra.mxu3 %v15463_v29 }
 0x663   : > { %v11269_v62 = vld [vmem:[%s15337_s11 + $0xfd8] sm:$0xf]  ;;  %v11014_v50 = vor.u32 %v14288_v44, %v11013_v42  ;;  %8677 = vmatpush.bf16.msra.mxu1 %v10758_v55 }
 0x664   : > { %v14352_v56 = vld [vmem:[%s15337_s11 + $0xff4] sm:$0xf0] }
 0x665   : > { %v10469_v60 = vld [vmem:[%s15337_s11 + $0x998] sm:$0xf]  ;;  %v11270_v16 = vor.u32 %v14352_v56, %v11269_v62  ;;  %8690 = vmatpush.bf16.msra.mxu2 %v11014_v50  ;;  %v8414_v62 = vadd.f32 %v8413_v36, %v17368_v9  ;;  %v8426_v56 = vpop.f32.mrf.mxu1 }
 0x666   : > { %v14152_v37 = vld [vmem:[%s15337_s11 + $0x9b4] sm:$0xf0] }
 0x667   : > { %v10725_v7 = vld [vmem:[%s15337_s11 + $0xb98] sm:$0xf]  ;;  %v10470_v14 = vor.u32 %v14152_v37, %v10469_v60  ;;  %8703 = vmatpush.bf16.msra.mxu3 %v11270_v16 }
 0x668   : > { %v14216_v57 = vld [vmem:[%s15337_s11 + $0xbb4] sm:$0xf0] }
 0x669   : > { %v10981_v59 = vld [vmem:[%s15337_s11 + $0xd98] sm:$0xf]  ;;  %v10726_v1 = vor.u32 %v14216_v57, %v10725_v7  ;;  %8665 = vmatpush.bf16.msra.mxu0 %v10470_v14  ;;  %v8427_v7 = vadd.f32 %v8426_v56, %v8414_v62 }
 0x66a   : > { %v14280_v61 = vld [vmem:[%s15337_s11 + $0xdb4] sm:$0xf0] }
 0x66b   : > { %v11237_v63 = vld [vmem:[%s15337_s11 + $0xf98] sm:$0xf]  ;;  %v10982_v4 = vor.u32 %v14280_v61, %v10981_v59  ;;  %8678 = vmatpush.bf16.msra.mxu1 %v10726_v1 }
 0x66c   : > { %v14344_v0 = vld [vmem:[%s15337_s11 + $0xfb4] sm:$0xf0] }
 0x66d   : > { %v10437_v6 = vld [vmem:[%s15337_s11 + $0x958] sm:$0xf]  ;;  %v11238_v2 = vor.u32 %v14344_v0, %v11237_v63  ;;  %8691 = vmatpush.bf16.msra.mxu2 %v10982_v4  ;;  %v8439_v0 = vpop.f32.mrf.mxu2 }
 0x66e   : > { %v14144_v10 = vld [vmem:[%s15337_s11 + $0x974] sm:$0xf0] }
 0x66f   : > { %v10693_v17 = vld [vmem:[%s15337_s11 + $0xb58] sm:$0xf]  ;;  %v10438_v22 = vor.u32 %v14144_v10, %v10437_v6  ;;  %8704 = vmatpush.bf16.msra.mxu3 %v11238_v2  ;;  %v8440_v10 = vadd.f32 %v8439_v0, %v8427_v7 }
 0x670   : > { %v14208_v18 = vld [vmem:[%s15337_s11 + $0xb74] sm:$0xf0] }
 0x671   : > { %v10949_v19 = vld [vmem:[%s15337_s11 + $0xd58] sm:$0xf]  ;;  %v10694_v5 = vor.u32 %v14208_v18, %v10693_v17  ;;  %8666 = vmatpush.bf16.msra.mxu0 %v10438_v22  ;;  %v8452_v17 = vpop.f32.mrf.mxu3 }
 0x672   : > { %v14272_v20 = vld [vmem:[%s15337_s11 + $0xd74] sm:$0xf0] }
 0x673   : > { %v11205_v41 = vld [vmem:[%s15337_s11 + $0xf58] sm:$0xf]  ;;  %v10950_v23 = vor.u32 %v14272_v20, %v10949_v19  ;;  %8679 = vmatpush.bf16.msra.mxu1 %v10694_v5  ;;  %v17436_v20 = vadd.f32 %v8452_v17, %v8440_v10 }
 0x674   : > { %v14336_v21 = vld [vmem:[%s15337_s11 + $0xf74] sm:$0xf0] }
 0x675   : > { %v10405_v45 = vld [vmem:[%s15337_s11 + $0x918] sm:$0xf]  ;;  %v11206_v40 = vor.u32 %v14336_v21, %v11205_v41  ;;  %8692 = vmatpush.bf16.msra.mxu2 %v10950_v23  ;;  %v8415_v41 = vpop.f32.mrf.mxu0  ;;  %v8441_v62 = vpop.f32.mrf.mxu2 }
 0x676   : > { %v14136_v24 = vld [vmem:[%s15337_s11 + $0x934] sm:$0xf0] }
 0x677   : > { %v10661_v43 = vld [vmem:[%s15337_s11 + $0xb18] sm:$0xf]  ;;  %v10406_v35 = vor.u32 %v14136_v24, %v10405_v45  ;;  %8705 = vmatpush.bf16.msra.mxu3 %v11206_v40  ;;  %v8428_v24 = vpop.f32.mrf.mxu1 }
 0x678   : > { %v14200_v13 = vld [vmem:[%s15337_s11 + $0xb34] sm:$0xf0] }
 0x679   : > { %v10917_v26 = vld [vmem:[%s15337_s11 + $0xd18] sm:$0xf]  ;;  %v10662_v51 = vor.u32 %v14200_v13, %v10661_v43  ;;  %8667 = vmatpush.bf16.msra.mxu0 %v10406_v35 }
 0x67a   : > { %v14264_v30 = vld [vmem:[%s15337_s11 + $0xd34] sm:$0xf0] }
 0x67b   : > { %v11173_v3 = vld [vmem:[%s15337_s11 + $0xf18] sm:$0xf]  ;;  %v10918_v42 = vor.u32 %v14264_v30, %v10917_v26  ;;  %8680 = vmatpush.bf16.msra.mxu1 %v10662_v51 }
 0x67c   : > { %v14328_v33 = vld [vmem:[%s15337_s11 + $0xf34] sm:$0xf0] }
 0x67d   : > { %v10373_v44 = vld [vmem:[%s15337_s11 + $0x8d8] sm:$0xf]  ;;  %v11174_v53 = vor.u32 %v14328_v33, %v11173_v3  ;;  %8693 = vmatpush.bf16.msra.mxu2 %v10918_v42 }
 0x67e   : > { %v14128_v52 = vld [vmem:[%s15337_s11 + $0x8f4] sm:$0xf0] }
 0x67f   : > { %v10629_v58 = vld [vmem:[%s15337_s11 + $0xad8] sm:$0xf]  ;;  %v10374_v16 = vor.u32 %v14128_v52, %v10373_v44  ;;  %8706 = vmatpush.bf16.msra.mxu3 %v11174_v53 }
 0x680   : > { %v14192_v54 = vld [vmem:[%s15337_s11 + $0xaf4] sm:$0xf0] }
 0x681   : > { %v10885_v55 = vld [vmem:[%s15337_s11 + $0xcd8] sm:$0xf]  ;;  %v10630_v9 = vor.u32 %v14192_v54, %v10629_v58  ;;  %8668 = vmatpush.bf16.msra.mxu0 %v10374_v16 }
 0x682   : > { %v14256_v50 = vld [vmem:[%s15337_s11 + $0xcf4] sm:$0xf0] }
 0x683   : > { %v11141_v60 = vld [vmem:[%s15337_s11 + $0xed8] sm:$0xf]  ;;  %v10886_v57 = vor.u32 %v14256_v50, %v10885_v55  ;;  %8681 = vmatpush.bf16.msra.mxu1 %v10630_v9  ;;  %v8454_v50 = vpop.f32.mrf.mxu3 }
 0x684   : > { %v14320_v37 = vld [vmem:[%s15337_s11 + $0xef4] sm:$0xf0] }
 0x685   : > { %v10341_v59 = vld [vmem:[%s15337_s11 + $0x898] sm:$0xf]  ;;  %v11142_v14 = vor.u32 %v14320_v37, %v11141_v60  ;;  %8694 = vmatpush.bf16.msra.mxu2 %v10886_v57 }
 0x686   : > { %v14120_v61 = vld [vmem:[%s15337_s11 + $0x8b4] sm:$0xf0] }
 0x687   : > { %v10597_v63 = vld [vmem:[%s15337_s11 + $0xa98] sm:$0xf]  ;;  %v10342_v19 = vor.u32 %v14120_v61, %v10341_v59  ;;  %8707 = vmatpush.bf16.msra.mxu3 %v11142_v14 }
 0x688   : > { %v14184_v1 = vld [vmem:[%s15337_s11 + $0xab4] sm:$0xf0] }
 0x689   : > { %v10853_v4 = vld [vmem:[%s15337_s11 + $0xc98] sm:$0xf]  ;;  %v10598_v21 = vor.u32 %v14184_v1, %v10597_v63  ;;  %8669 = vmatpush.bf16.msra.mxu0 %v10342_v19 }
 0x68a   : > { %v14248_v6 = vld [vmem:[%s15337_s11 + $0xcb4] sm:$0xf0] }
 0x68b   : > { %v11109_v2 = vld [vmem:[%s15337_s11 + $0xe98] sm:$0xf]  ;;  %v10854_v22 = vor.u32 %v14248_v6, %v10853_v4  ;;  %8682 = vmatpush.bf16.msra.mxu1 %v10598_v21 }
 0x68c   : > { %v14312_v18 = vld [vmem:[%s15337_s11 + $0xeb4] sm:$0xf0] }
 0x68d   : > { %v10309_v5 = vld [vmem:[%s15337_s11 + $0x858] sm:$0xf]  ;;  %v11110_v43 = vor.u32 %v14312_v18, %v11109_v2  ;;  %8695 = vmatpush.bf16.msra.mxu2 %v10854_v22 }
 0x68e   : > { %v14112_v23 = vld [vmem:[%s15337_s11 + $0x874] sm:$0xf0] }
 0x68f   : > { %v10565_v45 = vld [vmem:[%s15337_s11 + $0xa58] sm:$0xf]  ;;  %v10310_v33 = vor.u32 %v14112_v23, %v10309_v5  ;;  %8708 = vmatpush.bf16.msra.mxu3 %v11110_v43 }
 0x690   : > { %v14176_v40 = vld [vmem:[%s15337_s11 + $0xa74] sm:$0xf0] }
 0x691   : > { %v10821_v13 = vld [vmem:[%s15337_s11 + $0xc58] sm:$0xf]  ;;  %v10566_v51 = vor.u32 %v14176_v40, %v10565_v45  ;;  %8670 = vmatpush.bf16.msra.mxu0 %v10310_v33 }
 0x692   : > { %v14240_v26 = vld [vmem:[%s15337_s11 + $0xc74] sm:$0xf0] }
 0x693   : > { %v11077_v30 = vld [vmem:[%s15337_s11 + $0xe58] sm:$0xf]  ;;  %v10822_v42 = vor.u32 %v14240_v26, %v10821_v13  ;;  %8683 = vmatpush.bf16.msra.mxu1 %v10566_v51 }
 0x694   : > { %v14304_v3 = vld [vmem:[%s15337_s11 + $0xe74] sm:$0xf0] }
 0x695   : > { %v10277_v35 = vld [vmem:[%s15337_s11 + $0x818] sm:$0xf]  ;;  %v11078_v56 = vor.u32 %v14304_v3, %v11077_v30  ;;  %8696 = vmatpush.bf16.msra.mxu2 %v10822_v42 }
 0x696   : > { %v14104_v36 = vld [vmem:[%s15337_s11 + $0x834] sm:$0xf0] }
 0x697   : > { %v10533_v44 = vld [vmem:[%s15337_s11 + $0xa18] sm:$0xf]  ;;  %v10278_v16 = vor.u32 %v14104_v36, %v10277_v35  ;;  %8709 = vmatpush.bf16.msra.mxu3 %v11078_v56 }
 0x698   : > { %v14168_v52 = vld [vmem:[%s15337_s11 + $0xa34] sm:$0xf0] }
 0x699   : > { %v10789_v58 = vld [vmem:[%s15337_s11 + $0xc18] sm:$0xf]  ;;  %v10534_v61 = vor.u32 %v14168_v52, %v10533_v44  ;;  %8671 = vmatpush.bf16.msra.mxu0 %v10278_v16 }
 0x69a   : > { %v14232_v53 = vld [vmem:[%s15337_s11 + $0xc34] sm:$0xf0] }
 0x69b   : > { %v11045_v54 = vld [vmem:[%s15337_s11 + $0xe18] sm:$0xf]  ;;  %v10790_v63 = vor.u32 %v14232_v53, %v10789_v58  ;;  %8684 = vmatpush.bf16.msra.mxu1 %v10534_v61 }
 0x69c   : > { %v14296_v55 = vld [vmem:[%s15337_s11 + $0xe34] sm:$0xf0]  ;;  %8672 = vmatmul.bf16.vlgmr.msra.gmra.mxu0 %v15513_v31 }
 0x69d   : > { %v11525_v60 = vld [vmem:[%s15337_s11 + $0x11d8] sm:$0xf]  ;;  %v11046_v1 = vor.u32 %v14296_v55, %v11045_v54  ;;  %8697 = vmatpush.bf16.msra.mxu2 %v10790_v63 }
 0x69e   : > { %v14416_v37 = vld [vmem:[%s15337_s11 + $0x11f4] sm:$0xf0]  ;;  %8685 = vmatmul.bf16.vlgmr.msra.gmra.mxu1 %v15519_v38 }
 0x69f   : > { %v11781_v7 = vld [vmem:[%s15337_s11 + $0x13d8] sm:$0xf]  ;;  %v11526_v4 = vor.u32 %v14416_v37, %v11525_v60  ;;  %8710 = vmatpush.bf16.msra.mxu3 %v11046_v1  ;;  %v8465_v60 = vpop.f32.mrf.mxu0 }
 0x6a0   : > { %v14480_v9 = vld [vmem:[%s15337_s11 + $0x13f4] sm:$0xf0]  ;;  %8698 = vmatmul.bf16.vlgmr.msra.gmra.mxu2 %v15510_v25  ;;  %v8466_v16 = vadd.f32 %v8465_v60, %v17436_v20 }
 0x6a1   : > { %v12037_v57 = vld [vmem:[%s15337_s11 + $0x15d8] sm:$0xf]  ;;  %v11782_v6 = vor.u32 %v14480_v9, %v11781_v7  ;;  %8716 = vmatpush.bf16.msrb.mxu0 %v11526_v4 }
 0x6a2   : > { %v14544_v59 = vld [vmem:[%s15337_s11 + $0x15f4] sm:$0xf0]  ;;  %8711 = vmatmul.bf16.vlgmr.msra.gmra.mxu3 %v15515_v32 }
 0x6a3   : > { %v12293_v0 = vld [vmem:[%s15337_s11 + $0x17d8] sm:$0xf]  ;;  %v12038_v10 = vor.u32 %v14544_v59, %v12037_v57  ;;  %8729 = vmatpush.bf16.msrb.mxu1 %v11782_v6  ;;  %v8478_v57 = vpop.f32.mrf.mxu1 }
 0x6a4   : > { %v14608_v14 = vld [vmem:[%s15337_s11 + $0x17f4] sm:$0xf0]  ;;  %v8479_v4 = vadd.f32 %v8478_v57, %v8466_v16 }
 0x6a5   : > { %v11493_v17 = vld [vmem:[%s15337_s11 + $0x1198] sm:$0xf]  ;;  %v12294_v19 = vor.u32 %v14608_v14, %v12293_v0  ;;  %8742 = vmatpush.bf16.msrb.mxu2 %v12038_v10 }
 0x6a6   : > { %v14408_v2 = vld [vmem:[%s15337_s11 + $0x11b4] sm:$0xf0] }
 0x6a7   : > { %v11749_v18 = vld [vmem:[%s15337_s11 + $0x1398] sm:$0xf]  ;;  %v11494_v45 = vor.u32 %v14408_v2, %v11493_v17  ;;  %8755 = vmatpush.bf16.msrb.mxu3 %v12294_v19 }
 0x6a8   : > { %v14472_v41 = vld [vmem:[%s15337_s11 + $0x13b4] sm:$0xf0] }
 0x6a9   : > { %v12005_v21 = vld [vmem:[%s15337_s11 + $0x1598] sm:$0xf]  ;;  %v11750_v24 = vor.u32 %v14472_v41, %v11749_v18  ;;  %8717 = vmatpush.bf16.msrb.mxu0 %v11494_v45  ;;  %v8491_v45 = vpop.f32.mrf.mxu2 }
 0x6aa   : > { %v14536_v22 = vld [vmem:[%s15337_s11 + $0x15b4] sm:$0xf0] }
 0x6ab   : > { %v12261_v5 = vld [vmem:[%s15337_s11 + $0x1798] sm:$0xf]  ;;  %v12006_v43 = vor.u32 %v14536_v22, %v12005_v21  ;;  %8730 = vmatpush.bf16.msrb.mxu1 %v11750_v24 }
 0x6ac   : > { %v14600_v23 = vld [vmem:[%s15337_s11 + $0x17b4] sm:$0xf0] }
 0x6ad   : > { %v11461_v40 = vld [vmem:[%s15337_s11 + $0x1158] sm:$0xf]  ;;  %v12262_v30 = vor.u32 %v14600_v23, %v12261_v5  ;;  %8743 = vmatpush.bf16.msrb.mxu2 %v12006_v43 }
 0x6ae   : > { %v14400_v13 = vld [vmem:[%s15337_s11 + $0x1174] sm:$0xf0] }
 0x6af   : > { %v11717_v26 = vld [vmem:[%s15337_s11 + $0x1358] sm:$0xf]  ;;  %v11462_v42 = vor.u32 %v14400_v13, %v11461_v40  ;;  %8756 = vmatpush.bf16.msrb.mxu3 %v12262_v30  ;;  %v8492_v13 = vadd.f32 %v8491_v45, %v8479_v4 }
 0x6b0   : > { %v14464_v3 = vld [vmem:[%s15337_s11 + $0x1374] sm:$0xf0] }
 0x6b1   : > { %v11973_v33 = vld [vmem:[%s15337_s11 + $0x1558] sm:$0xf]  ;;  %v11718_v44 = vor.u32 %v14464_v3, %v11717_v26  ;;  %8718 = vmatpush.bf16.msrb.mxu0 %v11462_v42  ;;  %v8504_v26 = vpop.f32.mrf.mxu3 }
 0x6b2   : > { %v14528_v35 = vld [vmem:[%s15337_s11 + $0x1574] sm:$0xf0] }
 0x6b3   : > { %v12229_v36 = vld [vmem:[%s15337_s11 + $0x1758] sm:$0xf]  ;;  %v11974_v52 = vor.u32 %v14528_v35, %v11973_v33  ;;  %8731 = vmatpush.bf16.msrb.mxu1 %v11718_v44  ;;  %v8467_v33 = vpop.f32.mrf.mxu0 }
 0x6b4   : > { %v14592_v51 = vld [vmem:[%s15337_s11 + $0x1774] sm:$0xf0] }
 0x6b5   : > { %v11429_v58 = vld [vmem:[%s15337_s11 + $0x1118] sm:$0xf]  ;;  %v12230_v53 = vor.u32 %v14592_v51, %v12229_v36  ;;  %8744 = vmatpush.bf16.msrb.mxu2 %v11974_v52  ;;  %v8480_v36 = vpop.f32.mrf.mxu1  ;;  %v17507_v51 = vadd.f32 %v8504_v26, %v8492_v13 }
 0x6b6   : > { %v14392_v62 = vld [vmem:[%s15337_s11 + $0x1134] sm:$0xf0] }
 0x6b7   : > { %v11685_v56 = vld [vmem:[%s15337_s11 + $0x1318] sm:$0xf]  ;;  %v11430_v9 = vor.u32 %v14392_v62, %v11429_v58  ;;  %8757 = vmatpush.bf16.msrb.mxu3 %v12230_v53 }
 0x6b8   : > { %v14456_v54 = vld [vmem:[%s15337_s11 + $0x1334] sm:$0xf0] }
 0x6b9   : > { %v11941_v55 = vld [vmem:[%s15337_s11 + $0x1518] sm:$0xf]  ;;  %v11686_v59 = vor.u32 %v14456_v54, %v11685_v56  ;;  %8719 = vmatpush.bf16.msrb.mxu0 %v11430_v9 }
 0x6ba   : > { %v14520_v50 = vld [vmem:[%s15337_s11 + $0x1534] sm:$0xf0] }
 0x6bb   : > { %v12197_v37 = vld [vmem:[%s15337_s11 + $0x1718] sm:$0xf]  ;;  %v11942_v61 = vor.u32 %v14520_v50, %v11941_v55  ;;  %8732 = vmatpush.bf16.msrb.mxu1 %v11686_v59 }
 0x6bc   : > { %v14584_v7 = vld [vmem:[%s15337_s11 + $0x1734] sm:$0xf0] }
 0x6bd   : > { %v11397_v63 = vld [vmem:[%s15337_s11 + $0x10d8] sm:$0xf]  ;;  %v12198_v1 = vor.u32 %v14584_v7, %v12197_v37  ;;  %8745 = vmatpush.bf16.msrb.mxu2 %v11942_v61 }
 0x6be   : > { %v14384_v0 = vld [vmem:[%s15337_s11 + $0x10f4] sm:$0xf0] }
 0x6bf   : > { %v11653_v14 = vld [vmem:[%s15337_s11 + $0x12d8] sm:$0xf]  ;;  %v11398_v18 = vor.u32 %v14384_v0, %v11397_v63  ;;  %8758 = vmatpush.bf16.msrb.mxu3 %v12198_v1 }
 0x6c0   : > { %v14448_v6 = vld [vmem:[%s15337_s11 + $0x12f4] sm:$0xf0] }
 0x6c1   : > { %v11909_v10 = vld [vmem:[%s15337_s11 + $0x14d8] sm:$0xf]  ;;  %v11654_v19 = vor.u32 %v14448_v6, %v11653_v14  ;;  %8720 = vmatpush.bf16.msrb.mxu0 %v11398_v18  ;;  %v8493_v6 = vpop.f32.mrf.mxu2 }
 0x6c2   : > { %v14512_v20 = vld [vmem:[%s15337_s11 + $0x14f4] sm:$0xf0] }
 0x6c3   : > { %v12165_v17 = vld [vmem:[%s15337_s11 + $0x16d8] sm:$0xf]  ;;  %v11910_v41 = vor.u32 %v14512_v20, %v11909_v10  ;;  %8733 = vmatpush.bf16.msrb.mxu1 %v11654_v19 }
 0x6c4   : > { %v14576_v2 = vld [vmem:[%s15337_s11 + $0x16f4] sm:$0xf0] }
 0x6c5   : > { %v11365_v21 = vld [vmem:[%s15337_s11 + $0x1098] sm:$0xf]  ;;  %v12166_v23 = vor.u32 %v14576_v2, %v12165_v17  ;;  %8746 = vmatpush.bf16.msrb.mxu2 %v11910_v41  ;;  %v8506_v2 = vpop.f32.mrf.mxu3 }
 0x6c6   : > { %v14376_v22 = vld [vmem:[%s15337_s11 + $0x10b4] sm:$0xf0] }
 0x6c7   : > { %v11621_v5 = vld [vmem:[%s15337_s11 + $0x1298] sm:$0xf]  ;;  %v11366_v35 = vor.u32 %v14376_v22, %v11365_v21  ;;  %8759 = vmatpush.bf16.msrb.mxu3 %v12166_v23 }
 0x6c8   : > { %v14440_v24 = vld [vmem:[%s15337_s11 + $0x12b4] sm:$0xf0] }
 0x6c9   : > { %v11877_v43 = vld [vmem:[%s15337_s11 + $0x1498] sm:$0xf]  ;;  %v11622_v42 = vor.u32 %v14440_v24, %v11621_v5  ;;  %8721 = vmatpush.bf16.msrb.mxu0 %v11366_v35 }
 0x6ca   : > { %v14504_v40 = vld [vmem:[%s15337_s11 + $0x14b4] sm:$0xf0] }
 0x6cb   : > { %v12133_v30 = vld [vmem:[%s15337_s11 + $0x1698] sm:$0xf]  ;;  %v11878_v44 = vor.u32 %v14504_v40, %v11877_v43  ;;  %8734 = vmatpush.bf16.msrb.mxu1 %v11622_v42 }
 0x6cc   : > { %v14568_v3 = vld [vmem:[%s15337_s11 + $0x16b4] sm:$0xf0] }
 0x6cd   : > { %v11333_v52 = vld [vmem:[%s15337_s11 + $0x1058] sm:$0xf]  ;;  %v12134_v56 = vor.u32 %v14568_v3, %v12133_v30  ;;  %8747 = vmatpush.bf16.msrb.mxu2 %v11878_v44 }
 0x6ce   : > { %v14368_v58 = vld [vmem:[%s15337_s11 + $0x1074] sm:$0xf0] }
 0x6cf   : > { %v11589_v62 = vld [vmem:[%s15337_s11 + $0x1258] sm:$0xf]  ;;  %v11334_v37 = vor.u32 %v14368_v58, %v11333_v52  ;;  %8760 = vmatpush.bf16.msrb.mxu3 %v12134_v56 }
 0x6d0   : > { %v14432_v53 = vld [vmem:[%s15337_s11 + $0x1274] sm:$0xf0] }
 0x6d1   : > { %v11845_v54 = vld [vmem:[%s15337_s11 + $0x1458] sm:$0xf]  ;;  %v11590_v9 = vor.u32 %v14432_v53, %v11589_v62  ;;  %8722 = vmatpush.bf16.msrb.mxu0 %v11334_v37 }
 0x6d2   : > { %v14496_v55 = vld [vmem:[%s15337_s11 + $0x1474] sm:$0xf0] }
 0x6d3   : > { %v12101_v50 = vld [vmem:[%s15337_s11 + $0x1658] sm:$0xf]  ;;  %v11846_v57 = vor.u32 %v14496_v55, %v11845_v54  ;;  %8735 = vmatpush.bf16.msrb.mxu1 %v11590_v9 }
 0x6d4   : > { %v14560_v60 = vld [vmem:[%s15337_s11 + $0x1674] sm:$0xf0] }
 0x6d5   : > { %v11301_v7 = vld [vmem:[%s15337_s11 + $0x1018] sm:$0xf]  ;;  %v12102_v0 = vor.u32 %v14560_v60, %v12101_v50  ;;  %8748 = vmatpush.bf16.msrb.mxu2 %v11846_v57 }
 0x6d6   : > { %v14360_v16 = vld [vmem:[%s15337_s11 + $0x1034] sm:$0xf0] }
 0x6d7   : > { %v11557_v59 = vld [vmem:[%s15337_s11 + $0x1218] sm:$0xf]  ;;  %v11302_v18 = vor.u32 %v14360_v16, %v11301_v7  ;;  %8761 = vmatpush.bf16.msrb.mxu3 %v12102_v0 }
 0x6d8   : > { %v14424_v61 = vld [vmem:[%s15337_s11 + $0x1234] sm:$0xf0] }
 0x6d9   : > { %v11813_v63 = vld [vmem:[%s15337_s11 + $0x1418] sm:$0xf]  ;;  %v11558_v22 = vor.u32 %v14424_v61, %v11557_v59  ;;  %8723 = vmatpush.bf16.msrb.mxu0 %v11302_v18 }
 0x6da   : > { %v14488_v14 = vld [vmem:[%s15337_s11 + $0x1434] sm:$0xf0] }
 0x6db   : > { %v12069_v1 = vld [vmem:[%s15337_s11 + $0x1618] sm:$0xf]  ;;  %v11814_v5 = vor.u32 %v14488_v14, %v11813_v63  ;;  %8736 = vmatpush.bf16.msrb.mxu1 %v11558_v22 }
 0x6dc   : > { %v14552_v4 = vld [vmem:[%s15337_s11 + $0x1634] sm:$0xf0]  ;;  %8724 = vmatmul.bf16.vlgmr.msrb.gmra.mxu0 %v15587_v8 }
 0x6dd   : > { %v12549_v10 = vld [vmem:[%s15337_s11 + $0x19d8] sm:$0xf]  ;;  %v12070_v24 = vor.u32 %v14552_v4, %v12069_v1  ;;  %8749 = vmatpush.bf16.msrb.mxu2 %v11814_v5 }
 0x6de   : > { %v14672_v20 = vld [vmem:[%s15337_s11 + $0x19f4] sm:$0xf0]  ;;  %8737 = vmatmul.bf16.vlgmr.msrb.gmra.mxu1 %v15593_v12 }
 0x6df   : > { %v12805_v17 = vld [vmem:[%s15337_s11 + $0x1bd8] sm:$0xf]  ;;  %v12550_v43 = vor.u32 %v14672_v20, %v12549_v10  ;;  %8762 = vmatpush.bf16.msrb.mxu3 %v12070_v24  ;;  %v8517_v20 = vpop.f32.mrf.mxu0 }
 0x6e0   : > { %v14736_v19 = vld [vmem:[%s15337_s11 + $0x1bf4] sm:$0xf0]  ;;  %8750 = vmatmul.bf16.vlgmr.msrb.gmra.mxu2 %v15591_v11  ;;  %v8518_v18 = vadd.f32 %v8517_v20, %v17507_v51 }
 0x6e1   : > { %v13061_v41 = vld [vmem:[%s15337_s11 + $0x1dd8] sm:$0xf]  ;;  %v12806_v40 = vor.u32 %v14736_v19, %v12805_v17  ;;  %8768 = vmatpush.bf16.msra.mxu0 %v12550_v43 }
 0x6e2   : > { %v14800_v21 = vld [vmem:[%s15337_s11 + $0x1df4] sm:$0xf0]  ;;  %8763 = vmatmul.bf16.vlgmr.msrb.gmra.mxu3 %v15596_v15 }
 0x6e3   : > { %v13317_v23 = vld [vmem:[%s15337_s11 + $0x1fd8] sm:$0xf]  ;;  %v13062_v13 = vor.u32 %v14800_v21, %v13061_v41  ;;  %8781 = vmatpush.bf16.msra.mxu1 %v12806_v40  ;;  %v8530_v41 = vpop.f32.mrf.mxu1 }
 0x6e4   : > { %v14864_v45 = vld [vmem:[%s15337_s11 + $0x1ff4] sm:$0xf0]  ;;  %v8531_v43 = vadd.f32 %v8530_v41, %v8518_v18 }
 0x6e5   : > { %v12517_v26 = vld [vmem:[%s15337_s11 + $0x1998] sm:$0xf]  ;;  %v13318_v33 = vor.u32 %v14864_v45, %v13317_v23  ;;  %8794 = vmatpush.bf16.msra.mxu2 %v13062_v13 }
 0x6e6   : > { %v14664_v30 = vld [vmem:[%s15337_s11 + $0x19b4] sm:$0xf0] }
 0x6e7   : > { %v12773_v3 = vld [vmem:[%s15337_s11 + $0x1b98] sm:$0xf]  ;;  %v12518_v58 = vor.u32 %v14664_v30, %v12517_v26  ;;  %8807 = vmatpush.bf16.msra.mxu3 %v13318_v33 }
 0x6e8   : > { %v14728_v35 = vld [vmem:[%s15337_s11 + $0x1bb4] sm:$0xf0] }
 0x6e9   : > { %v13029_v36 = vld [vmem:[%s15337_s11 + $0x1d98] sm:$0xf]  ;;  %v12774_v62 = vor.u32 %v14728_v35, %v12773_v3  ;;  %8769 = vmatpush.bf16.msra.mxu0 %v12518_v58  ;;  %v8543_v58 = vpop.f32.mrf.mxu2 }
 0x6ea   : > { %v14792_v42 = vld [vmem:[%s15337_s11 + $0x1db4] sm:$0xf0] }
 0x6eb   : > { %v13285_v44 = vld [vmem:[%s15337_s11 + $0x1f98] sm:$0xf]  ;;  %v13030_v56 = vor.u32 %v14792_v42, %v13029_v36  ;;  %8782 = vmatpush.bf16.msra.mxu1 %v12774_v62 }
 0x6ec   : > { %v14856_v52 = vld [vmem:[%s15337_s11 + $0x1fb4] sm:$0xf0] }
 0x6ed   : > { %v12485_v53 = vld [vmem:[%s15337_s11 + $0x1958] sm:$0xf]  ;;  %v13286_v50 = vor.u32 %v14856_v52, %v13285_v44  ;;  %8795 = vmatpush.bf16.msra.mxu2 %v13030_v56 }
 0x6ee   : > { %v14656_v54 = vld [vmem:[%s15337_s11 + $0x1974] sm:$0xf0] }
 0x6ef   : > { %v12741_v55 = vld [vmem:[%s15337_s11 + $0x1b58] sm:$0xf]  ;;  %v12486_v57 = vor.u32 %v14656_v54, %v12485_v53  ;;  %8808 = vmatpush.bf16.msra.mxu3 %v13286_v50  ;;  %v8544_v54 = vadd.f32 %v8543_v58, %v8531_v43  ;;  %v9735_v58 = vld [vmem:[%s15337_s11 + $0x3f8] sm:$0xf0] }
 0x6f0   : > { %v14720_v60 = vld [vmem:[%s15337_s11 + $0x1b74] sm:$0xf0] }
 0x6f1   : > { %v12997_v37 = vld [vmem:[%s15337_s11 + $0x1d58] sm:$0xf]  ;;  %v12742_v59 = vor.u32 %v14720_v60, %v12741_v55  ;;  %8770 = vmatpush.bf16.msra.mxu0 %v12486_v57  ;;  %v8556_v55 = vpop.f32.mrf.mxu3 }
 0x6f2   : > { %v14784_v7 = vld [vmem:[%s15337_s11 + $0x1d74] sm:$0xf0] }
 0x6f3   : > { %v13253_v16 = vld [vmem:[%s15337_s11 + $0x1f58] sm:$0xf]  ;;  %v12998_v61 = vor.u32 %v14784_v7, %v12997_v37  ;;  %8783 = vmatpush.bf16.msra.mxu1 %v12742_v59  ;;  %v8519_v37 = vpop.f32.mrf.mxu0 }
 0x6f4   : > { %v14848_v9 = vld [vmem:[%s15337_s11 + $0x1f74] sm:$0xf0] }
 0x6f5   : > { %v12453_v63 = vld [vmem:[%s15337_s11 + $0x1918] sm:$0xf]  ;;  %v13254_v1 = vor.u32 %v14848_v9, %v13253_v16  ;;  %8796 = vmatpush.bf16.msra.mxu2 %v12998_v61  ;;  %v8532_v16 = vpop.f32.mrf.mxu1  ;;  %v17578_v9 = vadd.f32 %v8556_v55, %v8544_v54 }
 0x6f6   : > { %v14648_v0 = vld [vmem:[%s15337_s11 + $0x1934] sm:$0xf0]  ;;  %v13892_v16 = vld [vmem:[%s15337_s11 + $0x19c] sm:$0xf] }
 0x6f7   : > { %v12709_v14 = vld [vmem:[%s15337_s11 + $0x1b18] sm:$0xf]  ;;  %v12454_v19 = vor.u32 %v14648_v0, %v12453_v63  ;;  %8809 = vmatpush.bf16.msra.mxu3 %v13254_v1 }
 0x6f8   : > { %v14712_v4 = vld [vmem:[%s15337_s11 + $0x1b34] sm:$0xf0] }
 0x6f9   : > { %v12965_v6 = vld [vmem:[%s15337_s11 + $0x1d18] sm:$0xf]  ;;  %v12710_v21 = vor.u32 %v14712_v4, %v12709_v14  ;;  %8771 = vmatpush.bf16.msra.mxu0 %v12454_v19 }
 0x6fa   : > { %v14776_v10 = vld [vmem:[%s15337_s11 + $0x1d34] sm:$0xf0] }
 0x6fb   : > { %v13221_v17 = vld [vmem:[%s15337_s11 + $0x1f18] sm:$0xf]  ;;  %v12966_v22 = vor.u32 %v14776_v10, %v12965_v6  ;;  %8784 = vmatpush.bf16.msra.mxu1 %v12710_v21 }
 0x6fc   : > { %v14840_v2 = vld [vmem:[%s15337_s11 + $0x1f34] sm:$0xf0] }
 0x6fd   : > { %v12421_v5 = vld [vmem:[%s15337_s11 + $0x18d8] sm:$0xf]  ;;  %v13222_v24 = vor.u32 %v14840_v2, %v13221_v17  ;;  %8797 = vmatpush.bf16.msra.mxu2 %v12966_v22 }
 0x6fe   : > { %v14640_v23 = vld [vmem:[%s15337_s11 + $0x18f4] sm:$0xf0] }
 0x6ff   : > { %v12677_v45 = vld [vmem:[%s15337_s11 + $0x1ad8] sm:$0xf]  ;;  %v12422_v3 = vor.u32 %v14640_v23, %v12421_v5  ;;  %8810 = vmatpush.bf16.msra.mxu3 %v13222_v24 }
 0x700   : > { %v14704_v40 = vld [vmem:[%s15337_s11 + $0x1af4] sm:$0xf0] }
 0x701   : > { %v12933_v13 = vld [vmem:[%s15337_s11 + $0x1cd8] sm:$0xf]  ;;  %v12678_v33 = vor.u32 %v14704_v40, %v12677_v45  ;;  %8772 = vmatpush.bf16.msra.mxu0 %v12422_v3  ;;  %v8545_v40 = vpop.f32.mrf.mxu2 }
 0x702   : > { %v14768_v51 = vld [vmem:[%s15337_s11 + $0x1cf4] sm:$0xf0]  ;;  %v13876_v40 = vld [vmem:[%s15337_s11 + $0x11c] sm:$0xf] }
 0x703   : > { %v13189_v26 = vld [vmem:[%s15337_s11 + $0x1ed8] sm:$0xf]  ;;  %v12934_v35 = vor.u32 %v14768_v51, %v12933_v13  ;;  %8785 = vmatpush.bf16.msra.mxu1 %v12678_v33 }
 0x704   : > { %v14832_v30 = vld [vmem:[%s15337_s11 + $0x1ef4] sm:$0xf0] }
 0x705   : > { %v12389_v36 = vld [vmem:[%s15337_s11 + $0x1898] sm:$0xf]  ;;  %v13190_v52 = vor.u32 %v14832_v30, %v13189_v26  ;;  %8798 = vmatpush.bf16.msra.mxu2 %v12934_v35  ;;  %v8558_v30 = vpop.f32.mrf.mxu3  ;;  %v13900_v35 = vld [vmem:[%s15337_s11 + $0x1dc] sm:$0xf] }
 0x706   : > { %v14632_v42 = vld [vmem:[%s15337_s11 + $0x18b4] sm:$0xf0]  ;;  %v9639_v30 = vld [vmem:[%s15337_s11 + $0x338] sm:$0xf0] }
 0x707   : > { %v12645_v44 = vld [vmem:[%s15337_s11 + $0x1a98] sm:$0xf]  ;;  %v12390_v7 = vor.u32 %v14632_v42, %v12389_v36  ;;  %8811 = vmatpush.bf16.msra.mxu3 %v13190_v52  ;;  %v9479_v36 = vld [vmem:[%s15337_s11 + $0x1f8] sm:$0xf0] }
 0x708   : > { %v14696_v62 = vld [vmem:[%s15337_s11 + $0x1ab4] sm:$0xf0]  ;;  %v13964_v52 = vld [vmem:[%s15337_s11 + $0x3dc] sm:$0xf]  ;;  %v9482_v54 = vor.u32 %v13900_v35, %v9479_v36  ;;  %v8582_v35 = vpop.f32.mrf.mxu1 }
 0x709   : > { %v12901_v56 = vld [vmem:[%s15337_s11 + $0x1c98] sm:$0xf]  ;;  %v12646_v57 = vor.u32 %v14696_v62, %v12645_v44  ;;  %8773 = vmatpush.bf16.msra.mxu0 %v12390_v7  ;;  %v9738_v37 = vor.u32 %v13964_v52, %v9735_v58 }
 0x70a   : > { %v14760_v53 = vld [vmem:[%s15337_s11 + $0x1cb4] sm:$0xf0] }
 0x70b   : > { %v13157_v50 = vld [vmem:[%s15337_s11 + $0x1e98] sm:$0xf]  ;;  %v12902_v59 = vor.u32 %v14760_v53, %v12901_v56  ;;  %8786 = vmatpush.bf16.msra.mxu1 %v12646_v57  ;;  %v9447_v57 = vld [vmem:[%s15337_s11 + $0x1b8] sm:$0xf0] }
 0x70c   : > { %v14824_v60 = vld [vmem:[%s15337_s11 + $0x1eb4] sm:$0xf0] }
 0x70d   : > { %v12357_v61 = vld [vmem:[%s15337_s11 + $0x1858] sm:$0xf]  ;;  %v13158_v14 = vor.u32 %v14824_v60, %v13157_v50  ;;  %8799 = vmatpush.bf16.msra.mxu2 %v12902_v59  ;;  %v13956_v59 = vld [vmem:[%s15337_s11 + $0x39c] sm:$0xf] }
 0x70e   : > { %v14624_v63 = vld [vmem:[%s15337_s11 + $0x1874] sm:$0xf0] }
 0x70f   : > { %v12613_v0 = vld [vmem:[%s15337_s11 + $0x1a58] sm:$0xf]  ;;  %v12358_v17 = vor.u32 %v14624_v63, %v12357_v61  ;;  %8812 = vmatpush.bf16.msra.mxu3 %v13158_v14  ;;  %v9703_v61 = vld [vmem:[%s15337_s11 + $0x3b8] sm:$0xf0]  ;;  %v9450_v14 = vor.u32 %v13892_v16, %v9447_v57 }
 0x710   : > { %v14688_v1 = vld [vmem:[%s15337_s11 + $0x1a74] sm:$0xf0] }
 0x711   : > { %v12869_v4 = vld [vmem:[%s15337_s11 + $0x1c58] sm:$0xf]  ;;  %v12614_v19 = vor.u32 %v14688_v1, %v12613_v0  ;;  %8774 = vmatpush.bf16.msra.mxu0 %v12358_v17  ;;  %v13884_v17 = vld [vmem:[%s15337_s11 + $0x15c] sm:$0xf] }
 0x712   : > { %v14752_v6 = vld [vmem:[%s15337_s11 + $0x1c74] sm:$0xf0] }
 0x713   : > { %v13125_v10 = vld [vmem:[%s15337_s11 + $0x1e58] sm:$0xf]  ;;  %v12870_v41 = vor.u32 %v14752_v6, %v12869_v4  ;;  %8787 = vmatpush.bf16.msra.mxu1 %v12614_v19  ;;  %v9671_v19 = vld [vmem:[%s15337_s11 + $0x378] sm:$0xf0] }
 0x714   : > { %v14816_v20 = vld [vmem:[%s15337_s11 + $0x1e74] sm:$0xf0] }
 0x715   : > { %v12325_v2 = vld [vmem:[%s15337_s11 + $0x1818] sm:$0xf]  ;;  %v13126_v23 = vor.u32 %v14816_v20, %v13125_v10  ;;  %8800 = vmatpush.bf16.msra.mxu2 %v12870_v41  ;;  %v9706_v10 = vor.u32 %v13956_v59, %v9703_v61 }
 0x716   : > { %v14616_v18 = vld [vmem:[%s15337_s11 + $0x1834] sm:$0xf0] }
 0x717   : > { %v12581_v21 = vld [vmem:[%s15337_s11 + $0x1a18] sm:$0xf]  ;;  %v12326_v3 = vor.u32 %v14616_v18, %v12325_v2  ;;  %8813 = vmatpush.bf16.msra.mxu3 %v13126_v23  ;;  %v9415_v2 = vld [vmem:[%s15337_s11 + $0x178] sm:$0xf0] }
 0x718   : > { %v14680_v22 = vld [vmem:[%s15337_s11 + $0x1a34] sm:$0xf0]  ;;  %v13948_v18 = vld [vmem:[%s15337_s11 + $0x35c] sm:$0xf] }
 0x719   : > { %v12837_v5 = vld [vmem:[%s15337_s11 + $0x1c18] sm:$0xf]  ;;  %v12582_v42 = vor.u32 %v14680_v22, %v12581_v21  ;;  %8775 = vmatpush.bf16.msra.mxu0 %v12326_v3  ;;  %v9418_v22 = vor.u32 %v13884_v17, %v9415_v2 }
 0x71a   : > { %v14744_v45 = vld [vmem:[%s15337_s11 + $0x1c34] sm:$0xf0] }
 0x71b   : > { %v13093_v24 = vld [vmem:[%s15337_s11 + $0x1e18] sm:$0xf]  ;;  %v12838_v44 = vor.u32 %v14744_v45, %v12837_v5  ;;  %8788 = vmatpush.bf16.msra.mxu1 %v12582_v42 }
 0x71c   : > { %v14808_v43 = vld [vmem:[%s15337_s11 + $0x1e34] sm:$0xf0]  ;;  %8776 = vmatmul.bf16.vlgmr.msra.gmra.mxu0 %v15653_v46 }
 0x71d   : > { %v13573_v13 = vld [vmem:[%s15337_s11 + $0x21d8] sm:$0xf]  ;;  %v13094_v62 = vor.u32 %v14808_v43, %v13093_v24  ;;  %8801 = vmatpush.bf16.msra.mxu2 %v12838_v44  ;;  %v9674_v24 = vor.u32 %v13948_v18, %v9671_v19  ;;  %v8584_v18 = vpop.f32.mrf.mxu1 }
 0x71e   : > { %v14928_v51 = vld [vmem:[%s15337_s11 + $0x21f4] sm:$0xf0]  ;;  %8789 = vmatmul.bf16.vlgmr.msra.gmra.mxu1 %v15657_v48  ;;  %v10215_v18 = vld [vmem:[%s15337_s11 + $0x7b8] sm:$0xf0] }
 0x71f   : > { %v13829_v26 = vld [vmem:[%s15337_s11 + $0x23d8] sm:$0xf]  ;;  %v13574_v56 = vor.u32 %v14928_v51, %v13573_v13  ;;  %8814 = vmatpush.bf16.msra.mxu3 %v13094_v62  ;;  %v9383_v13 = vld [vmem:[%s15337_s11 + $0x138] sm:$0xf0]  ;;  %v8569_v51 = vpop.f32.mrf.mxu0 }
 0x720   : > { %v14992_v33 = vld [vmem:[%s15337_s11 + $0x23f4] sm:$0xf0]  ;;  %8802 = vmatmul.bf16.vlgmr.msra.gmra.mxu2 %v15655_v47  ;;  %v8570_v3 = vadd.f32 %v8569_v51, %v17578_v9  ;;  %v9386_v42 = vor.u32 %v13876_v40, %v9383_v13  ;;  %v9351_v9 = vld [vmem:[%s15337_s11 + $0xf8] sm:$0xf0] }
 0x721   : > { %v13830_v53 = vor.u32 %v14992_v33, %v13829_v26  ;;  %v13541_v55 = vld [vmem:[%s15337_s11 + $0x2198] sm:$0xf]  ;;  %8820 = vmatpush.bf16.msrb.mxu0 %v13574_v56  ;;  %8846 = vmatpush.bf16.msrb.mxu2 %v9482_v54  ;;  %v13940_v26 = vld [vmem:[%s15337_s11 + $0x31c] sm:$0xf] }
 0x722   : > { %v14920_v50 = vld [vmem:[%s15337_s11 + $0x21b4] sm:$0xf0]  ;;  %8815 = vmatmul.bf16.vlgmr.msra.gmra.mxu3 %v15659_v49  ;;  %v9642_v62 = vor.u32 %v13940_v26, %v9639_v30  ;;  %v8583_v56 = vadd.f32 %v8582_v35, %v8570_v3  ;;  %v13868_v54 = vld [vmem:[%s15337_s11 + $0xdc] sm:$0xf] }
 0x723   : > { %v13797_v60 = vld [vmem:[%s15337_s11 + $0x2398] sm:$0xf]  ;;  %v13542_v63 = vor.u32 %v14920_v50, %v13541_v55  ;;  %8833 = vmatpush.bf16.msrb.mxu1 %v13830_v53  ;;  %8859 = vmatpush.bf16.msrb.mxu3 %v9738_v37  ;;  %v13932_v55 = vld [vmem:[%s15337_s11 + $0x2dc] sm:$0xf] }
 0x724   : > { %v14984_v7 = vld [vmem:[%s15337_s11 + $0x23b4] sm:$0xf0]  ;;  %v9607_v50 = vld [vmem:[%s15337_s11 + $0x2f8] sm:$0xf0] }
 0x725   : > { %v13798_v0 = vor.u32 %v14984_v7, %v13797_v60  ;;  %v13509_v1 = vld [vmem:[%s15337_s11 + $0x2158] sm:$0xf]  ;;  %8821 = vmatpush.bf16.msrb.mxu0 %v13542_v63  ;;  %8847 = vmatpush.bf16.msrb.mxu2 %v9450_v14  ;;  %v9354_v7 = vor.u32 %v13868_v54, %v9351_v9  ;;  %v9610_v61 = vor.u32 %v13932_v55, %v9607_v50  ;;  %v8595_v63 = vpop.f32.mrf.mxu2  ;;  %v13860_v14 = vld [vmem:[%s15337_s11 + $0x9c] sm:$0xf] }
 0x726   : > { %v14912_v4 = vld [vmem:[%s15337_s11 + $0x2174] sm:$0xf0]  ;;  %v9287_v40 = vld [vmem:[%s15337_s11 + $0x78] sm:$0xf0] }
 0x727   : > { %v13765_v6 = vld [vmem:[%s15337_s11 + $0x2358] sm:$0xf]  ;;  %v13510_v41 = vor.u32 %v14912_v4, %v13509_v1  ;;  %8834 = vmatpush.bf16.msrb.mxu1 %v13798_v0  ;;  %8860 = vmatpush.bf16.msrb.mxu3 %v9706_v10  ;;  %v9319_v1 = vld [vmem:[%s15337_s11 + $0xb8] sm:$0xf0]  ;;  %v8596_v4 = vadd.f32 %v8595_v63, %v8583_v56  ;;  %v8571_v17 = vpop.f32.mrf.mxu0 }
 0x728   : > { %v14976_v20 = vld [vmem:[%s15337_s11 + $0x2374] sm:$0xf0]  ;;  %v13924_v10 = vld [vmem:[%s15337_s11 + $0x29c] sm:$0xf] }
 0x729   : > { %v13766_v21 = vor.u32 %v14976_v20, %v13765_v6  ;;  %v13477_v5 = vld [vmem:[%s15337_s11 + $0x2118] sm:$0xf]  ;;  %8822 = vmatpush.bf16.msrb.mxu0 %v13510_v41  ;;  %8848 = vmatpush.bf16.msrb.mxu2 %v9418_v22  ;;  %v8608_v6 = vpop.f32.mrf.mxu3  ;;  %v9575_v20 = vld [vmem:[%s15337_s11 + $0x2b8] sm:$0xf0] }
 0x72a   : > { %v14904_v23 = vld [vmem:[%s15337_s11 + $0x2134] sm:$0xf0]  ;;  %v8609_v19 = vadd.f32 %v8608_v6, %v8596_v4  ;;  %v13916_v51 = vld [vmem:[%s15337_s11 + $0x25c] sm:$0xf] }
 0x72b   : > { %v13733_v45 = vld [vmem:[%s15337_s11 + $0x2318] sm:$0xf]  ;;  %v13478_v33 = vor.u32 %v14904_v23, %v13477_v5  ;;  %8835 = vmatpush.bf16.msrb.mxu1 %v13766_v21  ;;  %8861 = vmatpush.bf16.msrb.mxu3 %v9674_v24  ;;  %v9322_v21 = vor.u32 %v13860_v14, %v9319_v1  ;;  %v9543_v26 = vld [vmem:[%s15337_s11 + $0x278] sm:$0xf0] }
 0x72c   : > { %v14968_v43 = vld [vmem:[%s15337_s11 + $0x2334] sm:$0xf0]  ;;  %v9091_v13 = vrot.slane %v8609_v19, 6  ;;  %v9255_v56 = vld [vmem:[%s15337_s11 + $0x38] sm:$0xf0] }
 0x72d   : > { %v13734_v36 = vor.u32 %v14968_v43, %v13733_v45  ;;  %v13445_v44 = vld [vmem:[%s15337_s11 + $0x20d8] sm:$0xf]  ;;  %8823 = vmatpush.bf16.msrb.mxu0 %v13478_v33  ;;  %8849 = vmatpush.bf16.msrb.mxu2 %v9386_v42  ;;  %v9578_v45 = vor.u32 %v13924_v10, %v9575_v20  ;;  %v13852_v43 = vld [vmem:[%s15337_s11 + $0x5c] sm:$0xf] }
 0x72e   : > { %v14896_v52 = vld [vmem:[%s15337_s11 + $0x20f4] sm:$0xf0]  ;;  %v17661_v35 = vsel %vm9094_vm0, %v17349_v39, %v9091_v13  ;;  %v9290_v42 = vor.u32 %v13852_v43, %v9287_v40  ;;  %v9511_v54 = vld [vmem:[%s15337_s11 + $0x238] sm:$0xf0]  ;;  %v8597_v39 = vpop.f32.mrf.mxu2 }
 0x72f   : > { %v13701_v58 = vld [vmem:[%s15337_s11 + $0x22d8] sm:$0xf]  ;;  %v13446_v60 = vor.u32 %v14896_v52, %v13445_v44  ;;  %8836 = vmatpush.bf16.msrb.mxu1 %v13734_v36  ;;  %8862 = vmatpush.bf16.msrb.mxu3 %v9642_v62  ;;  %v9546_v62 = vor.u32 %v13916_v51, %v9543_v26  ;;  %v14028_v9 = vld [vmem:[%s15337_s11 + $0x5dc] sm:$0xf] }
 0x730   : > { %v14960_v53 = vld [vmem:[%s15337_s11 + $0x22f4] sm:$0xf0]  ;;  %v9991_v55 = vld [vmem:[%s15337_s11 + $0x5f8] sm:$0xf0] }
 0x731   : > { %v13702_v37 = vor.u32 %v14960_v53, %v13701_v58  ;;  %v13413_v16 = vld [vmem:[%s15337_s11 + $0x2098] sm:$0xf]  ;;  %8824 = vmatpush.bf16.msrb.mxu0 %v13446_v60  ;;  %8850 = vmatpush.bf16.msrb.mxu2 %v9354_v7  ;;  %v13844_v58 = vld [vmem:[%s15337_s11 + $0x1c] sm:$0xf]  ;;  %v8610_v60 = vpop.f32.mrf.mxu3  ;;  %v9994_v1 = vor.u32 %v14028_v9, %v9991_v55 }
 0x732   : > { %v14888_v57 = vld [vmem:[%s15337_s11 + $0x20b4] sm:$0xf0]  ;;  %v13908_v53 = vld [vmem:[%s15337_s11 + $0x21c] sm:$0xf] }
 0x733   : > { %v13669_v59 = vld [vmem:[%s15337_s11 + $0x2298] sm:$0xf]  ;;  %v13414_v2 = vor.u32 %v14888_v57, %v13413_v16  ;;  %8837 = vmatpush.bf16.msrb.mxu1 %v13702_v37  ;;  %8863 = vmatpush.bf16.msrb.mxu3 %v9610_v61  ;;  %v14092_v50 = vld [vmem:[%s15337_s11 + $0x7dc] sm:$0xf]  ;;  %v9258_v61 = vor.u32 %v13844_v58, %v9255_v56  ;;  %v9514_v14 = vor.u32 %v13908_v53, %v9511_v54  ;;  %v15067_v54 = vld [vmem:[%s15345_s9] sm:$0xff] }
 0x734   : > { %v14952_v0 = vld [vmem:[%s15337_s11 + $0x22b4] sm:$0xf0]  ;;  %v10247_v7 = vld [vmem:[%s15337_s11 + $0x7f8] sm:$0xf0]  ;;  %v1396_v39 = vperm.slane %v15067_v54, 6 }
 0x735   : > { %v13670_v41 = vor.u32 %v14952_v0, %v13669_v59  ;;  %v13381_v22 = vld [vmem:[%s15337_s11 + $0x2058] sm:$0xf]  ;;  %8825 = vmatpush.bf16.msrb.mxu0 %v13414_v2  ;;  %8851 = vmatpush.bf16.msrb.mxu2 %v9322_v21  ;;  %v14156_v16 = vld [vmem:[%s15337_s11 + $0x9dc] sm:$0xf]  ;;  %v10250_v4 = vor.u32 %v14092_v50, %v10247_v7  ;;  %v8621_v7 = vpop.f32.mrf.mxu0 }
 0x736   : > { %v14880_v5 = vld [vmem:[%s15337_s11 + $0x2074] sm:$0xf0]  ;;  %v10503_v57 = vld [vmem:[%s15337_s11 + $0x9f8] sm:$0xf0] }
 0x737   : > { %v13637_v23 = vld [vmem:[%s15337_s11 + $0x2258] sm:$0xf]  ;;  %v13382_v30 = vor.u32 %v14880_v5, %v13381_v22  ;;  %8838 = vmatpush.bf16.msrb.mxu1 %v13670_v41  ;;  %8864 = vmatpush.bf16.msrb.mxu3 %v9578_v45  ;;  %v14220_v63 = vld [vmem:[%s15337_s11 + $0xbdc] sm:$0xf]  ;;  %v10506_v6 = vor.u32 %v14156_v16, %v10503_v57 }
 0x738   : > { %v14944_v24 = vld [vmem:[%s15337_s11 + $0x2274] sm:$0xf0]  ;;  %v10759_v0 = vld [vmem:[%s15337_s11 + $0xbf8] sm:$0xf0] }
 0x739   : > { %v13349_v3 = vld [vmem:[%s15337_s11 + $0x2018] sm:$0xf]  ;;  %v13638_v36 = vor.u32 %v14944_v24, %v13637_v23  ;;  %8826 = vmatpush.bf16.msrb.mxu0 %v13382_v30  ;;  %8852 = vmatpush.bf16.msrb.mxu2 %v9290_v42  ;;  %v14020_v10 = vld [vmem:[%s15337_s11 + $0x59c] sm:$0xf]  ;;  %v10762_v2 = vor.u32 %v14220_v63, %v10759_v0  ;;  %v8622_v0 = vadd.f32 %v8621_v7, %v1396_v39 }
 0x73a   : > { %v14872_v33 = vld [vmem:[%s15337_s11 + $0x2034] sm:$0xf0]  ;;  %v9959_v20 = vld [vmem:[%s15337_s11 + $0x5b8] sm:$0xf0] }
 0x73b   : > { %v13605_v44 = vld [vmem:[%s15337_s11 + $0x2218] sm:$0xf]  ;;  %v13350_v37 = vor.u32 %v14872_v33, %v13349_v3  ;;  %8839 = vmatpush.bf16.msrb.mxu1 %v13638_v36  ;;  %8865 = vmatpush.bf16.msrb.mxu3 %v9546_v62  ;;  %v14084_v17 = vld [vmem:[%s15337_s11 + $0x79c] sm:$0xf]  ;;  %v9962_v5 = vor.u32 %v14020_v10, %v9959_v20  ;;  %v15066_v33 = vld [vmem:[#allocation1 + $0x9] sm:$0xff] }
 0x73c   : > { %v14936_v52 = vld [vmem:[%s15337_s11 + $0x2234] sm:$0xf0]  ;;  %v14148_v19 = vld [vmem:[%s15337_s11 + $0x99c] sm:$0xf]  ;;  %v10218_v23 = vor.u32 %v14084_v17, %v10215_v18 }
 0x73d   : > { %v13606_v59 = vor.u32 %v14936_v52, %v13605_v44  ;;  %8827 = vmatpush.bf16.msrb.mxu0 %v13350_v37  ;;  %v10471_v41 = vld [vmem:[%s15337_s11 + $0x9b8] sm:$0xf0]  ;;  %8853 = vmatpush.bf16.msrb.mxu2 %v9258_v61 }
 0x73e   : > { %v14212_v21 = vld [vmem:[%s15337_s11 + $0xb9c] sm:$0xf]  ;;  %v10474_v45 = vor.u32 %v14148_v19, %v10471_v41 }
 0x73f   : > { %8840 = vmatpush.bf16.msrb.mxu1 %v13606_v59  ;;  %v10727_v22 = vld [vmem:[%s15337_s11 + $0xbb8] sm:$0xf0]  ;;  %8866 = vmatpush.bf16.msrb.mxu3 %v9514_v14  ;;  %v8634_v14 = vpop.f32.mrf.mxu1 }
 0x740   : > { %v14012_v24 = vld [vmem:[%s15337_s11 + $0x55c] sm:$0xf]  ;;  %v10730_v51 = vor.u32 %v14212_v21, %v10727_v22  ;;  %8854 = vmatmul.bf16.vlgmr.msrb.gmra.mxu2 %v15461_v28 }
 0x741   : > { %8872 = vmatpush.bf16.msra.mxu0 %v9994_v1  ;;  %8898 = vmatpush.bf16.msra.mxu2 %v10506_v6  ;;  %v9927_v43 = vld [vmem:[%s15337_s11 + $0x578] sm:$0xf0] }
 0x742   : > { %v14076_v40 = vld [vmem:[%s15337_s11 + $0x75c] sm:$0xf]  ;;  %8841 = vmatmul.bf16.vlgmr.msrb.gmra.mxu1 %v15066_v33  ;;  %v9930_v44 = vor.u32 %v14012_v24, %v9927_v43  ;;  %8867 = vmatmul.bf16.vlgmr.msrb.gmra.mxu3 %v15467_v34 }
 0x743   : > { %8885 = vmatpush.bf16.msra.mxu1 %v10250_v4  ;;  %8911 = vmatpush.bf16.msra.mxu3 %v10762_v2  ;;  %v15065_v13 = vld [vmem:[#allocation1] sm:$0xff]  ;;  %v8635_v2 = vadd.f32 %v8634_v14, %v8622_v0 }
 0x744   : > { %8828 = vmatmul.bf16.vlgmr.msrb.gmra.mxu0 %v15065_v13  ;;  %v10183_v26 = vld [vmem:[%s15337_s11 + $0x778] sm:$0xf0] }
 0x745   : > { %v14140_v30 = vld [vmem:[%s15337_s11 + $0x95c] sm:$0xf]  ;;  %8873 = vmatpush.bf16.msra.mxu0 %v9962_v5  ;;  %8899 = vmatpush.bf16.msra.mxu2 %v10474_v45  ;;  %v10186_v58 = vor.u32 %v14076_v40, %v10183_v26 }
 0x746   : > { %v10439_v3 = vld [vmem:[%s15337_s11 + $0x978] sm:$0xf0] }
 0x747   : > { %v14204_v36 = vld [vmem:[%s15337_s11 + $0xb5c] sm:$0xf]  ;;  %8886 = vmatpush.bf16.msra.mxu1 %v10218_v23  ;;  %v10442_v62 = vor.u32 %v14140_v30, %v10439_v3  ;;  %8912 = vmatpush.bf16.msra.mxu3 %v10730_v51  ;;  %v8647_v23 = vpop.f32.mrf.mxu2  ;;  %v8660_v51 = vpop.f32.mrf.mxu3 }
 0x748   : > { %v10695_v42 = vld [vmem:[%s15337_s11 + $0xb78] sm:$0xf0]  ;;  %v8648_v13 = vadd.f32 %v8647_v23, %v8635_v2 }
 0x749   : > { %v14004_v52 = vld [vmem:[%s15337_s11 + $0x51c] sm:$0xf]  ;;  %v10698_v28 = vor.u32 %v14204_v36, %v10695_v42  ;;  %8874 = vmatpush.bf16.msra.mxu0 %v9930_v44  ;;  %8900 = vmatpush.bf16.msra.mxu2 %v10442_v62  ;;  %v8623_v36 = vpop.f32.mrf.mxu0 }
 0x74a   : > { %v9895_v56 = vld [vmem:[%s15337_s11 + $0x538] sm:$0xf0]  ;;  %v17720_v33 = vadd.f32 %v8660_v51, %v8648_v13 }
 0x74b   : > { %v14068_v53 = vld [vmem:[%s15337_s11 + $0x71c] sm:$0xf]  ;;  %v9898_v34 = vor.u32 %v14004_v52, %v9895_v56  ;;  %8887 = vmatpush.bf16.msra.mxu1 %v10186_v58  ;;  %8913 = vmatpush.bf16.msra.mxu3 %v10698_v28  ;;  %v8636_v56 = vpop.f32.mrf.mxu1 }
 0x74c   : > { %v10151_v9 = vld [vmem:[%s15337_s11 + $0x738] sm:$0xf0] }
 0x74d   : > { %v14132_v55 = vld [vmem:[%s15337_s11 + $0x91c] sm:$0xf]  ;;  %v10154_v16 = vor.u32 %v14068_v53, %v10151_v9  ;;  %8875 = vmatpush.bf16.msra.mxu0 %v9898_v34 }
 0x74e   : > { %v10407_v50 = vld [vmem:[%s15337_s11 + $0x938] sm:$0xf0] }
 0x74f   : > { %v14196_v60 = vld [vmem:[%s15337_s11 + $0xb1c] sm:$0xf]  ;;  %v10410_v57 = vor.u32 %v14132_v55, %v10407_v50  ;;  %8888 = vmatpush.bf16.msra.mxu1 %v10154_v16 }
 0x750   : > { %v10663_v37 = vld [vmem:[%s15337_s11 + $0xb38] sm:$0xf0] }
 0x751   : > { %v13996_v59 = vld [vmem:[%s15337_s11 + $0x4dc] sm:$0xf]  ;;  %v10666_v1 = vor.u32 %v14196_v60, %v10663_v37  ;;  %8901 = vmatpush.bf16.msra.mxu2 %v10410_v57 }
 0x752   : > { %v9863_v61 = vld [vmem:[%s15337_s11 + $0x4f8] sm:$0xf0] }
 0x753   : > { %v14060_v63 = vld [vmem:[%s15337_s11 + $0x6dc] sm:$0xf]  ;;  %v9866_v18 = vor.u32 %v13996_v59, %v9863_v61  ;;  %8914 = vmatpush.bf16.msra.mxu3 %v10666_v1  ;;  %v8649_v61 = vpop.f32.mrf.mxu2 }
 0x754   : > { %v10119_v4 = vld [vmem:[%s15337_s11 + $0x6f8] sm:$0xf0] }
 0x755   : > { %v14124_v6 = vld [vmem:[%s15337_s11 + $0x8dc] sm:$0xf]  ;;  %v10122_v19 = vor.u32 %v14060_v63, %v10119_v4  ;;  %8876 = vmatpush.bf16.msra.mxu0 %v9866_v18  ;;  %v8662_v4 = vpop.f32.mrf.mxu3 }
 0x756   : > { %v10375_v10 = vld [vmem:[%s15337_s11 + $0x8f8] sm:$0xf0] }
 0x757   : > { %v14188_v20 = vld [vmem:[%s15337_s11 + $0xadc] sm:$0xf]  ;;  %v10378_v41 = vor.u32 %v14124_v6, %v10375_v10  ;;  %8889 = vmatpush.bf16.msra.mxu1 %v10122_v19 }
 0x758   : > { %v10631_v17 = vld [vmem:[%s15337_s11 + $0xaf8] sm:$0xf0] }
 0x759   : > { %v13988_v21 = vld [vmem:[%s15337_s11 + $0x49c] sm:$0xf]  ;;  %v10634_v45 = vor.u32 %v14188_v20, %v10631_v17  ;;  %8902 = vmatpush.bf16.msra.mxu2 %v10378_v41 }
 0x75a   : > { %v9831_v22 = vld [vmem:[%s15337_s11 + $0x4b8] sm:$0xf0] }
 0x75b   : > { %v14052_v5 = vld [vmem:[%s15337_s11 + $0x69c] sm:$0xf]  ;;  %v9834_v3 = vor.u32 %v13988_v21, %v9831_v22  ;;  %8915 = vmatpush.bf16.msra.mxu3 %v10634_v45 }
 0x75c   : > { %v10087_v24 = vld [vmem:[%s15337_s11 + $0x6b8] sm:$0xf0] }
 0x75d   : > { %v14116_v43 = vld [vmem:[%s15337_s11 + $0x89c] sm:$0xf]  ;;  %v10090_v42 = vor.u32 %v14052_v5, %v10087_v24  ;;  %8877 = vmatpush.bf16.msra.mxu0 %v9834_v3 }
 0x75e   : > { %v10343_v40 = vld [vmem:[%s15337_s11 + $0x8b8] sm:$0xf0] }
 0x75f   : > { %v14180_v26 = vld [vmem:[%s15337_s11 + $0xa9c] sm:$0xf]  ;;  %v10346_v44 = vor.u32 %v14116_v43, %v10343_v40  ;;  %8890 = vmatpush.bf16.msra.mxu1 %v10090_v42 }
 0x760   : > { %v10599_v30 = vld [vmem:[%s15337_s11 + $0xab8] sm:$0xf0] }
 0x761   : > { %v13980_v52 = vld [vmem:[%s15337_s11 + $0x45c] sm:$0xf]  ;;  %v10602_v53 = vor.u32 %v14180_v26, %v10599_v30  ;;  %8903 = vmatpush.bf16.msra.mxu2 %v10346_v44 }
 0x762   : > { %v9799_v58 = vld [vmem:[%s15337_s11 + $0x478] sm:$0xf0] }
 0x763   : > { %v14044_v62 = vld [vmem:[%s15337_s11 + $0x65c] sm:$0xf]  ;;  %v9802_v50 = vor.u32 %v13980_v52, %v9799_v58  ;;  %8916 = vmatpush.bf16.msra.mxu3 %v10602_v53 }
 0x764   : > { %v10055_v54 = vld [vmem:[%s15337_s11 + $0x678] sm:$0xf0] }
 0x765   : > { %v14108_v39 = vld [vmem:[%s15337_s11 + $0x85c] sm:$0xf]  ;;  %v10058_v34 = vor.u32 %v14044_v62, %v10055_v54  ;;  %8878 = vmatpush.bf16.msra.mxu0 %v9802_v50 }
 0x766   : > { %v10311_v28 = vld [vmem:[%s15337_s11 + $0x878] sm:$0xf0] }
 0x767   : > { %v14172_v9 = vld [vmem:[%s15337_s11 + $0xa5c] sm:$0xf]  ;;  %v10314_v7 = vor.u32 %v14108_v39, %v10311_v28  ;;  %8891 = vmatpush.bf16.msra.mxu1 %v10058_v34 }
 0x768   : > { %v10567_v55 = vld [vmem:[%s15337_s11 + $0xa78] sm:$0xf0] }
 0x769   : > { %v13972_v60 = vld [vmem:[%s15337_s11 + $0x41c] sm:$0xf]  ;;  %v10570_v63 = vor.u32 %v14172_v9, %v10567_v55  ;;  %8904 = vmatpush.bf16.msra.mxu2 %v10314_v7 }
 0x76a   : > { %v9767_v37 = vld [vmem:[%s15337_s11 + $0x438] sm:$0xf0] }
 0x76b   : > { %v14036_v16 = vld [vmem:[%s15337_s11 + $0x61c] sm:$0xf]  ;;  %v9770_v17 = vor.u32 %v13972_v60, %v9767_v37  ;;  %8917 = vmatpush.bf16.msra.mxu3 %v10570_v63 }
 0x76c   : > { %v10023_v57 = vld [vmem:[%s15337_s11 + $0x638] sm:$0xf0] }
 0x76d   : > { %v14100_v59 = vld [vmem:[%s15337_s11 + $0x81c] sm:$0xf]  ;;  %v10026_v41 = vor.u32 %v14036_v16, %v10023_v57  ;;  %8879 = vmatpush.bf16.msra.mxu0 %v9770_v17 }
 0x76e   : > { %v10279_v0 = vld [vmem:[%s15337_s11 + $0x838] sm:$0xf0] }
 0x76f   : > { %v14164_v14 = vld [vmem:[%s15337_s11 + $0xa1c] sm:$0xf]  ;;  %v10282_v21 = vor.u32 %v14100_v59, %v10279_v0  ;;  %8892 = vmatpush.bf16.msra.mxu1 %v10026_v41 }
 0x770   : > { %v10535_v1 = vld [vmem:[%s15337_s11 + $0xa38] sm:$0xf0]  ;;  %8880 = vmatmul.bf16.vlgmr.msra.gmra.mxu0 %v15459_v27 }
 0x771   : > { %v14284_v6 = vld [vmem:[%s15337_s11 + $0xddc] sm:$0xf]  ;;  %v10538_v23 = vor.u32 %v14164_v14, %v10535_v1  ;;  %8905 = vmatpush.bf16.msra.mxu2 %v10282_v21  ;;  %v8673_v14 = vpop.f32.mrf.mxu0 }
 0x772   : > { %v11015_v10 = vld [vmem:[%s15337_s11 + $0xdf8] sm:$0xf0]  ;;  %8893 = vmatmul.bf16.vlgmr.msra.gmra.mxu1 %v15463_v29  ;;  %v8674_v17 = vadd.f32 %v8673_v14, %v17720_v33 }
 0x773   : > { %v14348_v20 = vld [vmem:[%s15337_s11 + $0xfdc] sm:$0xf]  ;;  %v11018_v45 = vor.u32 %v14284_v6, %v11015_v10  ;;  %8918 = vmatpush.bf16.msra.mxu3 %v10538_v23 }
 0x774   : > { %v11271_v2 = vld [vmem:[%s15337_s11 + $0xff8] sm:$0xf0]  ;;  %8906 = vmatmul.bf16.vlgmr.msra.gmra.mxu2 %v15513_v31 }
 0x775   : > { %v14412_v18 = vld [vmem:[%s15337_s11 + $0x11dc] sm:$0xf]  ;;  %v11274_v24 = vor.u32 %v14348_v20, %v11271_v2  ;;  %8924 = vmatpush.bf16.msrb.mxu0 %v11018_v45  ;;  %v8686_v2 = vpop.f32.mrf.mxu1 }
 0x776   : > { %v11527_v19 = vld [vmem:[%s15337_s11 + $0x11f8] sm:$0xf0]  ;;  %8919 = vmatmul.bf16.vlgmr.msra.gmra.mxu3 %v15519_v38  ;;  %v8687_v23 = vadd.f32 %v8686_v2, %v8674_v17 }
 0x777   : > { %v14476_v22 = vld [vmem:[%s15337_s11 + $0x13dc] sm:$0xf]  ;;  %v11530_v43 = vor.u32 %v14412_v18, %v11527_v19  ;;  %8937 = vmatpush.bf16.msrb.mxu1 %v11274_v24 }
 0x778   : > { %v11783_v5 = vld [vmem:[%s15337_s11 + $0x13f8] sm:$0xf0] }
 0x779   : > { %v14276_v40 = vld [vmem:[%s15337_s11 + $0xd9c] sm:$0xf]  ;;  %v11786_v26 = vor.u32 %v14476_v22, %v11783_v5  ;;  %8950 = vmatpush.bf16.msrb.mxu2 %v11530_v43 }
 0x77a   : > { %v10983_v13 = vld [vmem:[%s15337_s11 + $0xdb8] sm:$0xf0] }
 0x77b   : > { %v14340_v51 = vld [vmem:[%s15337_s11 + $0xf9c] sm:$0xf]  ;;  %v10986_v52 = vor.u32 %v14276_v40, %v10983_v13  ;;  %8963 = vmatpush.bf16.msrb.mxu3 %v11786_v26 }
 0x77c   : > { %v11239_v30 = vld [vmem:[%s15337_s11 + $0xfb8] sm:$0xf0] }
 0x77d   : > { %v14404_v3 = vld [vmem:[%s15337_s11 + $0x119c] sm:$0xf]  ;;  %v11242_v58 = vor.u32 %v14340_v51, %v11239_v30  ;;  %8925 = vmatpush.bf16.msrb.mxu0 %v10986_v52  ;;  %v8699_v51 = vpop.f32.mrf.mxu2 }
 0x77e   : > { %v11495_v36 = vld [vmem:[%s15337_s11 + $0x11b8] sm:$0xf0] }
 0x77f   : > { %v14468_v42 = vld [vmem:[%s15337_s11 + $0x139c] sm:$0xf]  ;;  %v11498_v62 = vor.u32 %v14404_v3, %v11495_v36  ;;  %8938 = vmatpush.bf16.msrb.mxu1 %v11242_v58 }
 0x780   : > { %v11751_v44 = vld [vmem:[%s15337_s11 + $0x13b8] sm:$0xf0] }
 0x781   : > { %v14268_v56 = vld [vmem:[%s15337_s11 + $0xd5c] sm:$0xf]  ;;  %v11754_v39 = vor.u32 %v14468_v42, %v11751_v44  ;;  %8951 = vmatpush.bf16.msrb.mxu2 %v11498_v62  ;;  %v8700_v42 = vadd.f32 %v8699_v51, %v8687_v23  ;;  %v8712_v44 = vpop.f32.mrf.mxu3 }
 0x782   : > { %v10951_v53 = vld [vmem:[%s15337_s11 + $0xd78] sm:$0xf0] }
 0x783   : > { %v14332_v54 = vld [vmem:[%s15337_s11 + $0xf5c] sm:$0xf]  ;;  %v10954_v37 = vor.u32 %v14268_v56, %v10951_v53  ;;  %8964 = vmatpush.bf16.msrb.mxu3 %v11754_v39  ;;  %v17791_v56 = vadd.f32 %v8712_v44, %v8700_v42  ;;  %v8675_v53 = vpop.f32.mrf.mxu0 }
 0x784   : > { %v11207_v28 = vld [vmem:[%s15337_s11 + $0xf78] sm:$0xf0] }
 0x785   : > { %v14396_v9 = vld [vmem:[%s15337_s11 + $0x115c] sm:$0xf]  ;;  %v11210_v31 = vor.u32 %v14332_v54, %v11207_v28  ;;  %8926 = vmatpush.bf16.msrb.mxu0 %v10954_v37  ;;  %v8701_v14 = vpop.f32.mrf.mxu2 }
 0x786   : > { %v11463_v55 = vld [vmem:[%s15337_s11 + $0x1178] sm:$0xf0] }
 0x787   : > { %v14460_v50 = vld [vmem:[%s15337_s11 + $0x135c] sm:$0xf]  ;;  %v11466_v34 = vor.u32 %v14396_v9, %v11463_v55  ;;  %8939 = vmatpush.bf16.msrb.mxu1 %v11210_v31 }
 0x788   : > { %v11719_v60 = vld [vmem:[%s15337_s11 + $0x1378] sm:$0xf0] }
 0x789   : > { %v14260_v7 = vld [vmem:[%s15337_s11 + $0xd1c] sm:$0xf]  ;;  %v11722_v27 = vor.u32 %v14460_v50, %v11719_v60  ;;  %8952 = vmatpush.bf16.msrb.mxu2 %v11466_v34  ;;  %v8688_v50 = vpop.f32.mrf.mxu1 }
 0x78a   : > { %v10919_v16 = vld [vmem:[%s15337_s11 + $0xd38] sm:$0xf0] }
 0x78b   : > { %v14324_v57 = vld [vmem:[%s15337_s11 + $0xf1c] sm:$0xf]  ;;  %v10922_v29 = vor.u32 %v14260_v7, %v10919_v16  ;;  %8965 = vmatpush.bf16.msrb.mxu3 %v11722_v27 }
 0x78c   : > { %v11175_v59 = vld [vmem:[%s15337_s11 + $0xf38] sm:$0xf0] }
 0x78d   : > { %v14388_v38 = vld [vmem:[%s15337_s11 + $0x111c] sm:$0xf]  ;;  %v11178_v1 = vor.u32 %v14324_v57, %v11175_v59  ;;  %8927 = vmatpush.bf16.msrb.mxu0 %v10922_v29 }
 0x78e   : > { %v11431_v61 = vld [vmem:[%s15337_s11 + $0x1138] sm:$0xf0] }
 0x78f   : > { %v14452_v63 = vld [vmem:[%s15337_s11 + $0x131c] sm:$0xf]  ;;  %v11434_v4 = vor.u32 %v14388_v38, %v11431_v61  ;;  %8940 = vmatpush.bf16.msrb.mxu1 %v11178_v1 }
 0x790   : > { %v11687_v0 = vld [vmem:[%s15337_s11 + $0x1338] sm:$0xf0] }
 0x791   : > { %v14252_v6 = vld [vmem:[%s15337_s11 + $0xcdc] sm:$0xf]  ;;  %v11690_v18 = vor.u32 %v14452_v63, %v11687_v0  ;;  %8953 = vmatpush.bf16.msrb.mxu2 %v11434_v4 }
 0x792   : > { %v10887_v10 = vld [vmem:[%s15337_s11 + $0xcf8] sm:$0xf0] }
 0x793   : > { %v14316_v20 = vld [vmem:[%s15337_s11 + $0xedc] sm:$0xf]  ;;  %v10890_v45 = vor.u32 %v14252_v6, %v10887_v10  ;;  %8966 = vmatpush.bf16.msrb.mxu3 %v11690_v18 }
 0x794   : > { %v11143_v19 = vld [vmem:[%s15337_s11 + $0xef8] sm:$0xf0] }
 0x795   : > { %v14380_v41 = vld [vmem:[%s15337_s11 + $0x10dc] sm:$0xf]  ;;  %v11146_v33 = vor.u32 %v14316_v20, %v11143_v19  ;;  %8928 = vmatpush.bf16.msrb.mxu0 %v10890_v45  ;;  %v8714_v20 = vpop.f32.mrf.mxu3 }
 0x796   : > { %v11399_v21 = vld [vmem:[%s15337_s11 + $0x10f8] sm:$0xf0] }
 0x797   : > { %v14444_v22 = vld [vmem:[%s15337_s11 + $0x12dc] sm:$0xf]  ;;  %v11402_v24 = vor.u32 %v14380_v41, %v11399_v21  ;;  %8941 = vmatpush.bf16.msrb.mxu1 %v11146_v33 }
 0x798   : > { %v11655_v5 = vld [vmem:[%s15337_s11 + $0x12f8] sm:$0xf0] }
 0x799   : > { %v14244_v43 = vld [vmem:[%s15337_s11 + $0xc9c] sm:$0xf]  ;;  %v11658_v26 = vor.u32 %v14444_v22, %v11655_v5  ;;  %8954 = vmatpush.bf16.msrb.mxu2 %v11402_v24 }
 0x79a   : > { %v10855_v40 = vld [vmem:[%s15337_s11 + $0xcb8] sm:$0xf0] }
 0x79b   : > { %v14308_v13 = vld [vmem:[%s15337_s11 + $0xe9c] sm:$0xf]  ;;  %v10858_v62 = vor.u32 %v14244_v43, %v10855_v40  ;;  %8967 = vmatpush.bf16.msrb.mxu3 %v11658_v26 }
 0x79c   : > { %v11111_v30 = vld [vmem:[%s15337_s11 + $0xeb8] sm:$0xf0] }
 0x79d   : > { %v14372_v3 = vld [vmem:[%s15337_s11 + $0x109c] sm:$0xf]  ;;  %v11114_v54 = vor.u32 %v14308_v13, %v11111_v30  ;;  %8929 = vmatpush.bf16.msrb.mxu0 %v10858_v62 }
 0x79e   : > { %v11367_v36 = vld [vmem:[%s15337_s11 + $0x10b8] sm:$0xf0] }
 0x79f   : > { %v14436_v52 = vld [vmem:[%s15337_s11 + $0x129c] sm:$0xf]  ;;  %v11370_v39 = vor.u32 %v14372_v3, %v11367_v36  ;;  %8942 = vmatpush.bf16.msrb.mxu1 %v11114_v54 }
 0x7a0   : > { %v11623_v58 = vld [vmem:[%s15337_s11 + $0x12b8] sm:$0xf0] }
 0x7a1   : > { %v14236_v28 = vld [vmem:[%s15337_s11 + $0xc5c] sm:$0xf]  ;;  %v11626_v60 = vor.u32 %v14436_v52, %v11623_v58  ;;  %8955 = vmatpush.bf16.msrb.mxu2 %v11370_v39 }
 0x7a2   : > { %v10823_v9 = vld [vmem:[%s15337_s11 + $0xc78] sm:$0xf0] }
 0x7a3   : > { %v14300_v55 = vld [vmem:[%s15337_s11 + $0xe5c] sm:$0xf]  ;;  %v10826_v57 = vor.u32 %v14236_v28, %v10823_v9  ;;  %8968 = vmatpush.bf16.msrb.mxu3 %v11626_v60 }
 0x7a4   : > { %v11079_v37 = vld [vmem:[%s15337_s11 + $0xe78] sm:$0xf0] }
 0x7a5   : > { %v14364_v31 = vld [vmem:[%s15337_s11 + $0x105c] sm:$0xf]  ;;  %v11082_v38 = vor.u32 %v14300_v55, %v11079_v37  ;;  %8930 = vmatpush.bf16.msrb.mxu0 %v10826_v57 }
 0x7a6   : > { %v11335_v34 = vld [vmem:[%s15337_s11 + $0x1078] sm:$0xf0] }
 0x7a7   : > { %v14428_v7 = vld [vmem:[%s15337_s11 + $0x125c] sm:$0xf]  ;;  %v11338_v61 = vor.u32 %v14364_v31, %v11335_v34  ;;  %8943 = vmatpush.bf16.msrb.mxu1 %v11082_v38 }
 0x7a8   : > { %v11591_v16 = vld [vmem:[%s15337_s11 + $0x1278] sm:$0xf0] }
 0x7a9   : > { %v14228_v27 = vld [vmem:[%s15337_s11 + $0xc1c] sm:$0xf]  ;;  %v11594_v1 = vor.u32 %v14428_v7, %v11591_v16  ;;  %8956 = vmatpush.bf16.msrb.mxu2 %v11338_v61 }
 0x7aa   : > { %v10791_v59 = vld [vmem:[%s15337_s11 + $0xc38] sm:$0xf0] }
 0x7ab   : > { %v14292_v63 = vld [vmem:[%s15337_s11 + $0xe1c] sm:$0xf]  ;;  %v10794_v19 = vor.u32 %v14228_v27, %v10791_v59  ;;  %8969 = vmatpush.bf16.msrb.mxu3 %v11594_v1  ;;  %v8738_v1 = vpop.f32.mrf.mxu1 }
 0x7ac   : > { %v11047_v0 = vld [vmem:[%s15337_s11 + $0xe38] sm:$0xf0] }
 0x7ad   : > { %v14356_v29 = vld [vmem:[%s15337_s11 + $0x101c] sm:$0xf]  ;;  %v11050_v5 = vor.u32 %v14292_v63, %v11047_v0  ;;  %8931 = vmatpush.bf16.msrb.mxu0 %v10794_v19 }
 0x7ae   : > { %v11303_v4 = vld [vmem:[%s15337_s11 + $0x1038] sm:$0xf0] }
 0x7af   : > { %v14420_v6 = vld [vmem:[%s15337_s11 + $0x121c] sm:$0xf]  ;;  %v11306_v23 = vor.u32 %v14356_v29, %v11303_v4  ;;  %8944 = vmatpush.bf16.msrb.mxu1 %v11050_v5 }
 0x7b0   : > { %v11559_v10 = vld [vmem:[%s15337_s11 + $0x1238] sm:$0xf0]  ;;  %8932 = vmatmul.bf16.vlgmr.msrb.gmra.mxu0 %v15510_v25 }
 0x7b1   : > { %v14540_v17 = vld [vmem:[%s15337_s11 + $0x15dc] sm:$0xf]  ;;  %v11562_v24 = vor.u32 %v14420_v6, %v11559_v10  ;;  %8957 = vmatpush.bf16.msrb.mxu2 %v11306_v23 }
 0x7b2   : > { %v12039_v2 = vld [vmem:[%s15337_s11 + $0x15f8] sm:$0xf0]  ;;  %8945 = vmatmul.bf16.vlgmr.msrb.gmra.mxu1 %v15515_v32 }
 0x7b3   : > { %v14604_v18 = vld [vmem:[%s15337_s11 + $0x17dc] sm:$0xf]  ;;  %v12042_v43 = vor.u32 %v14540_v17, %v12039_v2  ;;  %8970 = vmatpush.bf16.msrb.mxu3 %v11562_v24 }
 0x7b4   : > { %v12295_v41 = vld [vmem:[%s15337_s11 + $0x17f8] sm:$0xf0]  ;;  %8958 = vmatmul.bf16.vlgmr.msrb.gmra.mxu2 %v15587_v8 }
 0x7b5   : > { %v14668_v21 = vld [vmem:[%s15337_s11 + $0x19dc] sm:$0xf]  ;;  %v12298_v40 = vor.u32 %v14604_v18, %v12295_v41  ;;  %8976 = vmatpush.bf16.msra.mxu0 %v12042_v43 }
 0x7b6   : > { %v12551_v22 = vld [vmem:[%s15337_s11 + $0x19f8] sm:$0xf0]  ;;  %8971 = vmatmul.bf16.vlgmr.msrb.gmra.mxu3 %v15593_v12  ;;  %v8725_v12 = vpop.f32.mrf.mxu0 }
 0x7b7   : > { %v14732_v45 = vld [vmem:[%s15337_s11 + $0x1bdc] sm:$0xf]  ;;  %v12554_v13 = vor.u32 %v14668_v21, %v12551_v22  ;;  %8989 = vmatpush.bf16.msra.mxu1 %v12298_v40  ;;  %v8726_v29 = vadd.f32 %v8725_v12, %v17791_v56 }
 0x7b8   : > { %v12807_v33 = vld [vmem:[%s15337_s11 + $0x1bf8] sm:$0xf0] }
 0x7b9   : > { %v14532_v51 = vld [vmem:[%s15337_s11 + $0x159c] sm:$0xf]  ;;  %v12810_v3 = vor.u32 %v14732_v45, %v12807_v33  ;;  %9002 = vmatpush.bf16.msra.mxu2 %v12554_v13  ;;  %v8739_v18 = vadd.f32 %v8738_v1, %v8726_v29  ;;  %v8751_v13 = vpop.f32.mrf.mxu2 }
 0x7ba   : > { %v12007_v26 = vld [vmem:[%s15337_s11 + $0x15b8] sm:$0xf0] }
 0x7bb   : > { %v14596_v30 = vld [vmem:[%s15337_s11 + $0x179c] sm:$0xf]  ;;  %v12010_v62 = vor.u32 %v14532_v51, %v12007_v26  ;;  %9015 = vmatpush.bf16.msra.mxu3 %v12810_v3  ;;  %v8752_v3 = vadd.f32 %v8751_v13, %v8739_v18 }
 0x7bc   : > { %v12263_v36 = vld [vmem:[%s15337_s11 + $0x17b8] sm:$0xf0] }
 0x7bd   : > { %v14660_v42 = vld [vmem:[%s15337_s11 + $0x199c] sm:$0xf]  ;;  %v12266_v53 = vor.u32 %v14596_v30, %v12263_v36  ;;  %8977 = vmatpush.bf16.msra.mxu0 %v12010_v62  ;;  %v8764_v36 = vpop.f32.mrf.mxu3  ;;  %v8740_v62 = vpop.f32.mrf.mxu1 }
 0x7be   : > { %v12519_v44 = vld [vmem:[%s15337_s11 + $0x19b8] sm:$0xf0] }
 0x7bf   : > { %v14724_v52 = vld [vmem:[%s15337_s11 + $0x1b9c] sm:$0xf]  ;;  %v12522_v54 = vor.u32 %v14660_v42, %v12519_v44  ;;  %8990 = vmatpush.bf16.msra.mxu1 %v12266_v53  ;;  %v17862_v53 = vadd.f32 %v8764_v36, %v8752_v3 }
 0x7c0   : > { %v12775_v58 = vld [vmem:[%s15337_s11 + $0x1bb8] sm:$0xf0] }
 0x7c1   : > { %v14524_v39 = vld [vmem:[%s15337_s11 + $0x155c] sm:$0xf]  ;;  %v12778_v55 = vor.u32 %v14724_v52, %v12775_v58  ;;  %9003 = vmatpush.bf16.msra.mxu2 %v12522_v54  ;;  %v8727_v52 = vpop.f32.mrf.mxu0  ;;  %v8753_v29 = vpop.f32.mrf.mxu2 }
 0x7c2   : > { %v11975_v28 = vld [vmem:[%s15337_s11 + $0x1578] sm:$0xf0] }
 0x7c3   : > { %v14588_v9 = vld [vmem:[%s15337_s11 + $0x175c] sm:$0xf]  ;;  %v11978_v25 = vor.u32 %v14524_v39, %v11975_v28  ;;  %9016 = vmatpush.bf16.msra.mxu3 %v12778_v55 }
 0x7c4   : > { %v12231_v50 = vld [vmem:[%s15337_s11 + $0x1778] sm:$0xf0] }
 0x7c5   : > { %v14652_v60 = vld [vmem:[%s15337_s11 + $0x195c] sm:$0xf]  ;;  %v12234_v7 = vor.u32 %v14588_v9, %v12231_v50  ;;  %8978 = vmatpush.bf16.msra.mxu0 %v11978_v25 }
 0x7c6   : > { %v12487_v37 = vld [vmem:[%s15337_s11 + $0x1978] sm:$0xf0] }
 0x7c7   : > { %v14716_v31 = vld [vmem:[%s15337_s11 + $0x1b5c] sm:$0xf]  ;;  %v12490_v16 = vor.u32 %v14652_v60, %v12487_v37  ;;  %8991 = vmatpush.bf16.msra.mxu1 %v12234_v7 }
 0x7c8   : > { %v12743_v34 = vld [vmem:[%s15337_s11 + $0x1b78] sm:$0xf0] }
 0x7c9   : > { %v14516_v57 = vld [vmem:[%s15337_s11 + $0x151c] sm:$0xf]  ;;  %v12746_v32 = vor.u32 %v14716_v31, %v12743_v34  ;;  %9004 = vmatpush.bf16.msra.mxu2 %v12490_v16 }
 0x7ca   : > { %v11943_v27 = vld [vmem:[%s15337_s11 + $0x1538] sm:$0xf0] }
 0x7cb   : > { %v14580_v8 = vld [vmem:[%s15337_s11 + $0x171c] sm:$0xf]  ;;  %v11946_v14 = vor.u32 %v14516_v57, %v11943_v27  ;;  %9017 = vmatpush.bf16.msra.mxu3 %v12746_v32 }
 0x7cc   : > { %v12199_v59 = vld [vmem:[%s15337_s11 + $0x1738] sm:$0xf0] }
 0x7cd   : > { %v14644_v38 = vld [vmem:[%s15337_s11 + $0x191c] sm:$0xf]  ;;  %v12202_v4 = vor.u32 %v14580_v8, %v12199_v59  ;;  %8979 = vmatpush.bf16.msra.mxu0 %v11946_v14 }
 0x7ce   : > { %v12455_v61 = vld [vmem:[%s15337_s11 + $0x1938] sm:$0xf0] }
 0x7cf   : > { %v14708_v63 = vld [vmem:[%s15337_s11 + $0x1b1c] sm:$0xf]  ;;  %v12458_v6 = vor.u32 %v14644_v38, %v12455_v61  ;;  %8992 = vmatpush.bf16.msra.mxu1 %v12202_v4 }
 0x7d0   : > { %v12711_v0 = vld [vmem:[%s15337_s11 + $0x1b38] sm:$0xf0] }
 0x7d1   : > { %v14508_v10 = vld [vmem:[%s15337_s11 + $0x14dc] sm:$0xf]  ;;  %v12714_v2 = vor.u32 %v14708_v63, %v12711_v0  ;;  %9005 = vmatpush.bf16.msra.mxu2 %v12458_v6  ;;  %v8766_v6 = vpop.f32.mrf.mxu3 }
 0x7d2   : > { %v11911_v20 = vld [vmem:[%s15337_s11 + $0x14f8] sm:$0xf0] }
 0x7d3   : > { %v14572_v17 = vld [vmem:[%s15337_s11 + $0x16dc] sm:$0xf]  ;;  %v11914_v5 = vor.u32 %v14508_v10, %v11911_v20  ;;  %9018 = vmatpush.bf16.msra.mxu3 %v12714_v2 }
 0x7d4   : > { %v12167_v19 = vld [vmem:[%s15337_s11 + $0x16f8] sm:$0xf0] }
 0x7d5   : > { %v14636_v41 = vld [vmem:[%s15337_s11 + $0x18dc] sm:$0xf]  ;;  %v12170_v23 = vor.u32 %v14572_v17, %v12167_v19  ;;  %8980 = vmatpush.bf16.msra.mxu0 %v11914_v5 }
 0x7d6   : > { %v12423_v56 = vld [vmem:[%s15337_s11 + $0x18f8] sm:$0xf0] }
 0x7d7   : > { %v14700_v21 = vld [vmem:[%s15337_s11 + $0x1adc] sm:$0xf]  ;;  %v12426_v45 = vor.u32 %v14636_v41, %v12423_v56  ;;  %8993 = vmatpush.bf16.msra.mxu1 %v12170_v23 }
 0x7d8   : > { %v12679_v22 = vld [vmem:[%s15337_s11 + $0x1af8] sm:$0xf0] }
 0x7d9   : > { %v14500_v33 = vld [vmem:[%s15337_s11 + $0x149c] sm:$0xf]  ;;  %v12682_v40 = vor.u32 %v14700_v21, %v12679_v22  ;;  %9006 = vmatpush.bf16.msra.mxu2 %v12426_v45 }
 0x7da   : > { %v11879_v24 = vld [vmem:[%s15337_s11 + $0x14b8] sm:$0xf0] }
 0x7db   : > { %v14564_v43 = vld [vmem:[%s15337_s11 + $0x169c] sm:$0xf]  ;;  %v11882_v58 = vor.u32 %v14500_v33, %v11879_v24  ;;  %9019 = vmatpush.bf16.msra.mxu3 %v12682_v40 }
 0x7dc   : > { %v12135_v51 = vld [vmem:[%s15337_s11 + $0x16b8] sm:$0xf0] }
 0x7dd   : > { %v14628_v26 = vld [vmem:[%s15337_s11 + $0x189c] sm:$0xf]  ;;  %v12138_v54 = vor.u32 %v14564_v43, %v12135_v51  ;;  %8981 = vmatpush.bf16.msra.mxu0 %v11882_v58 }
 0x7de   : > { %v12391_v30 = vld [vmem:[%s15337_s11 + $0x18b8] sm:$0xf0] }
 0x7df   : > { %v14692_v42 = vld [vmem:[%s15337_s11 + $0x1a9c] sm:$0xf]  ;;  %v12394_v39 = vor.u32 %v14628_v26, %v12391_v30  ;;  %8994 = vmatpush.bf16.msra.mxu1 %v12138_v54 }
 0x7e0   : > { %v12647_v44 = vld [vmem:[%s15337_s11 + $0x1ab8] sm:$0xf0] }
 0x7e1   : > { %v14492_v28 = vld [vmem:[%s15337_s11 + $0x145c] sm:$0xf]  ;;  %v12650_v50 = vor.u32 %v14692_v42, %v12647_v44  ;;  %9007 = vmatpush.bf16.msra.mxu2 %v12394_v39 }
 0x7e2   : > { %v11847_v9 = vld [vmem:[%s15337_s11 + $0x1478] sm:$0xf0] }
 0x7e3   : > { %v14556_v55 = vld [vmem:[%s15337_s11 + $0x165c] sm:$0xf]  ;;  %v11850_v7 = vor.u32 %v14492_v28, %v11847_v9  ;;  %9020 = vmatpush.bf16.msra.mxu3 %v12650_v50 }
 0x7e4   : > { %v12103_v60 = vld [vmem:[%s15337_s11 + $0x1678] sm:$0xf0] }
 0x7e5   : > { %v14620_v37 = vld [vmem:[%s15337_s11 + $0x185c] sm:$0xf]  ;;  %v12106_v27 = vor.u32 %v14556_v55, %v12103_v60  ;;  %8982 = vmatpush.bf16.msra.mxu0 %v11850_v7 }
 0x7e6   : > { %v12359_v31 = vld [vmem:[%s15337_s11 + $0x1878] sm:$0xf0] }
 0x7e7   : > { %v14684_v34 = vld [vmem:[%s15337_s11 + $0x1a5c] sm:$0xf]  ;;  %v12362_v8 = vor.u32 %v14620_v37, %v12359_v31  ;;  %8995 = vmatpush.bf16.msra.mxu1 %v12106_v27 }
 0x7e8   : > { %v12615_v25 = vld [vmem:[%s15337_s11 + $0x1a78] sm:$0xf0] }
 0x7e9   : > { %v14484_v16 = vld [vmem:[%s15337_s11 + $0x141c] sm:$0xf]  ;;  %v12618_v61 = vor.u32 %v14684_v34, %v12615_v25  ;;  %9008 = vmatpush.bf16.msra.mxu2 %v12362_v8 }
 0x7ea   : > { %v11815_v57 = vld [vmem:[%s15337_s11 + $0x1438] sm:$0xf0] }
 0x7eb   : > { %v14548_v32 = vld [vmem:[%s15337_s11 + $0x161c] sm:$0xf]  ;;  %v11818_v10 = vor.u32 %v14484_v16, %v11815_v57  ;;  %9021 = vmatpush.bf16.msra.mxu3 %v12618_v61 }
 0x7ec   : > { %v12071_v59 = vld [vmem:[%s15337_s11 + $0x1638] sm:$0xf0] }
 0x7ed   : > { %v14612_v38 = vld [vmem:[%s15337_s11 + $0x181c] sm:$0xf]  ;;  %v12074_v18 = vor.u32 %v14548_v32, %v12071_v59  ;;  %8983 = vmatpush.bf16.msra.mxu0 %v11818_v10  ;;  %v8790_v32 = vpop.f32.mrf.mxu1 }
 0x7ee   : > { %v12327_v12 = vld [vmem:[%s15337_s11 + $0x1838] sm:$0xf0] }
 0x7ef   : > { %v14676_v63 = vld [vmem:[%s15337_s11 + $0x1a1c] sm:$0xf]  ;;  %v12330_v19 = vor.u32 %v14612_v38, %v12327_v12  ;;  %8996 = vmatpush.bf16.msra.mxu1 %v12074_v18 }
 0x7f0   : > { %v12583_v0 = vld [vmem:[%s15337_s11 + $0x1a38] sm:$0xf0]  ;;  %8984 = vmatmul.bf16.vlgmr.msra.gmra.mxu0 %v15591_v11 }
 0x7f1   : > { %v14796_v14 = vld [vmem:[%s15337_s11 + $0x1ddc] sm:$0xf]  ;;  %v12586_v21 = vor.u32 %v14676_v63, %v12583_v0  ;;  %9009 = vmatpush.bf16.msra.mxu2 %v12330_v19 }
 0x7f2   : > { %v13063_v1 = vld [vmem:[%s15337_s11 + $0x1df8] sm:$0xf0]  ;;  %8997 = vmatmul.bf16.vlgmr.msra.gmra.mxu1 %v15596_v15 }
 0x7f3   : > { %v14860_v4 = vld [vmem:[%s15337_s11 + $0x1fdc] sm:$0xf]  ;;  %v13066_v22 = vor.u32 %v14796_v14, %v13063_v1  ;;  %9022 = vmatpush.bf16.msra.mxu3 %v12586_v21 }
 0x7f4   : > { %v13319_v20 = vld [vmem:[%s15337_s11 + $0x1ff8] sm:$0xf0]  ;;  %9010 = vmatmul.bf16.vlgmr.msra.gmra.mxu2 %v15653_v46 }
 0x7f5   : > { %v14924_v17 = vld [vmem:[%s15337_s11 + $0x21dc] sm:$0xf]  ;;  %v13322_v5 = vor.u32 %v14860_v4, %v13319_v20  ;;  %9028 = vmatpush.bf16.msrb.mxu0 %v13066_v22 }
 0x7f6   : > { %v13575_v2 = vld [vmem:[%s15337_s11 + $0x21f8] sm:$0xf0]  ;;  %9023 = vmatmul.bf16.vlgmr.msra.gmra.mxu3 %v15657_v48  ;;  %v8777_v48 = vpop.f32.mrf.mxu0 }
 0x7f7   : > { %v14988_v41 = vld [vmem:[%s15337_s11 + $0x23dc] sm:$0xf]  ;;  %v13578_v23 = vor.u32 %v14924_v17, %v13575_v2  ;;  %9041 = vmatpush.bf16.msrb.mxu1 %v13322_v5  ;;  %v8778_v27 = vadd.f32 %v8777_v48, %v17862_v53 }
 0x7f8   : > { %v13831_v56 = vld [vmem:[%s15337_s11 + $0x23f8] sm:$0xf0] }
 0x7f9   : > { %v14788_v45 = vld [vmem:[%s15337_s11 + $0x1d9c] sm:$0xf]  ;;  %v13834_v43 = vor.u32 %v14988_v41, %v13831_v56  ;;  %9054 = vmatpush.bf16.msrb.mxu2 %v13578_v23  ;;  %v8791_v29 = vadd.f32 %v8790_v32, %v8778_v27  ;;  %v8803_v56 = vpop.f32.mrf.mxu2 }
 0x7fa   : > { %v13031_v33 = vld [vmem:[%s15337_s11 + $0x1db8] sm:$0xf0] }
 0x7fb   : > { %v14852_v24 = vld [vmem:[%s15337_s11 + $0x1f9c] sm:$0xf]  ;;  %v13034_v3 = vor.u32 %v14788_v45, %v13031_v33  ;;  %9067 = vmatpush.bf16.msrb.mxu3 %v13834_v43  ;;  %v8804_v23 = vadd.f32 %v8803_v56, %v8791_v29  ;;  %v8816_v45 = vpop.f32.mrf.mxu3 }
 0x7fc   : > { %v13287_v40 = vld [vmem:[%s15337_s11 + $0x1fb8] sm:$0xf0] }
 0x7fd   : > { %v14916_v13 = vld [vmem:[%s15337_s11 + $0x219c] sm:$0xf]  ;;  %v13290_v36 = vor.u32 %v14852_v24, %v13287_v40  ;;  %9029 = vmatpush.bf16.msrb.mxu0 %v13034_v3 }
 0x7fe   : > { %v13543_v51 = vld [vmem:[%s15337_s11 + $0x21b8] sm:$0xf0]  ;;  %v8779_v43 = vpop.f32.mrf.mxu0 }
 0x7ff   : > { %v14980_v26 = vld [vmem:[%s15337_s11 + $0x239c] sm:$0xf]  ;;  %v13546_v42 = vor.u32 %v14916_v13, %v13543_v51  ;;  %9042 = vmatpush.bf16.msrb.mxu1 %v13290_v36  ;;  %v8792_v13 = vpop.f32.mrf.mxu1  ;;  %v8817_v51 = vadd.f32 %v8816_v45, %v8804_v23 }
 0x800   : > { %v13799_v30 = vld [vmem:[%s15337_s11 + $0x23b8] sm:$0xf0] }
 0x801   : > { %v14780_v44 = vld [vmem:[%s15337_s11 + $0x1d5c] sm:$0xf]  ;;  %v13802_v62 = vor.u32 %v14980_v26, %v13799_v30  ;;  %9055 = vmatpush.bf16.msrb.mxu2 %v13546_v42 }
 0x802   : > { %v12999_v52 = vld [vmem:[%s15337_s11 + $0x1d78] sm:$0xf0] }
 0x803   : > { %v14844_v58 = vld [vmem:[%s15337_s11 + $0x1f5c] sm:$0xf]  ;;  %v13002_v11 = vor.u32 %v14780_v44, %v12999_v52  ;;  %9068 = vmatpush.bf16.msrb.mxu3 %v13802_v62  ;;  %v8818_v48 = vpop.f32.mrf.mxu3 }
 0x804   : > { %v13255_v54 = vld [vmem:[%s15337_s11 + $0x1f78] sm:$0xf0] }
 0x805   : > { %v14908_v39 = vld [vmem:[%s15337_s11 + $0x215c] sm:$0xf]  ;;  %v13258_v50 = vor.u32 %v14844_v58, %v13255_v54  ;;  %9030 = vmatpush.bf16.msrb.mxu0 %v13002_v11 }
 0x806   : > { %v13511_v28 = vld [vmem:[%s15337_s11 + $0x2178] sm:$0xf0] }
 0x807   : > { %v14972_v9 = vld [vmem:[%s15337_s11 + $0x235c] sm:$0xf]  ;;  %v13514_v60 = vor.u32 %v14908_v39, %v13511_v28  ;;  %9043 = vmatpush.bf16.msrb.mxu1 %v13258_v50 }
 0x808   : > { %v13767_v55 = vld [vmem:[%s15337_s11 + $0x2378] sm:$0xf0] }
 0x809   : > { %v14772_v37 = vld [vmem:[%s15337_s11 + $0x1d1c] sm:$0xf]  ;;  %v13770_v15 = vor.u32 %v14972_v9, %v13767_v55  ;;  %9056 = vmatpush.bf16.msrb.mxu2 %v13514_v60 }
 0x80a   : > { %v12967_v31 = vld [vmem:[%s15337_s11 + $0x1d38] sm:$0xf0] }
 0x80b   : > { %v14836_v46 = vld [vmem:[%s15337_s11 + $0x1f1c] sm:$0xf]  ;;  %v12970_v8 = vor.u32 %v14772_v37, %v12967_v31  ;;  %9069 = vmatpush.bf16.msrb.mxu3 %v13770_v15 }
 0x80c   : > { %v13223_v34 = vld [vmem:[%s15337_s11 + $0x1f38] sm:$0xf0] }
 0x80d   : > { %v14900_v25 = vld [vmem:[%s15337_s11 + $0x211c] sm:$0xf]  ;;  %v13226_v59 = vor.u32 %v14836_v46, %v13223_v34  ;;  %9031 = vmatpush.bf16.msrb.mxu0 %v12970_v8  ;;  %v8805_v34 = vpop.f32.mrf.mxu2 }
 0x80e   : > { %v13479_v7 = vld [vmem:[%s15337_s11 + $0x2138] sm:$0xf0] }
 0x80f   : > { %v14964_v16 = vld [vmem:[%s15337_s11 + $0x231c] sm:$0xf]  ;;  %v13482_v38 = vor.u32 %v14900_v25, %v13479_v7  ;;  %9044 = vmatpush.bf16.msrb.mxu1 %v13226_v59  ;;  %v15069_v59 = vld [vmem:[#allocation1 + $0x9] sm:$0xff] }
 0x810   : > { %v13735_v57 = vld [vmem:[%s15337_s11 + $0x2338] sm:$0xf0] }
 0x811   : > { %v14764_v61 = vld [vmem:[%s15337_s11 + $0x1cdc] sm:$0xf]  ;;  %v13738_v0 = vor.u32 %v14964_v16, %v13735_v57  ;;  %9057 = vmatpush.bf16.msrb.mxu2 %v13482_v38  ;;  %v8829_v38 = vpop.f32.mrf.mxu0 }
 0x812   : > { %v12935_v12 = vld [vmem:[%s15337_s11 + $0x1cf8] sm:$0xf0] }
 0x813   : > { %v14828_v63 = vld [vmem:[%s15337_s11 + $0x1edc] sm:$0xf]  ;;  %v12938_v10 = vor.u32 %v14764_v61, %v12935_v12  ;;  %9070 = vmatpush.bf16.msrb.mxu3 %v13738_v0  ;;  %v8830_v61 = vadd.f32 %v8829_v38, %v8817_v51  ;;  %v8842_v12 = vpop.f32.mrf.mxu1  ;;  %v15070_v0 = vld [vmem:[%s15345_s9] sm:$0xff] }
 0x814   : > { %v13191_v14 = vld [vmem:[%s15337_s11 + $0x1ef8] sm:$0xf0]  ;;  %v1397_v29 = vperm.slane %v15070_v0, 7 }
 0x815   : > { %v14892_v1 = vld [vmem:[%s15337_s11 + $0x20dc] sm:$0xf]  ;;  %v13194_v20 = vor.u32 %v14828_v63, %v13191_v14  ;;  %9032 = vmatpush.bf16.msrb.mxu0 %v12938_v10  ;;  %v17951_v63 = vadd.f32 %v8842_v12, %v8830_v61  ;;  %v8855_v14 = vpop.f32.mrf.mxu2 }
 0x816   : > { %v13447_v53 = vld [vmem:[%s15337_s11 + $0x20f8] sm:$0xf0] }
 0x817   : > { %v14956_v4 = vld [vmem:[%s15337_s11 + $0x22dc] sm:$0xf]  ;;  %v13450_v17 = vor.u32 %v14892_v1, %v13447_v53  ;;  %9045 = vmatpush.bf16.msrb.mxu1 %v13194_v20  ;;  %v8856_v1 = vadd.f32 %v8855_v14, %v1397_v29  ;;  %v8868_v53 = vpop.f32.mrf.mxu3 }
 0x818   : > { %v13703_v6 = vld [vmem:[%s15337_s11 + $0x22f8] sm:$0xf0] }
 0x819   : > { %v14756_v2 = vld [vmem:[%s15337_s11 + $0x1c9c] sm:$0xf]  ;;  %v13706_v41 = vor.u32 %v14956_v4, %v13703_v6  ;;  %9058 = vmatpush.bf16.msrb.mxu2 %v13450_v17  ;;  %v8831_v4 = vpop.f32.mrf.mxu0  ;;  %v8869_v10 = vadd.f32 %v8868_v53, %v8856_v1 }
 0x81a   : > { %v12903_v18 = vld [vmem:[%s15337_s11 + $0x1cb8] sm:$0xf0] }
 0x81b   : > { %v14820_v19 = vld [vmem:[%s15337_s11 + $0x1e9c] sm:$0xf]  ;;  %v12906_v40 = vor.u32 %v14756_v2, %v12903_v18  ;;  %9071 = vmatpush.bf16.msrb.mxu3 %v13706_v41  ;;  %v8844_v6 = vpop.f32.mrf.mxu1 }
 0x81c   : > { %v13159_v21 = vld [vmem:[%s15337_s11 + $0x1eb8] sm:$0xf0] }
 0x81d   : > { %v14884_v22 = vld [vmem:[%s15337_s11 + $0x209c] sm:$0xf]  ;;  %v13162_v26 = vor.u32 %v14820_v19, %v13159_v21  ;;  %9033 = vmatpush.bf16.msrb.mxu0 %v12906_v40 }
 0x81e   : > { %v13415_v5 = vld [vmem:[%s15337_s11 + $0x20b8] sm:$0xf0] }
 0x81f   : > { %v14948_v33 = vld [vmem:[%s15337_s11 + $0x229c] sm:$0xf]  ;;  %v13418_v30 = vor.u32 %v14884_v22, %v13415_v5  ;;  %9046 = vmatpush.bf16.msrb.mxu1 %v13162_v26  ;;  %v8870_v20 = vpop.f32.mrf.mxu3 }
 0x820   : > { %v13671_v24 = vld [vmem:[%s15337_s11 + $0x22b8] sm:$0xf0] }
 0x821   : > { %v14748_v3 = vld [vmem:[%s15337_s11 + $0x1c5c] sm:$0xf]  ;;  %v13674_v44 = vor.u32 %v14948_v33, %v13671_v24  ;;  %9059 = vmatpush.bf16.msrb.mxu2 %v13418_v30 }
 0x822   : > { %v12871_v36 = vld [vmem:[%s15337_s11 + $0x1c78] sm:$0xf0] }
 0x823   : > { %v14812_v42 = vld [vmem:[%s15337_s11 + $0x1e5c] sm:$0xf]  ;;  %v12874_v28 = vor.u32 %v14748_v3, %v12871_v36  ;;  %9072 = vmatpush.bf16.msrb.mxu3 %v13674_v44  ;;  %v8894_v2 = vpop.f32.mrf.mxu1 }
 0x824   : > { %v13127_v52 = vld [vmem:[%s15337_s11 + $0x1e78] sm:$0xf0] }
 0x825   : > { %v14876_v58 = vld [vmem:[%s15337_s11 + $0x205c] sm:$0xf]  ;;  %v13130_v9 = vor.u32 %v14812_v42, %v13127_v52  ;;  %9034 = vmatpush.bf16.msrb.mxu0 %v12874_v28 }
 0x826   : > { %v13383_v62 = vld [vmem:[%s15337_s11 + $0x2078] sm:$0xf0] }
 0x827   : > { %v14940_v54 = vld [vmem:[%s15337_s11 + $0x225c] sm:$0xf]  ;;  %v13386_v55 = vor.u32 %v14876_v58, %v13383_v62  ;;  %9047 = vmatpush.bf16.msrb.mxu1 %v13130_v9  ;;  %v8920_v56 = vpop.f32.mrf.mxu3 }
 0x828   : > { %v13639_v39 = vld [vmem:[%s15337_s11 + $0x2278] sm:$0xf0] }
 0x829   : > { %v14740_v11 = vld [vmem:[%s15337_s11 + $0x1c1c] sm:$0xf]  ;;  %v13642_v37 = vor.u32 %v14940_v54, %v13639_v39  ;;  %9060 = vmatpush.bf16.msrb.mxu2 %v13386_v55 }
 0x82a   : > { %v12839_v50 = vld [vmem:[%s15337_s11 + $0x1c38] sm:$0xf0] }
 0x82b   : > { %v14804_v60 = vld [vmem:[%s15337_s11 + $0x1e1c] sm:$0xf]  ;;  %v12842_v16 = vor.u32 %v14740_v11, %v12839_v50  ;;  %9073 = vmatpush.bf16.msrb.mxu3 %v13642_v37  ;;  %v8896_v5 = vpop.f32.mrf.mxu1 }
 0x82c   : > { %v13095_v31 = vld [vmem:[%s15337_s11 + $0x1e38] sm:$0xf0] }
 0x82d   : > { %v14868_v46 = vld [vmem:[%s15337_s11 + $0x201c] sm:$0xf]  ;;  %v13098_v57 = vor.u32 %v14804_v60, %v13095_v31  ;;  %9035 = vmatpush.bf16.msrb.mxu0 %v12842_v16 }
 0x82e   : > { %v13351_v15 = vld [vmem:[%s15337_s11 + $0x2038] sm:$0xf0] }
 0x82f   : > { %v14932_v25 = vld [vmem:[%s15337_s11 + $0x221c] sm:$0xf]  ;;  %v13354_v27 = vor.u32 %v14868_v46, %v13351_v15  ;;  %9048 = vmatpush.bf16.msrb.mxu1 %v13098_v57  ;;  %v8922_v45 = vpop.f32.mrf.mxu3 }
 0x830   : > { %v13607_v7 = vld [vmem:[%s15337_s11 + $0x2238] sm:$0xf0]  ;;  %9036 = vmatmul.bf16.vlgmr.msrb.gmra.mxu0 %v15655_v47  ;;  %v8857_v47 = vpop.f32.mrf.mxu2  ;;  %s15145_s11 = sshra.s32 %s9124_s10, 4  ;;  %s15146_s11 = int_to_ptr.hbm [resolvable:$true] %s15145_s11 }
 0x831   : > { %v13610_v8 = vor.u32 %v14932_v25, %v13607_v7  ;;  %9061 = vmatpush.bf16.msrb.mxu2 %v13354_v27  ;;  %v15068_v32 = vld [vmem:[#allocation1] sm:$0xff]  ;;  %s15147_s1 = scalar_lea.hbm %s15146_s11, 16  ;;  %p15152_p9 = scmp.lt.s32.totalorder %s15146_s11, %s17995_s3 }
 0x832   : > { %9049 = vmatmul.bf16.vlgmr.msrb.gmra.mxu1 %v15659_v49  ;;  %v8881_v49 = vpop.f32.mrf.mxu0  ;;  %p15148_p6 = scmp.ne.s32.totalorder %s15146_s11, %s15147_s1  ;;  %p15153_p0 = scmp.lt.s32.totalorder %s15151_s22, %s15147_s1 }
 0x833   : > { %9074 = vmatpush.bf16.msrb.mxu3 %v13610_v8  ;;  %v8882_v17 = vadd.f32 %v8881_v49, %v8869_v10  ;;  %v8946_v24 = vpop.f32.mrf.mxu1  ;;  %v9092_v8 = vrot.slane %v17951_v63, 4 }
 0x834   : > { %9062 = vmatmul.bf16.vlgmr.msrb.gmra.mxu2 %v15068_v32  ;;  %p15149_p12 = pnand %p15148_p6, %p15271_p10  ;;  %p15154_p2 = por %p15153_p0, %p15152_p9 }
 0x835   : > { %v8895_v18 = vadd.f32 %v8894_v2, %v8882_v17 }
 0x836   : > { %9075 = vmatmul.bf16.vlgmr.msrb.gmra.mxu3 %v15069_v59  ;;  %p15150_p1 = pneg %p15149_p12 }
 0x838   : > { %v8907_v19 = vpop.f32.mrf.mxu2  ;;  %p15155_p13 = pnand %p15154_p2, %p15150_p1 }
 0x839   : > { %v8908_v41 = vadd.f32 %v8907_v19, %v8895_v18  ;;  %v8972_v40 = vpop.f32.mrf.mxu3 }
 0x83a   : > { %v8883_v22 = vpop.f32.mrf.mxu0 }
 0x83b   : > { %v8921_v21 = vadd.f32 %v8920_v56, %v8908_v41  ;;  %v8948_v51 = vpop.f32.mrf.mxu1 }
 0x840   : > { %v8909_v23 = vpop.f32.mrf.mxu2 }
 0x841   : > { %v8974_v30 = vpop.f32.mrf.mxu3 }
 0x842   : > { %v8933_v33 = vpop.f32.mrf.mxu0 }
 0x843   : > { %v8934_v42 = vadd.f32 %v8933_v33, %v8921_v21 }
 0x845   : > { %v8947_v54 = vadd.f32 %v8946_v24, %v8934_v42 }
 0x848   : > { %v8959_v43 = vpop.f32.mrf.mxu2 }
 0x849   : > { %v8960_v39 = vadd.f32 %v8959_v43, %v8947_v54 }
 0x84a   : > { %v8935_v13 = vpop.f32.mrf.mxu0 }
 0x84b   : > { %v8973_v55 = vadd.f32 %v8972_v40, %v8960_v39 }
 0x850   : > { %v8961_v26 = vpop.f32.mrf.mxu2 }
 0x86d   : > { %v8985_v3 = vpop.f32.mrf.mxu0 }
 0x86e   : > { %v8986_v11 = vadd.f32 %v8985_v3, %v8973_v55 }
 0x86f   : > { %v8998_v36 = vpop.f32.mrf.mxu1 }
 0x870   : > { %v8999_v50 = vadd.f32 %v8998_v36, %v8986_v11 }
 0x875   : > { %v8987_v58 = vpop.f32.mrf.mxu0 }
 0x877   : > { %v9011_v44 = vpop.f32.mrf.mxu2  ;;  %v9000_v62 = vpop.f32.mrf.mxu1 }
 0x878   : > { %v9012_v60 = vadd.f32 %v9011_v44, %v8999_v50 }
 0x879   : > { %v9024_v52 = vpop.f32.mrf.mxu3 }
 0x87a   : > { %v9025_v37 = vadd.f32 %v9024_v52, %v9012_v60 }
 0x87f   : > { %v9013_v28 = vpop.f32.mrf.mxu2 }
 0x881   : > { %v9026_v9 = vpop.f32.mrf.mxu3 }
 0x8ad   : > { %v9037_v31 = vpop.f32.mrf.mxu0 }
 0x8ae   : > { %v9038_v15 = vadd.f32 %v9037_v31, %v9025_v37 }
 0x8af   : > { %v9050_v46 = vpop.f32.mrf.mxu1 }
 0x8b0   : > { %v9051_v34 = vadd.f32 %v9050_v46, %v9038_v15 }
 0x8b5   : > { %v9039_v16 = vpop.f32.mrf.mxu0 }
 0x8b7   : > { %v9063_v25 = vpop.f32.mrf.mxu2  ;;  %v9052_v57 = vpop.f32.mrf.mxu1 }
 0x8b8   : > { %v9064_v7 = vadd.f32 %v9063_v25, %v9051_v34 }
 0x8b9   : > { %v9076_v48 = vpop.f32.mrf.mxu3 }
 0x8ba   : > { %v9077_v27 = vadd.f32 %v9076_v48, %v9064_v7 }
 0x8bc   : > { %v9093_v32 = vrot.slane %v9077_v27, 2 }
 0x8be   : > { %v9101_v59 = vsel %vm9096_vm1, %v9092_v8, %v9093_v32 }
 0x8bf   : > { %v9102_v38 = vsel %vm9098_vm2, %v17661_v35, %v9101_v59  ;;  %v9065_v61 = vpop.f32.mrf.mxu2 }
 0x8c0   : > { %9106 = vst [vmem:[%s17029_s8 + $0x8] sm:$0xff] %v9102_v38 }
 0x8c1   : > { %v9078_v12 = vpop.f32.mrf.mxu3 }
 0x8c2   : > { %15158 = shalt.err (!%p15155_p13)
}
 0x8c3   : > { %15000 = dma.vmem_to_hbm [thread:$0]  (%p15271_p10), %s9122_s30, 256, %s9124_s10, %s9108_s16  }
 0x8c4 PF: > { %p15014_p3 = scmp.ge.s32.totalorder %s15201_s15, 2  ;;  %s9135_s25 = sand.u32 1, %s15189_s12  }
 0x8c5   : > { %s9136_s20 = scalar_lea.sflag [#allocation4], %s9135_s25 }
 0x8c6   : > { %p15010_p4 = pnand %p15014_p3, %p15275_p11 }
 0x8c8   : > { %p15011_p5 = pneg %p15010_p4 }
 0x8ca   : > { %15184 = dma.done.wait (%p15011_p5), %s9136_s20, 256  }
 0x8cb   : > { %15186 = vsyncadd (%p15011_p5), %s9136_s20, 4294967040  ;;  %p19_p7 = scmp.ge.s32.totalorder %s15251_s18, 6   ;;  %s18003_s12 = smov %s15193_s13 }
 0x8cc   : > { %s18004_s13 = smov %s15197_s14  ;;  %s18005_s14 = smov %s15263_s21 }
 0x8cd   : > { %s18006_s15 = smov %s15251_s18  ;;  %21 = sbr.rel (!%p19_p7) target bundleno = 9 (0x9), region = 90 }
 0x8d2   :  { %9142 = vsyncpa [#allocation3], 1 }
 0x8d3   :  { %9144 = vsyncpa [#allocation3 + $0x1], 1 }
 0x8d4   :  { %9145 = vsyncpa [#allocation6], 1 }
 0x8d5   :  { %9147 = vsyncpa [#allocation6 + $0x1], 1 }
 0x8d6   :  { %9148 = vsyncpa [#allocation4], 1 }
 0x8d7   :  { %9150 = vsyncpa [#allocation4 + $0x1], 1 }

</bundles_post_ra>
